<compile_context>
chip_gen: v6e
topology: v6e:2x2x1
jax: 0.10.0
libtpu: 0.0.40
codegen_flags: <defaults>
</compile_context>

<pallas_src>
import functools

import jax
import jax.numpy as jnp
from jax.experimental import pallas as pl
from jax.experimental.pallas import tpu as pltpu


def _round_up(x, m):
    return (x + m - 1) // m * m


# ---------------------------------------------------------------------------
# Fused Pallas kernels
# ---------------------------------------------------------------------------
def _conv_bn_act_kernel(p_ref, w_ref, g_ref, b_ref, o_ref, *,
                        m_actual, relu, eps):
    # MXU matmul: bf16 x bf16 -> f32 accumulator.
    acc = jnp.dot(p_ref[...], w_ref[...], preferred_element_type=jnp.float32)
    # Training-mode BN statistics over the valid rows.  Padded rows of the
    # patch matrix are zero, so they contribute 0 to both sums; divide by the
    # true row count to keep mean/var exact.
    inv_m = 1.0 / float(m_actual)
    mean = jnp.sum(acc, axis=0, keepdims=True) * inv_m
    var = jnp.maximum(jnp.sum(acc * acc, axis=0, keepdims=True) * inv_m
                      - mean * mean, 0.0)
    scale = g_ref[...] * jax.lax.rsqrt(var + eps)
    shift = b_ref[...] - mean * scale
    y = acc * scale + shift
    if relu:
        y = jnp.maximum(y, 0.0)
    o_ref[...] = y


def _conv_bn_add_act_kernel(p_ref, w_ref, g_ref, b_ref, res_ref, o_ref, *,
                            m_actual, relu, eps):
    acc = jnp.dot(p_ref[...], w_ref[...], preferred_element_type=jnp.float32)
    inv_m = 1.0 / float(m_actual)
    mean = jnp.sum(acc, axis=0, keepdims=True) * inv_m
    var = jnp.maximum(jnp.sum(acc * acc, axis=0, keepdims=True) * inv_m
                      - mean * mean, 0.0)
    scale = g_ref[...] * jax.lax.rsqrt(var + eps)
    shift = b_ref[...] - mean * scale
    y = acc * scale + shift + res_ref[...]          # residual add fused
    if relu:
        y = jnp.maximum(y, 0.0)
    o_ref[...] = y


def _maxpool_kernel(x_ref, o_ref):
    y = x_ref[0]
    for j in range(1, x_ref.shape[0]):
        y = jnp.maximum(y, x_ref[j])
    o_ref[...] = y


# ---------------------------------------------------------------------------
# Pallas call wrappers
# ---------------------------------------------------------------------------
def fused_conv_bn_act(patches, w2, gamma, beta, res2d, m_actual, relu,
                      eps=1e-5):
    """patches: (Mp, K) bf16; w2: (K, Cout) bf16; gamma/beta: (1, Cout) f32;
    optional res2d: (Mp, Cout) f32.  Single whole-array block (M is small for
    this model), so matmul + BN stats + epilogue run in one kernel."""
    Mp, K = patches.shape
    Cout = w2.shape[1]
    args = [patches, w2, gamma, beta]
    in_specs = [
        pl.BlockSpec((Mp, K), lambda i: (0, 0)),
        pl.BlockSpec((K, Cout), lambda i: (0, 0)),
        pl.BlockSpec((1, Cout), lambda i: (0, 0)),
        pl.BlockSpec((1, Cout), lambda i: (0, 0)),
    ]
    if res2d is not None:
        args.append(res2d)
        in_specs.append(pl.BlockSpec((Mp, Cout), lambda i: (0, 0)))
        kern = functools.partial(_conv_bn_add_act_kernel,
                                 m_actual=m_actual, relu=relu, eps=eps)
    else:
        kern = functools.partial(_conv_bn_act_kernel,
                                 m_actual=m_actual, relu=relu, eps=eps)
    return pl.pallas_call(
        kern,
        out_shape=jax.ShapeDtypeStruct((Mp, Cout), jnp.float32),
        grid=(1,),
        in_specs=in_specs,
        out_specs=pl.BlockSpec((Mp, Cout), lambda i: (0, 0)),
        compiler_params=pltpu.CompilerParams(
            dimension_semantics=("arbitrary",)),
    )(*args)


def conv_bn_act(x, w, gamma, beta, *, stride, padding, relu=True,
                residual=None, eps=1e-5):
    """x: NHWC f32; w: (Cout, Cin, KH, KW) (PyTorch layout).  Returns NHWC f32.
    Conv (im2col, no bias) + training-mode BN (+residual) (+ReLU) fused into
    one Pallas kernel.  NHWC im2col only concatenates along the channel (lane)
    axis, so no transposes are generated."""
    N, H, W, Cin = x.shape
    Cout, _, KH, KW = w.shape
    if padding:
        x = jnp.pad(x, ((0, 0), (padding, padding), (padding, padding), (0, 0)))
    Hp, Wp = x.shape[1], x.shape[2]
    OH = (Hp - KH) // stride + 1
    OW = (Wp - KW) // stride + 1
    cols = []
    for kh in range(KH):
        for kw in range(KW):
            cols.append(x[:, kh:kh + stride * OH:stride,
                          kw:kw + stride * OW:stride, :])
    patches = jnp.concatenate(cols, axis=-1)          # (N, OH, OW, KH*KW*Cin)
    M = N * OH * OW
    K = KH * KW * Cin
    Mp = _round_up(M, 16)                             # bf16 sublane packing
    patches = patches.reshape(M, K)
    patches = jnp.pad(patches, ((0, Mp - M), (0, 0))).astype(jnp.bfloat16)
    # (Cout, Cin, KH, KW) -> (KH, KW, Cin, Cout) -> (K, Cout): matches the
    # tap-major / channel-minor ordering of the im2col columns above.
    w2 = jnp.transpose(w, (2, 3, 1, 0)).reshape(K, Cout).astype(jnp.bfloat16)
    res2d = None
    if residual is not None:
        res2d = jnp.pad(residual.reshape(M, Cout), ((0, Mp - M), (0, 0)))
    y = fused_conv_bn_act(patches, w2,
                          gamma.reshape(1, Cout).astype(jnp.float32),
                          beta.reshape(1, Cout).astype(jnp.float32),
                          res2d, M, relu, eps)
    return y[:M].reshape(N, OH, OW, Cout)


def maxpool3x3_s2(x):
    """x: NHWC f32; 3x3 stride-2 pad-0 max pool.  Window max runs in a single
    whole-M Pallas block."""
    N, H, W, C = x.shape
    OH = (H - 3) // 2 + 1
    OW = (W - 3) // 2 + 1
    M = N * OH * OW
    Mp = _round_up(M, 8)
    slabs = [x[:, kh:kh + 2 * OH:2, kw:kw + 2 * OW:2, :].reshape(M, C)
             for kh in range(3) for kw in range(3)]
    stk = jnp.pad(jnp.stack(slabs, axis=0), ((0, 0), (0, Mp - M), (0, 0)))
    out = pl.pallas_call(
        _maxpool_kernel,
        out_shape=jax.ShapeDtypeStruct((Mp, C), jnp.float32),
        grid=(1,),
        in_specs=[pl.BlockSpec((9, Mp, C), lambda i: (0, 0, 0))],
        out_specs=pl.BlockSpec((Mp, C), lambda i: (0, 0)),
        compiler_params=pltpu.CompilerParams(
            dimension_semantics=("arbitrary",)),
    )(stk)
    return out[:M].reshape(N, OH, OW, C)


# ---------------------------------------------------------------------------
# Network (all activations NHWC)
# ---------------------------------------------------------------------------
def basic_block(x, bp, stride):
    out = conv_bn_act(x, bp["conv1_w"], bp["bn1_g"], bp["bn1_b"],
                      stride=stride, padding=1, relu=True)
    if "ds_w" in bp:
        identity = conv_bn_act(x, bp["ds_w"], bp["ds_g"], bp["ds_b"],
                               stride=stride, padding=0, relu=False)
    else:
        identity = x
    # conv2 + bn2 + residual add + ReLU fused in one kernel.
    out = conv_bn_act(out, bp["conv2_w"], bp["bn2_g"], bp["bn2_b"],
                      stride=1, padding=1, relu=True, residual=identity)
    return out


def run_layer(x, blocks, stride):
    for i, bp in enumerate(blocks):
        x = basic_block(x, bp, stride if i == 0 else 1)
    return x


def resnet_forward(x_nchw, params):
    x = jnp.transpose(x_nchw, (0, 2, 3, 1))                 # NCHW -> NHWC once
    x = conv_bn_act(x, params["conv1_w"], params["bn1_g"], params["bn1_b"],
                    stride=2, padding=0, relu=True)          # conv1 7x7/2 pad 0
    x = maxpool3x3_s2(x)                                     # maxpool 3x3/2 pad 0
    x1 = run_layer(x, params["layer1"], stride=1)
    x2 = run_layer(x1, params["layer2"], stride=2)
    x3 = run_layer(x2, params["layer3"], stride=1)
    # layer4 exists in __init__ but is not used in forward()
    return [jnp.transpose(x2, (0, 3, 1, 2)),                 # back to NCHW once
            jnp.transpose(x3, (0, 3, 1, 2))]


# ---------------------------------------------------------------------------
# Deterministic parameter init (kaiming_normal fan_out relu; BN weight=1 bias=0)
# ---------------------------------------------------------------------------
def _kaiming(key, cout, cin, kh, kw):
    std = (2.0 / (cout * kh * kw)) ** 0.5
    return jax.random.normal(key, (cout, cin, kh, kw), jnp.float32) * std


def init_params(key, layers=(1, 1, 1, 1)):
    keys = iter(jax.random.split(key, 128))
    params = {
        "conv1_w": _kaiming(next(keys), 64, 3, 7, 7),
        "bn1_g": jnp.ones((64,), jnp.float32),
        "bn1_b": jnp.zeros((64,), jnp.float32),
    }
    inplanes = 64

    def make_layer(planes, n_blocks, stride):
        nonlocal inplanes
        blocks = []
        for b in range(n_blocks):
            s = stride if b == 0 else 1
            bp = {
                "conv1_w": _kaiming(next(keys), planes, inplanes, 3, 3),
                "bn1_g": jnp.ones((planes,), jnp.float32),
                "bn1_b": jnp.zeros((planes,), jnp.float32),
                "conv2_w": _kaiming(next(keys), planes, planes, 3, 3),
                "bn2_g": jnp.ones((planes,), jnp.float32),
                "bn2_b": jnp.zeros((planes,), jnp.float32),
            }
            if s != 1 or inplanes != planes:   # BasicBlock expansion = 1
                bp["ds_w"] = _kaiming(next(keys), planes, inplanes, 1, 1)
                bp["ds_g"] = jnp.ones((planes,), jnp.float32)
                bp["ds_b"] = jnp.zeros((planes,), jnp.float32)
            blocks.append(bp)
            inplanes = planes
        return blocks

    params["layer1"] = make_layer(64, layers[0], 1)
    params["layer2"] = make_layer(128, layers[1], 2)
    params["layer3"] = make_layer(256, layers[2], 1)
    # layer4 is unused by forward(); its params are not needed.
    return params


if __name__ == "__main__":
    key = jax.random.PRNGKey(0)
    kx, kp = jax.random.split(key)
    params = init_params(kp, layers=(1, 1, 1, 1))
    x = jax.random.normal(kx, (2, 3, 32, 32), jnp.float32)   # NCHW, 3 input chans

    fwd = jax.jit(resnet_forward)
    x2, x3 = fwd(x, params)
    jax.block_until_ready((x2, x3))

    assert x2.shape == (2, 128, 3, 3), x2.shape
    assert x3.shape == (2, 256, 3, 3), x3.shape
    assert jnp.all(jnp.isfinite(x2)) and jnp.all(jnp.isfinite(x3))
    print("KERNEL_OK")
</pallas_src>

<mosaic_0001>
module attributes {stable_mosaic.version = 11 : i64} {
  func.func @_conv_bn_act_kernel(%arg0: i32, %arg1: memref<352x147xbf16, #tpu.memory_space<vmem>>, %arg2: memref<147x64xbf16, #tpu.memory_space<vmem>>, %arg3: memref<1x64xf32, #tpu.memory_space<vmem>>, %arg4: memref<1x64xf32, #tpu.memory_space<vmem>>, %arg5: memref<352x64xf32, #tpu.memory_space<vmem>>) attributes {dimension_semantics = [#tpu.dimension_semantics<arbitrary>], iteration_bounds = array<i64: 1>, scalar_prefetch = 0 : i64, scratch_operands = 0 : i64, tpu.core_type = #tpu.core_type<tc>, window_params = [{pipeline_mode = #tpu.pipeline_mode<synchronous>, transform_indices = @transform_0, window_bounds = array<i64: 352, 147>}, {pipeline_mode = #tpu.pipeline_mode<synchronous>, transform_indices = @transform_1, window_bounds = array<i64: 147, 64>}, {pipeline_mode = #tpu.pipeline_mode<synchronous>, transform_indices = @transform_2, window_bounds = array<i64: 1, 64>}, {pipeline_mode = #tpu.pipeline_mode<synchronous>, transform_indices = @transform_3, window_bounds = array<i64: 1, 64>}, {pipeline_mode = #tpu.pipeline_mode<synchronous>, transform_indices = @transform_4, window_bounds = array<i64: 352, 64>}]} {
    %c0 = arith.constant 0 : index
    %c0_0 = arith.constant 0 : index
    %0 = vector.load %arg1[%c0, %c0_0] : memref<352x147xbf16, #tpu.memory_space<vmem>>, vector<352x147xbf16>
    %c0_1 = arith.constant 0 : index
    %c0_2 = arith.constant 0 : index
    %1 = vector.load %arg2[%c0_1, %c0_2] : memref<147x64xbf16, #tpu.memory_space<vmem>>, vector<147x64xbf16>
    %cst = arith.constant dense<0.000000e+00> : vector<352x64xf32>
    %2 = tpu.matmul %0, %1, %cst {dimension_numbers = #tpu.dot_dimension_numbers<[1], [0], [0], [1], [0, 0, 1, 1], [], []>} : vector<352x147xbf16>, vector<147x64xbf16>, vector<352x64xf32> -> vector<352x64xf32>
    %cst_3 = arith.constant dense<0.000000e+00> : vector<64xf32>
    %3 = vector.multi_reduction <add>, %2, %cst_3 [0] : vector<352x64xf32> to vector<64xf32>
    %4 = vector.shape_cast %3 : vector<64xf32> to vector<1x64xf32>
    %cst_4 = arith.constant 2.958580e-03 : f32
    %5 = vector.broadcast %cst_4 : f32 to vector<1x64xf32>
    %6 = arith.mulf %4, %5 : vector<1x64xf32>
    %7 = arith.mulf %2, %2 : vector<352x64xf32>
    %cst_5 = arith.constant dense<0.000000e+00> : vector<64xf32>
    %8 = vector.multi_reduction <add>, %7, %cst_5 [0] : vector<352x64xf32> to vector<64xf32>
    %9 = vector.shape_cast %8 : vector<64xf32> to vector<1x64xf32>
    %cst_6 = arith.constant 2.958580e-03 : f32
    %10 = vector.broadcast %cst_6 : f32 to vector<1x64xf32>
    %11 = arith.mulf %9, %10 : vector<1x64xf32>
    %12 = arith.mulf %6, %6 : vector<1x64xf32>
    %13 = arith.subf %11, %12 : vector<1x64xf32>
    %cst_7 = arith.constant 0.000000e+00 : f32
    %14 = vector.broadcast %cst_7 : f32 to vector<1x64xf32>
    %15 = arith.maximumf %13, %14 : vector<1x64xf32>
    %c0_8 = arith.constant 0 : index
    %c0_9 = arith.constant 0 : index
    %16 = vector.load %arg3[%c0_8, %c0_9] : memref<1x64xf32, #tpu.memory_space<vmem>>, vector<1x64xf32>
    %cst_10 = arith.constant 9.99999974E-6 : f32
    %17 = vector.broadcast %cst_10 : f32 to vector<1x64xf32>
    %18 = arith.addf %15, %17 : vector<1x64xf32>
    %19 = math.rsqrt %18 : vector<1x64xf32>
    %20 = arith.mulf %16, %19 : vector<1x64xf32>
    %c0_11 = arith.constant 0 : index
    %c0_12 = arith.constant 0 : index
    %21 = vector.load %arg4[%c0_11, %c0_12] : memref<1x64xf32, #tpu.memory_space<vmem>>, vector<1x64xf32>
    %22 = arith.mulf %6, %20 : vector<1x64xf32>
    %23 = arith.subf %21, %22 : vector<1x64xf32>
    %24 = vector.broadcast %20 : vector<1x64xf32> to vector<352x64xf32>
    %25 = arith.mulf %2, %24 : vector<352x64xf32>
    %26 = vector.broadcast %23 : vector<1x64xf32> to vector<352x64xf32>
    %27 = arith.addf %25, %26 : vector<352x64xf32>
    %cst_13 = arith.constant 0.000000e+00 : f32
    %28 = vector.broadcast %cst_13 : f32 to vector<352x64xf32>
    %29 = arith.maximumf %27, %28 : vector<352x64xf32>
    %c0_14 = arith.constant 0 : index
    %c0_15 = arith.constant 0 : index
    %30 = vector.load %arg5[%c0_14, %c0_15] : memref<352x64xf32, #tpu.memory_space<vmem>>, vector<352x64xf32>
    tpu.vector_store %arg5[%c0_14, %c0_15], %29 {strides = array<i32>} : memref<352x64xf32, #tpu.memory_space<vmem>>, vector<352x64xf32>,
    return
  }
  func.func @transform_0(%arg0: i32) -> (i32, i32) {
    %c0_i32 = arith.constant 0 : i32
    %c0_i32_0 = arith.constant 0 : i32
    %c0_i32_1 = arith.constant 0 : i32
    return %c0_i32, %c0_i32_0 : i32, i32
  }
  func.func @transform_1(%arg0: i32) -> (i32, i32) {
    %c0_i32 = arith.constant 0 : i32
    %c0_i32_0 = arith.constant 0 : i32
    %c0_i32_1 = arith.constant 0 : i32
    return %c0_i32, %c0_i32_0 : i32, i32
  }
  func.func @transform_2(%arg0: i32) -> (i32, i32) {
    %c0_i32 = arith.constant 0 : i32
    %c0_i32_0 = arith.constant 0 : i32
    %c0_i32_1 = arith.constant 0 : i32
    return %c0_i32, %c0_i32_0 : i32, i32
  }
  func.func @transform_3(%arg0: i32) -> (i32, i32) {
    %c0_i32 = arith.constant 0 : i32
    %c0_i32_0 = arith.constant 0 : i32
    %c0_i32_1 = arith.constant 0 : i32
    return %c0_i32, %c0_i32_0 : i32, i32
  }
  func.func @transform_4(%arg0: i32) -> (i32, i32) {
    %c0_i32 = arith.constant 0 : i32
    %c0_i32_0 = arith.constant 0 : i32
    %c0_i32_1 = arith.constant 0 : i32
    return %c0_i32, %c0_i32_0 : i32, i32
  }
}

module attributes {stable_mosaic.version = 11 : i64} {
  func.func @_maxpool_kernel(%arg0: i32, %arg1: memref<9x72x64xf32, #tpu.memory_space<vmem>>, %arg2: memref<72x64xf32, #tpu.memory_space<vmem>>) attributes {dimension_semantics = [#tpu.dimension_semantics<arbitrary>], iteration_bounds = array<i64: 1>, scalar_prefetch = 0 : i64, scratch_operands = 0 : i64, tpu.core_type = #tpu.core_type<tc>, window_params = [{pipeline_mode = #tpu.pipeline_mode<synchronous>, transform_indices = @transform_0, window_bounds = array<i64: 9, 72, 64>}, {pipeline_mode = #tpu.pipeline_mode<synchronous>, transform_indices = @transform_1, window_bounds = array<i64: 72, 64>}]} {
    %c0 = arith.constant 0 : index
    %c0_0 = arith.constant 0 : index
    %c0_1 = arith.constant 0 : index
    %0 = vector.load %arg1[%c0, %c0_0, %c0_1] : memref<9x72x64xf32, #tpu.memory_space<vmem>>, vector<1x72x64xf32>
    %1 = vector.shape_cast %0 : vector<1x72x64xf32> to vector<72x64xf32>
    %c1 = arith.constant 1 : index
    %c0_2 = arith.constant 0 : index
    %c0_3 = arith.constant 0 : index
    %2 = vector.load %arg1[%c1, %c0_2, %c0_3] : memref<9x72x64xf32, #tpu.memory_space<vmem>>, vector<1x72x64xf32>
    %3 = vector.shape_cast %2 : vector<1x72x64xf32> to vector<72x64xf32>
    %4 = arith.maximumf %1, %3 : vector<72x64xf32>
    %c2 = arith.constant 2 : index
    %c0_4 = arith.constant 0 : index
    %c0_5 = arith.constant 0 : index
    %5 = vector.load %arg1[%c2, %c0_4, %c0_5] : memref<9x72x64xf32, #tpu.memory_space<vmem>>, vector<1x72x64xf32>
    %6 = vector.shape_cast %5 : vector<1x72x64xf32> to vector<72x64xf32>
    %7 = arith.maximumf %4, %6 : vector<72x64xf32>
    %c3 = arith.constant 3 : index
    %c0_6 = arith.constant 0 : index
    %c0_7 = arith.constant 0 : index
    %8 = vector.load %arg1[%c3, %c0_6, %c0_7] : memref<9x72x64xf32, #tpu.memory_space<vmem>>, vector<1x72x64xf32>
    %9 = vector.shape_cast %8 : vector<1x72x64xf32> to vector<72x64xf32>
    %10 = arith.maximumf %7, %9 : vector<72x64xf32>
    %c4 = arith.constant 4 : index
    %c0_8 = arith.constant 0 : index
    %c0_9 = arith.constant 0 : index
    %11 = vector.load %arg1[%c4, %c0_8, %c0_9] : memref<9x72x64xf32, #tpu.memory_space<vmem>>, vector<1x72x64xf32>
    %12 = vector.shape_cast %11 : vector<1x72x64xf32> to vector<72x64xf32>
    %13 = arith.maximumf %10, %12 : vector<72x64xf32>
    %c5 = arith.constant 5 : index
    %c0_10 = arith.constant 0 : index
    %c0_11 = arith.constant 0 : index
    %14 = vector.load %arg1[%c5, %c0_10, %c0_11] : memref<9x72x64xf32, #tpu.memory_space<vmem>>, vector<1x72x64xf32>
    %15 = vector.shape_cast %14 : vector<1x72x64xf32> to vector<72x64xf32>
    %16 = arith.maximumf %13, %15 : vector<72x64xf32>
    %c6 = arith.constant 6 : index
    %c0_12 = arith.constant 0 : index
    %c0_13 = arith.constant 0 : index
    %17 = vector.load %arg1[%c6, %c0_12, %c0_13] : memref<9x72x64xf32, #tpu.memory_space<vmem>>, vector<1x72x64xf32>
    %18 = vector.shape_cast %17 : vector<1x72x64xf32> to vector<72x64xf32>
    %19 = arith.maximumf %16, %18 : vector<72x64xf32>
    %c7 = arith.constant 7 : index
    %c0_14 = arith.constant 0 : index
    %c0_15 = arith.constant 0 : index
    %20 = vector.load %arg1[%c7, %c0_14, %c0_15] : memref<9x72x64xf32, #tpu.memory_space<vmem>>, vector<1x72x64xf32>
    %21 = vector.shape_cast %20 : vector<1x72x64xf32> to vector<72x64xf32>
    %22 = arith.maximumf %19, %21 : vector<72x64xf32>
    %c8 = arith.constant 8 : index
    %c0_16 = arith.constant 0 : index
    %c0_17 = arith.constant 0 : index
    %23 = vector.load %arg1[%c8, %c0_16, %c0_17] : memref<9x72x64xf32, #tpu.memory_space<vmem>>, vector<1x72x64xf32>
    %24 = vector.shape_cast %23 : vector<1x72x64xf32> to vector<72x64xf32>
    %25 = arith.maximumf %22, %24 : vector<72x64xf32>
    %c0_18 = arith.constant 0 : index
    %c0_19 = arith.constant 0 : index
    %26 = vector.load %arg2[%c0_18, %c0_19] : memref<72x64xf32, #tpu.memory_space<vmem>>, vector<72x64xf32>
    tpu.vector_store %arg2[%c0_18, %c0_19], %25 {strides = array<i32>} : memref<72x64xf32, #tpu.memory_space<vmem>>, vector<72x64xf32>,
    return
  }
  func.func @transform_0(%arg0: i32) -> (i32, i32, i32) {
    %c0_i32 = arith.constant 0 : i32
    %c0_i32_0 = arith.constant 0 : i32
    %c0_i32_1 = arith.constant 0 : i32
    %c0_i32_2 = arith.constant 0 : i32
    return %c0_i32, %c0_i32_0, %c0_i32_1 : i32, i32, i32
  }
  func.func @transform_1(%arg0: i32) -> (i32, i32) {
    %c0_i32 = arith.constant 0 : i32
    %c0_i32_0 = arith.constant 0 : i32
    %c0_i32_1 = arith.constant 0 : i32
    return %c0_i32, %c0_i32_0 : i32, i32
  }
}

module attributes {stable_mosaic.version = 11 : i64} {
  func.func @_conv_bn_act_kernel(%arg0: i32, %arg1: memref<80x576xbf16, #tpu.memory_space<vmem>>, %arg2: memref<576x64xbf16, #tpu.memory_space<vmem>>, %arg3: memref<1x64xf32, #tpu.memory_space<vmem>>, %arg4: memref<1x64xf32, #tpu.memory_space<vmem>>, %arg5: memref<80x64xf32, #tpu.memory_space<vmem>>) attributes {dimension_semantics = [#tpu.dimension_semantics<arbitrary>], iteration_bounds = array<i64: 1>, scalar_prefetch = 0 : i64, scratch_operands = 0 : i64, tpu.core_type = #tpu.core_type<tc>, window_params = [{pipeline_mode = #tpu.pipeline_mode<synchronous>, transform_indices = @transform_0, window_bounds = array<i64: 80, 576>}, {pipeline_mode = #tpu.pipeline_mode<synchronous>, transform_indices = @transform_1, window_bounds = array<i64: 576, 64>}, {pipeline_mode = #tpu.pipeline_mode<synchronous>, transform_indices = @transform_2, window_bounds = array<i64: 1, 64>}, {pipeline_mode = #tpu.pipeline_mode<synchronous>, transform_indices = @transform_3, window_bounds = array<i64: 1, 64>}, {pipeline_mode = #tpu.pipeline_mode<synchronous>, transform_indices = @transform_4, window_bounds = array<i64: 80, 64>}]} {
    %c0 = arith.constant 0 : index
    %c0_0 = arith.constant 0 : index
    %0 = vector.load %arg1[%c0, %c0_0] : memref<80x576xbf16, #tpu.memory_space<vmem>>, vector<80x576xbf16>
    %c0_1 = arith.constant 0 : index
    %c0_2 = arith.constant 0 : index
    %1 = vector.load %arg2[%c0_1, %c0_2] : memref<576x64xbf16, #tpu.memory_space<vmem>>, vector<576x64xbf16>
    %cst = arith.constant dense<0.000000e+00> : vector<80x64xf32>
    %2 = tpu.matmul %0, %1, %cst {dimension_numbers = #tpu.dot_dimension_numbers<[1], [0], [0], [1], [0, 0, 1, 1], [], []>} : vector<80x576xbf16>, vector<576x64xbf16>, vector<80x64xf32> -> vector<80x64xf32>
    %cst_3 = arith.constant dense<0.000000e+00> : vector<64xf32>
    %3 = vector.multi_reduction <add>, %2, %cst_3 [0] : vector<80x64xf32> to vector<64xf32>
    %4 = vector.shape_cast %3 : vector<64xf32> to vector<1x64xf32>
    %cst_4 = arith.constant 0.013888889 : f32
    %5 = vector.broadcast %cst_4 : f32 to vector<1x64xf32>
    %6 = arith.mulf %4, %5 : vector<1x64xf32>
    %7 = arith.mulf %2, %2 : vector<80x64xf32>
    %cst_5 = arith.constant dense<0.000000e+00> : vector<64xf32>
    %8 = vector.multi_reduction <add>, %7, %cst_5 [0] : vector<80x64xf32> to vector<64xf32>
    %9 = vector.shape_cast %8 : vector<64xf32> to vector<1x64xf32>
    %cst_6 = arith.constant 0.013888889 : f32
    %10 = vector.broadcast %cst_6 : f32 to vector<1x64xf32>
    %11 = arith.mulf %9, %10 : vector<1x64xf32>
    %12 = arith.mulf %6, %6 : vector<1x64xf32>
    %13 = arith.subf %11, %12 : vector<1x64xf32>
    %cst_7 = arith.constant 0.000000e+00 : f32
    %14 = vector.broadcast %cst_7 : f32 to vector<1x64xf32>
    %15 = arith.maximumf %13, %14 : vector<1x64xf32>
    %c0_8 = arith.constant 0 : index
    %c0_9 = arith.constant 0 : index
    %16 = vector.load %arg3[%c0_8, %c0_9] : memref<1x64xf32, #tpu.memory_space<vmem>>, vector<1x64xf32>
    %cst_10 = arith.constant 9.99999974E-6 : f32
    %17 = vector.broadcast %cst_10 : f32 to vector<1x64xf32>
    %18 = arith.addf %15, %17 : vector<1x64xf32>
    %19 = math.rsqrt %18 : vector<1x64xf32>
    %20 = arith.mulf %16, %19 : vector<1x64xf32>
    %c0_11 = arith.constant 0 : index
    %c0_12 = arith.constant 0 : index
    %21 = vector.load %arg4[%c0_11, %c0_12] : memref<1x64xf32, #tpu.memory_space<vmem>>, vector<1x64xf32>
    %22 = arith.mulf %6, %20 : vector<1x64xf32>
    %23 = arith.subf %21, %22 : vector<1x64xf32>
    %24 = vector.broadcast %20 : vector<1x64xf32> to vector<80x64xf32>
    %25 = arith.mulf %2, %24 : vector<80x64xf32>
    %26 = vector.broadcast %23 : vector<1x64xf32> to vector<80x64xf32>
    %27 = arith.addf %25, %26 : vector<80x64xf32>
    %cst_13 = arith.constant 0.000000e+00 : f32
    %28 = vector.broadcast %cst_13 : f32 to vector<80x64xf32>
    %29 = arith.maximumf %27, %28 : vector<80x64xf32>
    %c0_14 = arith.constant 0 : index
    %c0_15 = arith.constant 0 : index
    %30 = vector.load %arg5[%c0_14, %c0_15] : memref<80x64xf32, #tpu.memory_space<vmem>>, vector<80x64xf32>
    tpu.vector_store %arg5[%c0_14, %c0_15], %29 {strides = array<i32>} : memref<80x64xf32, #tpu.memory_space<vmem>>, vector<80x64xf32>,
    return
  }
  func.func @transform_0(%arg0: i32) -> (i32, i32) {
    %c0_i32 = arith.constant 0 : i32
    %c0_i32_0 = arith.constant 0 : i32
    %c0_i32_1 = arith.constant 0 : i32
    return %c0_i32, %c0_i32_0 : i32, i32
  }
  func.func @transform_1(%arg0: i32) -> (i32, i32) {
    %c0_i32 = arith.constant 0 : i32
    %c0_i32_0 = arith.constant 0 : i32
    %c0_i32_1 = arith.constant 0 : i32
    return %c0_i32, %c0_i32_0 : i32, i32
  }
  func.func @transform_2(%arg0: i32) -> (i32, i32) {
    %c0_i32 = arith.constant 0 : i32
    %c0_i32_0 = arith.constant 0 : i32
    %c0_i32_1 = arith.constant 0 : i32
    return %c0_i32, %c0_i32_0 : i32, i32
  }
  func.func @transform_3(%arg0: i32) -> (i32, i32) {
    %c0_i32 = arith.constant 0 : i32
    %c0_i32_0 = arith.constant 0 : i32
    %c0_i32_1 = arith.constant 0 : i32
    return %c0_i32, %c0_i32_0 : i32, i32
  }
  func.func @transform_4(%arg0: i32) -> (i32, i32) {
    %c0_i32 = arith.constant 0 : i32
    %c0_i32_0 = arith.constant 0 : i32
    %c0_i32_1 = arith.constant 0 : i32
    return %c0_i32, %c0_i32_0 : i32, i32
  }
}

module attributes {stable_mosaic.version = 11 : i64} {
  func.func @_conv_bn_add_act_kernel(%arg0: i32, %arg1: memref<80x576xbf16, #tpu.memory_space<vmem>>, %arg2: memref<576x64xbf16, #tpu.memory_space<vmem>>, %arg3: memref<1x64xf32, #tpu.memory_space<vmem>>, %arg4: memref<1x64xf32, #tpu.memory_space<vmem>>, %arg5: memref<80x64xf32, #tpu.memory_space<vmem>>, %arg6: memref<80x64xf32, #tpu.memory_space<vmem>>) attributes {dimension_semantics = [#tpu.dimension_semantics<arbitrary>], iteration_bounds = array<i64: 1>, scalar_prefetch = 0 : i64, scratch_operands = 0 : i64, tpu.core_type = #tpu.core_type<tc>, window_params = [{pipeline_mode = #tpu.pipeline_mode<synchronous>, transform_indices = @transform_0, window_bounds = array<i64: 80, 576>}, {pipeline_mode = #tpu.pipeline_mode<synchronous>, transform_indices = @transform_1, window_bounds = array<i64: 576, 64>}, {pipeline_mode = #tpu.pipeline_mode<synchronous>, transform_indices = @transform_2, window_bounds = array<i64: 1, 64>}, {pipeline_mode = #tpu.pipeline_mode<synchronous>, transform_indices = @transform_3, window_bounds = array<i64: 1, 64>}, {pipeline_mode = #tpu.pipeline_mode<synchronous>, transform_indices = @transform_4, window_bounds = array<i64: 80, 64>}, {pipeline_mode = #tpu.pipeline_mode<synchronous>, transform_indices = @transform_5, window_bounds = array<i64: 80, 64>}]} {
    %c0 = arith.constant 0 : index
    %c0_0 = arith.constant 0 : index
    %0 = vector.load %arg1[%c0, %c0_0] : memref<80x576xbf16, #tpu.memory_space<vmem>>, vector<80x576xbf16>
    %c0_1 = arith.constant 0 : index
    %c0_2 = arith.constant 0 : index
    %1 = vector.load %arg2[%c0_1, %c0_2] : memref<576x64xbf16, #tpu.memory_space<vmem>>, vector<576x64xbf16>
    %cst = arith.constant dense<0.000000e+00> : vector<80x64xf32>
    %2 = tpu.matmul %0, %1, %cst {dimension_numbers = #tpu.dot_dimension_numbers<[1], [0], [0], [1], [0, 0, 1, 1], [], []>} : vector<80x576xbf16>, vector<576x64xbf16>, vector<80x64xf32> -> vector<80x64xf32>
    %cst_3 = arith.constant dense<0.000000e+00> : vector<64xf32>
    %3 = vector.multi_reduction <add>, %2, %cst_3 [0] : vector<80x64xf32> to vector<64xf32>
    %4 = vector.shape_cast %3 : vector<64xf32> to vector<1x64xf32>
    %cst_4 = arith.constant 0.013888889 : f32
    %5 = vector.broadcast %cst_4 : f32 to vector<1x64xf32>
    %6 = arith.mulf %4, %5 : vector<1x64xf32>
    %7 = arith.mulf %2, %2 : vector<80x64xf32>
    %cst_5 = arith.constant dense<0.000000e+00> : vector<64xf32>
    %8 = vector.multi_reduction <add>, %7, %cst_5 [0] : vector<80x64xf32> to vector<64xf32>
    %9 = vector.shape_cast %8 : vector<64xf32> to vector<1x64xf32>
    %cst_6 = arith.constant 0.013888889 : f32
    %10 = vector.broadcast %cst_6 : f32 to vector<1x64xf32>
    %11 = arith.mulf %9, %10 : vector<1x64xf32>
    %12 = arith.mulf %6, %6 : vector<1x64xf32>
    %13 = arith.subf %11, %12 : vector<1x64xf32>
    %cst_7 = arith.constant 0.000000e+00 : f32
    %14 = vector.broadcast %cst_7 : f32 to vector<1x64xf32>
    %15 = arith.maximumf %13, %14 : vector<1x64xf32>
    %c0_8 = arith.constant 0 : index
    %c0_9 = arith.constant 0 : index
    %16 = vector.load %arg3[%c0_8, %c0_9] : memref<1x64xf32, #tpu.memory_space<vmem>>, vector<1x64xf32>
    %cst_10 = arith.constant 9.99999974E-6 : f32
    %17 = vector.broadcast %cst_10 : f32 to vector<1x64xf32>
    %18 = arith.addf %15, %17 : vector<1x64xf32>
    %19 = math.rsqrt %18 : vector<1x64xf32>
    %20 = arith.mulf %16, %19 : vector<1x64xf32>
    %c0_11 = arith.constant 0 : index
    %c0_12 = arith.constant 0 : index
    %21 = vector.load %arg4[%c0_11, %c0_12] : memref<1x64xf32, #tpu.memory_space<vmem>>, vector<1x64xf32>
    %22 = arith.mulf %6, %20 : vector<1x64xf32>
    %23 = arith.subf %21, %22 : vector<1x64xf32>
    %24 = vector.broadcast %20 : vector<1x64xf32> to vector<80x64xf32>
    %25 = arith.mulf %2, %24 : vector<80x64xf32>
    %26 = vector.broadcast %23 : vector<1x64xf32> to vector<80x64xf32>
    %27 = arith.addf %25, %26 : vector<80x64xf32>
    %c0_13 = arith.constant 0 : index
    %c0_14 = arith.constant 0 : index
    %28 = vector.load %arg5[%c0_13, %c0_14] : memref<80x64xf32, #tpu.memory_space<vmem>>, vector<80x64xf32>
    %29 = arith.addf %27, %28 : vector<80x64xf32>
    %cst_15 = arith.constant 0.000000e+00 : f32
    %30 = vector.broadcast %cst_15 : f32 to vector<80x64xf32>
    %31 = arith.maximumf %29, %30 : vector<80x64xf32>
    %c0_16 = arith.constant 0 : index
    %c0_17 = arith.constant 0 : index
    %32 = vector.load %arg6[%c0_16, %c0_17] : memref<80x64xf32, #tpu.memory_space<vmem>>, vector<80x64xf32>
    tpu.vector_store %arg6[%c0_16, %c0_17], %31 {strides = array<i32>} : memref<80x64xf32, #tpu.memory_space<vmem>>, vector<80x64xf32>,
    return
  }
  func.func @transform_0(%arg0: i32) -> (i32, i32) {
    %c0_i32 = arith.constant 0 : i32
    %c0_i32_0 = arith.constant 0 : i32
    %c0_i32_1 = arith.constant 0 : i32
    return %c0_i32, %c0_i32_0 : i32, i32
  }
  func.func @transform_1(%arg0: i32) -> (i32, i32) {
    %c0_i32 = arith.constant 0 : i32
    %c0_i32_0 = arith.constant 0 : i32
    %c0_i32_1 = arith.constant 0 : i32
    return %c0_i32, %c0_i32_0 : i32, i32
  }
  func.func @transform_2(%arg0: i32) -> (i32, i32) {
    %c0_i32 = arith.constant 0 : i32
    %c0_i32_0 = arith.constant 0 : i32
    %c0_i32_1 = arith.constant 0 : i32
    return %c0_i32, %c0_i32_0 : i32, i32
  }
  func.func @transform_3(%arg0: i32) -> (i32, i32) {
    %c0_i32 = arith.constant 0 : i32
    %c0_i32_0 = arith.constant 0 : i32
    %c0_i32_1 = arith.constant 0 : i32
    return %c0_i32, %c0_i32_0 : i32, i32
  }
  func.func @transform_4(%arg0: i32) -> (i32, i32) {
    %c0_i32 = arith.constant 0 : i32
    %c0_i32_0 = arith.constant 0 : i32
    %c0_i32_1 = arith.constant 0 : i32
    return %c0_i32, %c0_i32_0 : i32, i32
  }
  func.func @transform_5(%arg0: i32) -> (i32, i32) {
    %c0_i32 = arith.constant 0 : i32
    %c0_i32_0 = arith.constant 0 : i32
    %c0_i32_1 = arith.constant 0 : i32
    return %c0_i32, %c0_i32_0 : i32, i32
  }
}

module attributes {stable_mosaic.version = 11 : i64} {
  func.func @_conv_bn_act_kernel(%arg0: i32, %arg1: memref<32x576xbf16, #tpu.memory_space<vmem>>, %arg2: memref<576x128xbf16, #tpu.memory_space<vmem>>, %arg3: memref<1x128xf32, #tpu.memory_space<vmem>>, %arg4: memref<1x128xf32, #tpu.memory_space<vmem>>, %arg5: memref<32x128xf32, #tpu.memory_space<vmem>>) attributes {dimension_semantics = [#tpu.dimension_semantics<arbitrary>], iteration_bounds = array<i64: 1>, scalar_prefetch = 0 : i64, scratch_operands = 0 : i64, tpu.core_type = #tpu.core_type<tc>, window_params = [{pipeline_mode = #tpu.pipeline_mode<synchronous>, transform_indices = @transform_0, window_bounds = array<i64: 32, 576>}, {pipeline_mode = #tpu.pipeline_mode<synchronous>, transform_indices = @transform_1, window_bounds = array<i64: 576, 128>}, {pipeline_mode = #tpu.pipeline_mode<synchronous>, transform_indices = @transform_2, window_bounds = array<i64: 1, 128>}, {pipeline_mode = #tpu.pipeline_mode<synchronous>, transform_indices = @transform_3, window_bounds = array<i64: 1, 128>}, {pipeline_mode = #tpu.pipeline_mode<synchronous>, transform_indices = @transform_4, window_bounds = array<i64: 32, 128>}]} {
    %c0 = arith.constant 0 : index
    %c0_0 = arith.constant 0 : index
    %0 = vector.load %arg1[%c0, %c0_0] : memref<32x576xbf16, #tpu.memory_space<vmem>>, vector<32x576xbf16>
    %c0_1 = arith.constant 0 : index
    %c0_2 = arith.constant 0 : index
    %1 = vector.load %arg2[%c0_1, %c0_2] : memref<576x128xbf16, #tpu.memory_space<vmem>>, vector<576x128xbf16>
    %cst = arith.constant dense<0.000000e+00> : vector<32x128xf32>
    %2 = tpu.matmul %0, %1, %cst {dimension_numbers = #tpu.dot_dimension_numbers<[1], [0], [0], [1], [0, 0, 1, 1], [], []>} : vector<32x576xbf16>, vector<576x128xbf16>, vector<32x128xf32> -> vector<32x128xf32>
    %cst_3 = arith.constant dense<0.000000e+00> : vector<128xf32>
    %3 = vector.multi_reduction <add>, %2, %cst_3 [0] : vector<32x128xf32> to vector<128xf32>
    %4 = vector.shape_cast %3 : vector<128xf32> to vector<1x128xf32>
    %cst_4 = arith.constant 0.055555556 : f32
    %5 = vector.broadcast %cst_4 : f32 to vector<1x128xf32>
    %6 = arith.mulf %4, %5 : vector<1x128xf32>
    %7 = arith.mulf %2, %2 : vector<32x128xf32>
    %cst_5 = arith.constant dense<0.000000e+00> : vector<128xf32>
    %8 = vector.multi_reduction <add>, %7, %cst_5 [0] : vector<32x128xf32> to vector<128xf32>
    %9 = vector.shape_cast %8 : vector<128xf32> to vector<1x128xf32>
    %cst_6 = arith.constant 0.055555556 : f32
    %10 = vector.broadcast %cst_6 : f32 to vector<1x128xf32>
    %11 = arith.mulf %9, %10 : vector<1x128xf32>
    %12 = arith.mulf %6, %6 : vector<1x128xf32>
    %13 = arith.subf %11, %12 : vector<1x128xf32>
    %cst_7 = arith.constant 0.000000e+00 : f32
    %14 = vector.broadcast %cst_7 : f32 to vector<1x128xf32>
    %15 = arith.maximumf %13, %14 : vector<1x128xf32>
    %c0_8 = arith.constant 0 : index
    %c0_9 = arith.constant 0 : index
    %16 = vector.load %arg3[%c0_8, %c0_9] : memref<1x128xf32, #tpu.memory_space<vmem>>, vector<1x128xf32>
    %cst_10 = arith.constant 9.99999974E-6 : f32
    %17 = vector.broadcast %cst_10 : f32 to vector<1x128xf32>
    %18 = arith.addf %15, %17 : vector<1x128xf32>
    %19 = math.rsqrt %18 : vector<1x128xf32>
    %20 = arith.mulf %16, %19 : vector<1x128xf32>
    %c0_11 = arith.constant 0 : index
    %c0_12 = arith.constant 0 : index
    %21 = vector.load %arg4[%c0_11, %c0_12] : memref<1x128xf32, #tpu.memory_space<vmem>>, vector<1x128xf32>
    %22 = arith.mulf %6, %20 : vector<1x128xf32>
    %23 = arith.subf %21, %22 : vector<1x128xf32>
    %24 = vector.broadcast %20 : vector<1x128xf32> to vector<32x128xf32>
    %25 = arith.mulf %2, %24 : vector<32x128xf32>
    %26 = vector.broadcast %23 : vector<1x128xf32> to vector<32x128xf32>
    %27 = arith.addf %25, %26 : vector<32x128xf32>
    %cst_13 = arith.constant 0.000000e+00 : f32
    %28 = vector.broadcast %cst_13 : f32 to vector<32x128xf32>
    %29 = arith.maximumf %27, %28 : vector<32x128xf32>
    %c0_14 = arith.constant 0 : index
    %c0_15 = arith.constant 0 : index
    %30 = vector.load %arg5[%c0_14, %c0_15] : memref<32x128xf32, #tpu.memory_space<vmem>>, vector<32x128xf32>
    tpu.vector_store %arg5[%c0_14, %c0_15], %29 {strides = array<i32>} : memref<32x128xf32, #tpu.memory_space<vmem>>, vector<32x128xf32>,
    return
  }
  func.func @transform_0(%arg0: i32) -> (i32, i32) {
    %c0_i32 = arith.constant 0 : i32
    %c0_i32_0 = arith.constant 0 : i32
    %c0_i32_1 = arith.constant 0 : i32
    return %c0_i32, %c0_i32_0 : i32, i32
  }
  func.func @transform_1(%arg0: i32) -> (i32, i32) {
    %c0_i32 = arith.constant 0 : i32
    %c0_i32_0 = arith.constant 0 : i32
    %c0_i32_1 = arith.constant 0 : i32
    return %c0_i32, %c0_i32_0 : i32, i32
  }
  func.func @transform_2(%arg0: i32) -> (i32, i32) {
    %c0_i32 = arith.constant 0 : i32
    %c0_i32_0 = arith.constant 0 : i32
    %c0_i32_1 = arith.constant 0 : i32
    return %c0_i32, %c0_i32_0 : i32, i32
  }
  func.func @transform_3(%arg0: i32) -> (i32, i32) {
    %c0_i32 = arith.constant 0 : i32
    %c0_i32_0 = arith.constant 0 : i32
    %c0_i32_1 = arith.constant 0 : i32
    return %c0_i32, %c0_i32_0 : i32, i32
  }
  func.func @transform_4(%arg0: i32) -> (i32, i32) {
    %c0_i32 = arith.constant 0 : i32
    %c0_i32_0 = arith.constant 0 : i32
    %c0_i32_1 = arith.constant 0 : i32
    return %c0_i32, %c0_i32_0 : i32, i32
  }
}

module attributes {stable_mosaic.version = 11 : i64} {
  func.func @_conv_bn_act_kernel(%arg0: i32, %arg1: memref<32x64xbf16, #tpu.memory_space<vmem>>, %arg2: memref<64x128xbf16, #tpu.memory_space<vmem>>, %arg3: memref<1x128xf32, #tpu.memory_space<vmem>>, %arg4: memref<1x128xf32, #tpu.memory_space<vmem>>, %arg5: memref<32x128xf32, #tpu.memory_space<vmem>>) attributes {dimension_semantics = [#tpu.dimension_semantics<arbitrary>], iteration_bounds = array<i64: 1>, scalar_prefetch = 0 : i64, scratch_operands = 0 : i64, tpu.core_type = #tpu.core_type<tc>, window_params = [{pipeline_mode = #tpu.pipeline_mode<synchronous>, transform_indices = @transform_0, window_bounds = array<i64: 32, 64>}, {pipeline_mode = #tpu.pipeline_mode<synchronous>, transform_indices = @transform_1, window_bounds = array<i64: 64, 128>}, {pipeline_mode = #tpu.pipeline_mode<synchronous>, transform_indices = @transform_2, window_bounds = array<i64: 1, 128>}, {pipeline_mode = #tpu.pipeline_mode<synchronous>, transform_indices = @transform_3, window_bounds = array<i64: 1, 128>}, {pipeline_mode = #tpu.pipeline_mode<synchronous>, transform_indices = @transform_4, window_bounds = array<i64: 32, 128>}]} {
    %c0 = arith.constant 0 : index
    %c0_0 = arith.constant 0 : index
    %0 = vector.load %arg1[%c0, %c0_0] : memref<32x64xbf16, #tpu.memory_space<vmem>>, vector<32x64xbf16>
    %c0_1 = arith.constant 0 : index
    %c0_2 = arith.constant 0 : index
    %1 = vector.load %arg2[%c0_1, %c0_2] : memref<64x128xbf16, #tpu.memory_space<vmem>>, vector<64x128xbf16>
    %cst = arith.constant dense<0.000000e+00> : vector<32x128xf32>
    %2 = tpu.matmul %0, %1, %cst {dimension_numbers = #tpu.dot_dimension_numbers<[1], [0], [0], [1], [0, 0, 1, 1], [], []>} : vector<32x64xbf16>, vector<64x128xbf16>, vector<32x128xf32> -> vector<32x128xf32>
    %cst_3 = arith.constant dense<0.000000e+00> : vector<128xf32>
    %3 = vector.multi_reduction <add>, %2, %cst_3 [0] : vector<32x128xf32> to vector<128xf32>
    %4 = vector.shape_cast %3 : vector<128xf32> to vector<1x128xf32>
    %cst_4 = arith.constant 0.055555556 : f32
    %5 = vector.broadcast %cst_4 : f32 to vector<1x128xf32>
    %6 = arith.mulf %4, %5 : vector<1x128xf32>
    %7 = arith.mulf %2, %2 : vector<32x128xf32>
    %cst_5 = arith.constant dense<0.000000e+00> : vector<128xf32>
    %8 = vector.multi_reduction <add>, %7, %cst_5 [0] : vector<32x128xf32> to vector<128xf32>
    %9 = vector.shape_cast %8 : vector<128xf32> to vector<1x128xf32>
    %cst_6 = arith.constant 0.055555556 : f32
    %10 = vector.broadcast %cst_6 : f32 to vector<1x128xf32>
    %11 = arith.mulf %9, %10 : vector<1x128xf32>
    %12 = arith.mulf %6, %6 : vector<1x128xf32>
    %13 = arith.subf %11, %12 : vector<1x128xf32>
    %cst_7 = arith.constant 0.000000e+00 : f32
    %14 = vector.broadcast %cst_7 : f32 to vector<1x128xf32>
    %15 = arith.maximumf %13, %14 : vector<1x128xf32>
    %c0_8 = arith.constant 0 : index
    %c0_9 = arith.constant 0 : index
    %16 = vector.load %arg3[%c0_8, %c0_9] : memref<1x128xf32, #tpu.memory_space<vmem>>, vector<1x128xf32>
    %cst_10 = arith.constant 9.99999974E-6 : f32
    %17 = vector.broadcast %cst_10 : f32 to vector<1x128xf32>
    %18 = arith.addf %15, %17 : vector<1x128xf32>
    %19 = math.rsqrt %18 : vector<1x128xf32>
    %20 = arith.mulf %16, %19 : vector<1x128xf32>
    %c0_11 = arith.constant 0 : index
    %c0_12 = arith.constant 0 : index
    %21 = vector.load %arg4[%c0_11, %c0_12] : memref<1x128xf32, #tpu.memory_space<vmem>>, vector<1x128xf32>
    %22 = arith.mulf %6, %20 : vector<1x128xf32>
    %23 = arith.subf %21, %22 : vector<1x128xf32>
    %24 = vector.broadcast %20 : vector<1x128xf32> to vector<32x128xf32>
    %25 = arith.mulf %2, %24 : vector<32x128xf32>
    %26 = vector.broadcast %23 : vector<1x128xf32> to vector<32x128xf32>
    %27 = arith.addf %25, %26 : vector<32x128xf32>
    %c0_13 = arith.constant 0 : index
    %c0_14 = arith.constant 0 : index
    %28 = vector.load %arg5[%c0_13, %c0_14] : memref<32x128xf32, #tpu.memory_space<vmem>>, vector<32x128xf32>
    tpu.vector_store %arg5[%c0_13, %c0_14], %27 {strides = array<i32>} : memref<32x128xf32, #tpu.memory_space<vmem>>, vector<32x128xf32>,
    return
  }
  func.func @transform_0(%arg0: i32) -> (i32, i32) {
    %c0_i32 = arith.constant 0 : i32
    %c0_i32_0 = arith.constant 0 : i32
    %c0_i32_1 = arith.constant 0 : i32
    return %c0_i32, %c0_i32_0 : i32, i32
  }
  func.func @transform_1(%arg0: i32) -> (i32, i32) {
    %c0_i32 = arith.constant 0 : i32
    %c0_i32_0 = arith.constant 0 : i32
    %c0_i32_1 = arith.constant 0 : i32
    return %c0_i32, %c0_i32_0 : i32, i32
  }
  func.func @transform_2(%arg0: i32) -> (i32, i32) {
    %c0_i32 = arith.constant 0 : i32
    %c0_i32_0 = arith.constant 0 : i32
    %c0_i32_1 = arith.constant 0 : i32
    return %c0_i32, %c0_i32_0 : i32, i32
  }
  func.func @transform_3(%arg0: i32) -> (i32, i32) {
    %c0_i32 = arith.constant 0 : i32
    %c0_i32_0 = arith.constant 0 : i32
    %c0_i32_1 = arith.constant 0 : i32
    return %c0_i32, %c0_i32_0 : i32, i32
  }
  func.func @transform_4(%arg0: i32) -> (i32, i32) {
    %c0_i32 = arith.constant 0 : i32
    %c0_i32_0 = arith.constant 0 : i32
    %c0_i32_1 = arith.constant 0 : i32
    return %c0_i32, %c0_i32_0 : i32, i32
  }
}

module attributes {stable_mosaic.version = 11 : i64} {
  func.func @_conv_bn_add_act_kernel(%arg0: i32, %arg1: memref<32x1152xbf16, #tpu.memory_space<vmem>>, %arg2: memref<1152x128xbf16, #tpu.memory_space<vmem>>, %arg3: memref<1x128xf32, #tpu.memory_space<vmem>>, %arg4: memref<1x128xf32, #tpu.memory_space<vmem>>, %arg5: memref<32x128xf32, #tpu.memory_space<vmem>>, %arg6: memref<32x128xf32, #tpu.memory_space<vmem>>) attributes {dimension_semantics = [#tpu.dimension_semantics<arbitrary>], iteration_bounds = array<i64: 1>, scalar_prefetch = 0 : i64, scratch_operands = 0 : i64, tpu.core_type = #tpu.core_type<tc>, window_params = [{pipeline_mode = #tpu.pipeline_mode<synchronous>, transform_indices = @transform_0, window_bounds = array<i64: 32, 1152>}, {pipeline_mode = #tpu.pipeline_mode<synchronous>, transform_indices = @transform_1, window_bounds = array<i64: 1152, 128>}, {pipeline_mode = #tpu.pipeline_mode<synchronous>, transform_indices = @transform_2, window_bounds = array<i64: 1, 128>}, {pipeline_mode = #tpu.pipeline_mode<synchronous>, transform_indices = @transform_3, window_bounds = array<i64: 1, 128>}, {pipeline_mode = #tpu.pipeline_mode<synchronous>, transform_indices = @transform_4, window_bounds = array<i64: 32, 128>}, {pipeline_mode = #tpu.pipeline_mode<synchronous>, transform_indices = @transform_5, window_bounds = array<i64: 32, 128>}]} {
    %c0 = arith.constant 0 : index
    %c0_0 = arith.constant 0 : index
    %0 = vector.load %arg1[%c0, %c0_0] : memref<32x1152xbf16, #tpu.memory_space<vmem>>, vector<32x1152xbf16>
    %c0_1 = arith.constant 0 : index
    %c0_2 = arith.constant 0 : index
    %1 = vector.load %arg2[%c0_1, %c0_2] : memref<1152x128xbf16, #tpu.memory_space<vmem>>, vector<1152x128xbf16>
    %cst = arith.constant dense<0.000000e+00> : vector<32x128xf32>
    %2 = tpu.matmul %0, %1, %cst {dimension_numbers = #tpu.dot_dimension_numbers<[1], [0], [0], [1], [0, 0, 1, 1], [], []>} : vector<32x1152xbf16>, vector<1152x128xbf16>, vector<32x128xf32> -> vector<32x128xf32>
    %cst_3 = arith.constant dense<0.000000e+00> : vector<128xf32>
    %3 = vector.multi_reduction <add>, %2, %cst_3 [0] : vector<32x128xf32> to vector<128xf32>
    %4 = vector.shape_cast %3 : vector<128xf32> to vector<1x128xf32>
    %cst_4 = arith.constant 0.055555556 : f32
    %5 = vector.broadcast %cst_4 : f32 to vector<1x128xf32>
    %6 = arith.mulf %4, %5 : vector<1x128xf32>
    %7 = arith.mulf %2, %2 : vector<32x128xf32>
    %cst_5 = arith.constant dense<0.000000e+00> : vector<128xf32>
    %8 = vector.multi_reduction <add>, %7, %cst_5 [0] : vector<32x128xf32> to vector<128xf32>
    %9 = vector.shape_cast %8 : vector<128xf32> to vector<1x128xf32>
    %cst_6 = arith.constant 0.055555556 : f32
    %10 = vector.broadcast %cst_6 : f32 to vector<1x128xf32>
    %11 = arith.mulf %9, %10 : vector<1x128xf32>
    %12 = arith.mulf %6, %6 : vector<1x128xf32>
    %13 = arith.subf %11, %12 : vector<1x128xf32>
    %cst_7 = arith.constant 0.000000e+00 : f32
    %14 = vector.broadcast %cst_7 : f32 to vector<1x128xf32>
    %15 = arith.maximumf %13, %14 : vector<1x128xf32>
    %c0_8 = arith.constant 0 : index
    %c0_9 = arith.constant 0 : index
    %16 = vector.load %arg3[%c0_8, %c0_9] : memref<1x128xf32, #tpu.memory_space<vmem>>, vector<1x128xf32>
    %cst_10 = arith.constant 9.99999974E-6 : f32
    %17 = vector.broadcast %cst_10 : f32 to vector<1x128xf32>
    %18 = arith.addf %15, %17 : vector<1x128xf32>
    %19 = math.rsqrt %18 : vector<1x128xf32>
    %20 = arith.mulf %16, %19 : vector<1x128xf32>
    %c0_11 = arith.constant 0 : index
    %c0_12 = arith.constant 0 : index
    %21 = vector.load %arg4[%c0_11, %c0_12] : memref<1x128xf32, #tpu.memory_space<vmem>>, vector<1x128xf32>
    %22 = arith.mulf %6, %20 : vector<1x128xf32>
    %23 = arith.subf %21, %22 : vector<1x128xf32>
    %24 = vector.broadcast %20 : vector<1x128xf32> to vector<32x128xf32>
    %25 = arith.mulf %2, %24 : vector<32x128xf32>
    %26 = vector.broadcast %23 : vector<1x128xf32> to vector<32x128xf32>
    %27 = arith.addf %25, %26 : vector<32x128xf32>
    %c0_13 = arith.constant 0 : index
    %c0_14 = arith.constant 0 : index
    %28 = vector.load %arg5[%c0_13, %c0_14] : memref<32x128xf32, #tpu.memory_space<vmem>>, vector<32x128xf32>
    %29 = arith.addf %27, %28 : vector<32x128xf32>
    %cst_15 = arith.constant 0.000000e+00 : f32
    %30 = vector.broadcast %cst_15 : f32 to vector<32x128xf32>
    %31 = arith.maximumf %29, %30 : vector<32x128xf32>
    %c0_16 = arith.constant 0 : index
    %c0_17 = arith.constant 0 : index
    %32 = vector.load %arg6[%c0_16, %c0_17] : memref<32x128xf32, #tpu.memory_space<vmem>>, vector<32x128xf32>
    tpu.vector_store %arg6[%c0_16, %c0_17], %31 {strides = array<i32>} : memref<32x128xf32, #tpu.memory_space<vmem>>, vector<32x128xf32>,
    return
  }
  func.func @transform_0(%arg0: i32) -> (i32, i32) {
    %c0_i32 = arith.constant 0 : i32
    %c0_i32_0 = arith.constant 0 : i32
    %c0_i32_1 = arith.constant 0 : i32
    return %c0_i32, %c0_i32_0 : i32, i32
  }
  func.func @transform_1(%arg0: i32) -> (i32, i32) {
    %c0_i32 = arith.constant 0 : i32
    %c0_i32_0 = arith.constant 0 : i32
    %c0_i32_1 = arith.constant 0 : i32
    return %c0_i32, %c0_i32_0 : i32, i32
  }
  func.func @transform_2(%arg0: i32) -> (i32, i32) {
    %c0_i32 = arith.constant 0 : i32
    %c0_i32_0 = arith.constant 0 : i32
    %c0_i32_1 = arith.constant 0 : i32
    return %c0_i32, %c0_i32_0 : i32, i32
  }
  func.func @transform_3(%arg0: i32) -> (i32, i32) {
    %c0_i32 = arith.constant 0 : i32
    %c0_i32_0 = arith.constant 0 : i32
    %c0_i32_1 = arith.constant 0 : i32
    return %c0_i32, %c0_i32_0 : i32, i32
  }
  func.func @transform_4(%arg0: i32) -> (i32, i32) {
    %c0_i32 = arith.constant 0 : i32
    %c0_i32_0 = arith.constant 0 : i32
    %c0_i32_1 = arith.constant 0 : i32
    return %c0_i32, %c0_i32_0 : i32, i32
  }
  func.func @transform_5(%arg0: i32) -> (i32, i32) {
    %c0_i32 = arith.constant 0 : i32
    %c0_i32_0 = arith.constant 0 : i32
    %c0_i32_1 = arith.constant 0 : i32
    return %c0_i32, %c0_i32_0 : i32, i32
  }
}

module attributes {stable_mosaic.version = 11 : i64} {
  func.func @_conv_bn_act_kernel(%arg0: i32, %arg1: memref<32x1152xbf16, #tpu.memory_space<vmem>>, %arg2: memref<1152x256xbf16, #tpu.memory_space<vmem>>, %arg3: memref<1x256xf32, #tpu.memory_space<vmem>>, %arg4: memref<1x256xf32, #tpu.memory_space<vmem>>, %arg5: memref<32x256xf32, #tpu.memory_space<vmem>>) attributes {dimension_semantics = [#tpu.dimension_semantics<arbitrary>], iteration_bounds = array<i64: 1>, scalar_prefetch = 0 : i64, scratch_operands = 0 : i64, tpu.core_type = #tpu.core_type<tc>, window_params = [{pipeline_mode = #tpu.pipeline_mode<synchronous>, transform_indices = @transform_0, window_bounds = array<i64: 32, 1152>}, {pipeline_mode = #tpu.pipeline_mode<synchronous>, transform_indices = @transform_1, window_bounds = array<i64: 1152, 256>}, {pipeline_mode = #tpu.pipeline_mode<synchronous>, transform_indices = @transform_2, window_bounds = array<i64: 1, 256>}, {pipeline_mode = #tpu.pipeline_mode<synchronous>, transform_indices = @transform_3, window_bounds = array<i64: 1, 256>}, {pipeline_mode = #tpu.pipeline_mode<synchronous>, transform_indices = @transform_4, window_bounds = array<i64: 32, 256>}]} {
    %c0 = arith.constant 0 : index
    %c0_0 = arith.constant 0 : index
    %0 = vector.load %arg1[%c0, %c0_0] : memref<32x1152xbf16, #tpu.memory_space<vmem>>, vector<32x1152xbf16>
    %c0_1 = arith.constant 0 : index
    %c0_2 = arith.constant 0 : index
    %1 = vector.load %arg2[%c0_1, %c0_2] : memref<1152x256xbf16, #tpu.memory_space<vmem>>, vector<1152x256xbf16>
    %cst = arith.constant dense<0.000000e+00> : vector<32x256xf32>
    %2 = tpu.matmul %0, %1, %cst {dimension_numbers = #tpu.dot_dimension_numbers<[1], [0], [0], [1], [0, 0, 1, 1], [], []>} : vector<32x1152xbf16>, vector<1152x256xbf16>, vector<32x256xf32> -> vector<32x256xf32>
    %cst_3 = arith.constant dense<0.000000e+00> : vector<256xf32>
    %3 = vector.multi_reduction <add>, %2, %cst_3 [0] : vector<32x256xf32> to vector<256xf32>
    %4 = vector.shape_cast %3 : vector<256xf32> to vector<1x256xf32>
    %cst_4 = arith.constant 0.055555556 : f32
    %5 = vector.broadcast %cst_4 : f32 to vector<1x256xf32>
    %6 = arith.mulf %4, %5 : vector<1x256xf32>
    %7 = arith.mulf %2, %2 : vector<32x256xf32>
    %cst_5 = arith.constant dense<0.000000e+00> : vector<256xf32>
    %8 = vector.multi_reduction <add>, %7, %cst_5 [0] : vector<32x256xf32> to vector<256xf32>
    %9 = vector.shape_cast %8 : vector<256xf32> to vector<1x256xf32>
    %cst_6 = arith.constant 0.055555556 : f32
    %10 = vector.broadcast %cst_6 : f32 to vector<1x256xf32>
    %11 = arith.mulf %9, %10 : vector<1x256xf32>
    %12 = arith.mulf %6, %6 : vector<1x256xf32>
    %13 = arith.subf %11, %12 : vector<1x256xf32>
    %cst_7 = arith.constant 0.000000e+00 : f32
    %14 = vector.broadcast %cst_7 : f32 to vector<1x256xf32>
    %15 = arith.maximumf %13, %14 : vector<1x256xf32>
    %c0_8 = arith.constant 0 : index
    %c0_9 = arith.constant 0 : index
    %16 = vector.load %arg3[%c0_8, %c0_9] : memref<1x256xf32, #tpu.memory_space<vmem>>, vector<1x256xf32>
    %cst_10 = arith.constant 9.99999974E-6 : f32
    %17 = vector.broadcast %cst_10 : f32 to vector<1x256xf32>
    %18 = arith.addf %15, %17 : vector<1x256xf32>
    %19 = math.rsqrt %18 : vector<1x256xf32>
    %20 = arith.mulf %16, %19 : vector<1x256xf32>
    %c0_11 = arith.constant 0 : index
    %c0_12 = arith.constant 0 : index
    %21 = vector.load %arg4[%c0_11, %c0_12] : memref<1x256xf32, #tpu.memory_space<vmem>>, vector<1x256xf32>
    %22 = arith.mulf %6, %20 : vector<1x256xf32>
    %23 = arith.subf %21, %22 : vector<1x256xf32>
    %24 = vector.broadcast %20 : vector<1x256xf32> to vector<32x256xf32>
    %25 = arith.mulf %2, %24 : vector<32x256xf32>
    %26 = vector.broadcast %23 : vector<1x256xf32> to vector<32x256xf32>
    %27 = arith.addf %25, %26 : vector<32x256xf32>
    %cst_13 = arith.constant 0.000000e+00 : f32
    %28 = vector.broadcast %cst_13 : f32 to vector<32x256xf32>
    %29 = arith.maximumf %27, %28 : vector<32x256xf32>
    %c0_14 = arith.constant 0 : index
    %c0_15 = arith.constant 0 : index
    %30 = vector.load %arg5[%c0_14, %c0_15] : memref<32x256xf32, #tpu.memory_space<vmem>>, vector<32x256xf32>
    tpu.vector_store %arg5[%c0_14, %c0_15], %29 {strides = array<i32>} : memref<32x256xf32, #tpu.memory_space<vmem>>, vector<32x256xf32>,
    return
  }
  func.func @transform_0(%arg0: i32) -> (i32, i32) {
    %c0_i32 = arith.constant 0 : i32
    %c0_i32_0 = arith.constant 0 : i32
    %c0_i32_1 = arith.constant 0 : i32
    return %c0_i32, %c0_i32_0 : i32, i32
  }
  func.func @transform_1(%arg0: i32) -> (i32, i32) {
    %c0_i32 = arith.constant 0 : i32
    %c0_i32_0 = arith.constant 0 : i32
    %c0_i32_1 = arith.constant 0 : i32
    return %c0_i32, %c0_i32_0 : i32, i32
  }
  func.func @transform_2(%arg0: i32) -> (i32, i32) {
    %c0_i32 = arith.constant 0 : i32
    %c0_i32_0 = arith.constant 0 : i32
    %c0_i32_1 = arith.constant 0 : i32
    return %c0_i32, %c0_i32_0 : i32, i32
  }
  func.func @transform_3(%arg0: i32) -> (i32, i32) {
    %c0_i32 = arith.constant 0 : i32
    %c0_i32_0 = arith.constant 0 : i32
    %c0_i32_1 = arith.constant 0 : i32
    return %c0_i32, %c0_i32_0 : i32, i32
  }
  func.func @transform_4(%arg0: i32) -> (i32, i32) {
    %c0_i32 = arith.constant 0 : i32
    %c0_i32_0 = arith.constant 0 : i32
    %c0_i32_1 = arith.constant 0 : i32
    return %c0_i32, %c0_i32_0 : i32, i32
  }
}

module attributes {stable_mosaic.version = 11 : i64} {
  func.func @_conv_bn_act_kernel(%arg0: i32, %arg1: memref<32x128xbf16, #tpu.memory_space<vmem>>, %arg2: memref<128x256xbf16, #tpu.memory_space<vmem>>, %arg3: memref<1x256xf32, #tpu.memory_space<vmem>>, %arg4: memref<1x256xf32, #tpu.memory_space<vmem>>, %arg5: memref<32x256xf32, #tpu.memory_space<vmem>>) attributes {dimension_semantics = [#tpu.dimension_semantics<arbitrary>], iteration_bounds = array<i64: 1>, scalar_prefetch = 0 : i64, scratch_operands = 0 : i64, tpu.core_type = #tpu.core_type<tc>, window_params = [{pipeline_mode = #tpu.pipeline_mode<synchronous>, transform_indices = @transform_0, window_bounds = array<i64: 32, 128>}, {pipeline_mode = #tpu.pipeline_mode<synchronous>, transform_indices = @transform_1, window_bounds = array<i64: 128, 256>}, {pipeline_mode = #tpu.pipeline_mode<synchronous>, transform_indices = @transform_2, window_bounds = array<i64: 1, 256>}, {pipeline_mode = #tpu.pipeline_mode<synchronous>, transform_indices = @transform_3, window_bounds = array<i64: 1, 256>}, {pipeline_mode = #tpu.pipeline_mode<synchronous>, transform_indices = @transform_4, window_bounds = array<i64: 32, 256>}]} {
    %c0 = arith.constant 0 : index
    %c0_0 = arith.constant 0 : index
    %0 = vector.load %arg1[%c0, %c0_0] : memref<32x128xbf16, #tpu.memory_space<vmem>>, vector<32x128xbf16>
    %c0_1 = arith.constant 0 : index
    %c0_2 = arith.constant 0 : index
    %1 = vector.load %arg2[%c0_1, %c0_2] : memref<128x256xbf16, #tpu.memory_space<vmem>>, vector<128x256xbf16>
    %cst = arith.constant dense<0.000000e+00> : vector<32x256xf32>
    %2 = tpu.matmul %0, %1, %cst {dimension_numbers = #tpu.dot_dimension_numbers<[1], [0], [0], [1], [0, 0, 1, 1], [], []>} : vector<32x128xbf16>, vector<128x256xbf16>, vector<32x256xf32> -> vector<32x256xf32>
    %cst_3 = arith.constant dense<0.000000e+00> : vector<256xf32>
    %3 = vector.multi_reduction <add>, %2, %cst_3 [0] : vector<32x256xf32> to vector<256xf32>
    %4 = vector.shape_cast %3 : vector<256xf32> to vector<1x256xf32>
    %cst_4 = arith.constant 0.055555556 : f32
    %5 = vector.broadcast %cst_4 : f32 to vector<1x256xf32>
    %6 = arith.mulf %4, %5 : vector<1x256xf32>
    %7 = arith.mulf %2, %2 : vector<32x256xf32>
    %cst_5 = arith.constant dense<0.000000e+00> : vector<256xf32>
    %8 = vector.multi_reduction <add>, %7, %cst_5 [0] : vector<32x256xf32> to vector<256xf32>
    %9 = vector.shape_cast %8 : vector<256xf32> to vector<1x256xf32>
    %cst_6 = arith.constant 0.055555556 : f32
    %10 = vector.broadcast %cst_6 : f32 to vector<1x256xf32>
    %11 = arith.mulf %9, %10 : vector<1x256xf32>
    %12 = arith.mulf %6, %6 : vector<1x256xf32>
    %13 = arith.subf %11, %12 : vector<1x256xf32>
    %cst_7 = arith.constant 0.000000e+00 : f32
    %14 = vector.broadcast %cst_7 : f32 to vector<1x256xf32>
    %15 = arith.maximumf %13, %14 : vector<1x256xf32>
    %c0_8 = arith.constant 0 : index
    %c0_9 = arith.constant 0 : index
    %16 = vector.load %arg3[%c0_8, %c0_9] : memref<1x256xf32, #tpu.memory_space<vmem>>, vector<1x256xf32>
    %cst_10 = arith.constant 9.99999974E-6 : f32
    %17 = vector.broadcast %cst_10 : f32 to vector<1x256xf32>
    %18 = arith.addf %15, %17 : vector<1x256xf32>
    %19 = math.rsqrt %18 : vector<1x256xf32>
    %20 = arith.mulf %16, %19 : vector<1x256xf32>
    %c0_11 = arith.constant 0 : index
    %c0_12 = arith.constant 0 : index
    %21 = vector.load %arg4[%c0_11, %c0_12] : memref<1x256xf32, #tpu.memory_space<vmem>>, vector<1x256xf32>
    %22 = arith.mulf %6, %20 : vector<1x256xf32>
    %23 = arith.subf %21, %22 : vector<1x256xf32>
    %24 = vector.broadcast %20 : vector<1x256xf32> to vector<32x256xf32>
    %25 = arith.mulf %2, %24 : vector<32x256xf32>
    %26 = vector.broadcast %23 : vector<1x256xf32> to vector<32x256xf32>
    %27 = arith.addf %25, %26 : vector<32x256xf32>
    %c0_13 = arith.constant 0 : index
    %c0_14 = arith.constant 0 : index
    %28 = vector.load %arg5[%c0_13, %c0_14] : memref<32x256xf32, #tpu.memory_space<vmem>>, vector<32x256xf32>
    tpu.vector_store %arg5[%c0_13, %c0_14], %27 {strides = array<i32>} : memref<32x256xf32, #tpu.memory_space<vmem>>, vector<32x256xf32>,
    return
  }
  func.func @transform_0(%arg0: i32) -> (i32, i32) {
    %c0_i32 = arith.constant 0 : i32
    %c0_i32_0 = arith.constant 0 : i32
    %c0_i32_1 = arith.constant 0 : i32
    return %c0_i32, %c0_i32_0 : i32, i32
  }
  func.func @transform_1(%arg0: i32) -> (i32, i32) {
    %c0_i32 = arith.constant 0 : i32
    %c0_i32_0 = arith.constant 0 : i32
    %c0_i32_1 = arith.constant 0 : i32
    return %c0_i32, %c0_i32_0 : i32, i32
  }
  func.func @transform_2(%arg0: i32) -> (i32, i32) {
    %c0_i32 = arith.constant 0 : i32
    %c0_i32_0 = arith.constant 0 : i32
    %c0_i32_1 = arith.constant 0 : i32
    return %c0_i32, %c0_i32_0 : i32, i32
  }
  func.func @transform_3(%arg0: i32) -> (i32, i32) {
    %c0_i32 = arith.constant 0 : i32
    %c0_i32_0 = arith.constant 0 : i32
    %c0_i32_1 = arith.constant 0 : i32
    return %c0_i32, %c0_i32_0 : i32, i32
  }
  func.func @transform_4(%arg0: i32) -> (i32, i32) {
    %c0_i32 = arith.constant 0 : i32
    %c0_i32_0 = arith.constant 0 : i32
    %c0_i32_1 = arith.constant 0 : i32
    return %c0_i32, %c0_i32_0 : i32, i32
  }
}

module attributes {stable_mosaic.version = 11 : i64} {
  func.func @_conv_bn_add_act_kernel(%arg0: i32, %arg1: memref<32x2304xbf16, #tpu.memory_space<vmem>>, %arg2: memref<2304x256xbf16, #tpu.memory_space<vmem>>, %arg3: memref<1x256xf32, #tpu.memory_space<vmem>>, %arg4: memref<1x256xf32, #tpu.memory_space<vmem>>, %arg5: memref<32x256xf32, #tpu.memory_space<vmem>>, %arg6: memref<32x256xf32, #tpu.memory_space<vmem>>) attributes {dimension_semantics = [#tpu.dimension_semantics<arbitrary>], iteration_bounds = array<i64: 1>, scalar_prefetch = 0 : i64, scratch_operands = 0 : i64, tpu.core_type = #tpu.core_type<tc>, window_params = [{pipeline_mode = #tpu.pipeline_mode<synchronous>, transform_indices = @transform_0, window_bounds = array<i64: 32, 2304>}, {pipeline_mode = #tpu.pipeline_mode<synchronous>, transform_indices = @transform_1, window_bounds = array<i64: 2304, 256>}, {pipeline_mode = #tpu.pipeline_mode<synchronous>, transform_indices = @transform_2, window_bounds = array<i64: 1, 256>}, {pipeline_mode = #tpu.pipeline_mode<synchronous>, transform_indices = @transform_3, window_bounds = array<i64: 1, 256>}, {pipeline_mode = #tpu.pipeline_mode<synchronous>, transform_indices = @transform_4, window_bounds = array<i64: 32, 256>}, {pipeline_mode = #tpu.pipeline_mode<synchronous>, transform_indices = @transform_5, window_bounds = array<i64: 32, 256>}]} {
    %c0 = arith.constant 0 : index
    %c0_0 = arith.constant 0 : index
    %0 = vector.load %arg1[%c0, %c0_0] : memref<32x2304xbf16, #tpu.memory_space<vmem>>, vector<32x2304xbf16>
    %c0_1 = arith.constant 0 : index
    %c0_2 = arith.constant 0 : index
    %1 = vector.load %arg2[%c0_1, %c0_2] : memref<2304x256xbf16, #tpu.memory_space<vmem>>, vector<2304x256xbf16>
    %cst = arith.constant dense<0.000000e+00> : vector<32x256xf32>
    %2 = tpu.matmul %0, %1, %cst {dimension_numbers = #tpu.dot_dimension_numbers<[1], [0], [0], [1], [0, 0, 1, 1], [], []>} : vector<32x2304xbf16>, vector<2304x256xbf16>, vector<32x256xf32> -> vector<32x256xf32>
    %cst_3 = arith.constant dense<0.000000e+00> : vector<256xf32>
    %3 = vector.multi_reduction <add>, %2, %cst_3 [0] : vector<32x256xf32> to vector<256xf32>
    %4 = vector.shape_cast %3 : vector<256xf32> to vector<1x256xf32>
    %cst_4 = arith.constant 0.055555556 : f32
    %5 = vector.broadcast %cst_4 : f32 to vector<1x256xf32>
    %6 = arith.mulf %4, %5 : vector<1x256xf32>
    %7 = arith.mulf %2, %2 : vector<32x256xf32>
    %cst_5 = arith.constant dense<0.000000e+00> : vector<256xf32>
    %8 = vector.multi_reduction <add>, %7, %cst_5 [0] : vector<32x256xf32> to vector<256xf32>
    %9 = vector.shape_cast %8 : vector<256xf32> to vector<1x256xf32>
    %cst_6 = arith.constant 0.055555556 : f32
    %10 = vector.broadcast %cst_6 : f32 to vector<1x256xf32>
    %11 = arith.mulf %9, %10 : vector<1x256xf32>
    %12 = arith.mulf %6, %6 : vector<1x256xf32>
    %13 = arith.subf %11, %12 : vector<1x256xf32>
    %cst_7 = arith.constant 0.000000e+00 : f32
    %14 = vector.broadcast %cst_7 : f32 to vector<1x256xf32>
    %15 = arith.maximumf %13, %14 : vector<1x256xf32>
    %c0_8 = arith.constant 0 : index
    %c0_9 = arith.constant 0 : index
    %16 = vector.load %arg3[%c0_8, %c0_9] : memref<1x256xf32, #tpu.memory_space<vmem>>, vector<1x256xf32>
    %cst_10 = arith.constant 9.99999974E-6 : f32
    %17 = vector.broadcast %cst_10 : f32 to vector<1x256xf32>
    %18 = arith.addf %15, %17 : vector<1x256xf32>
    %19 = math.rsqrt %18 : vector<1x256xf32>
    %20 = arith.mulf %16, %19 : vector<1x256xf32>
    %c0_11 = arith.constant 0 : index
    %c0_12 = arith.constant 0 : index
    %21 = vector.load %arg4[%c0_11, %c0_12] : memref<1x256xf32, #tpu.memory_space<vmem>>, vector<1x256xf32>
    %22 = arith.mulf %6, %20 : vector<1x256xf32>
    %23 = arith.subf %21, %22 : vector<1x256xf32>
    %24 = vector.broadcast %20 : vector<1x256xf32> to vector<32x256xf32>
    %25 = arith.mulf %2, %24 : vector<32x256xf32>
    %26 = vector.broadcast %23 : vector<1x256xf32> to vector<32x256xf32>
    %27 = arith.addf %25, %26 : vector<32x256xf32>
    %c0_13 = arith.constant 0 : index
    %c0_14 = arith.constant 0 : index
    %28 = vector.load %arg5[%c0_13, %c0_14] : memref<32x256xf32, #tpu.memory_space<vmem>>, vector<32x256xf32>
    %29 = arith.addf %27, %28 : vector<32x256xf32>
    %cst_15 = arith.constant 0.000000e+00 : f32
    %30 = vector.broadcast %cst_15 : f32 to vector<32x256xf32>
    %31 = arith.maximumf %29, %30 : vector<32x256xf32>
    %c0_16 = arith.constant 0 : index
    %c0_17 = arith.constant 0 : index
    %32 = vector.load %arg6[%c0_16, %c0_17] : memref<32x256xf32, #tpu.memory_space<vmem>>, vector<32x256xf32>
    tpu.vector_store %arg6[%c0_16, %c0_17], %31 {strides = array<i32>} : memref<32x256xf32, #tpu.memory_space<vmem>>, vector<32x256xf32>,
    return
  }
  func.func @transform_0(%arg0: i32) -> (i32, i32) {
    %c0_i32 = arith.constant 0 : i32
    %c0_i32_0 = arith.constant 0 : i32
    %c0_i32_1 = arith.constant 0 : i32
    return %c0_i32, %c0_i32_0 : i32, i32
  }
  func.func @transform_1(%arg0: i32) -> (i32, i32) {
    %c0_i32 = arith.constant 0 : i32
    %c0_i32_0 = arith.constant 0 : i32
    %c0_i32_1 = arith.constant 0 : i32
    return %c0_i32, %c0_i32_0 : i32, i32
  }
  func.func @transform_2(%arg0: i32) -> (i32, i32) {
    %c0_i32 = arith.constant 0 : i32
    %c0_i32_0 = arith.constant 0 : i32
    %c0_i32_1 = arith.constant 0 : i32
    return %c0_i32, %c0_i32_0 : i32, i32
  }
  func.func @transform_3(%arg0: i32) -> (i32, i32) {
    %c0_i32 = arith.constant 0 : i32
    %c0_i32_0 = arith.constant 0 : i32
    %c0_i32_1 = arith.constant 0 : i32
    return %c0_i32, %c0_i32_0 : i32, i32
  }
  func.func @transform_4(%arg0: i32) -> (i32, i32) {
    %c0_i32 = arith.constant 0 : i32
    %c0_i32_0 = arith.constant 0 : i32
    %c0_i32_1 = arith.constant 0 : i32
    return %c0_i32, %c0_i32_0 : i32, i32
  }
  func.func @transform_5(%arg0: i32) -> (i32, i32) {
    %c0_i32 = arith.constant 0 : i32
    %c0_i32_0 = arith.constant 0 : i32
    %c0_i32_1 = arith.constant 0 : i32
    return %c0_i32, %c0_i32_0 : i32, i32
  }
}

</mosaic_0001>

<bundles_post_ra>
// kernel: resnet_forward.10
= control target key start
LH: loop header
LB: loop body
LE: loop exit
PB: predicated region body
PF: predicated region fallthrough
CT: control target
= control target key end

     0   :  { %v1230_v0 = vmov 0   ;;  %vm336_vm0 = vcmask 154624   ;;  %vm403_vm1 = vcmask 1040384   ;;  %vm404_vm2 = vcmask 1041408   ;;  %s2083_s1 = inlined_call_operand.vmem [shape: bf16[147,64], index: 1, kind: input, shape index: {}]   ;;  %s2084_s0 = inlined_call_operand.vmem [shape: bf16[352,147], index: 0, kind: input, shape index: {}]   ;;  %s2085_s2 = inlined_call_operand.vmem [shape: f32[1,64], index: 2, kind: input, shape index: {}]   ;;  %s2086_s3 = inlined_call_operand.vmem [shape: f32[1,64], index: 3, kind: input, shape index: {}]   ;;  %s2087_s4 = inlined_call_operand.vmem [shape: f32[352,64], index: 4, kind: output, shape index: {}]  }
   0x1   :  { %410 = vmatprep.subr.bf16.mxu0 %v1230_v0  ;;  %v1152_v1 = vld [vmem:[%s2083_s1 + $0x38] sm:$0xff]   ;;  %1130 = vmatprep.subr.bf16.mxu1 %v1230_v0  ;;  %v1153_v2 = vld [vmem:[%s2083_s1 + $0x30] sm:$0xff]   ;;  %v1154_v3 = vld [vmem:[%s2083_s1 + $0x28] sm:$0xff]   ;;  %v1231_v10 = vmov 65535   ;;  %vm619_vm3 = vcmask 523264  }
   0x2   :  { %411 = vmatpush1.bf16.msra.mxu0 %v1152_v1  ;;  %1140 = vmatpush1.bf16.msra.mxu1 %v1152_v1  ;;  %v1155_v4 = vld [vmem:[%s2083_s1 + $0x20] sm:$0xff]   ;;  %v1156_v6 = vld [vmem:[%s2083_s1 + $0x18] sm:$0xff]   ;;  %v1157_v8 = vld [vmem:[%s2083_s1 + $0x10] sm:$0xff]   ;;  %v405_v11 = vsel %vm403_vm1, 4294967295, %v1231_v10 }
   0x3   :  { %412 = vmatprep.subr.bf16.mxu0 %v1230_v0  ;;  %1131 = vmatprep.subr.bf16.mxu1 %v1230_v0  ;;  %v1164_v5 = vld [vmem:[%s2084_s0 + $0x4] ss:$8 sps:$4 sm:$0xff]   ;;  %v1179_v7 = vld [vmem:[%s2084_s0 + $0xb4] ss:$8 sps:$4 sm:$0xff]   ;;  %v406_v14 = vsel %vm404_vm2, %v405_v11, 0 }
   0x4   :  { %1108 = vmatprep.mubr.msk.bf16.mxu0 %vm336_vm0, %v1164_v5  ;;  %1119 = vmatprep.mubr.msk.bf16.mxu1 %vm336_vm0, %v1179_v7  ;;  %v1158_v9 = vld [vmem:[%s2083_s1 + $0x8] sm:$0xff]   ;;  %v1159_v12 = vld [vmem:[%s2083_s1] sm:$0xff]   ;;  %v1177_v18 = vld [vmem:[%s2084_s0 + $0xb0] ss:$8 sps:$4 sm:$0xff]  }
   0x5   :  { %v1160_v13 = vld [vmem:[%s2083_s1 + $0x48] ss:$0 sps:$4 sm:$0x33]   ;;  %v1161_v16 = vld [vmem:[%s2083_s1 + $0x40] sm:$0xff]   ;;  %v1165_v19 = vld [vmem:[%s2084_s0 + $0x14] ss:$8 sps:$4 sm:$0xff]  }
   0x6   :  { %413 = vmatpush1.bf16.msra.mxu0 %v1153_v2  ;;  %1141 = vmatpush1.bf16.msra.mxu1 %v1153_v2  ;;  %v408_v15 = vand.u32 %v1160_v13, %v406_v14  ;;  %v1162_v17 = vld [vmem:[%s2084_s0] ss:$8 sps:$4 sm:$0xff]   ;;  %v1183_v20 = vld [vmem:[%s2084_s0 + $0xc4] ss:$8 sps:$4 sm:$0xff]   ;;  %v1167_v21 = vld [vmem:[%s2084_s0 + $0x10] ss:$8 sps:$4 sm:$0xff]  }
   0x7   :  { %414 = vmatprep.subr.bf16.mxu0 %v1230_v0  ;;  %1132 = vmatprep.subr.bf16.mxu1 %v1230_v0  ;;  %v1185_v22 = vld [vmem:[%s2084_s0 + $0xc0] ss:$8 sps:$4 sm:$0xff]   ;;  %v1168_v23 = vld [vmem:[%s2084_s0 + $0x24] ss:$8 sps:$4 sm:$0xff]   ;;  %v1189_v24 = vld [vmem:[%s2084_s0 + $0xd4] ss:$8 sps:$4 sm:$0xff]  }
   0x8   :  { %v1170_v25 = vld [vmem:[%s2084_s0 + $0x20] ss:$8 sps:$4 sm:$0xff]   ;;  %v1191_v26 = vld [vmem:[%s2084_s0 + $0xd0] ss:$8 sps:$4 sm:$0xff]   ;;  %v1171_v27 = vld [vmem:[%s2084_s0 + $0x34] ss:$8 sps:$4 sm:$0xff]  }
   0x9   :  { %v1195_v28 = vld [vmem:[%s2084_s0 + $0xe4] ss:$8 sps:$4 sm:$0xff]   ;;  %v1173_v29 = vld [vmem:[%s2084_s0 + $0x30] ss:$8 sps:$4 sm:$0xff]   ;;  %v1197_v30 = vld [vmem:[%s2084_s0 + $0xe0] ss:$8 sps:$4 sm:$0xff]  }
   0xa   :  { %415 = vmatpush1.bf16.msra.mxu0 %v1154_v3  ;;  %1142 = vmatpush1.bf16.msra.mxu1 %v1154_v3  ;;  %v1174_v31 = vld [vmem:[%s2084_s0 + $0x44] ss:$8 sps:$4 sm:$0xff]   ;;  %v1201_v32 = vld [vmem:[%s2084_s0 + $0xf4] ss:$8 sps:$4 sm:$0xff]   ;;  %v1176_v33 = vld [vmem:[%s2084_s0 + $0x40] ss:$8 sps:$4 sm:$0xff]  }
   0xb   :  { %416 = vmatprep.subr.bf16.mxu0 %v1230_v0  ;;  %1133 = vmatprep.subr.bf16.mxu1 %v1230_v0  ;;  %v1203_v34 = vld [vmem:[%s2084_s0 + $0xf0] ss:$8 sps:$4 sm:$0xff]   ;;  %v1180_v35 = vld [vmem:[%s2084_s0 + $0x54] ss:$8 sps:$4 sm:$0xff]   ;;  %v1207_v36 = vld [vmem:[%s2084_s0 + $0x104] ss:$8 sps:$4 sm:$0xff]  }
   0xc   :  { %v1182_v37 = vld [vmem:[%s2084_s0 + $0x50] ss:$8 sps:$4 sm:$0xff]   ;;  %v1209_v38 = vld [vmem:[%s2084_s0 + $0x100] ss:$8 sps:$4 sm:$0xff]   ;;  %v1186_v39 = vld [vmem:[%s2084_s0 + $0x64] ss:$8 sps:$4 sm:$0xff]  }
   0xd   :  { %v1213_v40 = vld [vmem:[%s2084_s0 + $0x114] ss:$8 sps:$4 sm:$0xff]   ;;  %v1188_v41 = vld [vmem:[%s2084_s0 + $0x60] ss:$8 sps:$4 sm:$0xff]   ;;  %v1215_v42 = vld [vmem:[%s2084_s0 + $0x110] ss:$8 sps:$4 sm:$0xff]  }
   0xe   :  { %417 = vmatpush1.bf16.msra.mxu0 %v1155_v4  ;;  %1143 = vmatpush1.bf16.msra.mxu1 %v1155_v4  ;;  %v1192_v43 = vld [vmem:[%s2084_s0 + $0x74] ss:$8 sps:$4 sm:$0xff]   ;;  %v1216_v44 = vld [vmem:[%s2084_s0 + $0x124] ss:$8 sps:$4 sm:$0xff]   ;;  %v1194_v45 = vld [vmem:[%s2084_s0 + $0x70] ss:$8 sps:$4 sm:$0xff]  }
   0xf   :  { %418 = vmatprep.subr.bf16.mxu0 %v1230_v0  ;;  %1134 = vmatprep.subr.bf16.mxu1 %v1230_v0  ;;  %v1218_v46 = vld [vmem:[%s2084_s0 + $0x120] ss:$8 sps:$4 sm:$0xff]   ;;  %v1198_v47 = vld [vmem:[%s2084_s0 + $0x84] ss:$8 sps:$4 sm:$0xff]   ;;  %v1219_v48 = vld [vmem:[%s2084_s0 + $0x134] ss:$8 sps:$4 sm:$0xff]  }
  0x10   :  { %v1200_v49 = vld [vmem:[%s2084_s0 + $0x80] ss:$8 sps:$4 sm:$0xff]   ;;  %v1221_v50 = vld [vmem:[%s2084_s0 + $0x130] ss:$8 sps:$4 sm:$0xff]   ;;  %v1204_v51 = vld [vmem:[%s2084_s0 + $0x94] ss:$8 sps:$4 sm:$0xff]  }
  0x11   :  { %v1222_v52 = vld [vmem:[%s2084_s0 + $0x144] ss:$8 sps:$4 sm:$0xff]   ;;  %v1206_v53 = vld [vmem:[%s2084_s0 + $0x90] ss:$8 sps:$4 sm:$0xff]   ;;  %v1224_v54 = vld [vmem:[%s2084_s0 + $0x140] ss:$8 sps:$4 sm:$0xff]  }
  0x12   :  { %419 = vmatpush1.bf16.msra.mxu0 %v1156_v6  ;;  %1144 = vmatpush1.bf16.msra.mxu1 %v1156_v6  ;;  %v1210_v55 = vld [vmem:[%s2084_s0 + $0xa4] ss:$8 sps:$4 sm:$0xff]   ;;  %v1225_v56 = vld [vmem:[%s2084_s0 + $0x154] ss:$8 sps:$4 sm:$0xff]   ;;  %v1212_v57 = vld [vmem:[%s2084_s0 + $0xa0] ss:$8 sps:$4 sm:$0xff]  }
  0x13   :  { %420 = vmatprep.subr.bf16.mxu0 %v1230_v0  ;;  %1135 = vmatprep.subr.bf16.mxu1 %v1230_v0  ;;  %v1227_v58 = vld [vmem:[%s2084_s0 + $0x150] ss:$8 sps:$4 sm:$0xff]  }
  0x16   :  { %421 = vmatpush1.bf16.msra.mxu0 %v1157_v8  ;;  %1145 = vmatpush1.bf16.msra.mxu1 %v1157_v8 }
  0x17   :  { %422 = vmatprep.subr.bf16.mxu0 %v1230_v0  ;;  %1136 = vmatprep.subr.bf16.mxu1 %v1230_v0 }
  0x1a   :  { %423 = vmatpush1.bf16.msra.mxu0 %v1158_v9  ;;  %1146 = vmatpush1.bf16.msra.mxu1 %v1158_v9 }
  0x1b   :  { %424 = vmatprep.subr.bf16.mxu0 %v1230_v0  ;;  %1137 = vmatprep.subr.bf16.mxu1 %v1230_v0 }
  0x1e   :  { %425 = vmatpush1.bf16.msra.mxu0 %v1159_v12  ;;  %1147 = vmatpush1.bf16.msra.mxu1 %v1159_v12 }
  0x1f   :  { %438 = vmatprep.subr.bf16.mxu0 %v1230_v0  ;;  %1138 = vmatprep.subr.bf16.mxu1 %v1230_v0 }
  0x22   :  { %439 = vmatpush2.bf16.msra.mxu0 %v408_v15  ;;  %1148 = vmatpush2.bf16.msra.mxu1 %v408_v15 }
  0x23   :  { %440 = vmatprep.subr.bf16.mxu0 %v1230_v0  ;;  %1139 = vmatprep.subr.bf16.mxu1 %v1230_v0 }
  0x26   :  { %441 = vmatpush2.bf16.msra.mxu0 %v1161_v16  ;;  %1149 = vmatpush2.bf16.msra.mxu1 %v1161_v16 }
  0x29   :  { %443 = vmatmul.mubr.bf16.vlgmr.msra.gmra.mxu0 %v1162_v17  ;;  %531 = vmatmul.mubr.bf16.vlgmr.msra.gmra.mxu1 %v1177_v18 }
  0x2a   :  { %1109 = vmatprep.mubr.msk.bf16.mxu0 %vm336_vm0, %v1165_v19  ;;  %1120 = vmatprep.mubr.msk.bf16.mxu1 %vm336_vm0, %v1183_v20 }
  0x31   :  { %451 = vmatmul.mubr.bf16.gmra.mxu0 %v1167_v21  ;;  %539 = vmatmul.mubr.bf16.gmra.mxu1 %v1185_v22 }
  0x32   :  { %1110 = vmatprep.mubr.msk.bf16.mxu0 %vm336_vm0, %v1168_v23  ;;  %1121 = vmatprep.mubr.msk.bf16.mxu1 %vm336_vm0, %v1189_v24 }
  0x39   :  { %459 = vmatmul.mubr.bf16.gmra.mxu0 %v1170_v25  ;;  %547 = vmatmul.mubr.bf16.gmra.mxu1 %v1191_v26 }
  0x3a   :  { %1111 = vmatprep.mubr.msk.bf16.mxu0 %vm336_vm0, %v1171_v27  ;;  %1122 = vmatprep.mubr.msk.bf16.mxu1 %vm336_vm0, %v1195_v28 }
  0x41   :  { %467 = vmatmul.mubr.bf16.gmra.mxu0 %v1173_v29  ;;  %555 = vmatmul.mubr.bf16.gmra.mxu1 %v1197_v30 }
  0x42   :  { %1112 = vmatprep.mubr.msk.bf16.mxu0 %vm336_vm0, %v1174_v31  ;;  %1123 = vmatprep.mubr.msk.bf16.mxu1 %vm336_vm0, %v1201_v32 }
  0x49   :  { %475 = vmatmul.mubr.bf16.gmra.mxu0 %v1176_v33  ;;  %563 = vmatmul.mubr.bf16.gmra.mxu1 %v1203_v34 }
  0x4a   :  { %1113 = vmatprep.mubr.msk.bf16.mxu0 %vm336_vm0, %v1180_v35  ;;  %1124 = vmatprep.mubr.msk.bf16.mxu1 %vm336_vm0, %v1207_v36 }
  0x51   :  { %483 = vmatmul.mubr.bf16.gmra.mxu0 %v1182_v37  ;;  %571 = vmatmul.mubr.bf16.gmra.mxu1 %v1209_v38 }
  0x52   :  { %1114 = vmatprep.mubr.msk.bf16.mxu0 %vm336_vm0, %v1186_v39  ;;  %1125 = vmatprep.mubr.msk.bf16.mxu1 %vm336_vm0, %v1213_v40 }
  0x59   :  { %491 = vmatmul.mubr.bf16.gmra.mxu0 %v1188_v41  ;;  %579 = vmatmul.mubr.bf16.gmra.mxu1 %v1215_v42 }
  0x5a   :  { %1115 = vmatprep.mubr.msk.bf16.mxu0 %vm336_vm0, %v1192_v43  ;;  %1126 = vmatprep.mubr.msk.bf16.mxu1 %vm336_vm0, %v1216_v44 }
  0x61   :  { %499 = vmatmul.mubr.bf16.gmra.mxu0 %v1194_v45  ;;  %587 = vmatmul.mubr.bf16.gmra.mxu1 %v1218_v46 }
  0x62   :  { %1116 = vmatprep.mubr.msk.bf16.mxu0 %vm336_vm0, %v1198_v47  ;;  %1127 = vmatprep.mubr.msk.bf16.mxu1 %vm336_vm0, %v1219_v48 }
  0x69   :  { %507 = vmatmul.mubr.bf16.gmra.mxu0 %v1200_v49  ;;  %595 = vmatmul.mubr.bf16.gmra.mxu1 %v1221_v50 }
  0x6a   :  { %1117 = vmatprep.mubr.msk.bf16.mxu0 %vm336_vm0, %v1204_v51  ;;  %1128 = vmatprep.mubr.msk.bf16.mxu1 %vm336_vm0, %v1222_v52 }
  0x71   :  { %515 = vmatmul.mubr.bf16.gmra.mxu0 %v1206_v53  ;;  %603 = vmatmul.mubr.bf16.gmra.mxu1 %v1224_v54 }
  0x72   :  { %1118 = vmatprep.mubr.msk.bf16.mxu0 %vm336_vm0, %v1210_v55  ;;  %1129 = vmatprep.mubr.msk.bf16.mxu1 %vm336_vm0, %v1225_v56 }
  0x79   :  { %523 = vmatmul.mubr.bf16.gmra.mxu0 %v1212_v57  ;;  %611 = vmatmul.mubr.bf16.gmra.mxu1 %v1227_v58 }
  0xe9   :  { %v1441_v59 = vpop.f32.mrf.mxu0  ;;  %v1443_v60 = vpop.f32.mrf.mxu1 }
  0xea   :  { %v714_v40 = vmul.f32 %v1441_v59, %v1441_v59  ;;  %v620_v45 = vsel %vm619_vm3, %v1441_v59, 0.0 }
  0xeb   :  { %v446_v61 = vpop.f32.mrf.mxu0  ;;  %v534_v62 = vpop.f32.mrf.mxu1 }
  0xec   :  { %v758_v52 = vsel %vm619_vm3, %v714_v40, 0.0 }
  0xed   :  { %v1445_v63 = vpop.f32.mrf.mxu0  ;;  %v1447_v0 = vpop.f32.mrf.mxu1 }
  0xee   :  { %v715_v37 = vmul.f32 %v1445_v63, %v1445_v63  ;;  %v621_v41 = vsel %vm619_vm3, %v1445_v63, 0.0 }
  0xef   :  { %v449_v1 = vpop.f32.mrf.mxu0  ;;  %v537_v2 = vpop.f32.mrf.mxu1  ;;  %v622_v49 = vadd.f32 %v621_v41, %v620_v45 }
  0xf0   :  { %v759_v46 = vsel %vm619_vm3, %v715_v37, 0.0 }
  0xf1   :  { %v1449_v3 = vpop.f32.mrf.mxu0  ;;  %v1451_v4 = vpop.f32.mrf.mxu1  ;;  %v760_v56 = vadd.f32 %v759_v46, %v758_v52 }
  0xf2   :  { %v716_v42 = vmul.f32 %v1449_v3, %v1449_v3  ;;  %v623_v47 = vsel %vm619_vm3, %v1449_v3, 0.0 }
  0xf3   :  { %v454_v5 = vpop.f32.mrf.mxu0  ;;  %v542_v6 = vpop.f32.mrf.mxu1  ;;  %v624_v57 = vadd.f32 %v623_v47, %v622_v49 }
  0xf4   :  { %v761_v53 = vsel %vm619_vm3, %v716_v42, 0.0 }
  0xf5   :  { %v1453_v7 = vpop.f32.mrf.mxu0  ;;  %v1455_v8 = vpop.f32.mrf.mxu1  ;;  %v762_v5 = vadd.f32 %v761_v53, %v760_v56 }
  0xf6   :  { %v717_v48 = vmul.f32 %v1453_v7, %v1453_v7  ;;  %v625_v54 = vsel %vm619_vm3, %v1453_v7, 0.0 }
  0xf7   :  { %v457_v9 = vpop.f32.mrf.mxu0  ;;  %v545_v10 = vpop.f32.mrf.mxu1  ;;  %v626_v6 = vadd.f32 %v625_v54, %v624_v57 }
  0xf8   :  { %v763_v62 = vsel %vm619_vm3, %v717_v48, 0.0 }
  0xf9   :  { %v1457_v11 = vpop.f32.mrf.mxu0  ;;  %v1459_v12 = vpop.f32.mrf.mxu1 }
  0xfa   :  { %v718_v55 = vmul.f32 %v1457_v11, %v1457_v11  ;;  %v627_v1 = vsel %vm619_vm3, %v1457_v11, 0.0 }
  0xfb   :  { %v462_v13 = vpop.f32.mrf.mxu0  ;;  %v550_v14 = vpop.f32.mrf.mxu1 }
  0xfc   :  { %v765_v13 = vsel %vm619_vm3, %v718_v55, 0.0 }
  0xfd   :  { %v1461_v15 = vpop.f32.mrf.mxu0  ;;  %v1463_v16 = vpop.f32.mrf.mxu1 }
  0xfe   :  { %v719_v2 = vmul.f32 %v1461_v15, %v1461_v15  ;;  %v629_v14 = vsel %vm619_vm3, %v1461_v15, 0.0 }
  0xff   :  { %v465_v17 = vpop.f32.mrf.mxu0  ;;  %v553_v18 = vpop.f32.mrf.mxu1 }
 0x100   :  { %v764_v18 = vadd.f32 %v763_v62, %v762_v5 }
 0x101   :  { %v1465_v19 = vpop.f32.mrf.mxu0  ;;  %v1467_v20 = vpop.f32.mrf.mxu1 }
 0x102   :  { %v720_v17 = vmul.f32 %v1465_v19, %v1465_v19 }
 0x103   :  { %v470_v21 = vpop.f32.mrf.mxu0  ;;  %v558_v22 = vpop.f32.mrf.mxu1 }
 0x104   :  { %v628_v21 = vadd.f32 %v627_v1, %v626_v6 }
 0x105   :  { %v1469_v23 = vpop.f32.mrf.mxu0  ;;  %v1471_v24 = vpop.f32.mrf.mxu1 }
 0x106   :  { %v633_v40 = vsel %vm619_vm3, %v1469_v23, 0.0 }
 0x107   :  { %v473_v25 = vpop.f32.mrf.mxu0  ;;  %v561_v26 = vpop.f32.mrf.mxu1 }
 0x108   :  { %v767_v26 = vsel %vm619_vm3, %v719_v2, 0.0 }
 0x109   :  { %v1473_v27 = vpop.f32.mrf.mxu0  ;;  %v1475_v28 = vpop.f32.mrf.mxu1 }
 0x10a   :  { %v722_v41 = vmul.f32 %v1473_v27, %v1473_v27  ;;  %v635_v49 = vsel %vm619_vm3, %v1473_v27, 0.0 }
 0x10b   :  { %v478_v29 = vpop.f32.mrf.mxu0  ;;  %v566_v30 = vpop.f32.mrf.mxu1 }
 0x10c   :  { %v631_v29 = vsel %vm619_vm3, %v1465_v19, 0.0  ;;  %v721_v30 = vmul.f32 %v1469_v23, %v1469_v23  ;;  %v773_v55 = vsel %vm619_vm3, %v722_v41, 0.0 }
 0x10d   :  { %v1477_v31 = vpop.f32.mrf.mxu0  ;;  %v1479_v32 = vpop.f32.mrf.mxu1 }
 0x10e   :  { %v771_v48 = vsel %vm619_vm3, %v721_v30, 0.0  ;;  %v637_v56 = vsel %vm619_vm3, %v1477_v31, 0.0 }
 0x10f   :  { %v481_v33 = vpop.f32.mrf.mxu0  ;;  %v569_v34 = vpop.f32.mrf.mxu1 }
 0x110   :  { %v766_v33 = vadd.f32 %v765_v13, %v764_v18  ;;  %v630_v34 = vadd.f32 %v629_v14, %v628_v21 }
 0x111   :  { %v1481_v35 = vpop.f32.mrf.mxu0  ;;  %v1483_v36 = vpop.f32.mrf.mxu1 }
 0x112   :  { %v768_v42 = vadd.f32 %v767_v26, %v766_v33  ;;  %v632_v45 = vadd.f32 %v631_v29, %v630_v34  ;;  %v724_v57 = vmul.f32 %v1481_v35, %v1481_v35 }
 0x113   :  { %v486_v38 = vpop.f32.mrf.mxu0  ;;  %v574_v39 = vpop.f32.mrf.mxu1 }
 0x114   :  { %v769_v39 = vsel %vm619_vm3, %v720_v17, 0.0  ;;  %v634_v52 = vadd.f32 %v633_v40, %v632_v45  ;;  %v777_v21 = vsel %vm619_vm3, %v724_v57, 0.0 }
 0x115   :  { %v1493_v43 = vpop.f32.mrf.mxu0  ;;  %v1495_v44 = vpop.f32.mrf.mxu1 }
 0x116   :  { %v636_v1 = vadd.f32 %v635_v49, %v634_v52  ;;  %v641_v26 = vsel %vm619_vm3, %v1493_v43, 0.0 }
 0x117   :  { %v489_v50 = vpop.f32.mrf.mxu0  ;;  %v577_v51 = vpop.f32.mrf.mxu1 }
 0x118   :  { %v723_v50 = vmul.f32 %v1477_v31, %v1477_v31  ;;  %v770_v51 = vadd.f32 %v769_v39, %v768_v42  ;;  %v638_v14 = vadd.f32 %v637_v56, %v636_v1 }
 0x119   :  { %v1510_v58 = vpop.f32.mrf.mxu0  ;;  %v1512_v61 = vpop.f32.mrf.mxu1 }
 0x11a   :  { %v772_v62 = vadd.f32 %v771_v48, %v770_v51  ;;  %v775_v6 = vsel %vm619_vm3, %v723_v50, 0.0  ;;  %v726_v29 = vmul.f32 %v1510_v58, %v1510_v58  ;;  %v643_v39 = vsel %vm619_vm3, %v1510_v58, 0.0 }
 0x11b   :  { %v494_v9 = vpop.f32.mrf.mxu0  ;;  %v582_v10 = vpop.f32.mrf.mxu1 }
 0x11c   :  { %v639_v9 = vsel %vm619_vm3, %v1481_v35, 0.0  ;;  %v725_v10 = vmul.f32 %v1493_v43, %v1493_v43  ;;  %v774_v13 = vadd.f32 %v773_v55, %v772_v62  ;;  %v781_v49 = vsel %vm619_vm3, %v726_v29, 0.0 }
 0x11d   :  { %v1524_v22 = vpop.f32.mrf.mxu0  ;;  %v1526_v25 = vpop.f32.mrf.mxu1  ;;  %v640_v33 = vadd.f32 %v639_v9, %v638_v14 }
 0x11e   :  { %v776_v30 = vadd.f32 %v775_v6, %v774_v13  ;;  %v727_v40 = vmul.f32 %v1524_v22, %v1524_v22  ;;  %v645_v50 = vsel %vm619_vm3, %v1524_v22, 0.0 }
 0x11f   :  { %v497_v37 = vpop.f32.mrf.mxu0  ;;  %v585_v38 = vpop.f32.mrf.mxu1  ;;  %v642_v42 = vadd.f32 %v641_v26, %v640_v33 }
 0x120   :  { %v779_v38 = vsel %vm619_vm3, %v725_v10, 0.0  ;;  %v778_v41 = vadd.f32 %v777_v21, %v776_v30  ;;  %v783_v56 = vsel %vm619_vm3, %v727_v40, 0.0 }
 0x121   :  { %v1538_v46 = vpop.f32.mrf.mxu0  ;;  %v1540_v47 = vpop.f32.mrf.mxu1 }
 0x122   :  { %v728_v51 = vmul.f32 %v1538_v46, %v1538_v46  ;;  %v780_v52 = vadd.f32 %v779_v38, %v778_v41  ;;  %v647_v57 = vsel %vm619_vm3, %v1538_v46, 0.0 }
 0x123   :  { %v502_v53 = vpop.f32.mrf.mxu0  ;;  %v590_v54 = vpop.f32.mrf.mxu1 }
 0x124   :  { %v644_v53 = vadd.f32 %v643_v39, %v642_v42  ;;  %v782_v1 = vadd.f32 %v781_v49, %v780_v52  ;;  %v785_v13 = vsel %vm619_vm3, %v728_v51, 0.0 }
 0x125   :  { %v1552_v2 = vpop.f32.mrf.mxu0  ;;  %v1554_v5 = vpop.f32.mrf.mxu1 }
 0x126   :  { %v729_v62 = vmul.f32 %v1552_v2, %v1552_v2  ;;  %v646_v6 = vadd.f32 %v645_v50, %v644_v53  ;;  %v649_v14 = vsel %vm619_vm3, %v1552_v2, 0.0 }
 0x127   :  { %v505_v17 = vpop.f32.mrf.mxu0  ;;  %v593_v18 = vpop.f32.mrf.mxu1 }
 0x128   :  { %v784_v18 = vadd.f32 %v783_v56, %v782_v1  ;;  %v648_v21 = vadd.f32 %v647_v57, %v646_v6  ;;  %v787_v30 = vsel %vm619_vm3, %v729_v62, 0.0 }
 0x129   :  { %v1566_v34 = vpop.f32.mrf.mxu0  ;;  %v1568_v37 = vpop.f32.mrf.mxu1 }
 0x12a   :  { %v730_v17 = vmul.f32 %v1566_v34, %v1566_v34  ;;  %v651_v33 = vsel %vm619_vm3, %v1566_v34, 0.0  ;;  %v786_v39 = vadd.f32 %v785_v13, %v784_v18  ;;  %v650_v40 = vadd.f32 %v649_v14, %v648_v21 }
 0x12b   :  { %v510_v45 = vpop.f32.mrf.mxu0  ;;  %v598_v48 = vpop.f32.mrf.mxu1 }
 0x12c   :  { %v789_v45 = vsel %vm619_vm3, %v730_v17, 0.0  ;;  %v788_v50 = vadd.f32 %v787_v30, %v786_v39  ;;  %v652_v51 = vadd.f32 %v651_v33, %v650_v40 }
 0x12d   :  { %v1580_v54 = vpop.f32.mrf.mxu0  ;;  %v1582_v55 = vpop.f32.mrf.mxu1 }
 0x12e   :  { %v731_v38 = vmul.f32 %v1580_v54, %v1580_v54  ;;  %v653_v48 = vsel %vm619_vm3, %v1580_v54, 0.0  ;;  %v790_v1 = vadd.f32 %v789_v45, %v788_v50 }
 0x12f   :  { %v513_v9 = vpop.f32.mrf.mxu0  ;;  %v601_v10 = vpop.f32.mrf.mxu1  ;;  %v654_v6 = vadd.f32 %v653_v48, %v652_v51 }
 0x130   :  { %v791_v56 = vsel %vm619_vm3, %v731_v38, 0.0 }
 0x131   :  { %v1594_v26 = vpop.f32.mrf.mxu0  ;;  %v1596_v29 = vpop.f32.mrf.mxu1  ;;  %v792_v17 = vadd.f32 %v791_v56, %v790_v1 }
 0x132   :  { %2092 = vst [vmem:[#allocation2_spill] sm:$0xff] %v1596_v29  ;;  %v732_v49 = vmul.f32 %v1594_v26, %v1594_v26  ;;  %v655_v57 = vsel %vm619_vm3, %v1594_v26, 0.0 }
 0x133   :  { %v518_v41 = vpop.f32.mrf.mxu0  ;;  %v606_v42 = vpop.f32.mrf.mxu1  ;;  %v656_v18 = vadd.f32 %v655_v57, %v654_v6  ;;  %v736_v57 = vmul.f32 %v1443_v60, %v1443_v60 }
 0x134   :  { %v793_v13 = vsel %vm619_vm3, %v732_v49, 0.0 }
 0x135   :  { %v1608_v52 = vpop.f32.mrf.mxu0  ;;  %v1610_v53 = vpop.f32.mrf.mxu1  ;;  %v794_v40 = vadd.f32 %v793_v13, %v792_v17  ;;  %v737_v17 = vmul.f32 %v1447_v0, %v1447_v0 }
 0x136   :  { %2093 = vst [vmem:[#allocation3_spill] sm:$0xff] %v1610_v53  ;;  %v733_v62 = vmul.f32 %v1608_v52, %v1608_v52  ;;  %v657_v14 = vsel %vm619_vm3, %v1608_v52, 0.0 }
 0x137   :  { %v521_v9 = vpop.f32.mrf.mxu0  ;;  %v609_v10 = vpop.f32.mrf.mxu1  ;;  %v658_v41 = vadd.f32 %v657_v14, %v656_v18  ;;  %v663_v14 = vsel %vm619_vm3, %v1443_v60, 0.0 }
 0x138   :  { %v795_v33 = vsel %vm619_vm3, %v733_v62, 0.0 }
 0x139   :  { %v1620_v21 = vpop.f32.mrf.mxu0  ;;  %v1622_v30 = vpop.f32.mrf.mxu1  ;;  %v796_v49 = vadd.f32 %v795_v33, %v794_v40  ;;  %v665_v40 = vsel %vm619_vm3, %v1447_v0, 0.0 }
 0x13a   :  { %2094 = vst [vmem:[#allocation4_spill] sm:$0xff] %v1622_v30  ;;  %v659_v38 = vsel %vm619_vm3, %v1620_v21, 0.0  ;;  %v734_v39 = vmul.f32 %v1620_v21, %v1620_v21 }
 0x13b   :  { %v526_v42 = vpop.f32.mrf.mxu0  ;;  %v614_v45 = vpop.f32.mrf.mxu1  ;;  %v660_v50 = vadd.f32 %v659_v38, %v658_v41  ;;  %v738_v41 = vmul.f32 %v1451_v4, %v1451_v4 }
 0x13c   :  { %v797_v48 = vsel %vm619_vm3, %v734_v39, 0.0  ;;  %v801_v39 = vsel %vm619_vm3, %v736_v57, 0.0 }
 0x13d   :  { %v1630_v51 = vpop.f32.mrf.mxu0  ;;  %v1632_v56 = vpop.f32.mrf.mxu1  ;;  %v798_v6 = vadd.f32 %v797_v48, %v796_v49  ;;  %v803_v48 = vsel %vm619_vm3, %v737_v17, 0.0  ;;  %v667_v49 = vsel %vm619_vm3, %v1451_v4, 0.0  ;;  %v805_v57 = vsel %vm619_vm3, %v738_v41, 0.0 }
 0x13e   :  { %2095 = vst [vmem:[#allocation5_spill] sm:$0xff] %v1632_v56  ;;  %v661_v62 = vsel %vm619_vm3, %v1630_v51, 0.0  ;;  %v735_v1 = vmul.f32 %v1630_v51, %v1630_v51  ;;  %v671_v17 = vsel %vm619_vm3, %v1459_v12, 0.0  ;;  %v742_v41 = vmul.f32 %v1467_v20, %v1467_v20 }
 0x13f   :  { %v662_v9 = vadd.f32 %v661_v62, %v660_v50  ;;  %v529_v10 = vpop.f32.mrf.mxu0  ;;  %v617_v13 = vpop.f32.mrf.mxu1  ;;  %v739_v50 = vmul.f32 %v1455_v8, %v1455_v8 }
 0x140   :  { %v799_v18 = vsel %vm619_vm3, %v735_v1, 0.0 }
 0x141   :  { %v664_v33 = vadd.f32 %v663_v14, %v662_v9  ;;  %v800_v38 = vadd.f32 %v799_v18, %v798_v6  ;;  %v669_v6 = vsel %vm619_vm3, %v1455_v8, 0.0  ;;  %v740_v9 = vmul.f32 %v1459_v12, %v1459_v12 }
 0x142   :  { %v807_v14 = vsel %vm619_vm3, %v739_v50, 0.0  ;;  %v741_v18 = vmul.f32 %v1463_v16, %v1463_v16  ;;  %v743_v50 = vmul.f32 %v1471_v24, %v1471_v24 }
 0x143   :  { %v666_v42 = vadd.f32 %v665_v40, %v664_v33  ;;  %v802_v45 = vadd.f32 %v801_v39, %v800_v38  ;;  %v809_v39 = vsel %vm619_vm3, %v740_v9, 0.0  ;;  %v673_v40 = vsel %vm619_vm3, %v1463_v16, 0.0 }
 0x144   :  { %v744_v9 = vmul.f32 %v1475_v28, %v1475_v28 }
 0x145   :  { %v668_v62 = vadd.f32 %v667_v49, %v666_v42  ;;  %v804_v1 = vadd.f32 %v803_v48, %v802_v45  ;;  %v811_v48 = vsel %vm619_vm3, %v741_v18, 0.0  ;;  %v675_v49 = vsel %vm619_vm3, %v1467_v20, 0.0 }
 0x146   :  { %v745_v18 = vmul.f32 %v1479_v32, %v1479_v32 }
 0x147   :  { %v670_v10 = vadd.f32 %v669_v6, %v668_v62  ;;  %v806_v13 = vadd.f32 %v805_v57, %v804_v1  ;;  %v813_v57 = vsel %vm619_vm3, %v742_v41, 0.0  ;;  %v677_v6 = vsel %vm619_vm3, %v1471_v24, 0.0 }
 0x148   :  { %v746_v41 = vmul.f32 %v1483_v36, %v1483_v36 }
 0x149   :  { %v672_v33 = vadd.f32 %v671_v17, %v670_v10  ;;  %v808_v38 = vadd.f32 %v807_v14, %v806_v13  ;;  %v815_v14 = vsel %vm619_vm3, %v743_v50, 0.0  ;;  %v679_v17 = vsel %vm619_vm3, %v1475_v28, 0.0 }
 0x14a   :  { %v747_v50 = vmul.f32 %v1495_v44, %v1495_v44 }
 0x14b   :  { %v674_v42 = vadd.f32 %v673_v40, %v672_v33  ;;  %v810_v45 = vadd.f32 %v809_v39, %v808_v38  ;;  %v817_v39 = vsel %vm619_vm3, %v744_v9, 0.0  ;;  %v681_v40 = vsel %vm619_vm3, %v1479_v32, 0.0 }
 0x14c   :  { %v748_v9 = vmul.f32 %v1512_v61, %v1512_v61 }
 0x14d   :  { %v812_v62 = vadd.f32 %v811_v48, %v810_v45  ;;  %v676_v1 = vadd.f32 %v675_v49, %v674_v42  ;;  %v819_v48 = vsel %vm619_vm3, %v745_v18, 0.0  ;;  %v683_v49 = vsel %vm619_vm3, %v1483_v36, 0.0 }
 0x14e   :  { %v749_v18 = vmul.f32 %v1526_v25, %v1526_v25 }
 0x14f   :  { %v678_v10 = vadd.f32 %v677_v6, %v676_v1  ;;  %v814_v13 = vadd.f32 %v813_v57, %v812_v62  ;;  %v821_v57 = vsel %vm619_vm3, %v746_v41, 0.0  ;;  %v685_v6 = vsel %vm619_vm3, %v1495_v44, 0.0 }
 0x150   :  { %v750_v41 = vmul.f32 %v1540_v47, %v1540_v47 }
 0x151   :  { %v680_v33 = vadd.f32 %v679_v17, %v678_v10  ;;  %v816_v38 = vadd.f32 %v815_v14, %v814_v13  ;;  %v823_v14 = vsel %vm619_vm3, %v747_v50, 0.0  ;;  %v687_v17 = vsel %vm619_vm3, %v1512_v61, 0.0 }
 0x152   :  { %v751_v50 = vmul.f32 %v1554_v5, %v1554_v5 }
 0x153   :  { %v682_v42 = vadd.f32 %v681_v40, %v680_v33  ;;  %v818_v45 = vadd.f32 %v817_v39, %v816_v38  ;;  %v825_v39 = vsel %vm619_vm3, %v748_v9, 0.0  ;;  %v689_v40 = vsel %vm619_vm3, %v1526_v25, 0.0 }
 0x154   :  { %v752_v9 = vmul.f32 %v1568_v37, %v1568_v37 }
 0x155   :  { %v684_v62 = vadd.f32 %v683_v49, %v682_v42  ;;  %v820_v1 = vadd.f32 %v819_v48, %v818_v45  ;;  %v827_v48 = vsel %vm619_vm3, %v749_v18, 0.0  ;;  %v691_v49 = vsel %vm619_vm3, %v1540_v47, 0.0 }
 0x156   :  { %v753_v18 = vmul.f32 %v1582_v55, %v1582_v55 }
 0x157   :  { %v686_v10 = vadd.f32 %v685_v6, %v684_v62  ;;  %v822_v13 = vadd.f32 %v821_v57, %v820_v1  ;;  %v829_v57 = vsel %vm619_vm3, %v750_v41, 0.0  ;;  %v693_v6 = vsel %vm619_vm3, %v1554_v5, 0.0 }
 0x158   :  { %v754_v41 = vmul.f32 %v1596_v29, %v1596_v29 }
 0x159   :  { %v688_v33 = vadd.f32 %v687_v17, %v686_v10  ;;  %v824_v38 = vadd.f32 %v823_v14, %v822_v13  ;;  %v831_v14 = vsel %vm619_vm3, %v751_v50, 0.0  ;;  %v695_v17 = vsel %vm619_vm3, %v1568_v37, 0.0 }
 0x15a   :  { %v755_v50 = vmul.f32 %v1610_v53, %v1610_v53 }
 0x15b   :  { %v826_v42 = vadd.f32 %v825_v39, %v824_v38  ;;  %v690_v45 = vadd.f32 %v689_v40, %v688_v33  ;;  %v833_v39 = vsel %vm619_vm3, %v752_v9, 0.0  ;;  %v697_v40 = vsel %vm619_vm3, %v1582_v55, 0.0 }
 0x15c   :  { %v756_v9 = vmul.f32 %v1622_v30, %v1622_v30 }
 0x15d   :  { %v828_v62 = vadd.f32 %v827_v48, %v826_v42  ;;  %v692_v1 = vadd.f32 %v691_v49, %v690_v45  ;;  %v835_v48 = vsel %vm619_vm3, %v753_v18, 0.0  ;;  %v699_v49 = vsel %vm619_vm3, %v1596_v29, 0.0 }
 0x15e   :  { %v757_v18 = vmul.f32 %v1632_v56, %v1632_v56 }
 0x15f   :  { %v830_v10 = vadd.f32 %v829_v57, %v828_v62  ;;  %v694_v13 = vadd.f32 %v693_v6, %v692_v1  ;;  %v837_v57 = vsel %vm619_vm3, %v754_v41, 0.0  ;;  %v701_v6 = vsel %vm619_vm3, %v1610_v53, 0.0 }
 0x161   :  { %v832_v33 = vadd.f32 %v831_v14, %v830_v10  ;;  %v696_v38 = vadd.f32 %v695_v17, %v694_v13  ;;  %v839_v14 = vsel %vm619_vm3, %v755_v50, 0.0  ;;  %v703_v17 = vsel %vm619_vm3, %v1622_v30, 0.0 }
 0x163   :  { %v834_v42 = vadd.f32 %v833_v39, %v832_v33  ;;  %v698_v45 = vadd.f32 %v697_v40, %v696_v38  ;;  %v841_v39 = vsel %vm619_vm3, %v756_v9, 0.0  ;;  %v705_v40 = vsel %vm619_vm3, %v1632_v56, 0.0 }
 0x165   :  { %v836_v62 = vadd.f32 %v835_v48, %v834_v42  ;;  %v700_v1 = vadd.f32 %v699_v49, %v698_v45  ;;  %v843_v45 = vsel %vm619_vm3, %v757_v18, 0.0  ;;  %v863_v18 = vlaneseq }
 0x167   :  { %v838_v10 = vadd.f32 %v837_v57, %v836_v62  ;;  %v702_v13 = vadd.f32 %v701_v6, %v700_v1 }
 0x169   :  { %v840_v33 = vadd.f32 %v839_v14, %v838_v10  ;;  %v704_v38 = vadd.f32 %v703_v17, %v702_v13 }
 0x16b   :  { %v842_v41 = vadd.f32 %v841_v39, %v840_v33  ;;  %v706_v42 = vadd.f32 %v705_v40, %v704_v38  ;;  %v864_v40 = vshrl.u32 %v863_v18, 7 }
 0x16d   :  { %v707_v48 = vrot.slane %v706_v42, 4  ;;  %v844_v49 = vadd.f32 %v843_v45, %v842_v41  ;;  %v855_v41 = vld [vmem:[%s2085_s2] sm:$0x1] }
 0x16f   :  { %v708_v50 = vadd.f32 %v707_v48, %v706_v42  ;;  %v845_v62 = vrot.slane %v844_v49, 4  ;;  %v865_v42 = vsub.s32 0, %v864_v40 }
 0x171   :  { %v709_v1 = vrot.slane %v708_v50, 2  ;;  %v846_v57 = vadd.f32 %v845_v62, %v844_v49 }
 0x173   :  { %v710_v6 = vadd.f32 %v709_v1, %v708_v50  ;;  %v847_v30 = vrot.slane %v846_v57, 2 }
 0x175   :  { %v711_v53 = vrot.slane %v710_v6, 1  ;;  %v848_v10 = vadd.f32 %v847_v30, %v846_v57 }
 0x177   :  { %v712_v13 = vadd.f32 %v711_v53, %v710_v6  ;;  %v849_v14 = vrot.slane %v848_v10, 1  ;;  %v859_v53 = vld [vmem:[%s2086_s3] sm:$0x1] }
 0x179   :  { %v713_v9 = vmul.f32 0.00295858, %v712_v13  ;;  %v850_v17 = vadd.f32 %v849_v14, %v848_v10 }
 0x17b   :  { %v851_v29 = vmul.f32 0.00295858, %v850_v17  ;;  %v852_v56 = vmul.f32 %v713_v9, %v713_v9 }
 0x17d   :  { %v853_v33 = vsub.f32 %v851_v29, %v852_v56 }
 0x17f   :  { %v854_v38 = vmax.f32 %v853_v33, 0.0 }
 0x181   :  { %v856_v39 = vadd.f32 1e-05, %v854_v38 }
 0x183   :  { %1228 = vrsqrt.f32 %v856_v39 }
 0x190   :  { %v1229_v45 = vpop.eup %1228 }
 0x191   :  { %v858_v48 = vmul.f32 %v1229_v45, %v855_v41 }
 0x193   :  { %v860_v30 = vmul.f32 %v858_v48, %v713_v9  ;;  %v866_v49 = vrot.slane %v858_v48, %v865_v42 }
 0x195   :  { %v861_v50 = vsub.f32 %v859_v53, %v860_v30  ;;  %v868_v29 = vmul.f32 %v866_v49, %v1441_v59  ;;  %v869_v56 = vmul.f32 %v866_v49, %v1445_v63  ;;  %v870_v62 = vmul.f32 %v866_v49, %v1449_v3 }
 0x196   :  { %v871_v1 = vmul.f32 %v866_v49, %v1453_v7  ;;  %v872_v57 = vmul.f32 %v866_v49, %v1457_v11  ;;  %v873_v6 = vmul.f32 %v866_v49, %v1461_v15  ;;  %v874_v10 = vmul.f32 %v866_v49, %v1465_v19 }
 0x197   :  { %v875_v13 = vmul.f32 %v866_v49, %v1469_v23  ;;  %v876_v14 = vmul.f32 %v866_v49, %v1473_v27  ;;  %v877_v9 = vmul.f32 %v866_v49, %v1477_v31  ;;  %v878_v59 = vmul.f32 %v866_v49, %v1481_v35 }
 0x198   :  { %v879_v63 = vmul.f32 %v866_v49, %v1493_v43  ;;  %v880_v3 = vmul.f32 %v866_v49, %v1510_v58  ;;  %v881_v7 = vmul.f32 %v866_v49, %v1524_v22  ;;  %v882_v11 = vmul.f32 %v866_v49, %v1538_v46 }
 0x199   :  { %v883_v15 = vmul.f32 %v866_v49, %v1552_v2  ;;  %v884_v19 = vmul.f32 %v866_v49, %v1566_v34  ;;  %v885_v23 = vmul.f32 %v866_v49, %v1580_v54  ;;  %v886_v27 = vmul.f32 %v866_v49, %v1594_v26 }
 0x19a   :  { %v887_v31 = vmul.f32 %v866_v49, %v1608_v52  ;;  %v888_v35 = vmul.f32 %v866_v49, %v1620_v21  ;;  %v889_v43 = vmul.f32 %v866_v49, %v1630_v51  ;;  %v890_v58 = vmul.f32 %v866_v49, %v1443_v60 }
 0x19b   :  { %v891_v22 = vmul.f32 %v866_v49, %v1447_v0  ;;  %v892_v46 = vmul.f32 %v866_v49, %v1451_v4  ;;  %v893_v2 = vmul.f32 %v866_v49, %v1455_v8  ;;  %v894_v34 = vmul.f32 %v866_v49, %v1459_v12 }
 0x19c   :  { %v895_v54 = vmul.f32 %v866_v49, %v1463_v16  ;;  %v896_v26 = vmul.f32 %v866_v49, %v1467_v20  ;;  %v897_v52 = vmul.f32 %v866_v49, %v1471_v24  ;;  %v898_v21 = vmul.f32 %v866_v49, %v1475_v28  ;;  %v2096_v28 = vld [vmem:[#allocation2_spill] sm:$0xff] }
 0x19d   :  { %v899_v51 = vmul.f32 %v866_v49, %v1479_v32  ;;  %v900_v60 = vmul.f32 %v866_v49, %v1483_v36  ;;  %v901_v0 = vmul.f32 %v866_v49, %v1495_v44  ;;  %v902_v4 = vmul.f32 %v866_v49, %v1512_v61  ;;  %v2097_v32 = vld [vmem:[#allocation3_spill] sm:$0xff]  ;;  %v2098_v36 = vld [vmem:[#allocation4_spill] sm:$0xff]  ;;  %v2099_v44 = vld [vmem:[#allocation5_spill] sm:$0xff] }
 0x19e   :  { %v903_v8 = vmul.f32 %v866_v49, %v1526_v25  ;;  %v904_v12 = vmul.f32 %v866_v49, %v1540_v47  ;;  %v905_v16 = vmul.f32 %v866_v49, %v1554_v5  ;;  %v906_v20 = vmul.f32 %v866_v49, %v1568_v37 }
 0x19f   :  { %v907_v24 = vmul.f32 %v866_v49, %v1582_v55  ;;  %v916_v17 = vrot.slane %v861_v50, %v865_v42  ;;  %v908_v33 = vmul.f32 %v866_v49, %v2096_v28  ;;  %v909_v38 = vmul.f32 %v866_v49, %v2097_v32 }
 0x1a0   :  { %v910_v39 = vmul.f32 %v866_v49, %v2098_v36  ;;  %v911_v18 = vmul.f32 %v866_v49, %v2099_v44 }
 0x1a1   :  { %v918_v61 = vadd.f32 %v916_v17, %v868_v29  ;;  %v919_v40 = vadd.f32 %v916_v17, %v869_v56  ;;  %v920_v25 = vadd.f32 %v916_v17, %v870_v62  ;;  %v921_v41 = vadd.f32 %v916_v17, %v871_v1 }
 0x1a2   :  { %v922_v47 = vadd.f32 %v916_v17, %v872_v57  ;;  %v923_v45 = vadd.f32 %v916_v17, %v873_v6  ;;  %v924_v5 = vadd.f32 %v916_v17, %v874_v10  ;;  %v925_v48 = vadd.f32 %v916_v17, %v875_v13 }
 0x1a3   :  { %v1799_v37 = vadd.f32 %v916_v17, %v876_v14  ;;  %v1801_v55 = vadd.f32 %v916_v17, %v877_v9  ;;  %v1803_v42 = vadd.f32 %v916_v17, %v878_v59  ;;  %v1805_v53 = vadd.f32 %v916_v17, %v879_v63 }
 0x1a4   :  { %v1807_v30 = vadd.f32 %v916_v17, %v880_v3  ;;  %v1809_v50 = vadd.f32 %v916_v17, %v881_v7  ;;  %v1811_v49 = vadd.f32 %v916_v17, %v882_v11  ;;  %v1813_v29 = vadd.f32 %v916_v17, %v883_v15 }
 0x1a5   :  { %v1815_v56 = vadd.f32 %v916_v17, %v884_v19  ;;  %v1817_v62 = vadd.f32 %v916_v17, %v885_v23  ;;  %v1819_v1 = vadd.f32 %v916_v17, %v886_v27  ;;  %v1821_v57 = vadd.f32 %v916_v17, %v887_v31 }
 0x1a6   :  { %v1823_v6 = vadd.f32 %v916_v17, %v888_v35  ;;  %v1825_v10 = vadd.f32 %v916_v17, %v889_v43  ;;  %v1827_v13 = vadd.f32 %v916_v17, %v890_v58  ;;  %v1829_v14 = vadd.f32 %v916_v17, %v891_v22 }
 0x1a7   :  { %v1831_v9 = vadd.f32 %v916_v17, %v892_v46  ;;  %v1833_v59 = vadd.f32 %v916_v17, %v893_v2  ;;  %v1835_v63 = vadd.f32 %v916_v17, %v894_v34  ;;  %v1837_v3 = vadd.f32 %v916_v17, %v895_v54 }
 0x1a8   :  { %v1839_v7 = vadd.f32 %v916_v17, %v896_v26  ;;  %v1841_v11 = vadd.f32 %v916_v17, %v897_v52  ;;  %v1843_v15 = vadd.f32 %v916_v17, %v898_v21  ;;  %v1845_v19 = vadd.f32 %v916_v17, %v899_v51 }
 0x1a9   :  { %v1847_v23 = vadd.f32 %v916_v17, %v900_v60  ;;  %v1849_v27 = vadd.f32 %v916_v17, %v901_v0  ;;  %v1851_v31 = vadd.f32 %v916_v17, %v902_v4  ;;  %v1853_v35 = vadd.f32 %v916_v17, %v903_v8 }
 0x1aa   :  { %v1855_v43 = vadd.f32 %v916_v17, %v904_v12  ;;  %v1857_v58 = vadd.f32 %v916_v17, %v905_v16  ;;  %v1859_v22 = vadd.f32 %v916_v17, %v906_v20  ;;  %v1861_v46 = vadd.f32 %v916_v17, %v907_v24 }
 0x1ab   :  { %v1863_v2 = vadd.f32 %v916_v17, %v908_v33  ;;  %v1865_v34 = vadd.f32 %v916_v17, %v909_v38  ;;  %v1867_v54 = vadd.f32 %v916_v17, %v910_v39  ;;  %v1869_v26 = vadd.f32 %v916_v17, %v911_v18 }
 0x1ac   :  { %v962_v52 = vmax.f32 %v918_v61, 0.0  ;;  %v963_v21 = vmax.f32 %v919_v40, 0.0  ;;  %v964_v51 = vmax.f32 %v920_v25, 0.0  ;;  %v965_v60 = vmax.f32 %v921_v41, 0.0 }
 0x1ad   :  { %v966_v0 = vmax.f32 %v922_v47, 0.0  ;;  %v967_v4 = vmax.f32 %v923_v45, 0.0  ;;  %v968_v8 = vmax.f32 %v924_v5, 0.0  ;;  %v969_v12 = vmax.f32 %v925_v48, 0.0 }
 0x1ae   :  { %v970_v16 = vmax.f32 %v1799_v37, 0.0  ;;  %v971_v20 = vmax.f32 %v1801_v55, 0.0  ;;  %v972_v24 = vmax.f32 %v1803_v42, 0.0  ;;  %v973_v28 = vmax.f32 %v1805_v53, 0.0  ;;  %1006 = vst.msk [vmem:[%s2087_s4] sm:$0xff] %vm619_vm3, %v962_v52  ;;  %1007 = vst.msk [vmem:[%s2087_s4 + $0x8] sm:$0xff] %vm619_vm3, %v963_v21 }
 0x1af   :  { %1008 = vst.msk [vmem:[%s2087_s4 + $0x10] sm:$0xff] %vm619_vm3, %v964_v51  ;;  %1009 = vst.msk [vmem:[%s2087_s4 + $0x18] sm:$0xff] %vm619_vm3, %v965_v60  ;;  %v974_v17 = vmax.f32 %v1807_v30, 0.0  ;;  %v975_v33 = vmax.f32 %v1809_v50, 0.0  ;;  %v976_v32 = vmax.f32 %v1811_v49, 0.0  ;;  %v977_v38 = vmax.f32 %v1813_v29, 0.0 }
 0x1b0   :  { %1010 = vst.msk [vmem:[%s2087_s4 + $0x20] sm:$0xff] %vm619_vm3, %v966_v0  ;;  %1011 = vst.msk [vmem:[%s2087_s4 + $0x28] sm:$0xff] %vm619_vm3, %v967_v4  ;;  %v978_v36 = vmax.f32 %v1815_v56, 0.0  ;;  %v979_v39 = vmax.f32 %v1817_v62, 0.0  ;;  %v980_v44 = vmax.f32 %v1819_v1, 0.0  ;;  %v981_v18 = vmax.f32 %v1821_v57, 0.0 }
 0x1b1   :  { %1012 = vst.msk [vmem:[%s2087_s4 + $0x30] sm:$0xff] %vm619_vm3, %v968_v8  ;;  %1013 = vst.msk [vmem:[%s2087_s4 + $0x38] sm:$0xff] %vm619_vm3, %v969_v12  ;;  %v982_v61 = vmax.f32 %v1823_v6, 0.0  ;;  %v983_v40 = vmax.f32 %v1825_v10, 0.0  ;;  %v984_v25 = vmax.f32 %v1827_v13, 0.0  ;;  %v985_v41 = vmax.f32 %v1829_v14, 0.0 }
 0x1b2   :  { %1014 = vst.msk [vmem:[%s2087_s4 + $0x40] sm:$0xff] %vm619_vm3, %v970_v16  ;;  %1015 = vst.msk [vmem:[%s2087_s4 + $0x48] sm:$0xff] %vm619_vm3, %v971_v20  ;;  %v986_v47 = vmax.f32 %v1831_v9, 0.0  ;;  %v987_v45 = vmax.f32 %v1833_v59, 0.0  ;;  %v988_v5 = vmax.f32 %v1835_v63, 0.0  ;;  %v989_v48 = vmax.f32 %v1837_v3, 0.0 }
 0x1b3   :  { %1016 = vst.msk [vmem:[%s2087_s4 + $0x50] sm:$0xff] %vm619_vm3, %v972_v24  ;;  %1017 = vst.msk [vmem:[%s2087_s4 + $0x58] sm:$0xff] %vm619_vm3, %v973_v28  ;;  %v990_v37 = vmax.f32 %v1839_v7, 0.0  ;;  %v991_v55 = vmax.f32 %v1841_v11, 0.0  ;;  %v992_v42 = vmax.f32 %v1843_v15, 0.0  ;;  %v993_v53 = vmax.f32 %v1845_v19, 0.0 }
 0x1b4   :  { %1018 = vst.msk [vmem:[%s2087_s4 + $0x60] sm:$0xff] %vm619_vm3, %v974_v17  ;;  %1019 = vst.msk [vmem:[%s2087_s4 + $0x68] sm:$0xff] %vm619_vm3, %v975_v33  ;;  %v994_v30 = vmax.f32 %v1847_v23, 0.0  ;;  %v995_v50 = vmax.f32 %v1849_v27, 0.0  ;;  %v996_v49 = vmax.f32 %v1851_v31, 0.0  ;;  %v997_v29 = vmax.f32 %v1853_v35, 0.0 }
 0x1b5   :  { %1020 = vst.msk [vmem:[%s2087_s4 + $0x70] sm:$0xff] %vm619_vm3, %v976_v32  ;;  %1021 = vst.msk [vmem:[%s2087_s4 + $0x78] sm:$0xff] %vm619_vm3, %v977_v38  ;;  %v998_v56 = vmax.f32 %v1855_v43, 0.0  ;;  %v999_v62 = vmax.f32 %v1857_v58, 0.0  ;;  %v1000_v1 = vmax.f32 %v1859_v22, 0.0  ;;  %v1001_v57 = vmax.f32 %v1861_v46, 0.0 }
 0x1b6   :  { %1022 = vst.msk [vmem:[%s2087_s4 + $0x80] sm:$0xff] %vm619_vm3, %v978_v36  ;;  %1023 = vst.msk [vmem:[%s2087_s4 + $0x88] sm:$0xff] %vm619_vm3, %v979_v39  ;;  %v1002_v6 = vmax.f32 %v1863_v2, 0.0  ;;  %v1003_v10 = vmax.f32 %v1865_v34, 0.0  ;;  %v1004_v13 = vmax.f32 %v1867_v54, 0.0  ;;  %v1005_v14 = vmax.f32 %v1869_v26, 0.0 }
 0x1b7   :  { %1024 = vst.msk [vmem:[%s2087_s4 + $0x90] sm:$0xff] %vm619_vm3, %v980_v44  ;;  %1025 = vst.msk [vmem:[%s2087_s4 + $0x98] sm:$0xff] %vm619_vm3, %v981_v18 }
 0x1b8   :  { %1026 = vst.msk [vmem:[%s2087_s4 + $0xa0] sm:$0xff] %vm619_vm3, %v982_v61  ;;  %1027 = vst.msk [vmem:[%s2087_s4 + $0xa8] sm:$0xff] %vm619_vm3, %v983_v40 }
 0x1b9   :  { %1028 = vst.msk [vmem:[%s2087_s4 + $0xb0] sm:$0xff] %vm619_vm3, %v984_v25  ;;  %1029 = vst.msk [vmem:[%s2087_s4 + $0xb8] sm:$0xff] %vm619_vm3, %v985_v41 }
 0x1ba   :  { %1030 = vst.msk [vmem:[%s2087_s4 + $0xc0] sm:$0xff] %vm619_vm3, %v986_v47  ;;  %1031 = vst.msk [vmem:[%s2087_s4 + $0xc8] sm:$0xff] %vm619_vm3, %v987_v45 }
 0x1bb   :  { %1032 = vst.msk [vmem:[%s2087_s4 + $0xd0] sm:$0xff] %vm619_vm3, %v988_v5  ;;  %1033 = vst.msk [vmem:[%s2087_s4 + $0xd8] sm:$0xff] %vm619_vm3, %v989_v48 }
 0x1bc   :  { %1034 = vst.msk [vmem:[%s2087_s4 + $0xe0] sm:$0xff] %vm619_vm3, %v990_v37  ;;  %1035 = vst.msk [vmem:[%s2087_s4 + $0xe8] sm:$0xff] %vm619_vm3, %v991_v55 }
 0x1bd   :  { %1036 = vst.msk [vmem:[%s2087_s4 + $0xf0] sm:$0xff] %vm619_vm3, %v992_v42  ;;  %1037 = vst.msk [vmem:[%s2087_s4 + $0xf8] sm:$0xff] %vm619_vm3, %v993_v53 }
 0x1be   :  { %1038 = vst.msk [vmem:[%s2087_s4 + $0x100] sm:$0xff] %vm619_vm3, %v994_v30  ;;  %1039 = vst.msk [vmem:[%s2087_s4 + $0x108] sm:$0xff] %vm619_vm3, %v995_v50 }
 0x1bf   :  { %1040 = vst.msk [vmem:[%s2087_s4 + $0x110] sm:$0xff] %vm619_vm3, %v996_v49  ;;  %1041 = vst.msk [vmem:[%s2087_s4 + $0x118] sm:$0xff] %vm619_vm3, %v997_v29 }
 0x1c0   :  { %1042 = vst.msk [vmem:[%s2087_s4 + $0x120] sm:$0xff] %vm619_vm3, %v998_v56  ;;  %1043 = vst.msk [vmem:[%s2087_s4 + $0x128] sm:$0xff] %vm619_vm3, %v999_v62 }
 0x1c1   :  { %1044 = vst.msk [vmem:[%s2087_s4 + $0x130] sm:$0xff] %vm619_vm3, %v1000_v1  ;;  %1045 = vst.msk [vmem:[%s2087_s4 + $0x138] sm:$0xff] %vm619_vm3, %v1001_v57 }
 0x1c2   :  { %1046 = vst.msk [vmem:[%s2087_s4 + $0x140] sm:$0xff] %vm619_vm3, %v1002_v6  ;;  %1047 = vst.msk [vmem:[%s2087_s4 + $0x148] sm:$0xff] %vm619_vm3, %v1003_v10 }
 0x1c3   :  { %1048 = vst.msk [vmem:[%s2087_s4 + $0x150] sm:$0xff] %vm619_vm3, %v1004_v13  ;;  %1049 = vst.msk [vmem:[%s2087_s4 + $0x158] sm:$0xff] %vm619_vm3, %v1005_v14 }

// kernel: resnet_forward.11
= control target key start
LH: loop header
LB: loop body
LE: loop exit
PB: predicated region body
PF: predicated region fallthrough
CT: control target
= control target key end

     0   :  { %vm169_vm0 = vcmask 523264   ;;  %s544_s0 = inlined_call_operand.vmem [shape: f32[9,72,64], index: 0, kind: input, shape index: {}]   ;;  %s545_s1 = inlined_call_operand.vmem [shape: f32[72,64], index: 1, kind: output, shape index: {}]  }
   0x1   :  { %v8_v0 = vld [vmem:[%s544_s0] sm:$0xff]  ;;  %v183_v1 = vld [vmem:[%s544_s0 + $0x48] sm:$0xff]  ;;  %v192_v2 = vld [vmem:[%s544_s0 + $0x90] sm:$0xff] }
   0x2   :  { %v27_v3 = vmax.f32 %v8_v0, %v183_v1  ;;  %v201_v4 = vld [vmem:[%s544_s0 + $0xd8] sm:$0xff]  ;;  %v9_v6 = vld [vmem:[%s544_s0 + $0x8] sm:$0xff]  ;;  %v184_v7 = vld [vmem:[%s544_s0 + $0x50] sm:$0xff] }
   0x3   :  { %v193_v8 = vld [vmem:[%s544_s0 + $0x98] sm:$0xff]  ;;  %v210_v9 = vld [vmem:[%s544_s0 + $0x120] sm:$0xff]  ;;  %v28_v10 = vmax.f32 %v9_v6, %v184_v7  ;;  %v219_v12 = vld [vmem:[%s544_s0 + $0x168] sm:$0xff] }
   0x4   :  { %v46_v5 = vmax.f32 %v27_v3, %v192_v2  ;;  %v202_v13 = vld [vmem:[%s544_s0 + $0xe0] sm:$0xff]  ;;  %v10_v15 = vld [vmem:[%s544_s0 + $0x10] sm:$0xff]  ;;  %v185_v16 = vld [vmem:[%s544_s0 + $0x58] sm:$0xff] }
   0x5   :  { %v47_v14 = vmax.f32 %v28_v10, %v193_v8  ;;  %v194_v17 = vld [vmem:[%s544_s0 + $0xa0] sm:$0xff]  ;;  %v211_v19 = vld [vmem:[%s544_s0 + $0x128] sm:$0xff]  ;;  %v29_v20 = vmax.f32 %v10_v15, %v185_v16  ;;  %v228_v21 = vld [vmem:[%s544_s0 + $0x1b0] sm:$0xff] }
   0x6   :  { %v65_v11 = vmax.f32 %v46_v5, %v201_v4  ;;  %v220_v23 = vld [vmem:[%s544_s0 + $0x170] sm:$0xff]  ;;  %v203_v24 = vld [vmem:[%s544_s0 + $0xe8] sm:$0xff]  ;;  %v11_v27 = vld [vmem:[%s544_s0 + $0x18] sm:$0xff] }
   0x7   :  { %v66_v22 = vmax.f32 %v47_v14, %v202_v13  ;;  %v48_v26 = vmax.f32 %v29_v20, %v194_v17  ;;  %v186_v28 = vld [vmem:[%s544_s0 + $0x60] sm:$0xff]  ;;  %v195_v29 = vld [vmem:[%s544_s0 + $0xa8] sm:$0xff]  ;;  %v237_v30 = vld [vmem:[%s544_s0 + $0x1f8] sm:$0xff] }
   0x8   :  { %v84_v18 = vmax.f32 %v65_v11, %v210_v9  ;;  %v246_v31 = vld [vmem:[%s544_s0 + $0x240] sm:$0xff]  ;;  %v212_v33 = vld [vmem:[%s544_s0 + $0x130] sm:$0xff]  ;;  %v30_v34 = vmax.f32 %v11_v27, %v186_v28  ;;  %v229_v36 = vld [vmem:[%s544_s0 + $0x1b8] sm:$0xff] }
   0x9   :  { %v85_v32 = vmax.f32 %v66_v22, %v211_v19  ;;  %v67_v37 = vmax.f32 %v48_v26, %v203_v24  ;;  %v221_v38 = vld [vmem:[%s544_s0 + $0x178] sm:$0xff]  ;;  %v204_v39 = vld [vmem:[%s544_s0 + $0xf0] sm:$0xff]  ;;  %v12_v42 = vld [vmem:[%s544_s0 + $0x20] sm:$0xff] }
   0xa   :  { %v103_v25 = vmax.f32 %v84_v18, %v219_v12  ;;  %v49_v41 = vmax.f32 %v30_v34, %v195_v29  ;;  %v187_v43 = vld [vmem:[%s544_s0 + $0x68] sm:$0xff]  ;;  %v196_v44 = vld [vmem:[%s544_s0 + $0xb0] sm:$0xff]  ;;  %v238_v46 = vld [vmem:[%s544_s0 + $0x200] sm:$0xff] }
   0xb   :  { %v104_v40 = vmax.f32 %v85_v32, %v220_v23  ;;  %v247_v47 = vld [vmem:[%s544_s0 + $0x248] sm:$0xff]  ;;  %v86_v48 = vmax.f32 %v67_v37, %v212_v33  ;;  %v213_v49 = vld [vmem:[%s544_s0 + $0x138] sm:$0xff]  ;;  %v31_v50 = vmax.f32 %v12_v42, %v187_v43  ;;  %v230_v52 = vld [vmem:[%s544_s0 + $0x1c0] sm:$0xff] }
   0xc   :  { %v122_v35 = vmax.f32 %v103_v25, %v228_v21  ;;  %v68_v53 = vmax.f32 %v49_v41, %v204_v39  ;;  %v222_v54 = vld [vmem:[%s544_s0 + $0x180] sm:$0xff]  ;;  %v205_v55 = vld [vmem:[%s544_s0 + $0xf8] sm:$0xff]  ;;  %v13_v59 = vld [vmem:[%s544_s0 + $0x28] sm:$0xff] }
   0xd   :  { %v123_v51 = vmax.f32 %v104_v40, %v229_v36  ;;  %v105_v57 = vmax.f32 %v86_v48, %v221_v38  ;;  %v50_v58 = vmax.f32 %v31_v50, %v196_v44  ;;  %v188_v60 = vld [vmem:[%s544_s0 + $0x70] sm:$0xff]  ;;  %v197_v61 = vld [vmem:[%s544_s0 + $0xb8] sm:$0xff]  ;;  %v239_v63 = vld [vmem:[%s544_s0 + $0x208] sm:$0xff] }
   0xe   :  { %v141_v45 = vmax.f32 %v122_v35, %v237_v30  ;;  %v248_v0 = vld [vmem:[%s544_s0 + $0x250] sm:$0xff]  ;;  %v87_v1 = vmax.f32 %v68_v53, %v213_v49  ;;  %v214_v2 = vld [vmem:[%s544_s0 + $0x140] sm:$0xff]  ;;  %v32_v3 = vmax.f32 %v13_v59, %v188_v60  ;;  %v231_v5 = vld [vmem:[%s544_s0 + $0x1c8] sm:$0xff] }
   0xf   :  { %v142_v62 = vmax.f32 %v123_v51, %v238_v46  ;;  %v124_v4 = vmax.f32 %v105_v57, %v230_v52  ;;  %v69_v6 = vmax.f32 %v50_v58, %v205_v55  ;;  %v223_v7 = vld [vmem:[%s544_s0 + $0x188] sm:$0xff]  ;;  %v206_v8 = vld [vmem:[%s544_s0 + $0x100] sm:$0xff]  ;;  %v14_v12 = vld [vmem:[%s544_s0 + $0x30] sm:$0xff] }
  0x10   :  { %v160_v56 = vmax.f32 %v141_v45, %v246_v31  ;;  %v106_v10 = vmax.f32 %v87_v1, %v222_v54  ;;  %v51_v11 = vmax.f32 %v32_v3, %v197_v61  ;;  %v189_v13 = vld [vmem:[%s544_s0 + $0x78] sm:$0xff]  ;;  %v198_v14 = vld [vmem:[%s544_s0 + $0xc0] sm:$0xff]  ;;  %v240_v16 = vld [vmem:[%s544_s0 + $0x210] sm:$0xff] }
  0x11   :  { %v161_v9 = vmax.f32 %v142_v62, %v247_v47  ;;  %v143_v15 = vmax.f32 %v124_v4, %v239_v63  ;;  %v249_v17 = vld [vmem:[%s544_s0 + $0x258] sm:$0xff]  ;;  %v88_v18 = vmax.f32 %v69_v6, %v214_v2  ;;  %v215_v19 = vld [vmem:[%s544_s0 + $0x148] sm:$0xff]  ;;  %v33_v20 = vmax.f32 %v14_v12, %v189_v13  ;;  %v232_v22 = vld [vmem:[%s544_s0 + $0x1d0] sm:$0xff] }
  0x12   :  { %170 = vst.msk [vmem:[%s545_s1] sm:$0xff] %vm169_vm0, %v160_v56  ;;  %v125_v21 = vmax.f32 %v106_v10, %v231_v5  ;;  %v70_v23 = vmax.f32 %v51_v11, %v206_v8  ;;  %v224_v24 = vld [vmem:[%s544_s0 + $0x190] sm:$0xff]  ;;  %v207_v25 = vld [vmem:[%s544_s0 + $0x108] sm:$0xff]  ;;  %v15_v29 = vld [vmem:[%s544_s0 + $0x38] sm:$0xff] }
  0x13   :  { %171 = vst.msk [vmem:[%s545_s1 + $0x8] sm:$0xff] %vm169_vm0, %v161_v9  ;;  %v162_v26 = vmax.f32 %v143_v15, %v248_v0  ;;  %v107_v27 = vmax.f32 %v88_v18, %v223_v7  ;;  %v52_v28 = vmax.f32 %v33_v20, %v198_v14  ;;  %v190_v30 = vld [vmem:[%s544_s0 + $0x80] sm:$0xff]  ;;  %v199_v31 = vld [vmem:[%s544_s0 + $0xc8] sm:$0xff]  ;;  %v241_v33 = vld [vmem:[%s544_s0 + $0x218] sm:$0xff] }
  0x14   :  { %v144_v32 = vmax.f32 %v125_v21, %v240_v16  ;;  %v250_v34 = vld [vmem:[%s544_s0 + $0x260] sm:$0xff]  ;;  %v89_v35 = vmax.f32 %v70_v23, %v215_v19  ;;  %v216_v36 = vld [vmem:[%s544_s0 + $0x150] sm:$0xff]  ;;  %v34_v37 = vmax.f32 %v15_v29, %v190_v30  ;;  %v233_v39 = vld [vmem:[%s544_s0 + $0x1d8] sm:$0xff] }
  0x15   :  { %172 = vst.msk [vmem:[%s545_s1 + $0x10] sm:$0xff] %vm169_vm0, %v162_v26  ;;  %v126_v38 = vmax.f32 %v107_v27, %v232_v22  ;;  %v71_v40 = vmax.f32 %v52_v28, %v207_v25  ;;  %v225_v41 = vld [vmem:[%s544_s0 + $0x198] sm:$0xff]  ;;  %v208_v42 = vld [vmem:[%s544_s0 + $0x110] sm:$0xff]  ;;  %v16_v46 = vld [vmem:[%s544_s0 + $0x40] sm:$0xff] }
  0x16   :  { %v163_v43 = vmax.f32 %v144_v32, %v249_v17  ;;  %v108_v44 = vmax.f32 %v89_v35, %v224_v24  ;;  %v53_v45 = vmax.f32 %v34_v37, %v199_v31  ;;  %v191_v47 = vld [vmem:[%s544_s0 + $0x88] sm:$0xff]  ;;  %v200_v48 = vld [vmem:[%s544_s0 + $0xd0] sm:$0xff]  ;;  %v242_v50 = vld [vmem:[%s544_s0 + $0x220] sm:$0xff] }
  0x17   :  { %v145_v49 = vmax.f32 %v126_v38, %v241_v33  ;;  %v90_v51 = vmax.f32 %v71_v40, %v216_v36  ;;  %v217_v52 = vld [vmem:[%s544_s0 + $0x158] sm:$0xff]  ;;  %v35_v53 = vmax.f32 %v16_v46, %v191_v47  ;;  %v234_v55 = vld [vmem:[%s544_s0 + $0x1e0] sm:$0xff]  ;;  %v251_v59 = vld [vmem:[%s544_s0 + $0x268] sm:$0xff] }
  0x18   :  { %173 = vst.msk [vmem:[%s545_s1 + $0x18] sm:$0xff] %vm169_vm0, %v163_v43  ;;  %v127_v54 = vmax.f32 %v108_v44, %v233_v39  ;;  %v72_v56 = vmax.f32 %v53_v45, %v208_v42  ;;  %v209_v57 = vld [vmem:[%s544_s0 + $0x118] sm:$0xff]  ;;  %v226_v61 = vld [vmem:[%s544_s0 + $0x1a0] sm:$0xff]  ;;  %v243_v0 = vld [vmem:[%s544_s0 + $0x228] sm:$0xff] }
  0x19   :  { %v164_v58 = vmax.f32 %v145_v49, %v250_v34  ;;  %v109_v60 = vmax.f32 %v90_v51, %v225_v41  ;;  %v54_v62 = vmax.f32 %v35_v53, %v200_v48  ;;  %v218_v2 = vld [vmem:[%s544_s0 + $0x160] sm:$0xff]  ;;  %v235_v4 = vld [vmem:[%s544_s0 + $0x1e8] sm:$0xff]  ;;  %v252_v7 = vld [vmem:[%s544_s0 + $0x270] sm:$0xff] }
  0x1a   :  { %v146_v63 = vmax.f32 %v127_v54, %v242_v50  ;;  %v91_v1 = vmax.f32 %v72_v56, %v217_v52  ;;  %v227_v9 = vld [vmem:[%s544_s0 + $0x1a8] sm:$0xff]  ;;  %v244_v11 = vld [vmem:[%s544_s0 + $0x230] sm:$0xff]  ;;  %v253_v16 = vld [vmem:[%s544_s0 + $0x278] sm:$0xff] }
  0x1b   :  { %174 = vst.msk [vmem:[%s545_s1 + $0x20] sm:$0xff] %vm169_vm0, %v164_v58  ;;  %v128_v3 = vmax.f32 %v109_v60, %v234_v55  ;;  %v73_v5 = vmax.f32 %v54_v62, %v209_v57  ;;  %v236_v14 = vld [vmem:[%s544_s0 + $0x1f0] sm:$0xff]  ;;  %v245_v19 = vld [vmem:[%s544_s0 + $0x238] sm:$0xff]  ;;  %v254_v22 = vld [vmem:[%s544_s0 + $0x280] sm:$0xff] }
  0x1c   :  { %v165_v6 = vmax.f32 %v146_v63, %v251_v59  ;;  %v110_v8 = vmax.f32 %v91_v1, %v226_v61 }
  0x1d   :  { %v147_v10 = vmax.f32 %v128_v3, %v243_v0  ;;  %v92_v12 = vmax.f32 %v73_v5, %v218_v2 }
  0x1e   :  { %175 = vst.msk [vmem:[%s545_s1 + $0x28] sm:$0xff] %vm169_vm0, %v165_v6  ;;  %v129_v13 = vmax.f32 %v110_v8, %v235_v4 }
  0x1f   :  { %v166_v15 = vmax.f32 %v147_v10, %v252_v7  ;;  %v111_v17 = vmax.f32 %v92_v12, %v227_v9 }
  0x20   :  { %v148_v18 = vmax.f32 %v129_v13, %v244_v11 }
  0x21   :  { %176 = vst.msk [vmem:[%s545_s1 + $0x30] sm:$0xff] %vm169_vm0, %v166_v15  ;;  %v130_v20 = vmax.f32 %v111_v17, %v236_v14 }
  0x22   :  { %v167_v21 = vmax.f32 %v148_v18, %v253_v16 }
  0x23   :  { %v149_v23 = vmax.f32 %v130_v20, %v245_v19 }
  0x24   :  { %177 = vst.msk [vmem:[%s545_s1 + $0x38] sm:$0xff] %vm169_vm0, %v167_v21 }
  0x25   :  { %v168_v24 = vmax.f32 %v149_v23, %v254_v22 }
  0x27   :  { %178 = vst.msk [vmem:[%s545_s1 + $0x40] sm:$0xff] %vm169_vm0, %v168_v24 }

// kernel: resnet_forward.12
= control target key start
LH: loop header
LB: loop body
LE: loop exit
PB: predicated region body
PF: predicated region fallthrough
CT: control target
= control target key end

     0   :  { %v1102_v34 = vmov 0.0   ;;  %vm1103_vm0 = vmmov 0   ;;  %vm461_vm1 = vcmask 523264   ;;  %s1456_s1 = inlined_call_operand.vmem [shape: bf16[576,64], index: 1, kind: input, shape index: {}]   ;;  %s1457_s0 = inlined_call_operand.vmem [shape: bf16[80,576], index: 0, kind: input, shape index: {}]   ;;  %s1458_s2 = inlined_call_operand.vmem [shape: f32[1,64], index: 2, kind: input, shape index: {}]   ;;  %s1459_s3 = inlined_call_operand.vmem [shape: f32[1,64], index: 3, kind: input, shape index: {}]   ;;  %s1460_s4 = inlined_call_operand.vmem [shape: f32[80,64], index: 4, kind: output, shape index: {}]  }
   0x1   :  { %v1029_v0 = vld [vmem:[%s1456_s1 + $0x78] sm:$0xff]   ;;  %v1033_v4 = vld [vmem:[%s1456_s1 + $0x70] sm:$0xff]   ;;  %v1037_v8 = vld [vmem:[%s1456_s1 + $0x68] sm:$0xff]  }
   0x2   :  { %v1030_v1 = vld [vmem:[%s1456_s1 + $0xf8] sm:$0xff]   ;;  %890 = vmatprep.subr.bf16.mxu0 %v1029_v0  ;;  %v1034_v5 = vld [vmem:[%s1456_s1 + $0xf0] sm:$0xff]   ;;  %v1038_v9 = vld [vmem:[%s1456_s1 + $0xe8] sm:$0xff]  }
   0x3   :  { %v1031_v2 = vld [vmem:[%s1456_s1 + $0x38] sm:$0xff]   ;;  %936 = vmatprep.subr.bf16.mxu1 %v1030_v1  ;;  %v1035_v6 = vld [vmem:[%s1456_s1 + $0x30] sm:$0xff]   ;;  %v1039_v10 = vld [vmem:[%s1456_s1 + $0x28] sm:$0xff]  }
   0x4   :  { %v1032_v3 = vld [vmem:[%s1456_s1 + $0xb8] sm:$0xff]   ;;  %891 = vmatpush3.bf16.msra.mxu0 %v1031_v2  ;;  %v1036_v7 = vld [vmem:[%s1456_s1 + $0xb0] sm:$0xff]   ;;  %v1040_v11 = vld [vmem:[%s1456_s1 + $0xa8] sm:$0xff]  }
   0x5   :  { %937 = vmatpush3.bf16.msra.mxu1 %v1032_v3  ;;  %892 = vmatprep.subr.bf16.mxu0 %v1033_v4  ;;  %v1041_v12 = vld [vmem:[%s1456_s1 + $0x60] sm:$0xff]   ;;  %v1045_v16 = vld [vmem:[%s1456_s1 + $0x58] sm:$0xff]   ;;  %v1049_v20 = vld [vmem:[%s1456_s1 + $0x50] sm:$0xff]  }
   0x6   :  { %938 = vmatprep.subr.bf16.mxu1 %v1034_v5  ;;  %v1042_v13 = vld [vmem:[%s1456_s1 + $0xe0] sm:$0xff]   ;;  %v1046_v17 = vld [vmem:[%s1456_s1 + $0xd8] sm:$0xff]   ;;  %v1050_v21 = vld [vmem:[%s1456_s1 + $0xd0] sm:$0xff]  }
   0x7   :  { %v1043_v14 = vld [vmem:[%s1456_s1 + $0x20] sm:$0xff]   ;;  %v1047_v18 = vld [vmem:[%s1456_s1 + $0x18] sm:$0xff]   ;;  %v1051_v22 = vld [vmem:[%s1456_s1 + $0x10] sm:$0xff]  }
   0x8   :  { %893 = vmatpush3.bf16.msra.mxu0 %v1035_v6  ;;  %v1044_v15 = vld [vmem:[%s1456_s1 + $0xa0] sm:$0xff]   ;;  %v1048_v19 = vld [vmem:[%s1456_s1 + $0x98] sm:$0xff]   ;;  %v1052_v23 = vld [vmem:[%s1456_s1 + $0x90] sm:$0xff]  }
   0x9   :  { %939 = vmatpush3.bf16.msra.mxu1 %v1036_v7  ;;  %894 = vmatprep.subr.bf16.mxu0 %v1037_v8  ;;  %v1053_v24 = vld [vmem:[%s1456_s1 + $0x48] sm:$0xff]   ;;  %v1057_v28 = vld [vmem:[%s1456_s1 + $0x40] sm:$0xff]   ;;  %v1067_v37 = vld [vmem:[%s1456_s1 + $0x118] sm:$0xff]  }
   0xa   :  { %940 = vmatprep.subr.bf16.mxu1 %v1038_v9  ;;  %v1054_v25 = vld [vmem:[%s1456_s1 + $0xc8] sm:$0xff]   ;;  %v1058_v29 = vld [vmem:[%s1456_s1 + $0xc0] sm:$0xff]   ;;  %v1074_v40 = vld [vmem:[%s1456_s1 + $0x110] sm:$0xff]  }
   0xb   :  { %v1055_v26 = vld [vmem:[%s1456_s1 + $0x8] sm:$0xff]   ;;  %v1059_v30 = vld [vmem:[%s1456_s1] sm:$0xff]   ;;  %v1077_v44 = vld [vmem:[%s1457_s0 + $0x5c] ss:$20 sps:$4 sm:$0xff]  }
   0xc   :  { %895 = vmatpush3.bf16.msra.mxu0 %v1039_v10  ;;  %v1056_v27 = vld [vmem:[%s1456_s1 + $0x88] sm:$0xff]   ;;  %v1060_v31 = vld [vmem:[%s1456_s1 + $0x80] sm:$0xff]   ;;  %v1082_v49 = vld [vmem:[%s1457_s0 + $0x7c] ss:$20 sps:$4 sm:$0xff]  }
   0xd   :  { %941 = vmatpush3.bf16.msra.mxu1 %v1040_v11  ;;  %896 = vmatprep.subr.bf16.mxu0 %v1041_v12  ;;  %v1061_v32 = vld [vmem:[%s1457_s0] ss:$20 sps:$4 sm:$0xff]   ;;  %v1063_v33 = vld [vmem:[%s1457_s0 + $0x4] ss:$20 sps:$4 sm:$0xff]   ;;  %v1064_v35 = vld [vmem:[%s1457_s0 + $0x8] ss:$20 sps:$4 sm:$0xff]  }
   0xe   :  { %942 = vmatprep.subr.bf16.mxu1 %v1042_v13  ;;  %v1066_v36 = vld [vmem:[%s1457_s0 + $0xc] ss:$20 sps:$4 sm:$0xff]   ;;  %509 = vmatprep.mubr.bf16.mxu0 %v1063_v33  ;;  %v1070_v39 = vld [vmem:[%s1457_s0 + $0x34] ss:$20 sps:$4 sm:$0xff]   ;;  %v1073_v42 = vld [vmem:[%s1457_s0 + $0x30] ss:$20 sps:$4 sm:$0xff]  }
   0xf   :  { %582 = vmatprep.mubr.bf16.mxu1 %v1066_v36  ;;  %v1068_v38 = vld [vmem:[%s1457_s0 + $0x2c] ss:$20 sps:$4 sm:$0xff]   ;;  %v1072_v41 = vld [vmem:[%s1457_s0 + $0x28] ss:$20 sps:$4 sm:$0xff]   ;;  %v1079_v46 = vld [vmem:[%s1457_s0 + $0x50] ss:$20 sps:$4 sm:$0xff]  }
  0x10   :  { %897 = vmatpush3.bf16.msra.mxu0 %v1043_v14  ;;  %v1075_v43 = vld [vmem:[%s1457_s0 + $0x54] ss:$20 sps:$4 sm:$0xff]   ;;  %v1080_v47 = vld [vmem:[%s1457_s0 + $0x58] ss:$20 sps:$4 sm:$0xff]   ;;  %v1092_v48 = vld [vmem:[%s1456_s1 + $0x100] sm:$0xff]  }
  0x11   :  { %943 = vmatpush3.bf16.msra.mxu1 %v1044_v15  ;;  %898 = vmatprep.subr.bf16.mxu0 %v1045_v16  ;;  %v1081_v45 = vld [vmem:[%s1456_s1 + $0x108] sm:$0xff]   ;;  %v1084_v50 = vld [vmem:[%s1457_s0 + $0x84] ss:$20 sps:$4 sm:$0xff]   ;;  %v1087_v52 = vld [vmem:[%s1457_s0 + $0x80] ss:$20 sps:$4 sm:$0xff]  }
  0x12   :  { %944 = vmatprep.subr.bf16.mxu1 %v1046_v17  ;;  %v1086_v51 = vld [vmem:[%s1457_s0 + $0x78] ss:$20 sps:$4 sm:$0xff]   ;;  %v1093_v55 = vld [vmem:[%s1457_s0 + $0xa0] ss:$20 sps:$4 sm:$0xff]   ;;  %v1094_v56 = vld [vmem:[%s1457_s0 + $0xa8] ss:$20 sps:$4 sm:$0xff]  }
  0x13   :  { %v1088_v53 = vld [vmem:[%s1457_s0 + $0xa4] ss:$20 sps:$4 sm:$0xff]   ;;  %v1090_v54 = vld [vmem:[%s1457_s0 + $0xac] ss:$20 sps:$4 sm:$0xff]   ;;  %v1096_v58 = vld [vmem:[%s1457_s0 + $0x88] ss:$20 sps:$4 sm:$0xff]  }
  0x14   :  { %899 = vmatpush3.bf16.msra.mxu0 %v1047_v18  ;;  %v1095_v57 = vld [vmem:[%s1457_s0 + $0x10] ss:$20 sps:$4 sm:$0xff]   ;;  %v1097_v59 = vld [vmem:[%s1457_s0 + $0x38] ss:$20 sps:$4 sm:$0xff]   ;;  %v1099_v61 = vld [vmem:[%s1457_s0 + $0x60] ss:$20 sps:$4 sm:$0xff]  }
  0x15   :  { %945 = vmatpush3.bf16.msra.mxu1 %v1048_v19  ;;  %900 = vmatprep.subr.bf16.mxu0 %v1049_v20  ;;  %v1098_v60 = vld [vmem:[%s1457_s0 + $0xb0] ss:$20 sps:$4 sm:$0xff]  }
  0x16   :  { %946 = vmatprep.subr.bf16.mxu1 %v1050_v21 }
  0x18   :  { %901 = vmatpush3.bf16.msra.mxu0 %v1051_v22 }
  0x19   :  { %947 = vmatpush3.bf16.msra.mxu1 %v1052_v23  ;;  %902 = vmatprep.subr.bf16.mxu0 %v1053_v24 }
  0x1a   :  { %948 = vmatprep.subr.bf16.mxu1 %v1054_v25 }
  0x1c   :  { %903 = vmatpush3.bf16.msra.mxu0 %v1055_v26 }
  0x1d   :  { %949 = vmatpush3.bf16.msra.mxu1 %v1056_v27  ;;  %904 = vmatprep.subr.bf16.mxu0 %v1057_v28 }
  0x1e   :  { %950 = vmatprep.subr.bf16.mxu1 %v1058_v29 }
  0x20   :  { %905 = vmatpush3.bf16.msra.mxu0 %v1059_v30 }
  0x21   :  { %951 = vmatpush3.bf16.msra.mxu1 %v1060_v31  ;;  %991 = vmatprep.subr.bf16.mxu0 %v1102_v34 }
  0x22   :  { %1019 = vmatprep.subr.bf16.mxu1 %v1102_v34 }
  0x23   :  { %510 = vmatmul.mubr.bf16.vlgmr.msra.gmra.mxu0 %v1061_v32 }
  0x24   :  { %583 = vmatmul.mubr.bf16.vlgmr.msra.gmra.mxu1 %v1064_v35  ;;  %992 = vmatpush3.bf16.msra.mxu0 %v1067_v37 }
  0x25   :  { %517 = vmatprep.mubr.bf16.mxu0 %v1068_v38  ;;  %993 = vmatprep.subr.bf16.mxu0 %v1102_v34 }
  0x26   :  { %590 = vmatprep.mubr.bf16.mxu1 %v1070_v39  ;;  %1023 = vmatpush3.bf16.msra.mxu1 %v1067_v37 }
  0x27   :  { %1020 = vmatprep.subr.bf16.mxu1 %v1102_v34 }
  0x28   :  { %994 = vmatpush3.bf16.msra.mxu0 %v1074_v40 }
  0x29   :  { %995 = vmatprep.subr.bf16.mxu0 %v1102_v34 }
  0x2a   :  { %1024 = vmatpush3.bf16.msra.mxu1 %v1074_v40 }
  0x2b   :  { %518 = vmatmul.mubr.bf16.gmra.mxu0 %v1072_v41  ;;  %1021 = vmatprep.subr.bf16.mxu1 %v1102_v34 }
  0x2c   :  { %591 = vmatmul.mubr.bf16.gmra.mxu1 %v1073_v42  ;;  %525 = vmatprep.mubr.bf16.mxu0 %v1075_v43 }
  0x2d   :  { %598 = vmatprep.mubr.bf16.mxu1 %v1077_v44  ;;  %996 = vmatpush3.bf16.msra.mxu0 %v1081_v45 }
  0x2e   :  { %997 = vmatprep.subr.bf16.mxu0 %v1102_v34  ;;  %1025 = vmatpush3.bf16.msra.mxu1 %v1081_v45 }
  0x2f   :  { %1022 = vmatprep.subr.bf16.mxu1 %v1102_v34 }
  0x31   :  { %998 = vmatpush3.bf16.msra.mxu0 %v1092_v48 }
  0x32   :  { %1026 = vmatpush3.bf16.msra.mxu1 %v1092_v48 }
  0x33   :  { %526 = vmatmul.mubr.bf16.gmra.mxu0 %v1079_v46 }
  0x34   :  { %599 = vmatmul.mubr.bf16.gmra.mxu1 %v1080_v47  ;;  %533 = vmatprep.mubr.bf16.mxu0 %v1082_v49 }
  0x35   :  { %606 = vmatprep.mubr.bf16.mxu1 %v1084_v50 }
  0x3b   :  { %534 = vmatmul.mubr.bf16.gmra.mxu0 %v1086_v51 }
  0x3c   :  { %607 = vmatmul.mubr.bf16.gmra.mxu1 %v1087_v52  ;;  %541 = vmatprep.mubr.bf16.mxu0 %v1088_v53 }
  0x3d   :  { %614 = vmatprep.mubr.bf16.mxu1 %v1090_v54 }
  0x43   :  { %542 = vmatmul.mubr.bf16.gmra.mxu0 %v1093_v55 }
  0x44   :  { %615 = vmatmul.mubr.bf16.gmra.mxu1 %v1094_v56  ;;  %999 = vmatprep.mubr.msk.bf16.mxu0 %vm1103_vm0, %v1102_v34 }
  0x45   :  { %1011 = vmatprep.mubr.msk.bf16.mxu1 %vm1103_vm0, %v1102_v34 }
  0x4b   :  { %1000 = vmatmul.mubr.msk.bf16.vlgmr.msra.gmra.mxu0 %vm461_vm1, %v1095_v57 }
  0x4c   :  { %1012 = vmatmul.mubr.msk.bf16.vlgmr.msra.gmra.mxu1 %vm461_vm1, %v1096_v58  ;;  %1003 = vmatprep.mubr.msk.bf16.mxu0 %vm1103_vm0, %v1102_v34 }
  0x4d   :  { %1015 = vmatprep.mubr.msk.bf16.mxu1 %vm1103_vm0, %v1102_v34 }
  0x53   :  { %1004 = vmatmul.mubr.msk.bf16.gmra.mxu0 %vm461_vm1, %v1097_v59 }
  0x54   :  { %1016 = vmatmul.mubr.msk.bf16.gmra.mxu1 %vm461_vm1, %v1098_v60  ;;  %1007 = vmatprep.mubr.msk.bf16.mxu0 %vm1103_vm0, %v1102_v34 }
  0x5b   :  { %1008 = vmatmul.mubr.msk.bf16.gmra.mxu0 %vm461_vm1, %v1099_v61 }
  0xe3   :  { %v906_v62 = vpop.f32.mrf.mxu0 }
  0xe4   :  { %v952_v63 = vpop.f32.mrf.mxu1 }
  0xe5   :  { %v907_v0 = vpop.f32.mrf.mxu0 }
  0xe6   :  { %v953_v1 = vpop.f32.mrf.mxu1  ;;  %v908_v42 = vadd.f32 %v907_v0, %v906_v62 }
  0xe7   :  { %v909_v2 = vpop.f32.mrf.mxu0  ;;  %v954_v43 = vadd.f32 %v953_v1, %v952_v63 }
  0xe8   :  { %v955_v3 = vpop.f32.mrf.mxu1 }
  0xe9   :  { %v910_v4 = vpop.f32.mrf.mxu0  ;;  %v585_v51 = vadd.f32 %v954_v43, %v908_v42 }
  0xea   :  { %v956_v5 = vpop.f32.mrf.mxu1  ;;  %v911_v39 = vadd.f32 %v910_v4, %v909_v2 }
  0xeb   :  { %v912_v6 = vpop.f32.mrf.mxu0  ;;  %v957_v40 = vadd.f32 %v956_v5, %v955_v3 }
  0xec   :  { %v958_v7 = vpop.f32.mrf.mxu1 }
  0xed   :  { %v913_v8 = vpop.f32.mrf.mxu0  ;;  %v588_v49 = vadd.f32 %v957_v40, %v911_v39 }
  0xee   :  { %v959_v9 = vpop.f32.mrf.mxu1  ;;  %v914_v45 = vadd.f32 %v913_v8, %v912_v6 }
  0xef   :  { %v915_v10 = vpop.f32.mrf.mxu0  ;;  %v960_v46 = vadd.f32 %v959_v9, %v958_v7 }
  0xf0   :  { %v961_v11 = vpop.f32.mrf.mxu1 }
  0xf1   :  { %v916_v12 = vpop.f32.mrf.mxu0  ;;  %v593_v57 = vadd.f32 %v960_v46, %v914_v45 }
  0xf2   :  { %v962_v13 = vpop.f32.mrf.mxu1  ;;  %v917_v53 = vadd.f32 %v916_v12, %v915_v10 }
  0xf3   :  { %v918_v14 = vpop.f32.mrf.mxu0  ;;  %v963_v54 = vadd.f32 %v962_v13, %v961_v11 }
  0xf4   :  { %v964_v15 = vpop.f32.mrf.mxu1 }
  0xf5   :  { %v919_v16 = vpop.f32.mrf.mxu0  ;;  %v596_v7 = vadd.f32 %v963_v54, %v917_v53 }
  0xf6   :  { %v965_v17 = vpop.f32.mrf.mxu1  ;;  %v920_v59 = vadd.f32 %v919_v16, %v918_v14 }
  0xf7   :  { %v921_v18 = vpop.f32.mrf.mxu0  ;;  %v966_v60 = vadd.f32 %v965_v17, %v964_v15 }
  0xf8   :  { %v967_v19 = vpop.f32.mrf.mxu1 }
  0xf9   :  { %v922_v20 = vpop.f32.mrf.mxu0 }
  0xfa   :  { %v968_v21 = vpop.f32.mrf.mxu1  ;;  %v923_v0 = vadd.f32 %v922_v20, %v921_v18  ;;  %v601_v18 = vadd.f32 %v966_v60, %v920_v59 }
  0xfb   :  { %v924_v22 = vpop.f32.mrf.mxu0  ;;  %v969_v1 = vadd.f32 %v968_v21, %v967_v19 }
  0xfc   :  { %v970_v23 = vpop.f32.mrf.mxu1 }
  0xfd   :  { %v925_v24 = vpop.f32.mrf.mxu0  ;;  %v604_v19 = vadd.f32 %v969_v1, %v923_v0 }
  0xfe   :  { %v971_v25 = vpop.f32.mrf.mxu1  ;;  %v926_v2 = vadd.f32 %v925_v24, %v924_v22 }
  0xff   :  { %v927_v26 = vpop.f32.mrf.mxu0  ;;  %v972_v3 = vadd.f32 %v971_v25, %v970_v23 }
 0x100   :  { %v973_v27 = vpop.f32.mrf.mxu1 }
 0x101   :  { %v928_v28 = vpop.f32.mrf.mxu0  ;;  %v609_v16 = vadd.f32 %v972_v3, %v926_v2 }
 0x102   :  { %v974_v29 = vpop.f32.mrf.mxu1  ;;  %v929_v8 = vadd.f32 %v928_v28, %v927_v26 }
 0x103   :  { %v930_v30 = vpop.f32.mrf.mxu0  ;;  %v975_v9 = vadd.f32 %v974_v29, %v973_v27 }
 0x104   :  { %v976_v31 = vpop.f32.mrf.mxu1 }
 0x105   :  { %v931_v32 = vpop.f32.mrf.mxu0  ;;  %v612_v28 = vadd.f32 %v975_v9, %v929_v8 }
 0x106   :  { %v977_v33 = vpop.f32.mrf.mxu1  ;;  %v932_v25 = vadd.f32 %v931_v32, %v930_v30 }
 0x107   :  { %v1330_v34 = vpop.f32.mrf.mxu0  ;;  %v978_v26 = vadd.f32 %v977_v33, %v976_v31 }
 0x108   :  { %v1332_v35 = vpop.f32.mrf.mxu1 }
 0x109   :  { %v934_v36 = vpop.f32.mrf.mxu0 }
 0x10a   :  { %v980_v37 = vpop.f32.mrf.mxu1  ;;  %v935_v43 = vadd.f32 %v934_v36, %v1330_v34  ;;  %v617_v34 = vadd.f32 %v978_v26, %v932_v25 }
 0x10b   :  { %v657_v38 = vpop.f32.mrf.mxu0 }
 0x10c   :  { %v681_v41 = vpop.f32.mrf.mxu1  ;;  %v1336_v61 = vadd.f32 %v657_v38, %v585_v51 }
 0x10d   :  { %v1001_v44 = vpop.f32.mrf.mxu0  ;;  %v1365_v31 = vadd.f32 %v681_v41, %v609_v16 }
 0x10e   :  { %v1013_v47 = vpop.f32.mrf.mxu1  ;;  %v722_v11 = vmul.f32 %v1336_v61, %v1336_v61  ;;  %v696_v20 = vsel %vm461_vm1, %v1336_v61, 0.0  ;;  %v981_v44 = vadd.f32 %v980_v37, %v1332_v35 }
 0x10f   :  { %v660_v48 = vpop.f32.mrf.mxu0  ;;  %v707_v0 = vsel %vm461_vm1, %v1365_v31, 0.0 }
 0x110   :  { %v684_v50 = vpop.f32.mrf.mxu1  ;;  %v1334_v55 = vadd.f32 %v660_v48, %v588_v49  ;;  %v732_v38 = vsel %vm461_vm1, %v722_v11, 0.0  ;;  %v620_v41 = vadd.f32 %v981_v44, %v935_v43 }
 0x111   :  { %v1002_v52 = vpop.f32.mrf.mxu0 }
 0x112   :  { %v1014_v56 = vpop.f32.mrf.mxu1  ;;  %v723_v5 = vmul.f32 %v1334_v55, %v1334_v55  ;;  %v697_v12 = vsel %vm461_vm1, %v1334_v55, 0.0  ;;  %v1372_v52 = vadd.f32 %v684_v50, %v612_v28 }
 0x113   :  { %v665_v58 = vpop.f32.mrf.mxu0  ;;  %v698_v27 = vadd.f32 %v697_v12, %v696_v20  ;;  %v728_v56 = vmul.f32 %v1365_v31, %v1365_v31 }
 0x114   :  { %v1338_v62 = vadd.f32 %v665_v58, %v593_v57  ;;  %v689_v63 = vpop.f32.mrf.mxu1  ;;  %v733_v21 = vsel %vm461_vm1, %v723_v5, 0.0  ;;  %v729_v1 = vmul.f32 %v1372_v52, %v1372_v52 }
 0x115   :  { %v1005_v4 = vpop.f32.mrf.mxu0  ;;  %v734_v45 = vadd.f32 %v733_v21, %v732_v38  ;;  %v1379_v57 = vadd.f32 %v689_v63, %v617_v34  ;;  %v743_v5 = vsel %vm461_vm1, %v728_v56, 0.0 }
 0x116   :  { %v1017_v6 = vpop.f32.mrf.mxu1  ;;  %v724_v13 = vmul.f32 %v1338_v62, %v1338_v62  ;;  %v699_v22 = vsel %vm461_vm1, %v1338_v62, 0.0 }
 0x117   :  { %v668_v10 = vpop.f32.mrf.mxu0  ;;  %v700_v46 = vadd.f32 %v699_v22, %v698_v27  ;;  %v709_v6 = vsel %vm461_vm1, %v1372_v52, 0.0  ;;  %v711_v11 = vsel %vm461_vm1, %v1379_v57, 0.0 }
 0x118   :  { %v1348_v14 = vadd.f32 %v668_v10, %v596_v7  ;;  %v692_v15 = vpop.f32.mrf.mxu1  ;;  %v735_v39 = vsel %vm461_vm1, %v724_v13, 0.0  ;;  %v730_v7 = vmul.f32 %v1379_v57, %v1379_v57  ;;  %v745_v10 = vsel %vm461_vm1, %v729_v1, 0.0 }
 0x119   :  { %v1006_v17 = vpop.f32.mrf.mxu0  ;;  %v736_v48 = vadd.f32 %v735_v39, %v734_v45  ;;  %v693_v2 = vadd.f32 %v692_v15, %v620_v41 }
 0x11a   :  { %v725_v23 = vmul.f32 %v1348_v14, %v1348_v14  ;;  %v1018_v24 = vpop.f32.mrf.mxu1  ;;  %v701_v40 = vsel %vm461_vm1, %v1348_v14, 0.0  ;;  %v747_v16 = vsel %vm461_vm1, %v730_v7, 0.0 }
 0x11b   :  { %v673_v29 = vpop.f32.mrf.mxu0  ;;  %v702_v49 = vadd.f32 %v701_v40, %v700_v46  ;;  %v731_v12 = vmul.f32 %v693_v2, %v693_v2  ;;  %v713_v17 = vsel %vm461_vm1, %v693_v2, 0.0 }
 0x11c   :  { %v1361_v42 = vadd.f32 %v673_v29, %v601_v18  ;;  %v737_v32 = vsel %vm461_vm1, %v725_v23, 0.0 }
 0x11d   :  { %v1009_v30 = vpop.f32.mrf.mxu0  ;;  %v738_v37 = vadd.f32 %v737_v32, %v736_v48  ;;  %v749_v20 = vsel %vm461_vm1, %v731_v12, 0.0 }
 0x11e   :  { %v703_v33 = vsel %vm461_vm1, %v1361_v42, 0.0  ;;  %v726_v47 = vmul.f32 %v1361_v42, %v1361_v42 }
 0x11f   :  { %v676_v51 = vpop.f32.mrf.mxu0  ;;  %v704_v53 = vadd.f32 %v703_v33, %v702_v49  ;;  %v761_v49 = vld [vmem:[%s1458_s2] sm:$0x1] }
 0x120   :  { %v739_v35 = vsel %vm461_vm1, %v726_v47, 0.0  ;;  %v1375_v36 = vadd.f32 %v676_v51, %v604_v19  ;;  %v769_v47 = vlaneseq }
 0x121   :  { %v1010_v54 = vpop.f32.mrf.mxu0  ;;  %v740_v59 = vadd.f32 %v739_v35, %v738_v37  ;;  %v765_v37 = vld [vmem:[%s1459_s3] sm:$0x1] }
 0x122   :  { %v705_v58 = vsel %vm461_vm1, %v1375_v36, 0.0  ;;  %v727_v50 = vmul.f32 %v1375_v36, %v1375_v36  ;;  %v770_v48 = vshrl.u32 %v769_v47, 7 }
 0x123   :  { %v706_v60 = vadd.f32 %v705_v58, %v704_v53 }
 0x124   :  { %v741_v3 = vsel %vm461_vm1, %v727_v50, 0.0  ;;  %v771_v51 = vsub.s32 0, %v770_v48 }
 0x125   :  { %v708_v4 = vadd.f32 %v707_v0, %v706_v60  ;;  %v742_v63 = vadd.f32 %v741_v3, %v740_v59 }
 0x127   :  { %v710_v8 = vadd.f32 %v709_v6, %v708_v4  ;;  %v744_v9 = vadd.f32 %v743_v5, %v742_v63 }
 0x129   :  { %v712_v13 = vadd.f32 %v711_v11, %v710_v8  ;;  %v746_v15 = vadd.f32 %v745_v10, %v744_v9 }
 0x12b   :  { %v714_v18 = vadd.f32 %v713_v17, %v712_v13  ;;  %v748_v19 = vadd.f32 %v747_v16, %v746_v15 }
 0x12d   :  { %v715_v21 = vrot.slane %v714_v18, 4  ;;  %v750_v22 = vadd.f32 %v749_v20, %v748_v19 }
 0x12f   :  { %v716_v23 = vadd.f32 %v715_v21, %v714_v18  ;;  %v751_v24 = vrot.slane %v750_v22, 4 }
 0x131   :  { %v717_v25 = vrot.slane %v716_v23, 2  ;;  %v752_v26 = vadd.f32 %v751_v24, %v750_v22 }
 0x133   :  { %v718_v27 = vadd.f32 %v717_v25, %v716_v23  ;;  %v753_v28 = vrot.slane %v752_v26, 2 }
 0x135   :  { %v719_v29 = vrot.slane %v718_v27, 1  ;;  %v754_v38 = vadd.f32 %v753_v28, %v752_v26 }
 0x137   :  { %v720_v39 = vadd.f32 %v719_v29, %v718_v27  ;;  %v755_v40 = vrot.slane %v754_v38, 1 }
 0x139   :  { %v721_v43 = vmul.f32 0.013888889, %v720_v39  ;;  %v756_v44 = vadd.f32 %v755_v40, %v754_v38 }
 0x13b   :  { %v757_v45 = vmul.f32 0.013888889, %v756_v44  ;;  %v758_v46 = vmul.f32 %v721_v43, %v721_v43 }
 0x13d   :  { %v759_v30 = vsub.f32 %v757_v45, %v758_v46 }
 0x13f   :  { %v760_v32 = vmax.f32 %v759_v30, 0.0 }
 0x141   :  { %v762_v33 = vadd.f32 1e-05, %v760_v32 }
 0x143   :  { %1100 = vrsqrt.f32 %v762_v33 }
 0x150   :  { %v1101_v34 = vpop.eup %1100 }
 0x151   :  { %v764_v35 = vmul.f32 %v1101_v34, %v761_v49 }
 0x153   :  { %v766_v41 = vmul.f32 %v764_v35, %v721_v43  ;;  %v772_v53 = vrot.slane %v764_v35, %v771_v51 }
 0x155   :  { %v767_v54 = vsub.f32 %v765_v37, %v766_v41  ;;  %v774_v56 = vmul.f32 %v772_v53, %v1336_v61  ;;  %v775_v58 = vmul.f32 %v772_v53, %v1334_v55  ;;  %v776_v50 = vmul.f32 %v772_v53, %v1338_v62 }
 0x156   :  { %v777_v59 = vmul.f32 %v772_v53, %v1348_v14  ;;  %v778_v60 = vmul.f32 %v772_v53, %v1361_v42  ;;  %v779_v0 = vmul.f32 %v772_v53, %v1375_v36  ;;  %v780_v3 = vmul.f32 %v772_v53, %v1365_v31 }
 0x157   :  { %v788_v1 = vrot.slane %v767_v54, %v771_v51  ;;  %v781_v4 = vmul.f32 %v772_v53, %v1372_v52  ;;  %v782_v63 = vmul.f32 %v772_v53, %v1379_v57  ;;  %v783_v5 = vmul.f32 %v772_v53, %v693_v2 }
 0x159   :  { %v790_v6 = vadd.f32 %v788_v1, %v774_v56  ;;  %v791_v61 = vadd.f32 %v788_v1, %v775_v58  ;;  %v792_v7 = vadd.f32 %v788_v1, %v776_v50  ;;  %v793_v55 = vadd.f32 %v788_v1, %v777_v59 }
 0x15a   :  { %v794_v8 = vadd.f32 %v788_v1, %v778_v60  ;;  %v795_v62 = vadd.f32 %v788_v1, %v779_v0  ;;  %v796_v9 = vadd.f32 %v788_v1, %v780_v3  ;;  %v797_v14 = vadd.f32 %v788_v1, %v781_v4 }
 0x15b   :  { %v798_v10 = vadd.f32 %v788_v1, %v782_v63  ;;  %v799_v42 = vadd.f32 %v788_v1, %v783_v5  ;;  %v800_v11 = vmax.f32 %v790_v6, 0.0  ;;  %v801_v36 = vmax.f32 %v791_v61, 0.0 }
 0x15c   :  { %v802_v12 = vmax.f32 %v792_v7, 0.0  ;;  %v803_v13 = vmax.f32 %v793_v55, 0.0  ;;  %v804_v31 = vmax.f32 %v794_v8, 0.0  ;;  %v805_v15 = vmax.f32 %v795_v62, 0.0 }
 0x15d   :  { %v806_v52 = vmax.f32 %v796_v9, 0.0  ;;  %v807_v16 = vmax.f32 %v797_v14, 0.0  ;;  %v808_v57 = vmax.f32 %v798_v10, 0.0  ;;  %v809_v2 = vmax.f32 %v799_v42, 0.0  ;;  %810 = vst.msk [vmem:[%s1460_s4] sm:$0xff] %vm461_vm1, %v800_v11  ;;  %811 = vst.msk [vmem:[%s1460_s4 + $0x8] sm:$0xff] %vm461_vm1, %v801_v36 }
 0x15e   :  { %812 = vst.msk [vmem:[%s1460_s4 + $0x10] sm:$0xff] %vm461_vm1, %v802_v12  ;;  %813 = vst.msk [vmem:[%s1460_s4 + $0x18] sm:$0xff] %vm461_vm1, %v803_v13 }
 0x15f   :  { %814 = vst.msk [vmem:[%s1460_s4 + $0x20] sm:$0xff] %vm461_vm1, %v804_v31  ;;  %815 = vst.msk [vmem:[%s1460_s4 + $0x28] sm:$0xff] %vm461_vm1, %v805_v15 }
 0x160   :  { %816 = vst.msk [vmem:[%s1460_s4 + $0x30] sm:$0xff] %vm461_vm1, %v806_v52  ;;  %817 = vst.msk [vmem:[%s1460_s4 + $0x38] sm:$0xff] %vm461_vm1, %v807_v16 }
 0x161   :  { %818 = vst.msk [vmem:[%s1460_s4 + $0x40] sm:$0xff] %vm461_vm1, %v808_v57  ;;  %819 = vst.msk [vmem:[%s1460_s4 + $0x48] sm:$0xff] %vm461_vm1, %v809_v2 }

// kernel: resnet_forward.13
= control target key start
LH: loop header
LB: loop body
LE: loop exit
PB: predicated region body
PF: predicated region fallthrough
CT: control target
= control target key end

     0   :  { %v1125_v34 = vmov 0.0   ;;  %vm1126_vm0 = vmmov 0   ;;  %vm464_vm1 = vcmask 523264   ;;  %s1520_s1 = inlined_call_operand.vmem [shape: bf16[576,64], index: 1, kind: input, shape index: {}]   ;;  %s1521_s0 = inlined_call_operand.vmem [shape: bf16[80,576], index: 0, kind: input, shape index: {}]   ;;  %s1522_s2 = inlined_call_operand.vmem [shape: f32[1,64], index: 2, kind: input, shape index: {}]   ;;  %s1523_s3 = inlined_call_operand.vmem [shape: f32[1,64], index: 3, kind: input, shape index: {}]   ;;  %s1524_s4 = inlined_call_operand.vmem [shape: f32[80,64], index: 4, kind: input, shape index: {}]   ;;  %s1525_s5 = inlined_call_operand.vmem [shape: f32[80,64], index: 5, kind: output, shape index: {}]  }
   0x1   :  { %v1052_v0 = vld [vmem:[%s1520_s1 + $0x78] sm:$0xff]   ;;  %v1056_v4 = vld [vmem:[%s1520_s1 + $0x70] sm:$0xff]   ;;  %v1060_v8 = vld [vmem:[%s1520_s1 + $0x68] sm:$0xff]  }
   0x2   :  { %v1053_v1 = vld [vmem:[%s1520_s1 + $0xf8] sm:$0xff]   ;;  %913 = vmatprep.subr.bf16.mxu0 %v1052_v0  ;;  %v1057_v5 = vld [vmem:[%s1520_s1 + $0xf0] sm:$0xff]   ;;  %v1061_v9 = vld [vmem:[%s1520_s1 + $0xe8] sm:$0xff]  }
   0x3   :  { %v1054_v2 = vld [vmem:[%s1520_s1 + $0x38] sm:$0xff]   ;;  %959 = vmatprep.subr.bf16.mxu1 %v1053_v1  ;;  %v1058_v6 = vld [vmem:[%s1520_s1 + $0x30] sm:$0xff]   ;;  %v1062_v10 = vld [vmem:[%s1520_s1 + $0x28] sm:$0xff]  }
   0x4   :  { %v1055_v3 = vld [vmem:[%s1520_s1 + $0xb8] sm:$0xff]   ;;  %914 = vmatpush3.bf16.msra.mxu0 %v1054_v2  ;;  %v1059_v7 = vld [vmem:[%s1520_s1 + $0xb0] sm:$0xff]   ;;  %v1063_v11 = vld [vmem:[%s1520_s1 + $0xa8] sm:$0xff]  }
   0x5   :  { %960 = vmatpush3.bf16.msra.mxu1 %v1055_v3  ;;  %915 = vmatprep.subr.bf16.mxu0 %v1056_v4  ;;  %v1064_v12 = vld [vmem:[%s1520_s1 + $0x60] sm:$0xff]   ;;  %v1068_v16 = vld [vmem:[%s1520_s1 + $0x58] sm:$0xff]   ;;  %v1072_v20 = vld [vmem:[%s1520_s1 + $0x50] sm:$0xff]  }
   0x6   :  { %961 = vmatprep.subr.bf16.mxu1 %v1057_v5  ;;  %v1065_v13 = vld [vmem:[%s1520_s1 + $0xe0] sm:$0xff]   ;;  %v1069_v17 = vld [vmem:[%s1520_s1 + $0xd8] sm:$0xff]   ;;  %v1073_v21 = vld [vmem:[%s1520_s1 + $0xd0] sm:$0xff]  }
   0x7   :  { %v1066_v14 = vld [vmem:[%s1520_s1 + $0x20] sm:$0xff]   ;;  %v1070_v18 = vld [vmem:[%s1520_s1 + $0x18] sm:$0xff]   ;;  %v1074_v22 = vld [vmem:[%s1520_s1 + $0x10] sm:$0xff]  }
   0x8   :  { %916 = vmatpush3.bf16.msra.mxu0 %v1058_v6  ;;  %v1067_v15 = vld [vmem:[%s1520_s1 + $0xa0] sm:$0xff]   ;;  %v1071_v19 = vld [vmem:[%s1520_s1 + $0x98] sm:$0xff]   ;;  %v1075_v23 = vld [vmem:[%s1520_s1 + $0x90] sm:$0xff]  }
   0x9   :  { %962 = vmatpush3.bf16.msra.mxu1 %v1059_v7  ;;  %917 = vmatprep.subr.bf16.mxu0 %v1060_v8  ;;  %v1076_v24 = vld [vmem:[%s1520_s1 + $0x48] sm:$0xff]   ;;  %v1080_v28 = vld [vmem:[%s1520_s1 + $0x40] sm:$0xff]   ;;  %v1090_v37 = vld [vmem:[%s1520_s1 + $0x118] sm:$0xff]  }
   0xa   :  { %963 = vmatprep.subr.bf16.mxu1 %v1061_v9  ;;  %v1077_v25 = vld [vmem:[%s1520_s1 + $0xc8] sm:$0xff]   ;;  %v1081_v29 = vld [vmem:[%s1520_s1 + $0xc0] sm:$0xff]   ;;  %v1097_v40 = vld [vmem:[%s1520_s1 + $0x110] sm:$0xff]  }
   0xb   :  { %v1078_v26 = vld [vmem:[%s1520_s1 + $0x8] sm:$0xff]   ;;  %v1082_v30 = vld [vmem:[%s1520_s1] sm:$0xff]   ;;  %v1100_v44 = vld [vmem:[%s1521_s0 + $0x5c] ss:$20 sps:$4 sm:$0xff]  }
   0xc   :  { %918 = vmatpush3.bf16.msra.mxu0 %v1062_v10  ;;  %v1079_v27 = vld [vmem:[%s1520_s1 + $0x88] sm:$0xff]   ;;  %v1083_v31 = vld [vmem:[%s1520_s1 + $0x80] sm:$0xff]   ;;  %v1105_v49 = vld [vmem:[%s1521_s0 + $0x7c] ss:$20 sps:$4 sm:$0xff]  }
   0xd   :  { %964 = vmatpush3.bf16.msra.mxu1 %v1063_v11  ;;  %919 = vmatprep.subr.bf16.mxu0 %v1064_v12  ;;  %v1084_v32 = vld [vmem:[%s1521_s0] ss:$20 sps:$4 sm:$0xff]   ;;  %v1086_v33 = vld [vmem:[%s1521_s0 + $0x4] ss:$20 sps:$4 sm:$0xff]   ;;  %v1087_v35 = vld [vmem:[%s1521_s0 + $0x8] ss:$20 sps:$4 sm:$0xff]  }
   0xe   :  { %965 = vmatprep.subr.bf16.mxu1 %v1065_v13  ;;  %v1089_v36 = vld [vmem:[%s1521_s0 + $0xc] ss:$20 sps:$4 sm:$0xff]   ;;  %512 = vmatprep.mubr.bf16.mxu0 %v1086_v33  ;;  %v1093_v39 = vld [vmem:[%s1521_s0 + $0x34] ss:$20 sps:$4 sm:$0xff]   ;;  %v1096_v42 = vld [vmem:[%s1521_s0 + $0x30] ss:$20 sps:$4 sm:$0xff]  }
   0xf   :  { %585 = vmatprep.mubr.bf16.mxu1 %v1089_v36  ;;  %v1091_v38 = vld [vmem:[%s1521_s0 + $0x2c] ss:$20 sps:$4 sm:$0xff]   ;;  %v1095_v41 = vld [vmem:[%s1521_s0 + $0x28] ss:$20 sps:$4 sm:$0xff]   ;;  %v1102_v46 = vld [vmem:[%s1521_s0 + $0x50] ss:$20 sps:$4 sm:$0xff]  }
  0x10   :  { %920 = vmatpush3.bf16.msra.mxu0 %v1066_v14  ;;  %v1098_v43 = vld [vmem:[%s1521_s0 + $0x54] ss:$20 sps:$4 sm:$0xff]   ;;  %v1103_v47 = vld [vmem:[%s1521_s0 + $0x58] ss:$20 sps:$4 sm:$0xff]   ;;  %v1115_v48 = vld [vmem:[%s1520_s1 + $0x100] sm:$0xff]  }
  0x11   :  { %966 = vmatpush3.bf16.msra.mxu1 %v1067_v15  ;;  %921 = vmatprep.subr.bf16.mxu0 %v1068_v16  ;;  %v1104_v45 = vld [vmem:[%s1520_s1 + $0x108] sm:$0xff]   ;;  %v1107_v50 = vld [vmem:[%s1521_s0 + $0x84] ss:$20 sps:$4 sm:$0xff]   ;;  %v1110_v52 = vld [vmem:[%s1521_s0 + $0x80] ss:$20 sps:$4 sm:$0xff]  }
  0x12   :  { %967 = vmatprep.subr.bf16.mxu1 %v1069_v17  ;;  %v1109_v51 = vld [vmem:[%s1521_s0 + $0x78] ss:$20 sps:$4 sm:$0xff]   ;;  %v1116_v55 = vld [vmem:[%s1521_s0 + $0xa0] ss:$20 sps:$4 sm:$0xff]   ;;  %v1117_v56 = vld [vmem:[%s1521_s0 + $0xa8] ss:$20 sps:$4 sm:$0xff]  }
  0x13   :  { %v1111_v53 = vld [vmem:[%s1521_s0 + $0xa4] ss:$20 sps:$4 sm:$0xff]   ;;  %v1113_v54 = vld [vmem:[%s1521_s0 + $0xac] ss:$20 sps:$4 sm:$0xff]   ;;  %v1119_v58 = vld [vmem:[%s1521_s0 + $0x88] ss:$20 sps:$4 sm:$0xff]  }
  0x14   :  { %922 = vmatpush3.bf16.msra.mxu0 %v1070_v18  ;;  %v1118_v57 = vld [vmem:[%s1521_s0 + $0x10] ss:$20 sps:$4 sm:$0xff]   ;;  %v1120_v59 = vld [vmem:[%s1521_s0 + $0x38] ss:$20 sps:$4 sm:$0xff]   ;;  %v1122_v61 = vld [vmem:[%s1521_s0 + $0x60] ss:$20 sps:$4 sm:$0xff]  }
  0x15   :  { %968 = vmatpush3.bf16.msra.mxu1 %v1071_v19  ;;  %923 = vmatprep.subr.bf16.mxu0 %v1072_v20  ;;  %v1121_v60 = vld [vmem:[%s1521_s0 + $0xb0] ss:$20 sps:$4 sm:$0xff]  }
  0x16   :  { %969 = vmatprep.subr.bf16.mxu1 %v1073_v21 }
  0x18   :  { %924 = vmatpush3.bf16.msra.mxu0 %v1074_v22 }
  0x19   :  { %970 = vmatpush3.bf16.msra.mxu1 %v1075_v23  ;;  %925 = vmatprep.subr.bf16.mxu0 %v1076_v24 }
  0x1a   :  { %971 = vmatprep.subr.bf16.mxu1 %v1077_v25 }
  0x1c   :  { %926 = vmatpush3.bf16.msra.mxu0 %v1078_v26 }
  0x1d   :  { %972 = vmatpush3.bf16.msra.mxu1 %v1079_v27  ;;  %927 = vmatprep.subr.bf16.mxu0 %v1080_v28 }
  0x1e   :  { %973 = vmatprep.subr.bf16.mxu1 %v1081_v29 }
  0x20   :  { %928 = vmatpush3.bf16.msra.mxu0 %v1082_v30 }
  0x21   :  { %974 = vmatpush3.bf16.msra.mxu1 %v1083_v31  ;;  %1014 = vmatprep.subr.bf16.mxu0 %v1125_v34 }
  0x22   :  { %1042 = vmatprep.subr.bf16.mxu1 %v1125_v34 }
  0x23   :  { %513 = vmatmul.mubr.bf16.vlgmr.msra.gmra.mxu0 %v1084_v32 }
  0x24   :  { %586 = vmatmul.mubr.bf16.vlgmr.msra.gmra.mxu1 %v1087_v35  ;;  %1015 = vmatpush3.bf16.msra.mxu0 %v1090_v37 }
  0x25   :  { %520 = vmatprep.mubr.bf16.mxu0 %v1091_v38  ;;  %1016 = vmatprep.subr.bf16.mxu0 %v1125_v34 }
  0x26   :  { %593 = vmatprep.mubr.bf16.mxu1 %v1093_v39  ;;  %1046 = vmatpush3.bf16.msra.mxu1 %v1090_v37 }
  0x27   :  { %1043 = vmatprep.subr.bf16.mxu1 %v1125_v34 }
  0x28   :  { %1017 = vmatpush3.bf16.msra.mxu0 %v1097_v40 }
  0x29   :  { %1018 = vmatprep.subr.bf16.mxu0 %v1125_v34 }
  0x2a   :  { %1047 = vmatpush3.bf16.msra.mxu1 %v1097_v40 }
  0x2b   :  { %521 = vmatmul.mubr.bf16.gmra.mxu0 %v1095_v41  ;;  %1044 = vmatprep.subr.bf16.mxu1 %v1125_v34 }
  0x2c   :  { %594 = vmatmul.mubr.bf16.gmra.mxu1 %v1096_v42  ;;  %528 = vmatprep.mubr.bf16.mxu0 %v1098_v43 }
  0x2d   :  { %601 = vmatprep.mubr.bf16.mxu1 %v1100_v44  ;;  %1019 = vmatpush3.bf16.msra.mxu0 %v1104_v45 }
  0x2e   :  { %1020 = vmatprep.subr.bf16.mxu0 %v1125_v34  ;;  %1048 = vmatpush3.bf16.msra.mxu1 %v1104_v45 }
  0x2f   :  { %1045 = vmatprep.subr.bf16.mxu1 %v1125_v34 }
  0x31   :  { %1021 = vmatpush3.bf16.msra.mxu0 %v1115_v48 }
  0x32   :  { %1049 = vmatpush3.bf16.msra.mxu1 %v1115_v48 }
  0x33   :  { %529 = vmatmul.mubr.bf16.gmra.mxu0 %v1102_v46 }
  0x34   :  { %602 = vmatmul.mubr.bf16.gmra.mxu1 %v1103_v47  ;;  %536 = vmatprep.mubr.bf16.mxu0 %v1105_v49 }
  0x35   :  { %609 = vmatprep.mubr.bf16.mxu1 %v1107_v50 }
  0x3b   :  { %537 = vmatmul.mubr.bf16.gmra.mxu0 %v1109_v51 }
  0x3c   :  { %610 = vmatmul.mubr.bf16.gmra.mxu1 %v1110_v52  ;;  %544 = vmatprep.mubr.bf16.mxu0 %v1111_v53 }
  0x3d   :  { %617 = vmatprep.mubr.bf16.mxu1 %v1113_v54 }
  0x43   :  { %545 = vmatmul.mubr.bf16.gmra.mxu0 %v1116_v55 }
  0x44   :  { %618 = vmatmul.mubr.bf16.gmra.mxu1 %v1117_v56  ;;  %1022 = vmatprep.mubr.msk.bf16.mxu0 %vm1126_vm0, %v1125_v34 }
  0x45   :  { %1034 = vmatprep.mubr.msk.bf16.mxu1 %vm1126_vm0, %v1125_v34 }
  0x4b   :  { %1023 = vmatmul.mubr.msk.bf16.vlgmr.msra.gmra.mxu0 %vm464_vm1, %v1118_v57 }
  0x4c   :  { %1035 = vmatmul.mubr.msk.bf16.vlgmr.msra.gmra.mxu1 %vm464_vm1, %v1119_v58  ;;  %1026 = vmatprep.mubr.msk.bf16.mxu0 %vm1126_vm0, %v1125_v34 }
  0x4d   :  { %1038 = vmatprep.mubr.msk.bf16.mxu1 %vm1126_vm0, %v1125_v34 }
  0x53   :  { %1027 = vmatmul.mubr.msk.bf16.gmra.mxu0 %vm464_vm1, %v1120_v59 }
  0x54   :  { %1039 = vmatmul.mubr.msk.bf16.gmra.mxu1 %vm464_vm1, %v1121_v60  ;;  %1030 = vmatprep.mubr.msk.bf16.mxu0 %vm1126_vm0, %v1125_v34 }
  0x5b   :  { %1031 = vmatmul.mubr.msk.bf16.gmra.mxu0 %vm464_vm1, %v1122_v61 }
  0xe3   :  { %v929_v62 = vpop.f32.mrf.mxu0 }
  0xe4   :  { %v975_v63 = vpop.f32.mrf.mxu1 }
  0xe5   :  { %v930_v0 = vpop.f32.mrf.mxu0 }
  0xe6   :  { %v976_v1 = vpop.f32.mrf.mxu1  ;;  %v931_v42 = vadd.f32 %v930_v0, %v929_v62 }
  0xe7   :  { %v932_v2 = vpop.f32.mrf.mxu0  ;;  %v977_v43 = vadd.f32 %v976_v1, %v975_v63 }
  0xe8   :  { %v978_v3 = vpop.f32.mrf.mxu1 }
  0xe9   :  { %v933_v4 = vpop.f32.mrf.mxu0  ;;  %v588_v51 = vadd.f32 %v977_v43, %v931_v42 }
  0xea   :  { %v979_v5 = vpop.f32.mrf.mxu1  ;;  %v934_v39 = vadd.f32 %v933_v4, %v932_v2 }
  0xeb   :  { %v935_v6 = vpop.f32.mrf.mxu0  ;;  %v980_v40 = vadd.f32 %v979_v5, %v978_v3 }
  0xec   :  { %v981_v7 = vpop.f32.mrf.mxu1 }
  0xed   :  { %v936_v8 = vpop.f32.mrf.mxu0  ;;  %v591_v49 = vadd.f32 %v980_v40, %v934_v39 }
  0xee   :  { %v982_v9 = vpop.f32.mrf.mxu1  ;;  %v937_v45 = vadd.f32 %v936_v8, %v935_v6 }
  0xef   :  { %v938_v10 = vpop.f32.mrf.mxu0  ;;  %v983_v46 = vadd.f32 %v982_v9, %v981_v7 }
  0xf0   :  { %v984_v11 = vpop.f32.mrf.mxu1 }
  0xf1   :  { %v939_v12 = vpop.f32.mrf.mxu0  ;;  %v596_v57 = vadd.f32 %v983_v46, %v937_v45 }
  0xf2   :  { %v985_v13 = vpop.f32.mrf.mxu1  ;;  %v940_v53 = vadd.f32 %v939_v12, %v938_v10 }
  0xf3   :  { %v941_v14 = vpop.f32.mrf.mxu0  ;;  %v986_v54 = vadd.f32 %v985_v13, %v984_v11 }
  0xf4   :  { %v987_v15 = vpop.f32.mrf.mxu1 }
  0xf5   :  { %v942_v16 = vpop.f32.mrf.mxu0  ;;  %v599_v7 = vadd.f32 %v986_v54, %v940_v53 }
  0xf6   :  { %v988_v17 = vpop.f32.mrf.mxu1  ;;  %v943_v59 = vadd.f32 %v942_v16, %v941_v14 }
  0xf7   :  { %v944_v18 = vpop.f32.mrf.mxu0  ;;  %v989_v60 = vadd.f32 %v988_v17, %v987_v15 }
  0xf8   :  { %v990_v19 = vpop.f32.mrf.mxu1 }
  0xf9   :  { %v945_v20 = vpop.f32.mrf.mxu0 }
  0xfa   :  { %v991_v21 = vpop.f32.mrf.mxu1  ;;  %v946_v0 = vadd.f32 %v945_v20, %v944_v18  ;;  %v604_v18 = vadd.f32 %v989_v60, %v943_v59 }
  0xfb   :  { %v947_v22 = vpop.f32.mrf.mxu0  ;;  %v992_v1 = vadd.f32 %v991_v21, %v990_v19 }
  0xfc   :  { %v993_v23 = vpop.f32.mrf.mxu1 }
  0xfd   :  { %v948_v24 = vpop.f32.mrf.mxu0  ;;  %v607_v19 = vadd.f32 %v992_v1, %v946_v0 }
  0xfe   :  { %v994_v25 = vpop.f32.mrf.mxu1  ;;  %v949_v2 = vadd.f32 %v948_v24, %v947_v22 }
  0xff   :  { %v950_v26 = vpop.f32.mrf.mxu0  ;;  %v995_v3 = vadd.f32 %v994_v25, %v993_v23 }
 0x100   :  { %v996_v27 = vpop.f32.mrf.mxu1 }
 0x101   :  { %v951_v28 = vpop.f32.mrf.mxu0  ;;  %v612_v16 = vadd.f32 %v995_v3, %v949_v2 }
 0x102   :  { %v997_v29 = vpop.f32.mrf.mxu1  ;;  %v952_v8 = vadd.f32 %v951_v28, %v950_v26 }
 0x103   :  { %v953_v30 = vpop.f32.mrf.mxu0  ;;  %v998_v9 = vadd.f32 %v997_v29, %v996_v27 }
 0x104   :  { %v999_v31 = vpop.f32.mrf.mxu1 }
 0x105   :  { %v954_v32 = vpop.f32.mrf.mxu0  ;;  %v615_v28 = vadd.f32 %v998_v9, %v952_v8 }
 0x106   :  { %v1000_v33 = vpop.f32.mrf.mxu1  ;;  %v955_v25 = vadd.f32 %v954_v32, %v953_v30 }
 0x107   :  { %v1358_v34 = vpop.f32.mrf.mxu0  ;;  %v1001_v26 = vadd.f32 %v1000_v33, %v999_v31 }
 0x108   :  { %v1360_v35 = vpop.f32.mrf.mxu1 }
 0x109   :  { %v957_v36 = vpop.f32.mrf.mxu0 }
 0x10a   :  { %v1003_v37 = vpop.f32.mrf.mxu1  ;;  %v958_v43 = vadd.f32 %v957_v36, %v1358_v34  ;;  %v620_v34 = vadd.f32 %v1001_v26, %v955_v25 }
 0x10b   :  { %v660_v38 = vpop.f32.mrf.mxu0 }
 0x10c   :  { %v684_v41 = vpop.f32.mrf.mxu1  ;;  %v1364_v61 = vadd.f32 %v660_v38, %v588_v51 }
 0x10d   :  { %v1024_v44 = vpop.f32.mrf.mxu0  ;;  %v1393_v31 = vadd.f32 %v684_v41, %v612_v16 }
 0x10e   :  { %v1036_v47 = vpop.f32.mrf.mxu1  ;;  %v725_v11 = vmul.f32 %v1364_v61, %v1364_v61  ;;  %v699_v20 = vsel %vm464_vm1, %v1364_v61, 0.0  ;;  %v1004_v44 = vadd.f32 %v1003_v37, %v1360_v35 }
 0x10f   :  { %v663_v48 = vpop.f32.mrf.mxu0  ;;  %v710_v0 = vsel %vm464_vm1, %v1393_v31, 0.0 }
 0x110   :  { %v687_v50 = vpop.f32.mrf.mxu1  ;;  %v1362_v55 = vadd.f32 %v663_v48, %v591_v49  ;;  %v735_v38 = vsel %vm464_vm1, %v725_v11, 0.0  ;;  %v623_v41 = vadd.f32 %v1004_v44, %v958_v43 }
 0x111   :  { %v1025_v52 = vpop.f32.mrf.mxu0 }
 0x112   :  { %v1037_v56 = vpop.f32.mrf.mxu1  ;;  %v726_v5 = vmul.f32 %v1362_v55, %v1362_v55  ;;  %v700_v12 = vsel %vm464_vm1, %v1362_v55, 0.0  ;;  %v1400_v52 = vadd.f32 %v687_v50, %v615_v28 }
 0x113   :  { %v668_v58 = vpop.f32.mrf.mxu0  ;;  %v701_v27 = vadd.f32 %v700_v12, %v699_v20  ;;  %v731_v56 = vmul.f32 %v1393_v31, %v1393_v31 }
 0x114   :  { %v1366_v62 = vadd.f32 %v668_v58, %v596_v57  ;;  %v692_v63 = vpop.f32.mrf.mxu1  ;;  %v736_v21 = vsel %vm464_vm1, %v726_v5, 0.0  ;;  %v732_v1 = vmul.f32 %v1400_v52, %v1400_v52 }
 0x115   :  { %v1028_v4 = vpop.f32.mrf.mxu0  ;;  %v737_v45 = vadd.f32 %v736_v21, %v735_v38  ;;  %v1407_v57 = vadd.f32 %v692_v63, %v620_v34  ;;  %v746_v5 = vsel %vm464_vm1, %v731_v56, 0.0 }
 0x116   :  { %v1040_v6 = vpop.f32.mrf.mxu1  ;;  %v727_v13 = vmul.f32 %v1366_v62, %v1366_v62  ;;  %v702_v22 = vsel %vm464_vm1, %v1366_v62, 0.0 }
 0x117   :  { %v671_v10 = vpop.f32.mrf.mxu0  ;;  %v703_v46 = vadd.f32 %v702_v22, %v701_v27  ;;  %v712_v6 = vsel %vm464_vm1, %v1400_v52, 0.0  ;;  %v714_v11 = vsel %vm464_vm1, %v1407_v57, 0.0 }
 0x118   :  { %v1376_v14 = vadd.f32 %v671_v10, %v599_v7  ;;  %v695_v15 = vpop.f32.mrf.mxu1  ;;  %v738_v39 = vsel %vm464_vm1, %v727_v13, 0.0  ;;  %v733_v7 = vmul.f32 %v1407_v57, %v1407_v57  ;;  %v748_v10 = vsel %vm464_vm1, %v732_v1, 0.0 }
 0x119   :  { %v1029_v17 = vpop.f32.mrf.mxu0  ;;  %v739_v48 = vadd.f32 %v738_v39, %v737_v45  ;;  %v1417_v2 = vadd.f32 %v695_v15, %v623_v41 }
 0x11a   :  { %v728_v23 = vmul.f32 %v1376_v14, %v1376_v14  ;;  %v1041_v24 = vpop.f32.mrf.mxu1  ;;  %v704_v40 = vsel %vm464_vm1, %v1376_v14, 0.0  ;;  %v750_v16 = vsel %vm464_vm1, %v733_v7, 0.0 }
 0x11b   :  { %v676_v29 = vpop.f32.mrf.mxu0  ;;  %v705_v49 = vadd.f32 %v704_v40, %v703_v46  ;;  %v734_v12 = vmul.f32 %v1417_v2, %v1417_v2  ;;  %v716_v17 = vsel %vm464_vm1, %v1417_v2, 0.0 }
 0x11c   :  { %v1389_v42 = vadd.f32 %v676_v29, %v604_v18  ;;  %v740_v32 = vsel %vm464_vm1, %v728_v23, 0.0 }
 0x11d   :  { %v1032_v30 = vpop.f32.mrf.mxu0  ;;  %v741_v37 = vadd.f32 %v740_v32, %v739_v48  ;;  %v752_v20 = vsel %vm464_vm1, %v734_v12, 0.0  ;;  %v811_v12 = vld [vmem:[%s1524_s4 + $0x40] sm:$0xff] }
 0x11e   :  { %v706_v33 = vsel %vm464_vm1, %v1389_v42, 0.0  ;;  %v729_v47 = vmul.f32 %v1389_v42, %v1389_v42 }
 0x11f   :  { %v679_v51 = vpop.f32.mrf.mxu0  ;;  %v707_v53 = vadd.f32 %v706_v33, %v705_v49  ;;  %v764_v49 = vld [vmem:[%s1522_s2] sm:$0x1] }
 0x120   :  { %v742_v35 = vsel %vm464_vm1, %v729_v47, 0.0  ;;  %v1403_v36 = vadd.f32 %v679_v51, %v607_v19  ;;  %v772_v47 = vlaneseq }
 0x121   :  { %v1033_v54 = vpop.f32.mrf.mxu0  ;;  %v743_v59 = vadd.f32 %v742_v35, %v741_v37  ;;  %v768_v37 = vld [vmem:[%s1523_s3] sm:$0x1] }
 0x122   :  { %v708_v58 = vsel %vm464_vm1, %v1403_v36, 0.0  ;;  %v730_v50 = vmul.f32 %v1403_v36, %v1403_v36  ;;  %v773_v48 = vshrl.u32 %v772_v47, 7 }
 0x123   :  { %v709_v60 = vadd.f32 %v708_v58, %v707_v53 }
 0x124   :  { %v744_v3 = vsel %vm464_vm1, %v730_v50, 0.0  ;;  %v774_v51 = vsub.s32 0, %v773_v48 }
 0x125   :  { %v711_v63 = vadd.f32 %v710_v0, %v709_v60  ;;  %v745_v4 = vadd.f32 %v744_v3, %v743_v59  ;;  %v803_v3 = vld [vmem:[%s1524_s4] sm:$0xff] }
 0x127   :  { %v713_v8 = vadd.f32 %v712_v6, %v711_v63  ;;  %v747_v9 = vadd.f32 %v746_v5, %v745_v4  ;;  %v809_v6 = vld [vmem:[%s1524_s4 + $0x30] sm:$0xff] }
 0x129   :  { %v715_v13 = vadd.f32 %v714_v11, %v713_v8  ;;  %v749_v15 = vadd.f32 %v748_v10, %v747_v9  ;;  %v810_v11 = vld [vmem:[%s1524_s4 + $0x38] sm:$0xff] }
 0x12b   :  { %v717_v18 = vadd.f32 %v716_v17, %v715_v13  ;;  %v751_v19 = vadd.f32 %v750_v16, %v749_v15  ;;  %v812_v13 = vld [vmem:[%s1524_s4 + $0x48] sm:$0xff] }
 0x12d   :  { %v718_v21 = vrot.slane %v717_v18, 4  ;;  %v753_v22 = vadd.f32 %v752_v20, %v751_v19 }
 0x12f   :  { %v719_v23 = vadd.f32 %v718_v21, %v717_v18  ;;  %v754_v24 = vrot.slane %v753_v22, 4 }
 0x131   :  { %v720_v25 = vrot.slane %v719_v23, 2  ;;  %v755_v26 = vadd.f32 %v754_v24, %v753_v22 }
 0x133   :  { %v721_v27 = vadd.f32 %v720_v25, %v719_v23  ;;  %v756_v28 = vrot.slane %v755_v26, 2 }
 0x135   :  { %v722_v29 = vrot.slane %v721_v27, 1  ;;  %v757_v38 = vadd.f32 %v756_v28, %v755_v26 }
 0x137   :  { %v723_v39 = vadd.f32 %v722_v29, %v721_v27  ;;  %v758_v40 = vrot.slane %v757_v38, 1 }
 0x139   :  { %v724_v43 = vmul.f32 0.013888889, %v723_v39  ;;  %v759_v44 = vadd.f32 %v758_v40, %v757_v38 }
 0x13b   :  { %v760_v45 = vmul.f32 0.013888889, %v759_v44  ;;  %v761_v46 = vmul.f32 %v724_v43, %v724_v43 }
 0x13d   :  { %v762_v30 = vsub.f32 %v760_v45, %v761_v46 }
 0x13f   :  { %v763_v32 = vmax.f32 %v762_v30, 0.0 }
 0x141   :  { %v765_v33 = vadd.f32 1e-05, %v763_v32 }
 0x143   :  { %1123 = vrsqrt.f32 %v765_v33 }
 0x150   :  { %v1124_v34 = vpop.eup %1123 }
 0x151   :  { %v767_v35 = vmul.f32 %v1124_v34, %v764_v49 }
 0x153   :  { %v769_v41 = vmul.f32 %v767_v35, %v724_v43  ;;  %v775_v53 = vrot.slane %v767_v35, %v774_v51 }
 0x155   :  { %v770_v54 = vsub.f32 %v768_v37, %v769_v41  ;;  %v777_v56 = vmul.f32 %v775_v53, %v1364_v61  ;;  %v778_v58 = vmul.f32 %v775_v53, %v1362_v55  ;;  %v779_v50 = vmul.f32 %v775_v53, %v1366_v62  ;;  %v804_v62 = vld [vmem:[%s1524_s4 + $0x8] sm:$0xff] }
 0x156   :  { %v780_v59 = vmul.f32 %v775_v53, %v1376_v14  ;;  %v781_v60 = vmul.f32 %v775_v53, %v1389_v42  ;;  %v782_v0 = vmul.f32 %v775_v53, %v1403_v36  ;;  %v783_v63 = vmul.f32 %v775_v53, %v1393_v31  ;;  %v805_v14 = vld [vmem:[%s1524_s4 + $0x10] sm:$0xff]  ;;  %v806_v42 = vld [vmem:[%s1524_s4 + $0x18] sm:$0xff] }
 0x157   :  { %v791_v1 = vrot.slane %v770_v54, %v774_v51  ;;  %v784_v4 = vmul.f32 %v775_v53, %v1400_v52  ;;  %v785_v61 = vmul.f32 %v775_v53, %v1407_v57  ;;  %v786_v55 = vmul.f32 %v775_v53, %v1417_v2  ;;  %v807_v57 = vld [vmem:[%s1524_s4 + $0x20] sm:$0xff]  ;;  %v808_v2 = vld [vmem:[%s1524_s4 + $0x28] sm:$0xff] }
 0x159   :  { %v793_v36 = vadd.f32 %v791_v1, %v777_v56  ;;  %v794_v31 = vadd.f32 %v791_v1, %v778_v58  ;;  %v795_v5 = vadd.f32 %v791_v1, %v779_v50  ;;  %v796_v52 = vadd.f32 %v791_v1, %v780_v59 }
 0x15a   :  { %v797_v7 = vadd.f32 %v791_v1, %v781_v60  ;;  %v798_v8 = vadd.f32 %v791_v1, %v782_v0  ;;  %v799_v9 = vadd.f32 %v791_v1, %v783_v63  ;;  %v800_v10 = vadd.f32 %v791_v1, %v784_v4 }
 0x15b   :  { %v801_v15 = vadd.f32 %v791_v1, %v785_v61  ;;  %v802_v16 = vadd.f32 %v791_v1, %v786_v55  ;;  %v813_v17 = vadd.f32 %v803_v3, %v793_v36  ;;  %v814_v18 = vadd.f32 %v804_v62, %v794_v31 }
 0x15c   :  { %v815_v19 = vadd.f32 %v805_v14, %v795_v5  ;;  %v816_v20 = vadd.f32 %v806_v42, %v796_v52  ;;  %v817_v21 = vadd.f32 %v807_v57, %v797_v7  ;;  %v818_v22 = vadd.f32 %v808_v2, %v798_v8 }
 0x15d   :  { %v819_v23 = vadd.f32 %v809_v6, %v799_v9  ;;  %v820_v24 = vadd.f32 %v810_v11, %v800_v10  ;;  %v821_v25 = vadd.f32 %v811_v12, %v801_v15  ;;  %v822_v26 = vadd.f32 %v812_v13, %v802_v16 }
 0x15e   :  { %v823_v27 = vmax.f32 %v813_v17, 0.0  ;;  %v824_v28 = vmax.f32 %v814_v18, 0.0  ;;  %v825_v29 = vmax.f32 %v815_v19, 0.0  ;;  %v826_v38 = vmax.f32 %v816_v20, 0.0 }
 0x15f   :  { %v827_v39 = vmax.f32 %v817_v21, 0.0  ;;  %v828_v40 = vmax.f32 %v818_v22, 0.0  ;;  %v829_v43 = vmax.f32 %v819_v23, 0.0  ;;  %v830_v44 = vmax.f32 %v820_v24, 0.0 }
 0x160   :  { %v831_v45 = vmax.f32 %v821_v25, 0.0  ;;  %v832_v46 = vmax.f32 %v822_v26, 0.0  ;;  %833 = vst.msk [vmem:[%s1525_s5] sm:$0xff] %vm464_vm1, %v823_v27  ;;  %834 = vst.msk [vmem:[%s1525_s5 + $0x8] sm:$0xff] %vm464_vm1, %v824_v28 }
 0x161   :  { %835 = vst.msk [vmem:[%s1525_s5 + $0x10] sm:$0xff] %vm464_vm1, %v825_v29  ;;  %836 = vst.msk [vmem:[%s1525_s5 + $0x18] sm:$0xff] %vm464_vm1, %v826_v38 }
 0x162   :  { %837 = vst.msk [vmem:[%s1525_s5 + $0x20] sm:$0xff] %vm464_vm1, %v827_v39  ;;  %838 = vst.msk [vmem:[%s1525_s5 + $0x28] sm:$0xff] %vm464_vm1, %v828_v40 }
 0x163   :  { %839 = vst.msk [vmem:[%s1525_s5 + $0x30] sm:$0xff] %vm464_vm1, %v829_v43  ;;  %840 = vst.msk [vmem:[%s1525_s5 + $0x38] sm:$0xff] %vm464_vm1, %v830_v44 }
 0x164   :  { %841 = vst.msk [vmem:[%s1525_s5 + $0x40] sm:$0xff] %vm464_vm1, %v831_v45  ;;  %842 = vst.msk [vmem:[%s1525_s5 + $0x48] sm:$0xff] %vm464_vm1, %v832_v46 }

// kernel: resnet_forward.14
= control target key start
LH: loop header
LB: loop body
LE: loop exit
PB: predicated region body
PF: predicated region fallthrough
CT: control target
= control target key end

     0   :  { %vm368_vm0 = vcmask 523264   ;;  %s943_s1 = inlined_call_operand.vmem [shape: bf16[576,128], index: 1, kind: input, shape index: {}]   ;;  %s944_s0 = inlined_call_operand.vmem [shape: bf16[32,576], index: 0, kind: input, shape index: {}]   ;;  %s945_s2 = inlined_call_operand.vmem [shape: f32[1,128], index: 2, kind: input, shape index: {}]   ;;  %s946_s3 = inlined_call_operand.vmem [shape: f32[1,128], index: 3, kind: input, shape index: {}]   ;;  %s947_s4 = inlined_call_operand.vmem [shape: f32[32,128], index: 4, kind: output, shape index: {}]  }
   0x1   :  { %v710_v0 = vld [vmem:[%s943_s1 + $0x78] sm:$0xff]   ;;  %v714_v4 = vld [vmem:[%s943_s1 + $0x70] sm:$0xff]   ;;  %v718_v8 = vld [vmem:[%s943_s1 + $0x68] sm:$0xff]  }
   0x2   :  { %v711_v1 = vld [vmem:[%s943_s1 + $0xf8] sm:$0xff]   ;;  %636 = vmatprep.subr.bf16.mxu0 %v710_v0  ;;  %v715_v5 = vld [vmem:[%s943_s1 + $0xf0] sm:$0xff]   ;;  %v719_v9 = vld [vmem:[%s943_s1 + $0xe8] sm:$0xff]  }
   0x3   :  { %v712_v2 = vld [vmem:[%s943_s1 + $0x38] sm:$0xff]   ;;  %664 = vmatprep.subr.bf16.mxu1 %v711_v1  ;;  %v716_v6 = vld [vmem:[%s943_s1 + $0x30] sm:$0xff]   ;;  %v720_v10 = vld [vmem:[%s943_s1 + $0x28] sm:$0xff]  }
   0x4   :  { %v713_v3 = vld [vmem:[%s943_s1 + $0xb8] sm:$0xff]   ;;  %637 = vmatpush3.bf16.msra.mxu0 %v712_v2  ;;  %v717_v7 = vld [vmem:[%s943_s1 + $0xb0] sm:$0xff]   ;;  %v721_v11 = vld [vmem:[%s943_s1 + $0xa8] sm:$0xff]  }
   0x5   :  { %665 = vmatpush3.bf16.msra.mxu1 %v713_v3  ;;  %638 = vmatprep.subr.bf16.mxu0 %v714_v4  ;;  %v722_v12 = vld [vmem:[%s943_s1 + $0x60] sm:$0xff]   ;;  %v726_v16 = vld [vmem:[%s943_s1 + $0x58] sm:$0xff]   ;;  %v730_v20 = vld [vmem:[%s943_s1 + $0x50] sm:$0xff]  }
   0x6   :  { %666 = vmatprep.subr.bf16.mxu1 %v715_v5  ;;  %v723_v13 = vld [vmem:[%s943_s1 + $0xe0] sm:$0xff]   ;;  %v727_v17 = vld [vmem:[%s943_s1 + $0xd8] sm:$0xff]   ;;  %v731_v21 = vld [vmem:[%s943_s1 + $0xd0] sm:$0xff]  }
   0x7   :  { %v724_v14 = vld [vmem:[%s943_s1 + $0x20] sm:$0xff]   ;;  %v728_v18 = vld [vmem:[%s943_s1 + $0x18] sm:$0xff]   ;;  %v732_v22 = vld [vmem:[%s943_s1 + $0x10] sm:$0xff]  }
   0x8   :  { %639 = vmatpush3.bf16.msra.mxu0 %v716_v6  ;;  %v725_v15 = vld [vmem:[%s943_s1 + $0xa0] sm:$0xff]   ;;  %v729_v19 = vld [vmem:[%s943_s1 + $0x98] sm:$0xff]   ;;  %v733_v23 = vld [vmem:[%s943_s1 + $0x90] sm:$0xff]  }
   0x9   :  { %667 = vmatpush3.bf16.msra.mxu1 %v717_v7  ;;  %640 = vmatprep.subr.bf16.mxu0 %v718_v8  ;;  %v734_v24 = vld [vmem:[%s943_s1 + $0x48] sm:$0xff]   ;;  %v738_v28 = vld [vmem:[%s943_s1 + $0x40] sm:$0xff]   ;;  %v748_v36 = vld [vmem:[%s943_s1 + $0x118] sm:$0xff]  }
   0xa   :  { %668 = vmatprep.subr.bf16.mxu1 %v719_v9  ;;  %v735_v25 = vld [vmem:[%s943_s1 + $0xc8] sm:$0xff]   ;;  %v739_v29 = vld [vmem:[%s943_s1 + $0xc0] sm:$0xff]   ;;  %v749_v37 = vld [vmem:[%s943_s1 + $0x110] sm:$0xff]  }
   0xb   :  { %v736_v26 = vld [vmem:[%s943_s1 + $0x8] sm:$0xff]   ;;  %v740_v30 = vld [vmem:[%s943_s1] sm:$0xff]  }
   0xc   :  { %641 = vmatpush3.bf16.msra.mxu0 %v720_v10  ;;  %v737_v27 = vld [vmem:[%s943_s1 + $0x88] sm:$0xff]   ;;  %v741_v31 = vld [vmem:[%s943_s1 + $0x80] sm:$0xff]  }
   0xd   :  { %669 = vmatpush3.bf16.msra.mxu1 %v721_v11  ;;  %642 = vmatprep.subr.bf16.mxu0 %v722_v12  ;;  %v742_v32 = vld [vmem:[%s944_s0] ss:$20 sps:$4 sm:$0xff]   ;;  %v744_v33 = vld [vmem:[%s944_s0 + $0x4] ss:$20 sps:$4 sm:$0xff]   ;;  %v745_v34 = vld [vmem:[%s944_s0 + $0x8] ss:$20 sps:$4 sm:$0xff]  }
   0xe   :  { %670 = vmatprep.subr.bf16.mxu1 %v723_v13  ;;  %v747_v35 = vld [vmem:[%s944_s0 + $0xc] ss:$20 sps:$4 sm:$0xff]   ;;  %407 = vmatprep.mubr.bf16.mxu0 %v744_v33  ;;  %v752_v39 = vld [vmem:[%s944_s0 + $0x34] ss:$20 sps:$4 sm:$0xff]   ;;  %v755_v42 = vld [vmem:[%s944_s0 + $0x30] ss:$20 sps:$4 sm:$0xff]  }
   0xf   :  { %456 = vmatprep.mubr.bf16.mxu1 %v747_v35  ;;  %v750_v38 = vld [vmem:[%s944_s0 + $0x2c] ss:$20 sps:$4 sm:$0xff]   ;;  %v754_v40 = vld [vmem:[%s944_s0 + $0x28] ss:$20 sps:$4 sm:$0xff]   ;;  %v758_v43 = vld [vmem:[%s944_s0 + $0x10] ss:$20 sps:$4 sm:$0xff]  }
  0x10   :  { %643 = vmatpush3.bf16.msra.mxu0 %v724_v14  ;;  %v756_v41 = vld [vmem:[%s943_s1 + $0x108] sm:$0xff]   ;;  %v757_v44 = vld [vmem:[%s943_s1 + $0x100] sm:$0xff]  }
  0x11   :  { %671 = vmatpush3.bf16.msra.mxu1 %v725_v15  ;;  %644 = vmatprep.subr.bf16.mxu0 %v726_v16  ;;  %v759_v45 = vld [vmem:[%s944_s0 + $0x38] ss:$20 sps:$4 sm:$0xff]  }
  0x12   :  { %672 = vmatprep.subr.bf16.mxu1 %v727_v17 }
  0x14   :  { %645 = vmatpush3.bf16.msra.mxu0 %v728_v18 }
  0x15   :  { %673 = vmatpush3.bf16.msra.mxu1 %v729_v19  ;;  %646 = vmatprep.subr.bf16.mxu0 %v730_v20 }
  0x16   :  { %674 = vmatprep.subr.bf16.mxu1 %v731_v21 }
  0x18   :  { %647 = vmatpush3.bf16.msra.mxu0 %v732_v22 }
  0x19   :  { %675 = vmatpush3.bf16.msra.mxu1 %v733_v23  ;;  %648 = vmatprep.subr.bf16.mxu0 %v734_v24 }
  0x1a   :  { %676 = vmatprep.subr.bf16.mxu1 %v735_v25 }
  0x1c   :  { %649 = vmatpush3.bf16.msra.mxu0 %v736_v26 }
  0x1d   :  { %677 = vmatpush3.bf16.msra.mxu1 %v737_v27  ;;  %650 = vmatprep.subr.bf16.mxu0 %v738_v28 }
  0x1e   :  { %678 = vmatprep.subr.bf16.mxu1 %v739_v29 }
  0x20   :  { %651 = vmatpush3.bf16.msra.mxu0 %v740_v30 }
  0x21   :  { %679 = vmatpush3.bf16.msra.mxu1 %v741_v31  ;;  %698 = vmatprep.subr.bf16.mxu0 %v748_v36 }
  0x23   :  { %408 = vmatmul.mubr.bf16.vlgmr.msra.gmra.mxu0 %v742_v32 }
  0x24   :  { %457 = vmatmul.mubr.bf16.vlgmr.msra.gmra.mxu1 %v745_v34  ;;  %699 = vmatpush3.bf16.msra.mxu0 %v748_v36 }
  0x25   :  { %700 = vmatprep.subr.bf16.mxu0 %v749_v37  ;;  %415 = vmatprep.mubr.bf16.mxu0 %v750_v38 }
  0x26   :  { %464 = vmatprep.mubr.bf16.mxu1 %v752_v39 }
  0x28   :  { %701 = vmatpush3.bf16.msra.mxu0 %v749_v37 }
  0x29   :  { %702 = vmatprep.subr.bf16.mxu0 %v756_v41 }
  0x2b   :  { %416 = vmatmul.mubr.bf16.gmra.mxu0 %v754_v40 }
  0x2c   :  { %465 = vmatmul.mubr.bf16.gmra.mxu1 %v755_v42  ;;  %706 = vmatprep.mubr.msk.bf16.mxu0 %vm368_vm0, %v758_v43 }
  0x2d   :  { %703 = vmatpush3.bf16.msra.mxu0 %v756_v41 }
  0x2e   :  { %704 = vmatprep.subr.bf16.mxu0 %v757_v44 }
  0x31   :  { %705 = vmatpush3.bf16.msra.mxu0 %v757_v44 }
  0x34   :  { %707 = vmatmul.mubr.msk.bf16.vlgmr.msra.gmra.mxu0 %vm368_vm0, %v759_v45 }
  0xe3   :  { %v652_v46 = vpop.f32.mrf.mxu0 }
  0xe4   :  { %v680_v47 = vpop.f32.mrf.mxu1 }
  0xe5   :  { %v653_v48 = vpop.f32.mrf.mxu0 }
  0xe6   :  { %v681_v49 = vpop.f32.mrf.mxu1  ;;  %v654_v61 = vadd.f32 %v653_v48, %v652_v46  ;;  %v557_v46 = vlaneseq  ;;  %v549_v48 = vld [vmem:[%s945_s2] sm:$0x1] }
  0xe7   :  { %v655_v50 = vpop.f32.mrf.mxu0  ;;  %v682_v62 = vadd.f32 %v681_v49, %v680_v47 }
  0xe8   :  { %v683_v51 = vpop.f32.mrf.mxu1  ;;  %v558_v47 = vshrl.u32 %v557_v46, 7 }
  0xe9   :  { %v656_v52 = vpop.f32.mrf.mxu0  ;;  %v459_v8 = vadd.f32 %v682_v62, %v654_v61 }
  0xea   :  { %v684_v53 = vpop.f32.mrf.mxu1  ;;  %v657_v1 = vadd.f32 %v656_v52, %v655_v50  ;;  %v559_v49 = vsub.s32 0, %v558_v47  ;;  %v553_v52 = vld [vmem:[%s946_s3] sm:$0x1] }
  0xeb   :  { %v658_v54 = vpop.f32.mrf.mxu0  ;;  %v685_v2 = vadd.f32 %v684_v53, %v683_v51 }
  0xec   :  { %v686_v55 = vpop.f32.mrf.mxu1 }
  0xed   :  { %v659_v56 = vpop.f32.mrf.mxu0  ;;  %v462_v12 = vadd.f32 %v685_v2, %v657_v1 }
  0xee   :  { %v687_v57 = vpop.f32.mrf.mxu1  ;;  %v660_v3 = vadd.f32 %v659_v56, %v658_v54 }
  0xef   :  { %v661_v58 = vpop.f32.mrf.mxu0  ;;  %v688_v4 = vadd.f32 %v687_v57, %v686_v55 }
  0xf0   :  { %v689_v59 = vpop.f32.mrf.mxu1 }
  0xf1   :  { %v662_v60 = vpop.f32.mrf.mxu0  ;;  %v467_v10 = vadd.f32 %v688_v4, %v660_v3 }
  0xf2   :  { %v690_v63 = vpop.f32.mrf.mxu1  ;;  %v663_v6 = vadd.f32 %v662_v60, %v661_v58 }
  0xf3   :  { %v691_v7 = vadd.f32 %v690_v63, %v689_v59 }
  0xf4   :  { %v708_v0 = vpop.f32.mrf.mxu0 }
  0xf5   :  { %v516_v14 = vadd.f32 %v708_v0, %v467_v10  ;;  %v470_v15 = vadd.f32 %v691_v7, %v663_v6 }
  0xf6   :  { %v507_v5 = vpop.f32.mrf.mxu0 }
  0xf7   :  { %v508_v11 = vadd.f32 %v507_v5, %v459_v8  ;;  %v534_v21 = vmul.f32 %v516_v14, %v516_v14 }
  0xf8   :  { %v709_v9 = vpop.f32.mrf.mxu0 }
  0xf9   :  { %v532_v17 = vmul.f32 %v508_v11, %v508_v11  ;;  %v519_v18 = vadd.f32 %v709_v9, %v470_v15 }
  0xfa   :  { %v510_v13 = vpop.f32.mrf.mxu0 }
  0xfb   :  { %v511_v16 = vadd.f32 %v510_v13, %v462_v12  ;;  %v535_v24 = vmul.f32 %v519_v18, %v519_v18 }
  0xfd   :  { %v522_v19 = vadd.f32 %v511_v16, %v508_v11  ;;  %v533_v20 = vmul.f32 %v511_v16, %v511_v16 }
  0xff   :  { %v523_v22 = vadd.f32 %v522_v19, %v516_v14  ;;  %v536_v23 = vadd.f32 %v533_v20, %v532_v17 }
 0x101   :  { %v524_v25 = vadd.f32 %v523_v22, %v519_v18  ;;  %v537_v26 = vadd.f32 %v536_v23, %v534_v21 }
 0x103   :  { %v525_v27 = vrot.slane %v524_v25, 4  ;;  %v538_v28 = vadd.f32 %v537_v26, %v535_v24 }
 0x105   :  { %v526_v29 = vadd.f32 %v525_v27, %v524_v25  ;;  %v539_v30 = vrot.slane %v538_v28, 4 }
 0x107   :  { %v527_v31 = vrot.slane %v526_v29, 2  ;;  %v540_v32 = vadd.f32 %v539_v30, %v538_v28 }
 0x109   :  { %v528_v33 = vadd.f32 %v527_v31, %v526_v29  ;;  %v541_v34 = vrot.slane %v540_v32, 2 }
 0x10b   :  { %v529_v35 = vrot.slane %v528_v33, 1  ;;  %v542_v36 = vadd.f32 %v541_v34, %v540_v32 }
 0x10d   :  { %v530_v37 = vadd.f32 %v529_v35, %v528_v33  ;;  %v543_v38 = vrot.slane %v542_v36, 1 }
 0x10f   :  { %v531_v39 = vmul.f32 0.055555556, %v530_v37  ;;  %v544_v40 = vadd.f32 %v543_v38, %v542_v36 }
 0x111   :  { %v545_v41 = vmul.f32 0.055555556, %v544_v40  ;;  %v546_v42 = vmul.f32 %v531_v39, %v531_v39 }
 0x113   :  { %v547_v43 = vsub.f32 %v545_v41, %v546_v42 }
 0x115   :  { %v548_v44 = vmax.f32 %v547_v43, 0.0 }
 0x117   :  { %v550_v45 = vadd.f32 1e-05, %v548_v44 }
 0x119   :  { %760 = vrsqrt.f32 %v550_v45 }
 0x126   :  { %v761_v50 = vpop.eup %760 }
 0x127   :  { %v552_v51 = vmul.f32 %v761_v50, %v549_v48 }
 0x129   :  { %v554_v53 = vmul.f32 %v552_v51, %v531_v39  ;;  %v560_v54 = vrot.slane %v552_v51, %v559_v49 }
 0x12b   :  { %v555_v55 = vsub.f32 %v553_v52, %v554_v53  ;;  %v562_v56 = vmul.f32 %v560_v54, %v508_v11  ;;  %v563_v57 = vmul.f32 %v560_v54, %v511_v16  ;;  %v564_v58 = vmul.f32 %v560_v54, %v516_v14 }
 0x12c   :  { %v565_v59 = vmul.f32 %v560_v54, %v519_v18 }
 0x12d   :  { %v570_v60 = vrot.slane %v555_v55, %v559_v49 }
 0x12f   :  { %v572_v61 = vadd.f32 %v570_v60, %v562_v56  ;;  %v573_v62 = vadd.f32 %v570_v60, %v563_v57  ;;  %v574_v63 = vadd.f32 %v570_v60, %v564_v58  ;;  %v575_v0 = vadd.f32 %v570_v60, %v565_v59 }
 0x131   :  { %v576_v1 = vmax.f32 %v572_v61, 0.0  ;;  %v577_v2 = vmax.f32 %v573_v62, 0.0  ;;  %v578_v3 = vmax.f32 %v574_v63, 0.0  ;;  %v579_v4 = vmax.f32 %v575_v0, 0.0 }
 0x133   :  { %580 = vst [vmem:[%s947_s4] sm:$0xff] %v576_v1  ;;  %581 = vst [vmem:[%s947_s4 + $0x8] sm:$0xff] %v577_v2 }
 0x134   :  { %582 = vst [vmem:[%s947_s4 + $0x10] sm:$0xff] %v578_v3  ;;  %583 = vst [vmem:[%s947_s4 + $0x18] sm:$0xff] %v579_v4 }

// kernel: resnet_forward.15
= control target key start
LH: loop header
LB: loop body
LE: loop exit
PB: predicated region body
PF: predicated region fallthrough
CT: control target
= control target key end

     0   :  { %vm64_vm0 = vcmask 523264   ;;  %v155_v38 = vlaneseq  ;;  %s277_s1 = inlined_call_operand.vmem [shape: bf16[64,128], index: 1, kind: input, shape index: {}]   ;;  %s278_s0 = inlined_call_operand.vmem [shape: bf16[32,64], index: 0, kind: input, shape index: {}]   ;;  %s279_s2 = inlined_call_operand.vmem [shape: f32[1,128], index: 2, kind: input, shape index: {}]   ;;  %s280_s3 = inlined_call_operand.vmem [shape: f32[1,128], index: 3, kind: input, shape index: {}]   ;;  %s281_s4 = inlined_call_operand.vmem [shape: f32[32,128], index: 4, kind: output, shape index: {}]  }
   0x1   :  { %v208_v0 = vld [vmem:[%s277_s1 + $0x18] sm:$0xff]   ;;  %v209_v1 = vld [vmem:[%s277_s1 + $0x10] sm:$0xff]   ;;  %v210_v2 = vld [vmem:[%s277_s1 + $0x8] sm:$0xff]  }
   0x2   :  { %196 = vmatprep.subr.bf16.mxu0 %v208_v0  ;;  %v212_v3 = vld [vmem:[%s278_s0] sm:$0xff]   ;;  %v213_v5 = vld [vmem:[%s278_s0 + $0x8] sm:$0xff]   ;;  %v156_v39 = vshrl.u32 %v155_v38, 7 }
   0x3   :  { %197 = vmatpush3.bf16.msra.mxu0 %v208_v0  ;;  %204 = vmatprep.mubr.msk.bf16.mxu0 %vm64_vm0, %v212_v3  ;;  %v211_v4 = vld [vmem:[%s277_s1] sm:$0xff]  }
   0x4   :  { %198 = vmatprep.subr.bf16.mxu0 %v209_v1  ;;  %v147_v40 = vld [vmem:[%s279_s2] sm:$0x1]  ;;  %v157_v41 = vsub.s32 0, %v156_v39 }
   0x5   :  { %v151_v44 = vld [vmem:[%s280_s3] sm:$0x1] }
   0x7   :  { %199 = vmatpush3.bf16.msra.mxu0 %v209_v1 }
   0x8   :  { %200 = vmatprep.subr.bf16.mxu0 %v210_v2 }
   0xb   :  { %201 = vmatpush3.bf16.msra.mxu0 %v210_v2 }
   0xc   :  { %202 = vmatprep.subr.bf16.mxu0 %v211_v4 }
   0xf   :  { %203 = vmatpush3.bf16.msra.mxu0 %v211_v4 }
  0x12   :  { %205 = vmatmul.mubr.msk.bf16.vlgmr.msra.gmra.mxu0 %vm64_vm0, %v213_v5 }
  0xd2   :  { %v206_v6 = vpop.f32.mrf.mxu0 }
  0xd3   :  { %v132_v13 = vmul.f32 %v206_v6, %v206_v6 }
  0xd4   :  { %v105_v7 = vpop.f32.mrf.mxu0 }
  0xd5   :  { %v130_v10 = vmul.f32 %v105_v7, %v105_v7 }
  0xd6   :  { %v207_v8 = vpop.f32.mrf.mxu0 }
  0xd7   :  { %v133_v16 = vmul.f32 %v207_v8, %v207_v8 }
  0xd8   :  { %v108_v9 = vpop.f32.mrf.mxu0 }
  0xd9   :  { %v120_v11 = vadd.f32 %v108_v9, %v105_v7  ;;  %v131_v12 = vmul.f32 %v108_v9, %v108_v9 }
  0xdb   :  { %v121_v14 = vadd.f32 %v206_v6, %v120_v11  ;;  %v134_v15 = vadd.f32 %v131_v12, %v130_v10 }
  0xdd   :  { %v122_v17 = vadd.f32 %v207_v8, %v121_v14  ;;  %v135_v18 = vadd.f32 %v134_v15, %v132_v13 }
  0xdf   :  { %v123_v19 = vrot.slane %v122_v17, 4  ;;  %v136_v20 = vadd.f32 %v135_v18, %v133_v16 }
  0xe1   :  { %v124_v21 = vadd.f32 %v123_v19, %v122_v17  ;;  %v137_v22 = vrot.slane %v136_v20, 4 }
  0xe3   :  { %v125_v23 = vrot.slane %v124_v21, 2  ;;  %v138_v24 = vadd.f32 %v137_v22, %v136_v20 }
  0xe5   :  { %v126_v25 = vadd.f32 %v125_v23, %v124_v21  ;;  %v139_v26 = vrot.slane %v138_v24, 2 }
  0xe7   :  { %v127_v27 = vrot.slane %v126_v25, 1  ;;  %v140_v28 = vadd.f32 %v139_v26, %v138_v24 }
  0xe9   :  { %v128_v29 = vadd.f32 %v127_v27, %v126_v25  ;;  %v141_v30 = vrot.slane %v140_v28, 1 }
  0xeb   :  { %v129_v31 = vmul.f32 0.055555556, %v128_v29  ;;  %v142_v32 = vadd.f32 %v141_v30, %v140_v28 }
  0xed   :  { %v143_v33 = vmul.f32 0.055555556, %v142_v32  ;;  %v144_v34 = vmul.f32 %v129_v31, %v129_v31 }
  0xef   :  { %v145_v35 = vsub.f32 %v143_v33, %v144_v34 }
  0xf1   :  { %v146_v36 = vmax.f32 %v145_v35, 0.0 }
  0xf3   :  { %v148_v37 = vadd.f32 1e-05, %v146_v36 }
  0xf5   :  { %214 = vrsqrt.f32 %v148_v37 }
 0x102   :  { %v215_v42 = vpop.eup %214 }
 0x103   :  { %v150_v43 = vmul.f32 %v215_v42, %v147_v40 }
 0x105   :  { %v152_v45 = vmul.f32 %v150_v43, %v129_v31  ;;  %v158_v46 = vrot.slane %v150_v43, %v157_v41 }
 0x107   :  { %v153_v47 = vsub.f32 %v151_v44, %v152_v45  ;;  %v160_v48 = vmul.f32 %v158_v46, %v105_v7  ;;  %v161_v49 = vmul.f32 %v158_v46, %v108_v9  ;;  %v162_v50 = vmul.f32 %v206_v6, %v158_v46 }
 0x108   :  { %v163_v51 = vmul.f32 %v207_v8, %v158_v46 }
 0x109   :  { %v168_v52 = vrot.slane %v153_v47, %v157_v41 }
 0x10b   :  { %v170_v53 = vadd.f32 %v168_v52, %v160_v48  ;;  %v171_v54 = vadd.f32 %v168_v52, %v161_v49  ;;  %v172_v55 = vadd.f32 %v168_v52, %v162_v50  ;;  %v173_v56 = vadd.f32 %v168_v52, %v163_v51 }
 0x10d   :  { %174 = vst [vmem:[%s281_s4] sm:$0xff] %v170_v53  ;;  %175 = vst [vmem:[%s281_s4 + $0x8] sm:$0xff] %v171_v54 }
 0x10e   :  { %176 = vst [vmem:[%s281_s4 + $0x10] sm:$0xff] %v172_v55  ;;  %177 = vst [vmem:[%s281_s4 + $0x18] sm:$0xff] %v173_v56 }

// kernel: resnet_forward.16
= control target key start
LH: loop header
LB: loop body
LE: loop exit
PB: predicated region body
PF: predicated region fallthrough
CT: control target
= control target key end

     0   :  { %s1690_s1 = inlined_call_operand.vmem [shape: bf16[1152,128], index: 1, kind: input, shape index: {}]   ;;  %s1691_s0 = inlined_call_operand.vmem [shape: bf16[32,1152], index: 0, kind: input, shape index: {}]   ;;  %s1692_s2 = inlined_call_operand.vmem [shape: f32[1,128], index: 2, kind: input, shape index: {}]   ;;  %s1693_s3 = inlined_call_operand.vmem [shape: f32[1,128], index: 3, kind: input, shape index: {}]   ;;  %s1694_s4 = inlined_call_operand.vmem [shape: f32[32,128], index: 4, kind: input, shape index: {}]   ;;  %s1695_s5 = inlined_call_operand.vmem [shape: f32[32,128], index: 5, kind: output, shape index: {}]  }
   0x1   :  { %v1260_v0 = vld [vmem:[%s1690_s1 + $0x78] sm:$0xff]   ;;  %v1264_v4 = vld [vmem:[%s1690_s1 + $0x70] sm:$0xff]   ;;  %v1268_v8 = vld [vmem:[%s1690_s1 + $0x68] sm:$0xff]  }
   0x2   :  { %v1261_v1 = vld [vmem:[%s1690_s1 + $0xf8] sm:$0xff]   ;;  %1118 = vmatprep.subr.bf16.mxu0 %v1260_v0  ;;  %v1265_v5 = vld [vmem:[%s1690_s1 + $0xf0] sm:$0xff]   ;;  %v1269_v9 = vld [vmem:[%s1690_s1 + $0xe8] sm:$0xff]  }
   0x3   :  { %v1262_v2 = vld [vmem:[%s1690_s1 + $0x38] sm:$0xff]   ;;  %1146 = vmatprep.subr.bf16.mxu1 %v1261_v1  ;;  %v1266_v6 = vld [vmem:[%s1690_s1 + $0x30] sm:$0xff]   ;;  %v1270_v10 = vld [vmem:[%s1690_s1 + $0x28] sm:$0xff]  }
   0x4   :  { %v1263_v3 = vld [vmem:[%s1690_s1 + $0xb8] sm:$0xff]   ;;  %1119 = vmatpush3.bf16.msra.mxu0 %v1262_v2  ;;  %v1267_v7 = vld [vmem:[%s1690_s1 + $0xb0] sm:$0xff]   ;;  %v1271_v11 = vld [vmem:[%s1690_s1 + $0xa8] sm:$0xff]  }
   0x5   :  { %1147 = vmatpush3.bf16.msra.mxu1 %v1263_v3  ;;  %1120 = vmatprep.subr.bf16.mxu0 %v1264_v4  ;;  %v1272_v12 = vld [vmem:[%s1690_s1 + $0x60] sm:$0xff]   ;;  %v1276_v16 = vld [vmem:[%s1690_s1 + $0x58] sm:$0xff]   ;;  %v1280_v20 = vld [vmem:[%s1690_s1 + $0x50] sm:$0xff]  }
   0x6   :  { %1148 = vmatprep.subr.bf16.mxu1 %v1265_v5  ;;  %v1273_v13 = vld [vmem:[%s1690_s1 + $0xe0] sm:$0xff]   ;;  %v1277_v17 = vld [vmem:[%s1690_s1 + $0xd8] sm:$0xff]   ;;  %v1281_v21 = vld [vmem:[%s1690_s1 + $0xd0] sm:$0xff]  }
   0x7   :  { %v1274_v14 = vld [vmem:[%s1690_s1 + $0x20] sm:$0xff]   ;;  %v1278_v18 = vld [vmem:[%s1690_s1 + $0x18] sm:$0xff]   ;;  %v1282_v22 = vld [vmem:[%s1690_s1 + $0x10] sm:$0xff]  }
   0x8   :  { %1121 = vmatpush3.bf16.msra.mxu0 %v1266_v6  ;;  %v1275_v15 = vld [vmem:[%s1690_s1 + $0xa0] sm:$0xff]   ;;  %v1279_v19 = vld [vmem:[%s1690_s1 + $0x98] sm:$0xff]   ;;  %v1283_v23 = vld [vmem:[%s1690_s1 + $0x90] sm:$0xff]  }
   0x9   :  { %1149 = vmatpush3.bf16.msra.mxu1 %v1267_v7  ;;  %1122 = vmatprep.subr.bf16.mxu0 %v1268_v8  ;;  %v1284_v24 = vld [vmem:[%s1690_s1 + $0x48] sm:$0xff]   ;;  %v1288_v28 = vld [vmem:[%s1690_s1 + $0x40] sm:$0xff]   ;;  %v1298_v36 = vld [vmem:[%s1690_s1 + $0x178] sm:$0xff]  }
   0xa   :  { %1150 = vmatprep.subr.bf16.mxu1 %v1269_v9  ;;  %v1285_v25 = vld [vmem:[%s1690_s1 + $0xc8] sm:$0xff]   ;;  %v1289_v29 = vld [vmem:[%s1690_s1 + $0xc0] sm:$0xff]   ;;  %v1299_v37 = vld [vmem:[%s1690_s1 + $0x138] sm:$0xff]  }
   0xb   :  { %v1286_v26 = vld [vmem:[%s1690_s1 + $0x8] sm:$0xff]   ;;  %v1290_v30 = vld [vmem:[%s1690_s1] sm:$0xff]   ;;  %v1300_v38 = vld [vmem:[%s1690_s1 + $0x1f8] sm:$0xff]  }
   0xc   :  { %1123 = vmatpush3.bf16.msra.mxu0 %v1270_v10  ;;  %v1287_v27 = vld [vmem:[%s1690_s1 + $0x88] sm:$0xff]   ;;  %v1291_v31 = vld [vmem:[%s1690_s1 + $0x80] sm:$0xff]   ;;  %v1301_v39 = vld [vmem:[%s1690_s1 + $0x1b8] sm:$0xff]  }
   0xd   :  { %1151 = vmatpush3.bf16.msra.mxu1 %v1271_v11  ;;  %1124 = vmatprep.subr.bf16.mxu0 %v1272_v12  ;;  %v1292_v32 = vld [vmem:[%s1691_s0] ss:$36 sps:$4 sm:$0xff]   ;;  %v1295_v34 = vld [vmem:[%s1691_s0 + $0x8] ss:$36 sps:$4 sm:$0xff]   ;;  %v1302_v40 = vld [vmem:[%s1690_s1 + $0x170] sm:$0xff]  }
   0xe   :  { %1152 = vmatprep.subr.bf16.mxu1 %v1273_v13  ;;  %v1294_v33 = vld [vmem:[%s1691_s0 + $0x4] ss:$36 sps:$4 sm:$0xff]   ;;  %v1297_v35 = vld [vmem:[%s1691_s0 + $0xc] ss:$36 sps:$4 sm:$0xff]   ;;  %v1314_v52 = vld [vmem:[%s1690_s1 + $0x158] sm:$0xff]  }
   0xf   :  { %741 = vmatprep.mubr.bf16.mxu0 %v1294_v33  ;;  %790 = vmatprep.mubr.bf16.mxu1 %v1297_v35  ;;  %v1303_v41 = vld [vmem:[%s1690_s1 + $0x130] sm:$0xff]   ;;  %v1306_v44 = vld [vmem:[%s1690_s1 + $0x168] sm:$0xff]   ;;  %v1310_v48 = vld [vmem:[%s1690_s1 + $0x160] sm:$0xff]  }
  0x10   :  { %1125 = vmatpush3.bf16.msra.mxu0 %v1274_v14  ;;  %v1304_v42 = vld [vmem:[%s1690_s1 + $0x1f0] sm:$0xff]   ;;  %v1307_v45 = vld [vmem:[%s1690_s1 + $0x128] sm:$0xff]   ;;  %v1311_v49 = vld [vmem:[%s1690_s1 + $0x120] sm:$0xff]  }
  0x11   :  { %1153 = vmatpush3.bf16.msra.mxu1 %v1275_v15  ;;  %1126 = vmatprep.subr.bf16.mxu0 %v1276_v16  ;;  %v1305_v43 = vld [vmem:[%s1690_s1 + $0x1b0] sm:$0xff]   ;;  %v1308_v46 = vld [vmem:[%s1690_s1 + $0x1e8] sm:$0xff]   ;;  %v1312_v50 = vld [vmem:[%s1690_s1 + $0x1e0] sm:$0xff]  }
  0x12   :  { %1154 = vmatprep.subr.bf16.mxu1 %v1277_v17  ;;  %v1309_v47 = vld [vmem:[%s1690_s1 + $0x1a8] sm:$0xff]   ;;  %v1313_v51 = vld [vmem:[%s1690_s1 + $0x1a0] sm:$0xff]   ;;  %v1315_v53 = vld [vmem:[%s1690_s1 + $0x118] sm:$0xff]  }
  0x13   :  { %v1316_v54 = vld [vmem:[%s1691_s0 + $0x4c] ss:$36 sps:$4 sm:$0xff]   ;;  %v1318_v55 = vld [vmem:[%s1691_s0 + $0x54] ss:$36 sps:$4 sm:$0xff]   ;;  %v1332_v4 = vld [vmem:[%s1690_s1 + $0x140] sm:$0xff]  }
  0x14   :  { %1127 = vmatpush3.bf16.msra.mxu0 %v1278_v18  ;;  %v1320_v56 = vld [vmem:[%s1690_s1 + $0x1d8] sm:$0xff]   ;;  %v1321_v57 = vld [vmem:[%s1691_s0 + $0x48] ss:$36 sps:$4 sm:$0xff]   ;;  %v1322_v58 = vld [vmem:[%s1691_s0 + $0x50] ss:$36 sps:$4 sm:$0xff]  }
  0x15   :  { %1155 = vmatpush3.bf16.msra.mxu1 %v1279_v19  ;;  %1128 = vmatprep.subr.bf16.mxu0 %v1280_v20  ;;  %v1323_v59 = vld [vmem:[%s1690_s1 + $0x198] sm:$0xff]   ;;  %v1324_v60 = vld [vmem:[%s1690_s1 + $0x150] sm:$0xff]   ;;  %v1328_v0 = vld [vmem:[%s1690_s1 + $0x148] sm:$0xff]  }
  0x16   :  { %1156 = vmatprep.subr.bf16.mxu1 %v1281_v21  ;;  %v1325_v61 = vld [vmem:[%s1690_s1 + $0x110] sm:$0xff]   ;;  %v1329_v1 = vld [vmem:[%s1690_s1 + $0x108] sm:$0xff]   ;;  %v1333_v5 = vld [vmem:[%s1690_s1 + $0x100] sm:$0xff]  }
  0x17   :  { %v1326_v62 = vld [vmem:[%s1690_s1 + $0x1d0] sm:$0xff]   ;;  %v1330_v2 = vld [vmem:[%s1690_s1 + $0x1c8] sm:$0xff]   ;;  %v1334_v6 = vld [vmem:[%s1690_s1 + $0x1c0] sm:$0xff]  }
  0x18   :  { %1129 = vmatpush3.bf16.msra.mxu0 %v1282_v22  ;;  %v1327_v63 = vld [vmem:[%s1690_s1 + $0x190] sm:$0xff]   ;;  %v1331_v3 = vld [vmem:[%s1690_s1 + $0x188] sm:$0xff]   ;;  %v1338_v9 = vld [vmem:[%s1690_s1 + $0x180] sm:$0xff]  }
  0x19   :  { %1157 = vmatpush3.bf16.msra.mxu1 %v1283_v23  ;;  %1130 = vmatprep.subr.bf16.mxu0 %v1284_v24  ;;  %v1335_v7 = vld [vmem:[%s1691_s0 + $0x10] ss:$36 sps:$4 sm:$0xff]   ;;  %v1339_v10 = vld [vmem:[%s1690_s1 + $0x238] sm:$0xff]   ;;  %v1347_v16 = vld [vmem:[%s1690_s1 + $0x228] sm:$0xff]  }
  0x1a   :  { %1158 = vmatprep.subr.bf16.mxu1 %v1285_v25  ;;  %v1337_v8 = vld [vmem:[%s1691_s0 + $0x14] ss:$36 sps:$4 sm:$0xff]   ;;  %v1342_v12 = vld [vmem:[%s1691_s0 + $0x1c] ss:$36 sps:$4 sm:$0xff]   ;;  %v1348_v17 = vld [vmem:[%s1691_s0 + $0x64] ss:$36 sps:$4 sm:$0xff]  }
  0x1b   :  { %v1340_v11 = vld [vmem:[%s1691_s0 + $0x18] ss:$36 sps:$4 sm:$0xff]   ;;  %v1343_v13 = vld [vmem:[%s1690_s1 + $0x230] sm:$0xff]   ;;  %v1350_v18 = vld [vmem:[%s1691_s0 + $0x60] ss:$36 sps:$4 sm:$0xff]  }
  0x1c   :  { %1131 = vmatpush3.bf16.msra.mxu0 %v1286_v26  ;;  %v1344_v14 = vld [vmem:[%s1691_s0 + $0x5c] ss:$36 sps:$4 sm:$0xff]   ;;  %v1353_v22 = vld [vmem:[%s1690_s1 + $0x210] sm:$0xff]   ;;  %v1354_v23 = vld [vmem:[%s1690_s1 + $0x208] sm:$0xff]  }
  0x1d   :  { %1159 = vmatpush3.bf16.msra.mxu1 %v1287_v27  ;;  %1132 = vmatprep.subr.bf16.mxu0 %v1288_v28  ;;  %v1346_v15 = vld [vmem:[%s1691_s0 + $0x58] ss:$36 sps:$4 sm:$0xff]   ;;  %v1351_v19 = vld [vmem:[%s1690_s1 + $0x220] sm:$0xff]   ;;  %v1357_v25 = vld [vmem:[%s1691_s0 + $0x68] ss:$36 sps:$4 sm:$0xff]  }
  0x1e   :  { %1160 = vmatprep.subr.bf16.mxu1 %v1289_v29  ;;  %v1352_v20 = vld [vmem:[%s1690_s1 + $0x218] sm:$0xff]   ;;  %v1356_v21 = vld [vmem:[%s1691_s0 + $0x20] ss:$36 sps:$4 sm:$0xff]  }
  0x1f   :  { %v1355_v24 = vld [vmem:[%s1690_s1 + $0x200] sm:$0xff]  }
  0x20   :  { %1133 = vmatpush3.bf16.msra.mxu0 %v1290_v30 }
  0x21   :  { %1161 = vmatpush3.bf16.msra.mxu1 %v1291_v31  ;;  %1174 = vmatprep.subr.bf16.mxu0 %v1298_v36 }
  0x22   :  { %1202 = vmatprep.subr.bf16.mxu1 %v1300_v38 }
  0x23   :  { %742 = vmatmul.mubr.bf16.vlgmr.msra.gmra.mxu0 %v1292_v32 }
  0x24   :  { %791 = vmatmul.mubr.bf16.vlgmr.msra.gmra.mxu1 %v1295_v34  ;;  %1175 = vmatpush3.bf16.msra.mxu0 %v1299_v37 }
  0x25   :  { %1203 = vmatpush3.bf16.msra.mxu1 %v1301_v39  ;;  %1176 = vmatprep.subr.bf16.mxu0 %v1302_v40 }
  0x26   :  { %1204 = vmatprep.subr.bf16.mxu1 %v1304_v42  ;;  %749 = vmatprep.mubr.bf16.mxu0 %v1316_v54 }
  0x27   :  { %798 = vmatprep.mubr.bf16.mxu1 %v1318_v55 }
  0x28   :  { %1177 = vmatpush3.bf16.msra.mxu0 %v1303_v41 }
  0x29   :  { %1205 = vmatpush3.bf16.msra.mxu1 %v1305_v43  ;;  %1178 = vmatprep.subr.bf16.mxu0 %v1306_v44 }
  0x2a   :  { %1206 = vmatprep.subr.bf16.mxu1 %v1308_v46 }
  0x2b   :  { %750 = vmatmul.mubr.bf16.gmra.mxu0 %v1321_v57 }
  0x2c   :  { %1179 = vmatpush3.bf16.msra.mxu0 %v1307_v45  ;;  %799 = vmatmul.mubr.bf16.gmra.mxu1 %v1322_v58 }
  0x2d   :  { %1207 = vmatpush3.bf16.msra.mxu1 %v1309_v47  ;;  %1180 = vmatprep.subr.bf16.mxu0 %v1310_v48 }
  0x2e   :  { %1208 = vmatprep.subr.bf16.mxu1 %v1312_v50  ;;  %839 = vmatprep.mubr.bf16.mxu0 %v1337_v8 }
  0x2f   :  { %888 = vmatprep.mubr.bf16.mxu1 %v1342_v12 }
  0x30   :  { %1181 = vmatpush3.bf16.msra.mxu0 %v1311_v49 }
  0x31   :  { %1209 = vmatpush3.bf16.msra.mxu1 %v1313_v51  ;;  %1182 = vmatprep.subr.bf16.mxu0 %v1314_v52 }
  0x32   :  { %1210 = vmatprep.subr.bf16.mxu1 %v1320_v56 }
  0x34   :  { %1183 = vmatpush3.bf16.msra.mxu0 %v1315_v53 }
  0x35   :  { %1211 = vmatpush3.bf16.msra.mxu1 %v1323_v59  ;;  %1184 = vmatprep.subr.bf16.mxu0 %v1324_v60 }
  0x36   :  { %1212 = vmatprep.subr.bf16.mxu1 %v1326_v62 }
  0x38   :  { %1185 = vmatpush3.bf16.msra.mxu0 %v1325_v61 }
  0x39   :  { %1213 = vmatpush3.bf16.msra.mxu1 %v1327_v63  ;;  %1186 = vmatprep.subr.bf16.mxu0 %v1328_v0 }
  0x3a   :  { %1214 = vmatprep.subr.bf16.mxu1 %v1330_v2 }
  0x3c   :  { %1187 = vmatpush3.bf16.msra.mxu0 %v1329_v1 }
  0x3d   :  { %1215 = vmatpush3.bf16.msra.mxu1 %v1331_v3  ;;  %1188 = vmatprep.subr.bf16.mxu0 %v1332_v4 }
  0x3e   :  { %1216 = vmatprep.subr.bf16.mxu1 %v1334_v6 }
  0x40   :  { %1189 = vmatpush3.bf16.msra.mxu0 %v1333_v5 }
  0x41   :  { %1217 = vmatpush3.bf16.msra.mxu1 %v1338_v9  ;;  %1240 = vmatprep.subr.bf16.mxu0 %v1339_v10 }
  0x43   :  { %840 = vmatmul.mubr.bf16.vlgmr.msra.gmra.mxu0 %v1335_v7 }
  0x44   :  { %1241 = vmatpush3.bf16.msra.mxu0 %v1339_v10  ;;  %889 = vmatmul.mubr.bf16.vlgmr.msra.gmra.mxu1 %v1340_v11 }
  0x45   :  { %1242 = vmatprep.subr.bf16.mxu0 %v1343_v13  ;;  %847 = vmatprep.mubr.bf16.mxu0 %v1344_v14 }
  0x46   :  { %896 = vmatprep.mubr.bf16.mxu1 %v1348_v17 }
  0x48   :  { %1243 = vmatpush3.bf16.msra.mxu0 %v1343_v13 }
  0x49   :  { %1244 = vmatprep.subr.bf16.mxu0 %v1347_v16 }
  0x4b   :  { %848 = vmatmul.mubr.bf16.gmra.mxu0 %v1346_v15 }
  0x4c   :  { %1245 = vmatpush3.bf16.msra.mxu0 %v1347_v16  ;;  %897 = vmatmul.mubr.bf16.gmra.mxu1 %v1350_v18 }
  0x4d   :  { %1246 = vmatprep.subr.bf16.mxu0 %v1351_v19  ;;  %1256 = vmatprep.mubr.bf16.mxu0 %v1356_v21 }
  0x50   :  { %1247 = vmatpush3.bf16.msra.mxu0 %v1351_v19 }
  0x51   :  { %1248 = vmatprep.subr.bf16.mxu0 %v1352_v20 }
  0x54   :  { %1249 = vmatpush3.bf16.msra.mxu0 %v1352_v20 }
  0x55   :  { %1250 = vmatprep.subr.bf16.mxu0 %v1353_v22 }
  0x58   :  { %1251 = vmatpush3.bf16.msra.mxu0 %v1353_v22 }
  0x59   :  { %1252 = vmatprep.subr.bf16.mxu0 %v1354_v23 }
  0x5c   :  { %1253 = vmatpush3.bf16.msra.mxu0 %v1354_v23 }
  0x5d   :  { %1254 = vmatprep.subr.bf16.mxu0 %v1355_v24 }
  0x60   :  { %1255 = vmatpush3.bf16.msra.mxu0 %v1355_v24 }
  0x63   :  { %1257 = vmatmul.mubr.bf16.vlgmr.msra.gmra.mxu0 %v1357_v25 }
  0xe3   :  { %v1134_v26 = vpop.f32.mrf.mxu0 }
  0xe4   :  { %v1162_v27 = vpop.f32.mrf.mxu1 }
  0xe5   :  { %v1135_v28 = vpop.f32.mrf.mxu0 }
  0xe6   :  { %v1163_v29 = vpop.f32.mrf.mxu1  ;;  %v1136_v55 = vadd.f32 %v1135_v28, %v1134_v26 }
  0xe7   :  { %v1137_v30 = vpop.f32.mrf.mxu0  ;;  %v1164_v56 = vadd.f32 %v1163_v29, %v1162_v27 }
  0xe8   :  { %v1165_v31 = vpop.f32.mrf.mxu1 }
  0xe9   :  { %v1138_v32 = vpop.f32.mrf.mxu0  ;;  %v793_v2 = vadd.f32 %v1164_v56, %v1136_v55 }
  0xea   :  { %v1166_v34 = vpop.f32.mrf.mxu1  ;;  %v1139_v57 = vadd.f32 %v1138_v32, %v1137_v30 }
  0xeb   :  { %v1140_v33 = vpop.f32.mrf.mxu0  ;;  %v1167_v58 = vadd.f32 %v1166_v34, %v1165_v31 }
  0xec   :  { %v1168_v35 = vpop.f32.mrf.mxu1 }
  0xed   :  { %v1141_v36 = vpop.f32.mrf.mxu0  ;;  %v796_v5 = vadd.f32 %v1167_v58, %v1139_v57  ;;  %v989_v58 = vlaneseq }
  0xee   :  { %v1169_v37 = vpop.f32.mrf.mxu1  ;;  %v1142_v59 = vadd.f32 %v1141_v36, %v1140_v33 }
  0xef   :  { %v1143_v38 = vpop.f32.mrf.mxu0  ;;  %v1170_v60 = vadd.f32 %v1169_v37, %v1168_v35 }
  0xf0   :  { %v1171_v39 = vpop.f32.mrf.mxu1 }
  0xf1   :  { %v1144_v40 = vpop.f32.mrf.mxu0  ;;  %v801_v6 = vadd.f32 %v1170_v60, %v1142_v59  ;;  %v990_v59 = vshrl.u32 %v989_v58, 7  ;;  %v981_v60 = vld [vmem:[%s1692_s2] sm:$0x1] }
  0xf2   :  { %v1172_v42 = vpop.f32.mrf.mxu1  ;;  %v1145_v62 = vadd.f32 %v1144_v40, %v1143_v38 }
  0xf3   :  { %v1173_v63 = vadd.f32 %v1172_v42, %v1171_v39 }
  0xf5   :  { %v804_v10 = vadd.f32 %v1173_v63, %v1145_v62 }
 0x103   :  { %v1190_v41 = vpop.f32.mrf.mxu0 }
 0x104   :  { %v1218_v44 = vpop.f32.mrf.mxu1 }
 0x105   :  { %v1191_v43 = vpop.f32.mrf.mxu0 }
 0x106   :  { %v1219_v46 = vpop.f32.mrf.mxu1  ;;  %v1192_v61 = vadd.f32 %v1191_v43, %v1190_v41 }
 0x107   :  { %v1193_v45 = vpop.f32.mrf.mxu0  ;;  %v1220_v8 = vadd.f32 %v1219_v46, %v1218_v44 }
 0x108   :  { %v1221_v48 = vpop.f32.mrf.mxu1  ;;  %v842_v7 = vadd.f32 %v1192_v61, %v793_v2  ;;  %v991_v61 = vsub.s32 0, %v990_v59 }
 0x109   :  { %v1194_v47 = vpop.f32.mrf.mxu0 }
 0x10a   :  { %v1222_v50 = vpop.f32.mrf.mxu1  ;;  %v1195_v3 = vadd.f32 %v1194_v47, %v1193_v45  ;;  %v891_v20 = vadd.f32 %v1220_v8, %v842_v7 }
 0x10b   :  { %v1196_v49 = vpop.f32.mrf.mxu0  ;;  %v1223_v14 = vadd.f32 %v1222_v50, %v1221_v48 }
 0x10c   :  { %v1224_v52 = vpop.f32.mrf.mxu1  ;;  %v845_v13 = vadd.f32 %v1195_v3, %v796_v5 }
 0x10d   :  { %v1197_v51 = vpop.f32.mrf.mxu0 }
 0x10e   :  { %v1225_v54 = vpop.f32.mrf.mxu1  ;;  %v1198_v4 = vadd.f32 %v1197_v51, %v1196_v49  ;;  %v894_v24 = vadd.f32 %v1223_v14, %v845_v13 }
 0x10f   :  { %v1199_v53 = vpop.f32.mrf.mxu0  ;;  %v1226_v16 = vadd.f32 %v1225_v54, %v1224_v52 }
 0x110   :  { %v1227_v1 = vpop.f32.mrf.mxu1  ;;  %v850_v15 = vadd.f32 %v1198_v4, %v801_v6 }
 0x111   :  { %v1200_v0 = vpop.f32.mrf.mxu0 }
 0x112   :  { %v1201_v9 = vadd.f32 %v1200_v0, %v1199_v53  ;;  %v1228_v11 = vpop.f32.mrf.mxu1  ;;  %v899_v22 = vadd.f32 %v1226_v16, %v850_v15  ;;  %v985_v0 = vld [vmem:[%s1693_s3] sm:$0x1] }
 0x113   :  { %v1229_v19 = vadd.f32 %v1228_v11, %v1227_v1  ;;  %v1010_v11 = vld [vmem:[%s1694_s4 + $0x10] sm:$0xff] }
 0x114   :  { %v853_v18 = vadd.f32 %v1201_v9, %v804_v10  ;;  %v1008_v9 = vld [vmem:[%s1694_s4] sm:$0xff]  ;;  %v1009_v10 = vld [vmem:[%s1694_s4 + $0x8] sm:$0xff] }
 0x116   :  { %v902_v27 = vadd.f32 %v1229_v19, %v853_v18 }
 0x123   :  { %v1258_v12 = vpop.f32.mrf.mxu0 }
 0x124   :  { %v948_v26 = vadd.f32 %v1258_v12, %v899_v22  ;;  %v1011_v12 = vld [vmem:[%s1694_s4 + $0x18] sm:$0xff] }
 0x125   :  { %v939_v17 = vpop.f32.mrf.mxu0 }
 0x126   :  { %v940_v23 = vadd.f32 %v939_v17, %v891_v20  ;;  %v966_v33 = vmul.f32 %v948_v26, %v948_v26 }
 0x127   :  { %v1259_v21 = vpop.f32.mrf.mxu0 }
 0x128   :  { %v964_v29 = vmul.f32 %v940_v23, %v940_v23  ;;  %v951_v30 = vadd.f32 %v1259_v21, %v902_v27 }
 0x129   :  { %v942_v25 = vpop.f32.mrf.mxu0 }
 0x12a   :  { %v943_v28 = vadd.f32 %v942_v25, %v894_v24  ;;  %v967_v36 = vmul.f32 %v951_v30, %v951_v30 }
 0x12c   :  { %v954_v31 = vadd.f32 %v943_v28, %v940_v23  ;;  %v965_v32 = vmul.f32 %v943_v28, %v943_v28 }
 0x12e   :  { %v955_v34 = vadd.f32 %v954_v31, %v948_v26  ;;  %v968_v35 = vadd.f32 %v965_v32, %v964_v29 }
 0x130   :  { %v956_v37 = vadd.f32 %v955_v34, %v951_v30  ;;  %v969_v38 = vadd.f32 %v968_v35, %v966_v33 }
 0x132   :  { %v957_v39 = vrot.slane %v956_v37, 4  ;;  %v970_v40 = vadd.f32 %v969_v38, %v967_v36 }
 0x134   :  { %v958_v41 = vadd.f32 %v957_v39, %v956_v37  ;;  %v971_v42 = vrot.slane %v970_v40, 4 }
 0x136   :  { %v959_v43 = vrot.slane %v958_v41, 2  ;;  %v972_v44 = vadd.f32 %v971_v42, %v970_v40 }
 0x138   :  { %v960_v45 = vadd.f32 %v959_v43, %v958_v41  ;;  %v973_v46 = vrot.slane %v972_v44, 2 }
 0x13a   :  { %v961_v47 = vrot.slane %v960_v45, 1  ;;  %v974_v48 = vadd.f32 %v973_v46, %v972_v44 }
 0x13c   :  { %v962_v49 = vadd.f32 %v961_v47, %v960_v45  ;;  %v975_v50 = vrot.slane %v974_v48, 1 }
 0x13e   :  { %v963_v51 = vmul.f32 0.055555556, %v962_v49  ;;  %v976_v52 = vadd.f32 %v975_v50, %v974_v48 }
 0x140   :  { %v977_v53 = vmul.f32 0.055555556, %v976_v52  ;;  %v978_v54 = vmul.f32 %v963_v51, %v963_v51 }
 0x142   :  { %v979_v55 = vsub.f32 %v977_v53, %v978_v54 }
 0x144   :  { %v980_v56 = vmax.f32 %v979_v55, 0.0 }
 0x146   :  { %v982_v57 = vadd.f32 1e-05, %v980_v56 }
 0x148   :  { %1358 = vrsqrt.f32 %v982_v57 }
 0x155   :  { %v1359_v62 = vpop.eup %1358 }
 0x156   :  { %v984_v63 = vmul.f32 %v1359_v62, %v981_v60 }
 0x158   :  { %v986_v1 = vmul.f32 %v984_v63, %v963_v51  ;;  %v992_v2 = vrot.slane %v984_v63, %v991_v61 }
 0x15a   :  { %v987_v3 = vsub.f32 %v985_v0, %v986_v1  ;;  %v994_v4 = vmul.f32 %v992_v2, %v940_v23  ;;  %v995_v5 = vmul.f32 %v992_v2, %v943_v28  ;;  %v996_v6 = vmul.f32 %v992_v2, %v948_v26 }
 0x15b   :  { %v997_v7 = vmul.f32 %v992_v2, %v951_v30 }
 0x15c   :  { %v1002_v8 = vrot.slane %v987_v3, %v991_v61 }
 0x15e   :  { %v1004_v13 = vadd.f32 %v1002_v8, %v994_v4  ;;  %v1005_v14 = vadd.f32 %v1002_v8, %v995_v5  ;;  %v1006_v15 = vadd.f32 %v1002_v8, %v996_v6  ;;  %v1007_v16 = vadd.f32 %v1002_v8, %v997_v7 }
 0x160   :  { %v1012_v17 = vadd.f32 %v1008_v9, %v1004_v13  ;;  %v1013_v18 = vadd.f32 %v1009_v10, %v1005_v14  ;;  %v1014_v19 = vadd.f32 %v1010_v11, %v1006_v15  ;;  %v1015_v20 = vadd.f32 %v1011_v12, %v1007_v16 }
 0x162   :  { %v1016_v21 = vmax.f32 %v1012_v17, 0.0  ;;  %v1017_v22 = vmax.f32 %v1013_v18, 0.0  ;;  %v1018_v23 = vmax.f32 %v1014_v19, 0.0  ;;  %v1019_v24 = vmax.f32 %v1015_v20, 0.0 }
 0x164   :  { %1020 = vst [vmem:[%s1695_s5] sm:$0xff] %v1016_v21  ;;  %1021 = vst [vmem:[%s1695_s5 + $0x8] sm:$0xff] %v1017_v22 }
 0x165   :  { %1022 = vst [vmem:[%s1695_s5 + $0x10] sm:$0xff] %v1018_v23  ;;  %1023 = vst [vmem:[%s1695_s5 + $0x18] sm:$0xff] %v1019_v24 }

// kernel: resnet_forward.17
= control target key start
LH: loop header
LB: loop body
LE: loop exit
PB: predicated region body
PF: predicated region fallthrough
CT: control target
= control target key end

     0   :  { %s2434_s1 = inlined_call_operand.vmem [shape: bf16[1152,256], index: 1, kind: input, shape index: {}]   ;;  %s2435_s0 = inlined_call_operand.vmem [shape: bf16[32,1152], index: 0, kind: input, shape index: {}]   ;;  %s2436_s2 = inlined_call_operand.vmem [shape: f32[1,256], index: 2, kind: input, shape index: {}]   ;;  %s2437_s3 = inlined_call_operand.vmem [shape: f32[1,256], index: 3, kind: input, shape index: {}]   ;;  %s2438_s4 = inlined_call_operand.vmem [shape: f32[32,256], index: 4, kind: output, shape index: {}]  }
   0x1   :  { %v1597_v0 = vld [vmem:[%s2434_s1 + $0x74] ss:$8 sps:$4 sm:$0xff]   ;;  %v1601_v2 = vld [vmem:[%s2434_s1 + $0x70] ss:$8 sps:$4 sm:$0xff]   ;;  %v1603_v4 = vld [vmem:[%s2434_s1 + $0x64] ss:$8 sps:$4 sm:$0xff]  }
   0x2   :  { %v1599_v1 = vld [vmem:[%s2434_s1 + $0x174] ss:$8 sps:$4 sm:$0xff]   ;;  %994 = vmatprep.subr.bf16.mxu0 %v1597_v0  ;;  %v1602_v3 = vld [vmem:[%s2434_s1 + $0x170] ss:$8 sps:$4 sm:$0xff]   ;;  %v1605_v5 = vld [vmem:[%s2434_s1 + $0x164] ss:$8 sps:$4 sm:$0xff]  }
   0x3   :  { %1047 = vmatprep.subr.bf16.mxu1 %v1599_v1  ;;  %995 = vmatpush1.bf16.msra.mxu0 %v1601_v2  ;;  %v1607_v6 = vld [vmem:[%s2434_s1 + $0x60] ss:$8 sps:$4 sm:$0xff]   ;;  %v1609_v8 = vld [vmem:[%s2434_s1 + $0x54] ss:$8 sps:$4 sm:$0xff]   ;;  %v1613_v10 = vld [vmem:[%s2434_s1 + $0x50] ss:$8 sps:$4 sm:$0xff]  }
   0x4   :  { %1048 = vmatpush1.bf16.msra.mxu1 %v1602_v3  ;;  %996 = vmatprep.subr.bf16.mxu0 %v1603_v4  ;;  %v1608_v7 = vld [vmem:[%s2434_s1 + $0x160] ss:$8 sps:$4 sm:$0xff]   ;;  %v1611_v9 = vld [vmem:[%s2434_s1 + $0x154] ss:$8 sps:$4 sm:$0xff]   ;;  %v1614_v11 = vld [vmem:[%s2434_s1 + $0x150] ss:$8 sps:$4 sm:$0xff]  }
   0x5   :  { %1049 = vmatprep.subr.bf16.mxu1 %v1605_v5  ;;  %v1615_v12 = vld [vmem:[%s2434_s1 + $0x44] ss:$8 sps:$4 sm:$0xff]   ;;  %v1619_v14 = vld [vmem:[%s2434_s1 + $0x40] ss:$8 sps:$4 sm:$0xff]   ;;  %v1621_v16 = vld [vmem:[%s2434_s1 + $0x34] ss:$8 sps:$4 sm:$0xff]  }
   0x6   :  { %v1617_v13 = vld [vmem:[%s2434_s1 + $0x144] ss:$8 sps:$4 sm:$0xff]   ;;  %v1620_v15 = vld [vmem:[%s2434_s1 + $0x140] ss:$8 sps:$4 sm:$0xff]   ;;  %v1623_v17 = vld [vmem:[%s2434_s1 + $0x134] ss:$8 sps:$4 sm:$0xff]  }
   0x7   :  { %997 = vmatpush1.bf16.msra.mxu0 %v1607_v6  ;;  %v1625_v18 = vld [vmem:[%s2434_s1 + $0x30] ss:$8 sps:$4 sm:$0xff]   ;;  %v1627_v20 = vld [vmem:[%s2434_s1 + $0x24] ss:$8 sps:$4 sm:$0xff]   ;;  %v1631_v22 = vld [vmem:[%s2434_s1 + $0x20] ss:$8 sps:$4 sm:$0xff]  }
   0x8   :  { %1050 = vmatpush1.bf16.msra.mxu1 %v1608_v7  ;;  %998 = vmatprep.subr.bf16.mxu0 %v1609_v8  ;;  %v1626_v19 = vld [vmem:[%s2434_s1 + $0x130] ss:$8 sps:$4 sm:$0xff]   ;;  %v1629_v21 = vld [vmem:[%s2434_s1 + $0x124] ss:$8 sps:$4 sm:$0xff]   ;;  %v1632_v23 = vld [vmem:[%s2434_s1 + $0x120] ss:$8 sps:$4 sm:$0xff]  }
   0x9   :  { %1051 = vmatprep.subr.bf16.mxu1 %v1611_v9  ;;  %v1633_v24 = vld [vmem:[%s2434_s1 + $0x14] ss:$8 sps:$4 sm:$0xff]   ;;  %v1637_v26 = vld [vmem:[%s2434_s1 + $0x10] ss:$8 sps:$4 sm:$0xff]   ;;  %v1639_v28 = vld [vmem:[%s2434_s1 + $0x4] ss:$8 sps:$4 sm:$0xff]  }
   0xa   :  { %v1635_v25 = vld [vmem:[%s2434_s1 + $0x114] ss:$8 sps:$4 sm:$0xff]   ;;  %v1638_v27 = vld [vmem:[%s2434_s1 + $0x110] ss:$8 sps:$4 sm:$0xff]   ;;  %v1641_v29 = vld [vmem:[%s2434_s1 + $0x104] ss:$8 sps:$4 sm:$0xff]  }
   0xb   :  { %999 = vmatpush1.bf16.msra.mxu0 %v1613_v10  ;;  %v1643_v30 = vld [vmem:[%s2434_s1] ss:$8 sps:$4 sm:$0xff]   ;;  %v1645_v32 = vld [vmem:[%s2434_s1 + $0xf4] ss:$8 sps:$4 sm:$0xff]   ;;  %v1649_v34 = vld [vmem:[%s2434_s1 + $0xf0] ss:$8 sps:$4 sm:$0xff]  }
   0xc   :  { %1052 = vmatpush1.bf16.msra.mxu1 %v1614_v11  ;;  %1000 = vmatprep.subr.bf16.mxu0 %v1615_v12  ;;  %v1644_v31 = vld [vmem:[%s2434_s1 + $0x100] ss:$8 sps:$4 sm:$0xff]   ;;  %v1647_v33 = vld [vmem:[%s2434_s1 + $0x1f4] ss:$8 sps:$4 sm:$0xff]   ;;  %v1650_v35 = vld [vmem:[%s2434_s1 + $0x1f0] ss:$8 sps:$4 sm:$0xff]  }
   0xd   :  { %1053 = vmatprep.subr.bf16.mxu1 %v1617_v13  ;;  %v1651_v36 = vld [vmem:[%s2434_s1 + $0xe4] ss:$8 sps:$4 sm:$0xff]   ;;  %v1655_v38 = vld [vmem:[%s2434_s1 + $0xe0] ss:$8 sps:$4 sm:$0xff]   ;;  %v1657_v40 = vld [vmem:[%s2434_s1 + $0xd4] ss:$8 sps:$4 sm:$0xff]  }
   0xe   :  { %v1653_v37 = vld [vmem:[%s2434_s1 + $0x1e4] ss:$8 sps:$4 sm:$0xff]   ;;  %v1656_v39 = vld [vmem:[%s2434_s1 + $0x1e0] ss:$8 sps:$4 sm:$0xff]   ;;  %v1659_v41 = vld [vmem:[%s2434_s1 + $0x1d4] ss:$8 sps:$4 sm:$0xff]  }
   0xf   :  { %1001 = vmatpush1.bf16.msra.mxu0 %v1619_v14  ;;  %v1661_v42 = vld [vmem:[%s2434_s1 + $0xd0] ss:$8 sps:$4 sm:$0xff]   ;;  %v1663_v44 = vld [vmem:[%s2434_s1 + $0xc4] ss:$8 sps:$4 sm:$0xff]   ;;  %v1667_v46 = vld [vmem:[%s2434_s1 + $0xc0] ss:$8 sps:$4 sm:$0xff]  }
  0x10   :  { %1054 = vmatpush1.bf16.msra.mxu1 %v1620_v15  ;;  %1002 = vmatprep.subr.bf16.mxu0 %v1621_v16  ;;  %v1662_v43 = vld [vmem:[%s2434_s1 + $0x1d0] ss:$8 sps:$4 sm:$0xff]   ;;  %v1665_v45 = vld [vmem:[%s2434_s1 + $0x1c4] ss:$8 sps:$4 sm:$0xff]   ;;  %v1668_v47 = vld [vmem:[%s2434_s1 + $0x1c0] ss:$8 sps:$4 sm:$0xff]  }
  0x11   :  { %1055 = vmatprep.subr.bf16.mxu1 %v1623_v17  ;;  %v1669_v48 = vld [vmem:[%s2434_s1 + $0xb4] ss:$8 sps:$4 sm:$0xff]   ;;  %v1695_v49 = vld [vmem:[%s2435_s0 + $0x4] ss:$36 sps:$4 sm:$0xff]   ;;  %v1698_v51 = vld [vmem:[%s2435_s0 + $0xc] ss:$36 sps:$4 sm:$0xff]  }
  0x12   :  { %v1671_v50 = vld [vmem:[%s2434_s1 + $0x1b4] ss:$8 sps:$4 sm:$0xff]   ;;  %1026 = vmatprep.mubr.bf16.mxu0 %v1695_v49  ;;  %v1673_v52 = vld [vmem:[%s2434_s1 + $0xb0] ss:$8 sps:$4 sm:$0xff]   ;;  %1079 = vmatprep.mubr.bf16.mxu1 %v1698_v51  ;;  %v1675_v54 = vld [vmem:[%s2434_s1 + $0xa4] ss:$8 sps:$4 sm:$0xff]  }
  0x13   :  { %1003 = vmatpush1.bf16.msra.mxu0 %v1625_v18  ;;  %v1674_v53 = vld [vmem:[%s2434_s1 + $0x1b0] ss:$8 sps:$4 sm:$0xff]   ;;  %v1677_v55 = vld [vmem:[%s2434_s1 + $0x1a4] ss:$8 sps:$4 sm:$0xff]   ;;  %v1679_v56 = vld [vmem:[%s2434_s1 + $0xa0] ss:$8 sps:$4 sm:$0xff]  }
  0x14   :  { %1056 = vmatpush1.bf16.msra.mxu1 %v1626_v19  ;;  %1004 = vmatprep.subr.bf16.mxu0 %v1627_v20  ;;  %v1680_v57 = vld [vmem:[%s2434_s1 + $0x1a0] ss:$8 sps:$4 sm:$0xff]   ;;  %v1681_v58 = vld [vmem:[%s2434_s1 + $0x94] ss:$8 sps:$4 sm:$0xff]   ;;  %v1685_v60 = vld [vmem:[%s2434_s1 + $0x90] ss:$8 sps:$4 sm:$0xff]  }
  0x15   :  { %1057 = vmatprep.subr.bf16.mxu1 %v1629_v21  ;;  %v1683_v59 = vld [vmem:[%s2434_s1 + $0x194] ss:$8 sps:$4 sm:$0xff]   ;;  %v1686_v61 = vld [vmem:[%s2434_s1 + $0x190] ss:$8 sps:$4 sm:$0xff]   ;;  %v1687_v62 = vld [vmem:[%s2434_s1 + $0x84] ss:$8 sps:$4 sm:$0xff]  }
  0x16   :  { %v1689_v63 = vld [vmem:[%s2434_s1 + $0x184] ss:$8 sps:$4 sm:$0xff]   ;;  %v1691_v0 = vld [vmem:[%s2434_s1 + $0x80] ss:$8 sps:$4 sm:$0xff]   ;;  %v1701_v2 = vld [vmem:[%s2434_s1 + $0x274] ss:$8 sps:$4 sm:$0xff]  }
  0x17   :  { %1005 = vmatpush1.bf16.msra.mxu0 %v1631_v22  ;;  %v1692_v1 = vld [vmem:[%s2434_s1 + $0x180] ss:$8 sps:$4 sm:$0xff]   ;;  %v1704_v3 = vld [vmem:[%s2434_s1 + $0x374] ss:$8 sps:$4 sm:$0xff]   ;;  %v1699_v6 = vld [vmem:[%s2434_s1 + $0x270] ss:$8 sps:$4 sm:$0xff]  }
  0x18   :  { %1058 = vmatpush1.bf16.msra.mxu1 %v1632_v23  ;;  %1006 = vmatprep.subr.bf16.mxu0 %v1633_v24  ;;  %v1693_v4 = vld [vmem:[%s2435_s0] ss:$36 sps:$4 sm:$0xff]   ;;  %v1696_v5 = vld [vmem:[%s2435_s0 + $0x8] ss:$36 sps:$4 sm:$0xff]   ;;  %v1702_v7 = vld [vmem:[%s2434_s1 + $0x370] ss:$8 sps:$4 sm:$0xff]  }
  0x19   :  { %1059 = vmatprep.subr.bf16.mxu1 %v1635_v25  ;;  %v1707_v8 = vld [vmem:[%s2434_s1 + $0x264] ss:$8 sps:$4 sm:$0xff]   ;;  %v1705_v10 = vld [vmem:[%s2434_s1 + $0x260] ss:$8 sps:$4 sm:$0xff]   ;;  %v1713_v12 = vld [vmem:[%s2434_s1 + $0x254] ss:$8 sps:$4 sm:$0xff]  }
  0x1a   :  { %v1710_v9 = vld [vmem:[%s2434_s1 + $0x364] ss:$8 sps:$4 sm:$0xff]   ;;  %v1708_v11 = vld [vmem:[%s2434_s1 + $0x360] ss:$8 sps:$4 sm:$0xff]   ;;  %v1716_v13 = vld [vmem:[%s2434_s1 + $0x354] ss:$8 sps:$4 sm:$0xff]  }
  0x1b   :  { %1007 = vmatpush1.bf16.msra.mxu0 %v1637_v26  ;;  %v1711_v14 = vld [vmem:[%s2434_s1 + $0x250] ss:$8 sps:$4 sm:$0xff]   ;;  %v1719_v16 = vld [vmem:[%s2434_s1 + $0x244] ss:$8 sps:$4 sm:$0xff]   ;;  %v1717_v18 = vld [vmem:[%s2434_s1 + $0x240] ss:$8 sps:$4 sm:$0xff]  }
  0x1c   :  { %1060 = vmatpush1.bf16.msra.mxu1 %v1638_v27  ;;  %1008 = vmatprep.subr.bf16.mxu0 %v1639_v28  ;;  %v1714_v15 = vld [vmem:[%s2434_s1 + $0x350] ss:$8 sps:$4 sm:$0xff]   ;;  %v1722_v17 = vld [vmem:[%s2434_s1 + $0x344] ss:$8 sps:$4 sm:$0xff]   ;;  %v1720_v19 = vld [vmem:[%s2434_s1 + $0x340] ss:$8 sps:$4 sm:$0xff]  }
  0x1d   :  { %1061 = vmatprep.subr.bf16.mxu1 %v1641_v29  ;;  %v1725_v20 = vld [vmem:[%s2434_s1 + $0x234] ss:$8 sps:$4 sm:$0xff]   ;;  %v1723_v22 = vld [vmem:[%s2434_s1 + $0x230] ss:$8 sps:$4 sm:$0xff]   ;;  %v1731_v24 = vld [vmem:[%s2434_s1 + $0x224] ss:$8 sps:$4 sm:$0xff]  }
  0x1e   :  { %v1728_v21 = vld [vmem:[%s2434_s1 + $0x334] ss:$8 sps:$4 sm:$0xff]   ;;  %v1726_v23 = vld [vmem:[%s2434_s1 + $0x330] ss:$8 sps:$4 sm:$0xff]   ;;  %v1734_v25 = vld [vmem:[%s2434_s1 + $0x324] ss:$8 sps:$4 sm:$0xff]  }
  0x1f   :  { %1009 = vmatpush1.bf16.msra.mxu0 %v1643_v30  ;;  %v1777_v26 = vld [vmem:[%s2435_s0 + $0x4c] ss:$36 sps:$4 sm:$0xff]   ;;  %v1779_v27 = vld [vmem:[%s2435_s0 + $0x54] ss:$36 sps:$4 sm:$0xff]   ;;  %v1729_v30 = vld [vmem:[%s2434_s1 + $0x220] ss:$8 sps:$4 sm:$0xff]  }
  0x20   :  { %1062 = vmatpush1.bf16.msra.mxu1 %v1644_v31  ;;  %1010 = vmatprep.subr.bf16.mxu0 %v1645_v32  ;;  %v1781_v28 = vld [vmem:[%s2435_s0 + $0x48] ss:$36 sps:$4 sm:$0xff]   ;;  %v1782_v29 = vld [vmem:[%s2435_s0 + $0x50] ss:$36 sps:$4 sm:$0xff]  }
  0x21   :  { %1063 = vmatprep.subr.bf16.mxu1 %v1647_v33  ;;  %v1732_v31 = vld [vmem:[%s2434_s1 + $0x320] ss:$8 sps:$4 sm:$0xff]   ;;  %v1737_v32 = vld [vmem:[%s2434_s1 + $0x214] ss:$8 sps:$4 sm:$0xff]  }
  0x22   :  { %v1740_v33 = vld [vmem:[%s2434_s1 + $0x314] ss:$8 sps:$4 sm:$0xff]   ;;  %v1756_v49 = vld [vmem:[%s2434_s1 + $0x3e0] ss:$8 sps:$4 sm:$0xff]  }
  0x23   :  { %1011 = vmatpush2.bf16.msra.mxu0 %v1649_v34  ;;  %v1735_v34 = vld [vmem:[%s2434_s1 + $0x210] ss:$8 sps:$4 sm:$0xff]   ;;  %v1764_v51 = vld [vmem:[%s2434_s1 + $0x3d4] ss:$8 sps:$4 sm:$0xff]  }
  0x24   :  { %1064 = vmatpush2.bf16.msra.mxu1 %v1650_v35  ;;  %1012 = vmatprep.subr.bf16.mxu0 %v1651_v36  ;;  %v1738_v35 = vld [vmem:[%s2434_s1 + $0x310] ss:$8 sps:$4 sm:$0xff]   ;;  %v1743_v36 = vld [vmem:[%s2434_s1 + $0x204] ss:$8 sps:$4 sm:$0xff]  }
  0x25   :  { %1065 = vmatprep.subr.bf16.mxu1 %v1653_v37  ;;  %v1746_v37 = vld [vmem:[%s2434_s1 + $0x304] ss:$8 sps:$4 sm:$0xff]  }
  0x27   :  { %1013 = vmatpush2.bf16.msra.mxu0 %v1655_v38  ;;  %v1741_v38 = vld [vmem:[%s2434_s1 + $0x200] ss:$8 sps:$4 sm:$0xff]  }
  0x28   :  { %1066 = vmatpush2.bf16.msra.mxu1 %v1656_v39  ;;  %1014 = vmatprep.subr.bf16.mxu0 %v1657_v40  ;;  %v1744_v39 = vld [vmem:[%s2434_s1 + $0x300] ss:$8 sps:$4 sm:$0xff]   ;;  %v1749_v40 = vld [vmem:[%s2434_s1 + $0x2f4] ss:$8 sps:$4 sm:$0xff]  }
  0x29   :  { %1067 = vmatprep.subr.bf16.mxu1 %v1659_v41  ;;  %v1803_v41 = vld [vmem:[%s2435_s0 + $0x14] ss:$36 sps:$4 sm:$0xff]  }
  0x2b   :  { %1015 = vmatpush2.bf16.msra.mxu0 %v1661_v42  ;;  %v1752_v42 = vld [vmem:[%s2434_s1 + $0x3f4] ss:$8 sps:$4 sm:$0xff]  }
  0x2c   :  { %1068 = vmatpush2.bf16.msra.mxu1 %v1662_v43  ;;  %1016 = vmatprep.subr.bf16.mxu0 %v1663_v44  ;;  %v1806_v43 = vld [vmem:[%s2435_s0 + $0x1c] ss:$36 sps:$4 sm:$0xff]   ;;  %v1747_v44 = vld [vmem:[%s2434_s1 + $0x2f0] ss:$8 sps:$4 sm:$0xff]  }
  0x2d   :  { %1069 = vmatprep.subr.bf16.mxu1 %v1665_v45  ;;  %v1750_v45 = vld [vmem:[%s2434_s1 + $0x3f0] ss:$8 sps:$4 sm:$0xff]  }
  0x2f   :  { %1017 = vmatpush2.bf16.msra.mxu0 %v1667_v46  ;;  %v1755_v46 = vld [vmem:[%s2434_s1 + $0x2e4] ss:$8 sps:$4 sm:$0xff]  }
  0x30   :  { %1070 = vmatpush2.bf16.msra.mxu1 %v1668_v47  ;;  %1018 = vmatprep.subr.bf16.mxu0 %v1669_v48  ;;  %v1758_v47 = vld [vmem:[%s2434_s1 + $0x3e4] ss:$8 sps:$4 sm:$0xff]   ;;  %v1753_v48 = vld [vmem:[%s2434_s1 + $0x2e0] ss:$8 sps:$4 sm:$0xff]  }
  0x31   :  { %1071 = vmatprep.subr.bf16.mxu1 %v1671_v50  ;;  %v1761_v50 = vld [vmem:[%s2434_s1 + $0x2d4] ss:$8 sps:$4 sm:$0xff]  }
  0x33   :  { %1019 = vmatpush2.bf16.msra.mxu0 %v1673_v52  ;;  %v1759_v52 = vld [vmem:[%s2434_s1 + $0x2d0] ss:$8 sps:$4 sm:$0xff]  }
  0x34   :  { %1072 = vmatpush2.bf16.msra.mxu1 %v1674_v53  ;;  %1020 = vmatprep.subr.bf16.mxu0 %v1675_v54  ;;  %v1762_v53 = vld [vmem:[%s2434_s1 + $0x3d0] ss:$8 sps:$4 sm:$0xff]   ;;  %v1767_v54 = vld [vmem:[%s2434_s1 + $0x2c4] ss:$8 sps:$4 sm:$0xff]  }
  0x35   :  { %1073 = vmatprep.subr.bf16.mxu1 %v1677_v55  ;;  %v1770_v55 = vld [vmem:[%s2434_s1 + $0x3c4] ss:$8 sps:$4 sm:$0xff]  }
  0x37   :  { %1021 = vmatpush2.bf16.msra.mxu0 %v1679_v56  ;;  %v1765_v56 = vld [vmem:[%s2434_s1 + $0x2c0] ss:$8 sps:$4 sm:$0xff]  }
  0x38   :  { %1074 = vmatpush2.bf16.msra.mxu1 %v1680_v57  ;;  %1022 = vmatprep.subr.bf16.mxu0 %v1681_v58  ;;  %v1768_v57 = vld [vmem:[%s2434_s1 + $0x3c0] ss:$8 sps:$4 sm:$0xff]   ;;  %v1773_v58 = vld [vmem:[%s2434_s1 + $0x2b4] ss:$8 sps:$4 sm:$0xff]  }
  0x39   :  { %1075 = vmatprep.subr.bf16.mxu1 %v1683_v59  ;;  %v1776_v59 = vld [vmem:[%s2434_s1 + $0x3b4] ss:$8 sps:$4 sm:$0xff]  }
  0x3b   :  { %1023 = vmatpush2.bf16.msra.mxu0 %v1685_v60  ;;  %v1771_v60 = vld [vmem:[%s2434_s1 + $0x2b0] ss:$8 sps:$4 sm:$0xff]  }
  0x3c   :  { %1076 = vmatpush2.bf16.msra.mxu1 %v1686_v61  ;;  %1024 = vmatprep.subr.bf16.mxu0 %v1687_v62  ;;  %v1774_v61 = vld [vmem:[%s2434_s1 + $0x3b0] ss:$8 sps:$4 sm:$0xff]   ;;  %v1785_v62 = vld [vmem:[%s2434_s1 + $0x2a4] ss:$8 sps:$4 sm:$0xff]  }
  0x3d   :  { %1077 = vmatprep.subr.bf16.mxu1 %v1689_v63  ;;  %v1788_v63 = vld [vmem:[%s2434_s1 + $0x3a4] ss:$8 sps:$4 sm:$0xff]  }
  0x3f   :  { %1025 = vmatpush2.bf16.msra.mxu0 %v1691_v0  ;;  %v1783_v0 = vld [vmem:[%s2434_s1 + $0x2a0] ss:$8 sps:$4 sm:$0xff]  }
  0x40   :  { %1078 = vmatpush2.bf16.msra.mxu1 %v1692_v1  ;;  %1100 = vmatprep.subr.bf16.mxu0 %v1701_v2  ;;  %v1786_v1 = vld [vmem:[%s2434_s1 + $0x3a0] ss:$8 sps:$4 sm:$0xff]   ;;  %v1791_v2 = vld [vmem:[%s2434_s1 + $0x294] ss:$8 sps:$4 sm:$0xff]  }
  0x41   :  { %1153 = vmatprep.subr.bf16.mxu1 %v1704_v3  ;;  %v1794_v3 = vld [vmem:[%s2434_s1 + $0x394] ss:$8 sps:$4 sm:$0xff]  }
  0x42   :  { %1027 = vmatmul.mubr.bf16.vlgmr.msra.gmra.mxu0 %v1693_v4  ;;  %v1789_v4 = vld [vmem:[%s2434_s1 + $0x290] ss:$8 sps:$4 sm:$0xff]  }
  0x43   :  { %1080 = vmatmul.mubr.bf16.vlgmr.msra.gmra.mxu1 %v1696_v5  ;;  %1101 = vmatpush1.bf16.msra.mxu0 %v1699_v6  ;;  %v1792_v5 = vld [vmem:[%s2434_s1 + $0x390] ss:$8 sps:$4 sm:$0xff]   ;;  %v1797_v6 = vld [vmem:[%s2434_s1 + $0x284] ss:$8 sps:$4 sm:$0xff]  }
  0x44   :  { %1154 = vmatpush1.bf16.msra.mxu1 %v1702_v7  ;;  %1102 = vmatprep.subr.bf16.mxu0 %v1707_v8  ;;  %v1800_v7 = vld [vmem:[%s2434_s1 + $0x384] ss:$8 sps:$4 sm:$0xff]   ;;  %v1795_v8 = vld [vmem:[%s2434_s1 + $0x280] ss:$8 sps:$4 sm:$0xff]  }
  0x45   :  { %1155 = vmatprep.subr.bf16.mxu1 %v1710_v9  ;;  %1036 = vmatprep.mubr.bf16.mxu0 %v1777_v26  ;;  %v1798_v9 = vld [vmem:[%s2434_s1 + $0x380] ss:$8 sps:$4 sm:$0xff]   ;;  %v1825_v26 = vld [vmem:[%s2434_s1 + $0x430] ss:$8 sps:$4 sm:$0xff]  }
  0x46   :  { %1089 = vmatprep.mubr.bf16.mxu1 %v1779_v27  ;;  %v1830_v27 = vld [vmem:[%s2434_s1 + $0x424] ss:$8 sps:$4 sm:$0xff]  }
  0x47   :  { %1103 = vmatpush1.bf16.msra.mxu0 %v1705_v10  ;;  %v1809_v10 = vld [vmem:[%s2434_s1 + $0x474] ss:$8 sps:$4 sm:$0xff]  }
  0x48   :  { %1156 = vmatpush1.bf16.msra.mxu1 %v1708_v11  ;;  %1104 = vmatprep.subr.bf16.mxu0 %v1713_v12  ;;  %v1801_v11 = vld [vmem:[%s2435_s0 + $0x10] ss:$36 sps:$4 sm:$0xff]   ;;  %v1804_v12 = vld [vmem:[%s2435_s0 + $0x18] ss:$36 sps:$4 sm:$0xff]  }
  0x49   :  { %1157 = vmatprep.subr.bf16.mxu1 %v1716_v13  ;;  %v1807_v13 = vld [vmem:[%s2434_s1 + $0x470] ss:$8 sps:$4 sm:$0xff]  }
  0x4a   :  { %1037 = vmatmul.mubr.bf16.gmra.mxu0 %v1781_v28  ;;  %v1828_v28 = vld [vmem:[%s2434_s1 + $0x420] ss:$8 sps:$4 sm:$0xff]  }
  0x4b   :  { %1105 = vmatpush1.bf16.msra.mxu0 %v1711_v14  ;;  %1090 = vmatmul.mubr.bf16.gmra.mxu1 %v1782_v29  ;;  %v1812_v14 = vld [vmem:[%s2434_s1 + $0x464] ss:$8 sps:$4 sm:$0xff]   ;;  %v1833_v29 = vld [vmem:[%s2434_s1 + $0x414] ss:$8 sps:$4 sm:$0xff]  }
  0x4c   :  { %1158 = vmatpush1.bf16.msra.mxu1 %v1714_v15  ;;  %1106 = vmatprep.subr.bf16.mxu0 %v1719_v16  ;;  %v1813_v15 = vld [vmem:[%s2435_s0 + $0x5c] ss:$36 sps:$4 sm:$0xff]   ;;  %v1819_v16 = vld [vmem:[%s2435_s0 + $0x64] ss:$36 sps:$4 sm:$0xff]  }
  0x4d   :  { %1159 = vmatprep.subr.bf16.mxu1 %v1722_v17  ;;  %1132 = vmatprep.mubr.bf16.mxu0 %v1803_v41  ;;  %v1810_v17 = vld [vmem:[%s2434_s1 + $0x460] ss:$8 sps:$4 sm:$0xff]  }
  0x4e   :  { %1185 = vmatprep.mubr.bf16.mxu1 %v1806_v43 }
  0x4f   :  { %1107 = vmatpush1.bf16.msra.mxu0 %v1717_v18  ;;  %v1818_v18 = vld [vmem:[%s2434_s1 + $0x454] ss:$8 sps:$4 sm:$0xff]  }
  0x50   :  { %1160 = vmatpush1.bf16.msra.mxu1 %v1720_v19  ;;  %1108 = vmatprep.subr.bf16.mxu0 %v1725_v20  ;;  %v1815_v19 = vld [vmem:[%s2435_s0 + $0x58] ss:$36 sps:$4 sm:$0xff]   ;;  %v1821_v20 = vld [vmem:[%s2435_s0 + $0x60] ss:$36 sps:$4 sm:$0xff]  }
  0x51   :  { %1161 = vmatprep.subr.bf16.mxu1 %v1728_v21  ;;  %v1816_v21 = vld [vmem:[%s2434_s1 + $0x450] ss:$8 sps:$4 sm:$0xff]  }
  0x53   :  { %1109 = vmatpush1.bf16.msra.mxu0 %v1723_v22  ;;  %v1824_v22 = vld [vmem:[%s2434_s1 + $0x444] ss:$8 sps:$4 sm:$0xff]  }
  0x54   :  { %1162 = vmatpush1.bf16.msra.mxu1 %v1726_v23  ;;  %1110 = vmatprep.subr.bf16.mxu0 %v1731_v24  ;;  %v1822_v23 = vld [vmem:[%s2434_s1 + $0x440] ss:$8 sps:$4 sm:$0xff]   ;;  %v1827_v24 = vld [vmem:[%s2434_s1 + $0x434] ss:$8 sps:$4 sm:$0xff]  }
  0x55   :  { %1163 = vmatprep.subr.bf16.mxu1 %v1734_v25  ;;  %v1843_v25 = vmov 0  }
  0x57   :  { %1111 = vmatpush1.bf16.msra.mxu0 %v1729_v30  ;;  %v1831_v30 = vld [vmem:[%s2434_s1 + $0x410] ss:$8 sps:$4 sm:$0xff]  }
  0x58   :  { %1164 = vmatpush1.bf16.msra.mxu1 %v1732_v31  ;;  %1112 = vmatprep.subr.bf16.mxu0 %v1737_v32  ;;  %v1836_v31 = vld [vmem:[%s2434_s1 + $0x404] ss:$8 sps:$4 sm:$0xff]   ;;  %v1834_v32 = vld [vmem:[%s2434_s1 + $0x400] ss:$8 sps:$4 sm:$0xff]  }
  0x59   :  { %1165 = vmatprep.subr.bf16.mxu1 %v1740_v33  ;;  %v1837_v33 = vld [vmem:[%s2435_s0 + $0x20] ss:$36 sps:$4 sm:$0xff]  }
  0x5b   :  { %1113 = vmatpush1.bf16.msra.mxu0 %v1735_v34  ;;  %v1838_v34 = vld [vmem:[%s2435_s0 + $0x68] ss:$36 sps:$4 sm:$0xff]  }
  0x5c   :  { %1166 = vmatpush1.bf16.msra.mxu1 %v1738_v35  ;;  %1114 = vmatprep.subr.bf16.mxu0 %v1743_v36 }
  0x5d   :  { %1167 = vmatprep.subr.bf16.mxu1 %v1746_v37 }
  0x5f   :  { %1115 = vmatpush1.bf16.msra.mxu0 %v1741_v38 }
  0x60   :  { %1168 = vmatpush1.bf16.msra.mxu1 %v1744_v39  ;;  %1116 = vmatprep.subr.bf16.mxu0 %v1749_v40 }
  0x61   :  { %1169 = vmatprep.subr.bf16.mxu1 %v1752_v42 }
  0x63   :  { %1117 = vmatpush2.bf16.msra.mxu0 %v1747_v44 }
  0x64   :  { %1170 = vmatpush2.bf16.msra.mxu1 %v1750_v45  ;;  %1118 = vmatprep.subr.bf16.mxu0 %v1755_v46 }
  0x65   :  { %1171 = vmatprep.subr.bf16.mxu1 %v1758_v47 }
  0x67   :  { %1119 = vmatpush2.bf16.msra.mxu0 %v1753_v48 }
  0x68   :  { %1172 = vmatpush2.bf16.msra.mxu1 %v1756_v49  ;;  %1120 = vmatprep.subr.bf16.mxu0 %v1761_v50 }
  0x69   :  { %1173 = vmatprep.subr.bf16.mxu1 %v1764_v51 }
  0x6b   :  { %1121 = vmatpush2.bf16.msra.mxu0 %v1759_v52 }
  0x6c   :  { %1174 = vmatpush2.bf16.msra.mxu1 %v1762_v53  ;;  %1122 = vmatprep.subr.bf16.mxu0 %v1767_v54 }
  0x6d   :  { %1175 = vmatprep.subr.bf16.mxu1 %v1770_v55 }
  0x6f   :  { %1123 = vmatpush2.bf16.msra.mxu0 %v1765_v56 }
  0x70   :  { %1176 = vmatpush2.bf16.msra.mxu1 %v1768_v57  ;;  %1124 = vmatprep.subr.bf16.mxu0 %v1773_v58 }
  0x71   :  { %1177 = vmatprep.subr.bf16.mxu1 %v1776_v59 }
  0x73   :  { %1125 = vmatpush2.bf16.msra.mxu0 %v1771_v60 }
  0x74   :  { %1178 = vmatpush2.bf16.msra.mxu1 %v1774_v61  ;;  %1126 = vmatprep.subr.bf16.mxu0 %v1785_v62 }
  0x75   :  { %1179 = vmatprep.subr.bf16.mxu1 %v1788_v63 }
  0x77   :  { %1127 = vmatpush2.bf16.msra.mxu0 %v1783_v0 }
  0x78   :  { %1180 = vmatpush2.bf16.msra.mxu1 %v1786_v1  ;;  %1128 = vmatprep.subr.bf16.mxu0 %v1791_v2 }
  0x79   :  { %1181 = vmatprep.subr.bf16.mxu1 %v1794_v3 }
  0x7b   :  { %1129 = vmatpush2.bf16.msra.mxu0 %v1789_v4 }
  0x7c   :  { %1182 = vmatpush2.bf16.msra.mxu1 %v1792_v5  ;;  %1130 = vmatprep.subr.bf16.mxu0 %v1797_v6 }
  0x7d   :  { %1183 = vmatprep.subr.bf16.mxu1 %v1800_v7 }
  0x7f   :  { %1131 = vmatpush2.bf16.msra.mxu0 %v1795_v8 }
  0x80   :  { %1184 = vmatpush2.bf16.msra.mxu1 %v1798_v9  ;;  %1206 = vmatprep.subr.bf16.mxu0 %v1809_v10 }
  0x81   :  { %1579 = vmatprep.subr.bf16.mxu1 %v1809_v10 }
  0x82   :  { %1133 = vmatmul.mubr.bf16.vlgmr.msra.gmra.mxu0 %v1801_v11 }
  0x83   :  { %1186 = vmatmul.mubr.bf16.vlgmr.msra.gmra.mxu1 %v1804_v12  ;;  %1207 = vmatpush1.bf16.msra.mxu0 %v1807_v13 }
  0x84   :  { %1587 = vmatpush1.bf16.msra.mxu1 %v1807_v13  ;;  %1208 = vmatprep.subr.bf16.mxu0 %v1812_v14 }
  0x85   :  { %1580 = vmatprep.subr.bf16.mxu1 %v1812_v14  ;;  %1142 = vmatprep.mubr.bf16.mxu0 %v1813_v15 }
  0x86   :  { %1195 = vmatprep.mubr.bf16.mxu1 %v1819_v16 }
  0x87   :  { %1209 = vmatpush1.bf16.msra.mxu0 %v1810_v17 }
  0x88   :  { %1588 = vmatpush1.bf16.msra.mxu1 %v1810_v17  ;;  %1210 = vmatprep.subr.bf16.mxu0 %v1818_v18 }
  0x89   :  { %1581 = vmatprep.subr.bf16.mxu1 %v1818_v18 }
  0x8a   :  { %1143 = vmatmul.mubr.bf16.gmra.mxu0 %v1815_v19 }
  0x8b   :  { %1196 = vmatmul.mubr.bf16.gmra.mxu1 %v1821_v20  ;;  %1211 = vmatpush1.bf16.msra.mxu0 %v1816_v21 }
  0x8c   :  { %1589 = vmatpush1.bf16.msra.mxu1 %v1816_v21  ;;  %1212 = vmatprep.subr.bf16.mxu0 %v1824_v22 }
  0x8d   :  { %1582 = vmatprep.subr.bf16.mxu1 %v1824_v22  ;;  %1238 = vmatprep.mubr.bf16.mxu0 %v1843_v25 }
  0x8e   :  { %1248 = vmatprep.mubr.bf16.mxu1 %v1843_v25 }
  0x8f   :  { %1213 = vmatpush1.bf16.msra.mxu0 %v1822_v23 }
  0x90   :  { %1590 = vmatpush1.bf16.msra.mxu1 %v1822_v23  ;;  %1214 = vmatprep.subr.bf16.mxu0 %v1827_v24 }
  0x91   :  { %1583 = vmatprep.subr.bf16.mxu1 %v1827_v24 }
  0x93   :  { %1215 = vmatpush1.bf16.msra.mxu0 %v1825_v26 }
  0x94   :  { %1591 = vmatpush1.bf16.msra.mxu1 %v1825_v26  ;;  %1216 = vmatprep.subr.bf16.mxu0 %v1830_v27 }
  0x95   :  { %1584 = vmatprep.subr.bf16.mxu1 %v1830_v27 }
  0x97   :  { %1217 = vmatpush1.bf16.msra.mxu0 %v1828_v28 }
  0x98   :  { %1592 = vmatpush1.bf16.msra.mxu1 %v1828_v28  ;;  %1218 = vmatprep.subr.bf16.mxu0 %v1833_v29 }
  0x99   :  { %1585 = vmatprep.subr.bf16.mxu1 %v1833_v29 }
  0x9b   :  { %1219 = vmatpush1.bf16.msra.mxu0 %v1831_v30 }
  0x9c   :  { %1593 = vmatpush1.bf16.msra.mxu1 %v1831_v30  ;;  %1220 = vmatprep.subr.bf16.mxu0 %v1836_v31 }
  0x9d   :  { %1586 = vmatprep.subr.bf16.mxu1 %v1836_v31 }
  0x9f   :  { %1221 = vmatpush1.bf16.msra.mxu0 %v1834_v32 }
  0xa0   :  { %1594 = vmatpush1.bf16.msra.mxu1 %v1834_v32 }
  0xa2   :  { %1239 = vmatmul.mubr.bf16.vlgmr.msra.gmra.mxu0 %v1837_v33 }
  0xa3   :  { %1249 = vmatmul.mubr.bf16.vlgmr.msra.gmra.mxu1 %v1838_v34 }
 0x102   :  { %v1028_v35 = vpop.f32.mrf.mxu0 }
 0x103   :  { %v1081_v36 = vpop.f32.mrf.mxu1 }
 0x104   :  { %v1030_v37 = vpop.f32.mrf.mxu0  ;;  %v1082_v1 = vadd.f32 %v1081_v36, %v1028_v35 }
 0x105   :  { %v1083_v38 = vpop.f32.mrf.mxu1 }
 0x106   :  { %v1032_v39 = vpop.f32.mrf.mxu0  ;;  %v1084_v2 = vadd.f32 %v1083_v38, %v1030_v37 }
 0x107   :  { %v1085_v40 = vpop.f32.mrf.mxu1 }
 0x108   :  { %v1034_v41 = vpop.f32.mrf.mxu0  ;;  %v1086_v4 = vadd.f32 %v1085_v40, %v1032_v39 }
 0x109   :  { %v1087_v42 = vpop.f32.mrf.mxu1 }
 0x10a   :  { %v1038_v43 = vpop.f32.mrf.mxu0  ;;  %v1088_v12 = vadd.f32 %v1087_v42, %v1034_v41 }
 0x10b   :  { %v1091_v44 = vpop.f32.mrf.mxu1 }
 0x10c   :  { %v1040_v45 = vpop.f32.mrf.mxu0  ;;  %v1092_v3 = vadd.f32 %v1091_v44, %v1038_v43 }
 0x10d   :  { %v1093_v46 = vpop.f32.mrf.mxu1 }
 0x10e   :  { %v1042_v47 = vpop.f32.mrf.mxu0  ;;  %v1094_v6 = vadd.f32 %v1093_v46, %v1040_v45 }
 0x10f   :  { %v1095_v48 = vpop.f32.mrf.mxu1 }
 0x110   :  { %v1044_v49 = vpop.f32.mrf.mxu0  ;;  %v1096_v7 = vadd.f32 %v1095_v48, %v1042_v47 }
 0x111   :  { %v1097_v50 = vpop.f32.mrf.mxu1 }
 0x112   :  { %v1098_v14 = vadd.f32 %v1097_v50, %v1044_v49 }
 0x142   :  { %v1134_v51 = vpop.f32.mrf.mxu0 }
 0x143   :  { %v1187_v52 = vpop.f32.mrf.mxu1  ;;  %v1135_v5 = vadd.f32 %v1134_v51, %v1082_v1 }
 0x144   :  { %v1136_v53 = vpop.f32.mrf.mxu0 }
 0x145   :  { %v1189_v54 = vpop.f32.mrf.mxu1  ;;  %v1137_v8 = vadd.f32 %v1136_v53, %v1084_v2  ;;  %v1188_v19 = vadd.f32 %v1187_v52, %v1135_v5 }
 0x146   :  { %v1138_v55 = vpop.f32.mrf.mxu0 }
 0x147   :  { %v1191_v56 = vpop.f32.mrf.mxu1  ;;  %v1139_v13 = vadd.f32 %v1138_v55, %v1086_v4  ;;  %v1190_v21 = vadd.f32 %v1189_v54, %v1137_v8 }
 0x148   :  { %v1140_v57 = vpop.f32.mrf.mxu0 }
 0x149   :  { %v1193_v58 = vpop.f32.mrf.mxu1  ;;  %v1141_v20 = vadd.f32 %v1140_v57, %v1088_v12  ;;  %v1192_v26 = vadd.f32 %v1191_v56, %v1139_v13 }
 0x14a   :  { %v1144_v59 = vpop.f32.mrf.mxu0 }
 0x14b   :  { %v1197_v60 = vpop.f32.mrf.mxu1  ;;  %v1145_v9 = vadd.f32 %v1144_v59, %v1092_v3  ;;  %v1194_v34 = vadd.f32 %v1193_v58, %v1141_v20 }
 0x14c   :  { %v1146_v61 = vpop.f32.mrf.mxu0 }
 0x14d   :  { %v1199_v62 = vpop.f32.mrf.mxu1  ;;  %v1147_v15 = vadd.f32 %v1146_v61, %v1094_v6  ;;  %v1198_v22 = vadd.f32 %v1197_v60, %v1145_v9 }
 0x14e   :  { %v1148_v63 = vpop.f32.mrf.mxu0 }
 0x14f   :  { %v1201_v0 = vpop.f32.mrf.mxu1  ;;  %v1149_v16 = vadd.f32 %v1148_v63, %v1096_v7  ;;  %v1200_v28 = vadd.f32 %v1199_v62, %v1147_v15 }
 0x150   :  { %v1150_v10 = vpop.f32.mrf.mxu0 }
 0x151   :  { %v1203_v11 = vpop.f32.mrf.mxu1  ;;  %v1151_v23 = vadd.f32 %v1150_v10, %v1098_v14  ;;  %v1202_v29 = vadd.f32 %v1201_v0, %v1149_v16 }
 0x153   :  { %v1204_v36 = vadd.f32 %v1203_v11, %v1151_v23 }
 0x162   :  { %v1240_v17 = vpop.f32.mrf.mxu0 }
 0x163   :  { %v1250_v18 = vpop.f32.mrf.mxu1  ;;  %v2356_v27 = vadd.f32 %v1240_v17, %v1188_v19 }
 0x164   :  { %v1242_v24 = vpop.f32.mrf.mxu0  ;;  %v2358_v30 = vadd.f32 %v1250_v18, %v1198_v22 }
 0x165   :  { %v1252_v25 = vpop.f32.mrf.mxu1  ;;  %v2360_v31 = vadd.f32 %v1242_v24, %v1190_v21  ;;  %v1279_v41 = vmul.f32 %v2356_v27, %v2356_v27 }
 0x166   :  { %v1244_v32 = vpop.f32.mrf.mxu0  ;;  %v2364_v37 = vadd.f32 %v1252_v25, %v1200_v28  ;;  %v1283_v45 = vmul.f32 %v2358_v30, %v2358_v30 }
 0x167   :  { %v1254_v33 = vpop.f32.mrf.mxu1  ;;  %v2362_v35 = vadd.f32 %v1244_v32, %v1192_v26  ;;  %v1280_v46 = vmul.f32 %v2360_v31, %v2360_v31 }
 0x168   :  { %v2366_v38 = vadd.f32 %v1254_v33, %v1202_v29  ;;  %v1246_v39 = vpop.f32.mrf.mxu0  ;;  %v1284_v52 = vmul.f32 %v2364_v37, %v2364_v37 }
 0x169   :  { %v1256_v40 = vpop.f32.mrf.mxu1  ;;  %v1259_v42 = vadd.f32 %v2362_v35, %v2356_v27  ;;  %v1281_v43 = vmul.f32 %v2362_v35, %v2362_v35  ;;  %v2374_v44 = vadd.f32 %v1246_v39, %v1194_v34 }
 0x16a   :  { %v2380_v47 = vadd.f32 %v1256_v40, %v1204_v36  ;;  %v1285_v53 = vmul.f32 %v2366_v38, %v2366_v38 }
 0x16b   :  { %v1287_v48 = vadd.f32 %v1281_v43, %v1279_v41  ;;  %v1260_v49 = vadd.f32 %v1259_v42, %v2358_v30  ;;  %v1268_v50 = vadd.f32 %v2374_v44, %v2360_v31  ;;  %v1282_v51 = vmul.f32 %v2374_v44, %v2374_v44 }
 0x16c   :  { %v1286_v58 = vmul.f32 %v2380_v47, %v2380_v47  ;;  %v1844_v41 = vmov 1966171168   ;;  %v1324_v43 = vlaneseq }
 0x16d   :  { %v1261_v54 = vadd.f32 %v1260_v49, %v2366_v38  ;;  %v1288_v55 = vadd.f32 %v1287_v48, %v1283_v45  ;;  %v1296_v56 = vadd.f32 %v1282_v51, %v1280_v46  ;;  %v1269_v57 = vadd.f32 %v1268_v50, %v2364_v37 }
 0x16e   :  { %v1322_v42 = vunpack.c.l.s4 %v1844_v41  ;;  %v1325_v46 = vshrl.u32 %v1324_v43, 7 }
 0x16f   :  { %v1262_v59 = vrot.slane %v1261_v54, 4  ;;  %v1289_v60 = vadd.f32 %v1288_v55, %v1285_v53  ;;  %v1270_v61 = vadd.f32 %v1269_v57, %v2380_v47  ;;  %v1297_v62 = vadd.f32 %v1296_v56, %v1284_v52  ;;  %v1313_v53 = vld [vmem:[%s2436_s2] sm:$0x3] }
 0x170   :  { %v1323_v45 = vunpack.c.0.s8 %v1322_v42  ;;  %v1341_v55 = vsub.s32 0, %v1325_v46  ;;  %v1345_v56 = vsub.s32 1, %v1325_v46 }
 0x171   :  { %v1263_v63 = vadd.f32 %v1262_v59, %v1261_v54  ;;  %v1290_v0 = vrot.slane %v1289_v60, 4  ;;  %v1271_v1 = vrot.slane %v1270_v61, 4  ;;  %v1298_v2 = vadd.f32 %v1297_v62, %v1286_v58 }
 0x172   :  { %v1326_v49 = vsub.s32 %v1323_v45, %v1325_v46 }
 0x173   :  { %v1264_v3 = vrot.slane %v1263_v63, 2  ;;  %v1291_v4 = vadd.f32 %v1290_v0, %v1289_v60  ;;  %v1272_v5 = vadd.f32 %v1271_v1, %v1270_v61  ;;  %v1299_v6 = vrot.slane %v1298_v2, 4  ;;  %v1337_v0 = vld [vmem:[%s2437_s3] sm:$0x3] }
 0x175   :  { %v1265_v7 = vadd.f32 %v1264_v3, %v1263_v63  ;;  %v1292_v8 = vrot.slane %v1291_v4, 2  ;;  %v1273_v9 = vrot.slane %v1272_v5, 2  ;;  %v1300_v10 = vadd.f32 %v1299_v6, %v1298_v2 }
 0x177   :  { %v1266_v11 = vrot.slane %v1265_v7, 1  ;;  %v1293_v12 = vadd.f32 %v1292_v8, %v1291_v4  ;;  %v1274_v13 = vadd.f32 %v1273_v9, %v1272_v5  ;;  %v1301_v14 = vrot.slane %v1300_v10, 2 }
 0x179   :  { %v1267_v15 = vadd.f32 %v1266_v11, %v1265_v7  ;;  %v1294_v16 = vrot.slane %v1293_v12, 1  ;;  %v1275_v17 = vrot.slane %v1274_v13, 1  ;;  %v1302_v18 = vadd.f32 %v1301_v14, %v1300_v10 }
 0x17b   :  { %v1277_v19 = vmul.f32 0.055555556, %v1267_v15  ;;  %v1295_v20 = vadd.f32 %v1294_v16, %v1293_v12  ;;  %v1276_v21 = vadd.f32 %v1275_v17, %v1274_v13  ;;  %v1303_v22 = vrot.slane %v1302_v18, 1 }
 0x17d   :  { %v1305_v23 = vmul.f32 0.055555556, %v1295_v20  ;;  %v1307_v24 = vmul.f32 %v1277_v19, %v1277_v19  ;;  %v1278_v25 = vmul.f32 0.055555556, %v1276_v21  ;;  %v1304_v26 = vadd.f32 %v1303_v22, %v1302_v18 }
 0x17f   :  { %v1309_v28 = vsub.f32 %v1305_v23, %v1307_v24  ;;  %v1306_v29 = vmul.f32 0.055555556, %v1304_v26  ;;  %v1308_v32 = vmul.f32 %v1278_v25, %v1278_v25 }
 0x181   :  { %v1311_v33 = vmax.f32 %v1309_v28, 0.0  ;;  %v1310_v34 = vsub.f32 %v1306_v29, %v1308_v32 }
 0x183   :  { %v1314_v36 = vadd.f32 1e-05, %v1311_v33  ;;  %v1312_v39 = vmax.f32 %v1310_v34, 0.0 }
 0x185   :  { %v1315_v40 = vadd.f32 1e-05, %v1312_v39  ;;  %1839 = vrsqrt.f32 %v1314_v36 }
 0x187   :  { %1841 = vrsqrt.f32 %v1315_v40 }
 0x192   :  { %v1840_v48 = vpop.eup %1839 }
 0x194   :  { %v1842_v50 = vpop.eup %1841 }
 0x195   :  { %v1320_v51 = vcombine.low %v1840_v48, %v1842_v50 }
 0x197   :  { %v1327_v52 = vrot.slane %v1320_v51, %v1326_v49 }
 0x199   :  { %v1334_v54 = vrot.slane %v1327_v52, %v1326_v49 }
 0x19b   :  { %v1336_v57 = vmul.f32 %v1334_v54, %v1313_v53 }
 0x19d   :  { %v1342_v58 = vrot.slane %v1336_v57, %v1341_v55  ;;  %v1346_v59 = vrot.slane %v1336_v57, %v1345_v56 }
 0x19f   :  { %v1349_v60 = vmul.f32 %v1342_v58, %v1277_v19  ;;  %v1350_v61 = vmul.f32 %v1346_v59, %v1278_v25  ;;  %v1370_v3 = vmul.f32 %v1342_v58, %v2356_v27  ;;  %v1371_v4 = vmul.f32 %v1346_v59, %v2360_v31 }
 0x1a0   :  { %v1372_v5 = vmul.f32 %v1342_v58, %v2362_v35  ;;  %v1373_v6 = vmul.f32 %v1346_v59, %v2374_v44  ;;  %v1374_v9 = vmul.f32 %v1342_v58, %v2358_v30  ;;  %v1375_v10 = vmul.f32 %v1346_v59, %v2364_v37 }
 0x1a1   :  { %v1353_v62 = vcombine.low %v1349_v60, %v1350_v61  ;;  %v1376_v11 = vmul.f32 %v1342_v58, %v2366_v38  ;;  %v1377_v12 = vmul.f32 %v1346_v59, %v2380_v47 }
 0x1a3   :  { %v1360_v63 = vrot.slane %v1353_v62, %v1326_v49 }
 0x1a5   :  { %v1367_v1 = vrot.slane %v1360_v63, %v1326_v49 }
 0x1a7   :  { %v1369_v2 = vsub.f32 %v1337_v0, %v1367_v1 }
 0x1a9   :  { %v1382_v7 = vrot.slane %v1369_v2, %v1341_v55  ;;  %v1386_v8 = vrot.slane %v1369_v2, %v1345_v56 }
 0x1ab   :  { %v1389_v13 = vadd.f32 %v1382_v7, %v1370_v3  ;;  %v1390_v14 = vadd.f32 %v1386_v8, %v1371_v4  ;;  %v1391_v15 = vadd.f32 %v1382_v7, %v1372_v5  ;;  %v1392_v27 = vadd.f32 %v1386_v8, %v1373_v6 }
 0x1ac   :  { %v1393_v16 = vadd.f32 %v1382_v7, %v1374_v9  ;;  %v1394_v31 = vadd.f32 %v1386_v8, %v1375_v10  ;;  %v1395_v17 = vadd.f32 %v1382_v7, %v1376_v11  ;;  %v1396_v35 = vadd.f32 %v1386_v8, %v1377_v12 }
 0x1ad   :  { %v1397_v18 = vmax.f32 %v1389_v13, 0.0  ;;  %v1398_v44 = vmax.f32 %v1390_v14, 0.0  ;;  %v1399_v19 = vmax.f32 %v1391_v15, 0.0  ;;  %v1400_v20 = vmax.f32 %v1392_v27, 0.0 }
 0x1ae   :  { %v1401_v21 = vmax.f32 %v1393_v16, 0.0  ;;  %v1402_v30 = vmax.f32 %v1394_v31, 0.0  ;;  %v1403_v22 = vmax.f32 %v1395_v17, 0.0  ;;  %v1404_v37 = vmax.f32 %v1396_v35, 0.0 }
 0x1af   :  { %1405 = vst [vmem:[%s2438_s4] sm:$0xff] %v1397_v18  ;;  %1406 = vst [vmem:[%s2438_s4 + $0x8] sm:$0xff] %v1398_v44 }
 0x1b0   :  { %1407 = vst [vmem:[%s2438_s4 + $0x10] sm:$0xff] %v1399_v19  ;;  %1408 = vst [vmem:[%s2438_s4 + $0x18] sm:$0xff] %v1400_v20 }
 0x1b1   :  { %1409 = vst [vmem:[%s2438_s4 + $0x20] sm:$0xff] %v1401_v21  ;;  %1410 = vst [vmem:[%s2438_s4 + $0x28] sm:$0xff] %v1402_v30 }
 0x1b2   :  { %1411 = vst [vmem:[%s2438_s4 + $0x30] sm:$0xff] %v1403_v22  ;;  %1412 = vst [vmem:[%s2438_s4 + $0x38] sm:$0xff] %v1404_v37 }

// kernel: resnet_forward.18
= control target key start
LH: loop header
LB: loop body
LE: loop exit
PB: predicated region body
PF: predicated region fallthrough
CT: control target
= control target key end

     0   :  { %v399_v1 = vmov 0   ;;  %s558_s1 = inlined_call_operand.vmem [shape: bf16[128,256], index: 1, kind: input, shape index: {}]   ;;  %s559_s0 = inlined_call_operand.vmem [shape: bf16[32,128], index: 0, kind: input, shape index: {}]   ;;  %s560_s2 = inlined_call_operand.vmem [shape: f32[1,256], index: 2, kind: input, shape index: {}]   ;;  %s561_s3 = inlined_call_operand.vmem [shape: f32[1,256], index: 3, kind: input, shape index: {}]   ;;  %s562_s4 = inlined_call_operand.vmem [shape: f32[32,256], index: 4, kind: output, shape index: {}]  }
   0x1   :  { %v369_v0 = vld [vmem:[%s558_s1 + $0x74] ss:$8 sps:$4 sm:$0xff]   ;;  %162 = vmatprep.mubr.bf16.mxu0 %v399_v1  ;;  %172 = vmatprep.mubr.bf16.mxu1 %v399_v1  ;;  %v371_v2 = vld [vmem:[%s558_s1 + $0x70] ss:$8 sps:$4 sm:$0xff]   ;;  %v372_v3 = vld [vmem:[%s558_s1 + $0x64] ss:$8 sps:$4 sm:$0xff]  }
   0x2   :  { %130 = vmatprep.subr.bf16.mxu0 %v369_v0  ;;  %351 = vmatprep.subr.bf16.mxu1 %v369_v0  ;;  %v374_v4 = vld [vmem:[%s558_s1 + $0x60] ss:$8 sps:$4 sm:$0xff]   ;;  %v375_v5 = vld [vmem:[%s558_s1 + $0x54] ss:$8 sps:$4 sm:$0xff]   ;;  %v377_v6 = vld [vmem:[%s558_s1 + $0x50] ss:$8 sps:$4 sm:$0xff]  }
   0x3   :  { %131 = vmatpush1.bf16.msra.mxu0 %v371_v2  ;;  %359 = vmatpush1.bf16.msra.mxu1 %v371_v2  ;;  %v378_v7 = vld [vmem:[%s558_s1 + $0x44] ss:$8 sps:$4 sm:$0xff]   ;;  %v380_v8 = vld [vmem:[%s558_s1 + $0x40] ss:$8 sps:$4 sm:$0xff]   ;;  %v381_v9 = vld [vmem:[%s558_s1 + $0x34] ss:$8 sps:$4 sm:$0xff]  }
   0x4   :  { %132 = vmatprep.subr.bf16.mxu0 %v372_v3  ;;  %352 = vmatprep.subr.bf16.mxu1 %v372_v3  ;;  %v383_v10 = vld [vmem:[%s558_s1 + $0x30] ss:$8 sps:$4 sm:$0xff]   ;;  %v384_v11 = vld [vmem:[%s558_s1 + $0x24] ss:$8 sps:$4 sm:$0xff]   ;;  %v386_v12 = vld [vmem:[%s558_s1 + $0x20] ss:$8 sps:$4 sm:$0xff]  }
   0x5   :  { %v387_v13 = vld [vmem:[%s558_s1 + $0x14] ss:$8 sps:$4 sm:$0xff]   ;;  %v389_v14 = vld [vmem:[%s558_s1 + $0x10] ss:$8 sps:$4 sm:$0xff]   ;;  %v390_v15 = vld [vmem:[%s558_s1 + $0x4] ss:$8 sps:$4 sm:$0xff]  }
   0x6   :  { %v392_v16 = vld [vmem:[%s558_s1] ss:$8 sps:$4 sm:$0xff]  }
   0x7   :  { %133 = vmatpush1.bf16.msra.mxu0 %v374_v4  ;;  %360 = vmatpush1.bf16.msra.mxu1 %v374_v4  ;;  %v393_v17 = vld [vmem:[%s559_s0] sm:$0xff]   ;;  %v394_v18 = vld [vmem:[%s559_s0 + $0x8] sm:$0xff]  }
   0x8   :  { %134 = vmatprep.subr.bf16.mxu0 %v375_v5  ;;  %353 = vmatprep.subr.bf16.mxu1 %v375_v5 }
   0xb   :  { %135 = vmatpush1.bf16.msra.mxu0 %v377_v6  ;;  %361 = vmatpush1.bf16.msra.mxu1 %v377_v6 }
   0xc   :  { %136 = vmatprep.subr.bf16.mxu0 %v378_v7  ;;  %354 = vmatprep.subr.bf16.mxu1 %v378_v7 }
   0xf   :  { %137 = vmatpush1.bf16.msra.mxu0 %v380_v8  ;;  %362 = vmatpush1.bf16.msra.mxu1 %v380_v8 }
  0x10   :  { %138 = vmatprep.subr.bf16.mxu0 %v381_v9  ;;  %355 = vmatprep.subr.bf16.mxu1 %v381_v9 }
  0x13   :  { %139 = vmatpush1.bf16.msra.mxu0 %v383_v10  ;;  %363 = vmatpush1.bf16.msra.mxu1 %v383_v10 }
  0x14   :  { %140 = vmatprep.subr.bf16.mxu0 %v384_v11  ;;  %356 = vmatprep.subr.bf16.mxu1 %v384_v11 }
  0x17   :  { %141 = vmatpush1.bf16.msra.mxu0 %v386_v12  ;;  %364 = vmatpush1.bf16.msra.mxu1 %v386_v12 }
  0x18   :  { %142 = vmatprep.subr.bf16.mxu0 %v387_v13  ;;  %357 = vmatprep.subr.bf16.mxu1 %v387_v13 }
  0x1b   :  { %143 = vmatpush1.bf16.msra.mxu0 %v389_v14  ;;  %365 = vmatpush1.bf16.msra.mxu1 %v389_v14 }
  0x1c   :  { %144 = vmatprep.subr.bf16.mxu0 %v390_v15  ;;  %358 = vmatprep.subr.bf16.mxu1 %v390_v15 }
  0x1f   :  { %145 = vmatpush1.bf16.msra.mxu0 %v392_v16  ;;  %366 = vmatpush1.bf16.msra.mxu1 %v392_v16 }
  0x22   :  { %163 = vmatmul.mubr.bf16.vlgmr.msra.gmra.mxu0 %v393_v17  ;;  %173 = vmatmul.mubr.bf16.vlgmr.msra.gmra.mxu1 %v394_v18 }
  0xe2   :  { %v480_v19 = vpop.f32.mrf.mxu0  ;;  %v482_v20 = vpop.f32.mrf.mxu1 }
  0xe3   :  { %v203_v25 = vmul.f32 %v480_v19, %v480_v19  ;;  %v207_v28 = vmul.f32 %v482_v20, %v482_v20 }
  0xe4   :  { %v484_v21 = vpop.f32.mrf.mxu0  ;;  %v486_v22 = vpop.f32.mrf.mxu1 }
  0xe5   :  { %v204_v29 = vmul.f32 %v484_v21, %v484_v21  ;;  %v208_v36 = vmul.f32 %v486_v22, %v486_v22 }
  0xe6   :  { %v488_v23 = vpop.f32.mrf.mxu0  ;;  %v490_v24 = vpop.f32.mrf.mxu1 }
  0xe7   :  { %v183_v26 = vadd.f32 %v488_v23, %v480_v19  ;;  %v205_v27 = vmul.f32 %v488_v23, %v488_v23  ;;  %v209_v37 = vmul.f32 %v490_v24, %v490_v24 }
  0xe8   :  { %v502_v30 = vpop.f32.mrf.mxu0  ;;  %v509_v35 = vpop.f32.mrf.mxu1 }
  0xe9   :  { %v211_v31 = vadd.f32 %v205_v27, %v203_v25  ;;  %v184_v32 = vadd.f32 %v183_v26, %v482_v20  ;;  %v192_v33 = vadd.f32 %v502_v30, %v484_v21  ;;  %v206_v34 = vmul.f32 %v502_v30, %v502_v30 }
  0xea   :  { %v210_v42 = vmul.f32 %v509_v35, %v509_v35  ;;  %v400_v25 = vmov 1966171168   ;;  %v248_v27 = vlaneseq }
  0xeb   :  { %v185_v38 = vadd.f32 %v184_v32, %v490_v24  ;;  %v212_v39 = vadd.f32 %v211_v31, %v207_v28  ;;  %v220_v40 = vadd.f32 %v206_v34, %v204_v29  ;;  %v193_v41 = vadd.f32 %v192_v33, %v486_v22 }
  0xec   :  { %v246_v26 = vunpack.c.l.s4 %v400_v25  ;;  %v249_v29 = vshrl.u32 %v248_v27, 7 }
  0xed   :  { %v186_v43 = vrot.slane %v185_v38, 4  ;;  %v213_v44 = vadd.f32 %v212_v39, %v209_v37  ;;  %v194_v45 = vadd.f32 %v193_v41, %v509_v35  ;;  %v221_v46 = vadd.f32 %v220_v40, %v208_v36  ;;  %v237_v37 = vld [vmem:[%s560_s2] sm:$0x3] }
  0xee   :  { %v247_v28 = vunpack.c.0.s8 %v246_v26  ;;  %v265_v39 = vsub.s32 0, %v249_v29  ;;  %v269_v40 = vsub.s32 1, %v249_v29 }
  0xef   :  { %v187_v47 = vadd.f32 %v186_v43, %v185_v38  ;;  %v214_v48 = vrot.slane %v213_v44, 4  ;;  %v195_v49 = vrot.slane %v194_v45, 4  ;;  %v222_v50 = vadd.f32 %v221_v46, %v210_v42 }
  0xf0   :  { %v250_v32 = vsub.s32 %v247_v28, %v249_v29 }
  0xf1   :  { %v188_v51 = vrot.slane %v187_v47, 2  ;;  %v215_v52 = vadd.f32 %v214_v48, %v213_v44  ;;  %v196_v53 = vadd.f32 %v195_v49, %v194_v45  ;;  %v223_v54 = vrot.slane %v222_v50, 4  ;;  %v261_v48 = vld [vmem:[%s561_s3] sm:$0x3] }
  0xf3   :  { %v189_v55 = vadd.f32 %v188_v51, %v187_v47  ;;  %v216_v56 = vrot.slane %v215_v52, 2  ;;  %v197_v57 = vrot.slane %v196_v53, 2  ;;  %v224_v58 = vadd.f32 %v223_v54, %v222_v50 }
  0xf5   :  { %v190_v59 = vrot.slane %v189_v55, 1  ;;  %v217_v60 = vadd.f32 %v216_v56, %v215_v52  ;;  %v198_v61 = vadd.f32 %v197_v57, %v196_v53  ;;  %v225_v62 = vrot.slane %v224_v58, 2 }
  0xf7   :  { %v191_v63 = vadd.f32 %v190_v59, %v189_v55  ;;  %v218_v0 = vrot.slane %v217_v60, 1  ;;  %v199_v1 = vrot.slane %v198_v61, 1  ;;  %v226_v2 = vadd.f32 %v225_v62, %v224_v58 }
  0xf9   :  { %v201_v3 = vmul.f32 0.055555556, %v191_v63  ;;  %v219_v4 = vadd.f32 %v218_v0, %v217_v60  ;;  %v200_v5 = vadd.f32 %v199_v1, %v198_v61  ;;  %v227_v6 = vrot.slane %v226_v2, 1 }
  0xfb   :  { %v229_v7 = vmul.f32 0.055555556, %v219_v4  ;;  %v231_v8 = vmul.f32 %v201_v3, %v201_v3  ;;  %v202_v9 = vmul.f32 0.055555556, %v200_v5  ;;  %v228_v10 = vadd.f32 %v227_v6, %v226_v2 }
  0xfd   :  { %v233_v11 = vsub.f32 %v229_v7, %v231_v8  ;;  %v230_v12 = vmul.f32 0.055555556, %v228_v10  ;;  %v232_v13 = vmul.f32 %v202_v9, %v202_v9 }
  0xff   :  { %v235_v14 = vmax.f32 %v233_v11, 0.0  ;;  %v234_v15 = vsub.f32 %v230_v12, %v232_v13 }
 0x101   :  { %v238_v16 = vadd.f32 1e-05, %v235_v14  ;;  %v236_v17 = vmax.f32 %v234_v15, 0.0 }
 0x103   :  { %v239_v18 = vadd.f32 1e-05, %v236_v17  ;;  %395 = vrsqrt.f32 %v238_v16 }
 0x105   :  { %397 = vrsqrt.f32 %v239_v18 }
 0x110   :  { %v396_v31 = vpop.eup %395 }
 0x112   :  { %v398_v33 = vpop.eup %397 }
 0x113   :  { %v244_v34 = vcombine.low %v396_v31, %v398_v33 }
 0x115   :  { %v251_v36 = vrot.slane %v244_v34, %v250_v32 }
 0x117   :  { %v258_v38 = vrot.slane %v251_v36, %v250_v32 }
 0x119   :  { %v260_v41 = vmul.f32 %v258_v38, %v237_v37 }
 0x11b   :  { %v266_v42 = vrot.slane %v260_v41, %v265_v39  ;;  %v270_v43 = vrot.slane %v260_v41, %v269_v40 }
 0x11d   :  { %v273_v44 = vmul.f32 %v266_v42, %v201_v3  ;;  %v274_v45 = vmul.f32 %v270_v43, %v202_v9  ;;  %v294_v51 = vmul.f32 %v266_v42, %v480_v19  ;;  %v295_v52 = vmul.f32 %v270_v43, %v484_v21 }
 0x11e   :  { %v296_v53 = vmul.f32 %v266_v42, %v488_v23  ;;  %v297_v54 = vmul.f32 %v270_v43, %v502_v30  ;;  %v298_v57 = vmul.f32 %v266_v42, %v482_v20  ;;  %v299_v58 = vmul.f32 %v270_v43, %v486_v22 }
 0x11f   :  { %v277_v46 = vcombine.low %v273_v44, %v274_v45  ;;  %v300_v59 = vmul.f32 %v266_v42, %v490_v24  ;;  %v301_v60 = vmul.f32 %v270_v43, %v509_v35 }
 0x121   :  { %v284_v47 = vrot.slane %v277_v46, %v250_v32 }
 0x123   :  { %v291_v49 = vrot.slane %v284_v47, %v250_v32 }
 0x125   :  { %v293_v50 = vsub.f32 %v261_v48, %v291_v49 }
 0x127   :  { %v306_v55 = vrot.slane %v293_v50, %v265_v39  ;;  %v310_v56 = vrot.slane %v293_v50, %v269_v40 }
 0x129   :  { %v313_v61 = vadd.f32 %v306_v55, %v294_v51  ;;  %v314_v62 = vadd.f32 %v310_v56, %v295_v52  ;;  %v315_v63 = vadd.f32 %v306_v55, %v296_v53  ;;  %v316_v19 = vadd.f32 %v310_v56, %v297_v54 }
 0x12a   :  { %v317_v0 = vadd.f32 %v306_v55, %v298_v57  ;;  %v318_v21 = vadd.f32 %v310_v56, %v299_v58  ;;  %v319_v1 = vadd.f32 %v306_v55, %v300_v59  ;;  %v320_v23 = vadd.f32 %v310_v56, %v301_v60 }
 0x12b   :  { %321 = vst [vmem:[%s562_s4] sm:$0xff] %v313_v61  ;;  %322 = vst [vmem:[%s562_s4 + $0x8] sm:$0xff] %v314_v62 }
 0x12c   :  { %323 = vst [vmem:[%s562_s4 + $0x10] sm:$0xff] %v315_v63  ;;  %324 = vst [vmem:[%s562_s4 + $0x18] sm:$0xff] %v316_v19 }
 0x12d   :  { %325 = vst [vmem:[%s562_s4 + $0x20] sm:$0xff] %v317_v0  ;;  %326 = vst [vmem:[%s562_s4 + $0x28] sm:$0xff] %v318_v21 }
 0x12e   :  { %327 = vst [vmem:[%s562_s4 + $0x30] sm:$0xff] %v319_v1  ;;  %328 = vst [vmem:[%s562_s4 + $0x38] sm:$0xff] %v320_v23 }

// kernel: resnet_forward.19
= control target key start
LH: loop header
LB: loop body
LE: loop exit
PB: predicated region body
PF: predicated region fallthrough
CT: control target
= control target key end

     0   :  { %s4582_s1 = inlined_call_operand.vmem [shape: bf16[2304,256], index: 1, kind: input, shape index: {}]   ;;  %s4583_s0 = inlined_call_operand.vmem [shape: bf16[32,2304], index: 0, kind: input, shape index: {}]   ;;  %s4584_s2 = inlined_call_operand.vmem [shape: f32[1,256], index: 2, kind: input, shape index: {}]   ;;  %s4585_s3 = inlined_call_operand.vmem [shape: f32[1,256], index: 3, kind: input, shape index: {}]   ;;  %s4586_s4 = inlined_call_operand.vmem [shape: f32[32,256], index: 4, kind: input, shape index: {}]   ;;  %s4587_s5 = inlined_call_operand.vmem [shape: f32[32,256], index: 5, kind: output, shape index: {}]  }
   0x1   :  { %v2972_v0 = vld [vmem:[%s4582_s1 + $0x74] ss:$8 sps:$4 sm:$0xff]   ;;  %v2976_v2 = vld [vmem:[%s4582_s1 + $0x70] ss:$8 sps:$4 sm:$0xff]   ;;  %v2978_v4 = vld [vmem:[%s4582_s1 + $0x64] ss:$8 sps:$4 sm:$0xff]  }
   0x2   :  { %v2974_v1 = vld [vmem:[%s4582_s1 + $0x174] ss:$8 sps:$4 sm:$0xff]   ;;  %1964 = vmatprep.subr.bf16.mxu0 %v2972_v0  ;;  %v2977_v3 = vld [vmem:[%s4582_s1 + $0x170] ss:$8 sps:$4 sm:$0xff]   ;;  %v2980_v5 = vld [vmem:[%s4582_s1 + $0x164] ss:$8 sps:$4 sm:$0xff]  }
   0x3   :  { %2017 = vmatprep.subr.bf16.mxu1 %v2974_v1  ;;  %1965 = vmatpush1.bf16.msra.mxu0 %v2976_v2  ;;  %v2982_v6 = vld [vmem:[%s4582_s1 + $0x60] ss:$8 sps:$4 sm:$0xff]   ;;  %v2984_v8 = vld [vmem:[%s4582_s1 + $0x54] ss:$8 sps:$4 sm:$0xff]   ;;  %v2988_v10 = vld [vmem:[%s4582_s1 + $0x50] ss:$8 sps:$4 sm:$0xff]  }
   0x4   :  { %2018 = vmatpush1.bf16.msra.mxu1 %v2977_v3  ;;  %1966 = vmatprep.subr.bf16.mxu0 %v2978_v4  ;;  %v2983_v7 = vld [vmem:[%s4582_s1 + $0x160] ss:$8 sps:$4 sm:$0xff]   ;;  %v2986_v9 = vld [vmem:[%s4582_s1 + $0x154] ss:$8 sps:$4 sm:$0xff]   ;;  %v2989_v11 = vld [vmem:[%s4582_s1 + $0x150] ss:$8 sps:$4 sm:$0xff]  }
   0x5   :  { %2019 = vmatprep.subr.bf16.mxu1 %v2980_v5  ;;  %v2990_v12 = vld [vmem:[%s4582_s1 + $0x44] ss:$8 sps:$4 sm:$0xff]   ;;  %v2994_v14 = vld [vmem:[%s4582_s1 + $0x40] ss:$8 sps:$4 sm:$0xff]   ;;  %v2996_v16 = vld [vmem:[%s4582_s1 + $0x34] ss:$8 sps:$4 sm:$0xff]  }
   0x6   :  { %v2992_v13 = vld [vmem:[%s4582_s1 + $0x144] ss:$8 sps:$4 sm:$0xff]   ;;  %v2995_v15 = vld [vmem:[%s4582_s1 + $0x140] ss:$8 sps:$4 sm:$0xff]   ;;  %v2998_v17 = vld [vmem:[%s4582_s1 + $0x134] ss:$8 sps:$4 sm:$0xff]  }
   0x7   :  { %1967 = vmatpush1.bf16.msra.mxu0 %v2982_v6  ;;  %v3000_v18 = vld [vmem:[%s4582_s1 + $0x30] ss:$8 sps:$4 sm:$0xff]   ;;  %v3002_v20 = vld [vmem:[%s4582_s1 + $0x24] ss:$8 sps:$4 sm:$0xff]   ;;  %v3006_v22 = vld [vmem:[%s4582_s1 + $0x20] ss:$8 sps:$4 sm:$0xff]  }
   0x8   :  { %2020 = vmatpush1.bf16.msra.mxu1 %v2983_v7  ;;  %1968 = vmatprep.subr.bf16.mxu0 %v2984_v8  ;;  %v3001_v19 = vld [vmem:[%s4582_s1 + $0x130] ss:$8 sps:$4 sm:$0xff]   ;;  %v3004_v21 = vld [vmem:[%s4582_s1 + $0x124] ss:$8 sps:$4 sm:$0xff]   ;;  %v3007_v23 = vld [vmem:[%s4582_s1 + $0x120] ss:$8 sps:$4 sm:$0xff]  }
   0x9   :  { %2021 = vmatprep.subr.bf16.mxu1 %v2986_v9  ;;  %v3008_v24 = vld [vmem:[%s4582_s1 + $0x14] ss:$8 sps:$4 sm:$0xff]   ;;  %v3012_v26 = vld [vmem:[%s4582_s1 + $0x10] ss:$8 sps:$4 sm:$0xff]   ;;  %v3014_v28 = vld [vmem:[%s4582_s1 + $0x4] ss:$8 sps:$4 sm:$0xff]  }
   0xa   :  { %v3010_v25 = vld [vmem:[%s4582_s1 + $0x114] ss:$8 sps:$4 sm:$0xff]   ;;  %v3013_v27 = vld [vmem:[%s4582_s1 + $0x110] ss:$8 sps:$4 sm:$0xff]   ;;  %v3016_v29 = vld [vmem:[%s4582_s1 + $0x104] ss:$8 sps:$4 sm:$0xff]  }
   0xb   :  { %1969 = vmatpush1.bf16.msra.mxu0 %v2988_v10  ;;  %v3018_v30 = vld [vmem:[%s4582_s1] ss:$8 sps:$4 sm:$0xff]   ;;  %v3020_v32 = vld [vmem:[%s4582_s1 + $0xf4] ss:$8 sps:$4 sm:$0xff]   ;;  %v3024_v34 = vld [vmem:[%s4582_s1 + $0xf0] ss:$8 sps:$4 sm:$0xff]  }
   0xc   :  { %2022 = vmatpush1.bf16.msra.mxu1 %v2989_v11  ;;  %1970 = vmatprep.subr.bf16.mxu0 %v2990_v12  ;;  %v3019_v31 = vld [vmem:[%s4582_s1 + $0x100] ss:$8 sps:$4 sm:$0xff]   ;;  %v3022_v33 = vld [vmem:[%s4582_s1 + $0x1f4] ss:$8 sps:$4 sm:$0xff]   ;;  %v3025_v35 = vld [vmem:[%s4582_s1 + $0x1f0] ss:$8 sps:$4 sm:$0xff]  }
   0xd   :  { %2023 = vmatprep.subr.bf16.mxu1 %v2992_v13  ;;  %v3026_v36 = vld [vmem:[%s4582_s1 + $0xe4] ss:$8 sps:$4 sm:$0xff]   ;;  %v3030_v38 = vld [vmem:[%s4582_s1 + $0xe0] ss:$8 sps:$4 sm:$0xff]   ;;  %v3032_v40 = vld [vmem:[%s4582_s1 + $0xd4] ss:$8 sps:$4 sm:$0xff]  }
   0xe   :  { %v3028_v37 = vld [vmem:[%s4582_s1 + $0x1e4] ss:$8 sps:$4 sm:$0xff]   ;;  %v3031_v39 = vld [vmem:[%s4582_s1 + $0x1e0] ss:$8 sps:$4 sm:$0xff]   ;;  %v3034_v41 = vld [vmem:[%s4582_s1 + $0x1d4] ss:$8 sps:$4 sm:$0xff]  }
   0xf   :  { %1971 = vmatpush1.bf16.msra.mxu0 %v2994_v14  ;;  %v3036_v42 = vld [vmem:[%s4582_s1 + $0xd0] ss:$8 sps:$4 sm:$0xff]   ;;  %v3038_v44 = vld [vmem:[%s4582_s1 + $0xc4] ss:$8 sps:$4 sm:$0xff]   ;;  %v3042_v46 = vld [vmem:[%s4582_s1 + $0xc0] ss:$8 sps:$4 sm:$0xff]  }
  0x10   :  { %2024 = vmatpush1.bf16.msra.mxu1 %v2995_v15  ;;  %1972 = vmatprep.subr.bf16.mxu0 %v2996_v16  ;;  %v3037_v43 = vld [vmem:[%s4582_s1 + $0x1d0] ss:$8 sps:$4 sm:$0xff]   ;;  %v3040_v45 = vld [vmem:[%s4582_s1 + $0x1c4] ss:$8 sps:$4 sm:$0xff]   ;;  %v3043_v47 = vld [vmem:[%s4582_s1 + $0x1c0] ss:$8 sps:$4 sm:$0xff]  }
  0x11   :  { %2025 = vmatprep.subr.bf16.mxu1 %v2998_v17  ;;  %v3044_v48 = vld [vmem:[%s4582_s1 + $0xb4] ss:$8 sps:$4 sm:$0xff]   ;;  %v3070_v49 = vld [vmem:[%s4583_s0 + $0x4] ss:$72 sps:$4 sm:$0xff]   ;;  %v3048_v52 = vld [vmem:[%s4582_s1 + $0xb0] ss:$8 sps:$4 sm:$0xff]  }
  0x12   :  { %v3046_v50 = vld [vmem:[%s4582_s1 + $0x1b4] ss:$8 sps:$4 sm:$0xff]   ;;  %1996 = vmatprep.mubr.bf16.mxu0 %v3070_v49  ;;  %v3049_v53 = vld [vmem:[%s4582_s1 + $0x1b0] ss:$8 sps:$4 sm:$0xff]   ;;  %v3050_v54 = vld [vmem:[%s4582_s1 + $0xa4] ss:$8 sps:$4 sm:$0xff]  }
  0x13   :  { %1973 = vmatpush1.bf16.msra.mxu0 %v3000_v18  ;;  %v3073_v51 = vld [vmem:[%s4583_s0 + $0xc] ss:$72 sps:$4 sm:$0xff]   ;;  %v3054_v56 = vld [vmem:[%s4582_s1 + $0xa0] ss:$8 sps:$4 sm:$0xff]   ;;  %v3060_v60 = vld [vmem:[%s4582_s1 + $0x90] ss:$8 sps:$4 sm:$0xff]  }
  0x14   :  { %2026 = vmatpush1.bf16.msra.mxu1 %v3001_v19  ;;  %1974 = vmatprep.subr.bf16.mxu0 %v3002_v20  ;;  %v3052_v55 = vld [vmem:[%s4582_s1 + $0x1a4] ss:$8 sps:$4 sm:$0xff]   ;;  %v3055_v57 = vld [vmem:[%s4582_s1 + $0x1a0] ss:$8 sps:$4 sm:$0xff]   ;;  %v3056_v58 = vld [vmem:[%s4582_s1 + $0x94] ss:$8 sps:$4 sm:$0xff]  }
  0x15   :  { %2027 = vmatprep.subr.bf16.mxu1 %v3004_v21  ;;  %2049 = vmatprep.mubr.bf16.mxu1 %v3073_v51  ;;  %v3058_v59 = vld [vmem:[%s4582_s1 + $0x194] ss:$8 sps:$4 sm:$0xff]   ;;  %v3061_v61 = vld [vmem:[%s4582_s1 + $0x190] ss:$8 sps:$4 sm:$0xff]   ;;  %v3062_v62 = vld [vmem:[%s4582_s1 + $0x84] ss:$8 sps:$4 sm:$0xff]  }
  0x16   :  { %v3064_v63 = vld [vmem:[%s4582_s1 + $0x184] ss:$8 sps:$4 sm:$0xff]   ;;  %v3066_v0 = vld [vmem:[%s4582_s1 + $0x80] ss:$8 sps:$4 sm:$0xff]   ;;  %v3076_v2 = vld [vmem:[%s4582_s1 + $0x274] ss:$8 sps:$4 sm:$0xff]  }
  0x17   :  { %1975 = vmatpush1.bf16.msra.mxu0 %v3006_v22  ;;  %v3067_v1 = vld [vmem:[%s4582_s1 + $0x180] ss:$8 sps:$4 sm:$0xff]   ;;  %v3079_v3 = vld [vmem:[%s4582_s1 + $0x374] ss:$8 sps:$4 sm:$0xff]   ;;  %v3074_v6 = vld [vmem:[%s4582_s1 + $0x270] ss:$8 sps:$4 sm:$0xff]  }
  0x18   :  { %2028 = vmatpush1.bf16.msra.mxu1 %v3007_v23  ;;  %1976 = vmatprep.subr.bf16.mxu0 %v3008_v24  ;;  %v3068_v4 = vld [vmem:[%s4583_s0] ss:$72 sps:$4 sm:$0xff]   ;;  %v3077_v7 = vld [vmem:[%s4582_s1 + $0x370] ss:$8 sps:$4 sm:$0xff]   ;;  %v3082_v8 = vld [vmem:[%s4582_s1 + $0x264] ss:$8 sps:$4 sm:$0xff]  }
  0x19   :  { %2029 = vmatprep.subr.bf16.mxu1 %v3010_v25  ;;  %v3071_v5 = vld [vmem:[%s4583_s0 + $0x8] ss:$72 sps:$4 sm:$0xff]   ;;  %v3085_v9 = vld [vmem:[%s4582_s1 + $0x364] ss:$8 sps:$4 sm:$0xff]   ;;  %v3088_v12 = vld [vmem:[%s4582_s1 + $0x254] ss:$8 sps:$4 sm:$0xff]  }
  0x1a   :  { %v3080_v10 = vld [vmem:[%s4582_s1 + $0x260] ss:$8 sps:$4 sm:$0xff]   ;;  %v3091_v13 = vld [vmem:[%s4582_s1 + $0x354] ss:$8 sps:$4 sm:$0xff]   ;;  %v3086_v14 = vld [vmem:[%s4582_s1 + $0x250] ss:$8 sps:$4 sm:$0xff]  }
  0x1b   :  { %1977 = vmatpush1.bf16.msra.mxu0 %v3012_v26  ;;  %v3083_v11 = vld [vmem:[%s4582_s1 + $0x360] ss:$8 sps:$4 sm:$0xff]   ;;  %v3089_v15 = vld [vmem:[%s4582_s1 + $0x350] ss:$8 sps:$4 sm:$0xff]   ;;  %v3094_v16 = vld [vmem:[%s4582_s1 + $0x244] ss:$8 sps:$4 sm:$0xff]  }
  0x1c   :  { %2030 = vmatpush1.bf16.msra.mxu1 %v3013_v27  ;;  %1978 = vmatprep.subr.bf16.mxu0 %v3014_v28  ;;  %v3097_v17 = vld [vmem:[%s4582_s1 + $0x344] ss:$8 sps:$4 sm:$0xff]   ;;  %v3092_v18 = vld [vmem:[%s4582_s1 + $0x240] ss:$8 sps:$4 sm:$0xff]   ;;  %v3100_v20 = vld [vmem:[%s4582_s1 + $0x234] ss:$8 sps:$4 sm:$0xff]  }
  0x1d   :  { %2031 = vmatprep.subr.bf16.mxu1 %v3016_v29  ;;  %v3095_v19 = vld [vmem:[%s4582_s1 + $0x340] ss:$8 sps:$4 sm:$0xff]   ;;  %v3103_v21 = vld [vmem:[%s4582_s1 + $0x334] ss:$8 sps:$4 sm:$0xff]   ;;  %v3098_v22 = vld [vmem:[%s4582_s1 + $0x230] ss:$8 sps:$4 sm:$0xff]  }
  0x1e   :  { %v3101_v23 = vld [vmem:[%s4582_s1 + $0x330] ss:$8 sps:$4 sm:$0xff]   ;;  %v3106_v24 = vld [vmem:[%s4582_s1 + $0x224] ss:$8 sps:$4 sm:$0xff]   ;;  %v3152_v26 = vld [vmem:[%s4583_s0 + $0x94] ss:$72 sps:$4 sm:$0xff]  }
  0x1f   :  { %1979 = vmatpush1.bf16.msra.mxu0 %v3018_v30  ;;  %v3109_v25 = vld [vmem:[%s4582_s1 + $0x324] ss:$8 sps:$4 sm:$0xff]   ;;  %v3156_v28 = vld [vmem:[%s4583_s0 + $0x90] ss:$72 sps:$4 sm:$0xff]   ;;  %v3104_v30 = vld [vmem:[%s4582_s1 + $0x220] ss:$8 sps:$4 sm:$0xff]  }
  0x20   :  { %2032 = vmatpush1.bf16.msra.mxu1 %v3019_v31  ;;  %1980 = vmatprep.subr.bf16.mxu0 %v3020_v32  ;;  %v3154_v27 = vld [vmem:[%s4583_s0 + $0x9c] ss:$72 sps:$4 sm:$0xff]   ;;  %v3157_v29 = vld [vmem:[%s4583_s0 + $0x98] ss:$72 sps:$4 sm:$0xff]  }
  0x21   :  { %2033 = vmatprep.subr.bf16.mxu1 %v3022_v33  ;;  %v3107_v31 = vld [vmem:[%s4582_s1 + $0x320] ss:$8 sps:$4 sm:$0xff]   ;;  %v3112_v32 = vld [vmem:[%s4582_s1 + $0x214] ss:$8 sps:$4 sm:$0xff]  }
  0x22   :  { %v3115_v33 = vld [vmem:[%s4582_s1 + $0x314] ss:$8 sps:$4 sm:$0xff]   ;;  %v3131_v49 = vld [vmem:[%s4582_s1 + $0x3e0] ss:$8 sps:$4 sm:$0xff]  }
  0x23   :  { %1981 = vmatpush2.bf16.msra.mxu0 %v3024_v34  ;;  %v3110_v34 = vld [vmem:[%s4582_s1 + $0x210] ss:$8 sps:$4 sm:$0xff]   ;;  %v3139_v51 = vld [vmem:[%s4582_s1 + $0x3d4] ss:$8 sps:$4 sm:$0xff]  }
  0x24   :  { %2034 = vmatpush2.bf16.msra.mxu1 %v3025_v35  ;;  %1982 = vmatprep.subr.bf16.mxu0 %v3026_v36  ;;  %v3113_v35 = vld [vmem:[%s4582_s1 + $0x310] ss:$8 sps:$4 sm:$0xff]   ;;  %v3118_v36 = vld [vmem:[%s4582_s1 + $0x204] ss:$8 sps:$4 sm:$0xff]  }
  0x25   :  { %2035 = vmatprep.subr.bf16.mxu1 %v3028_v37  ;;  %v3121_v37 = vld [vmem:[%s4582_s1 + $0x304] ss:$8 sps:$4 sm:$0xff]  }
  0x27   :  { %1983 = vmatpush2.bf16.msra.mxu0 %v3030_v38  ;;  %v3116_v38 = vld [vmem:[%s4582_s1 + $0x200] ss:$8 sps:$4 sm:$0xff]  }
  0x28   :  { %2036 = vmatpush2.bf16.msra.mxu1 %v3031_v39  ;;  %1984 = vmatprep.subr.bf16.mxu0 %v3032_v40  ;;  %v3119_v39 = vld [vmem:[%s4582_s1 + $0x300] ss:$8 sps:$4 sm:$0xff]   ;;  %v3124_v40 = vld [vmem:[%s4582_s1 + $0x2f4] ss:$8 sps:$4 sm:$0xff]  }
  0x29   :  { %2037 = vmatprep.subr.bf16.mxu1 %v3034_v41  ;;  %v3178_v41 = vld [vmem:[%s4583_s0 + $0x14] ss:$72 sps:$4 sm:$0xff]  }
  0x2b   :  { %1985 = vmatpush2.bf16.msra.mxu0 %v3036_v42  ;;  %v3127_v42 = vld [vmem:[%s4582_s1 + $0x3f4] ss:$8 sps:$4 sm:$0xff]  }
  0x2c   :  { %2038 = vmatpush2.bf16.msra.mxu1 %v3037_v43  ;;  %1986 = vmatprep.subr.bf16.mxu0 %v3038_v44  ;;  %v3181_v43 = vld [vmem:[%s4583_s0 + $0x1c] ss:$72 sps:$4 sm:$0xff]   ;;  %v3122_v44 = vld [vmem:[%s4582_s1 + $0x2f0] ss:$8 sps:$4 sm:$0xff]  }
  0x2d   :  { %2039 = vmatprep.subr.bf16.mxu1 %v3040_v45  ;;  %v3125_v45 = vld [vmem:[%s4582_s1 + $0x3f0] ss:$8 sps:$4 sm:$0xff]  }
  0x2f   :  { %1987 = vmatpush2.bf16.msra.mxu0 %v3042_v46  ;;  %v3130_v46 = vld [vmem:[%s4582_s1 + $0x2e4] ss:$8 sps:$4 sm:$0xff]  }
  0x30   :  { %2040 = vmatpush2.bf16.msra.mxu1 %v3043_v47  ;;  %1988 = vmatprep.subr.bf16.mxu0 %v3044_v48  ;;  %v3133_v47 = vld [vmem:[%s4582_s1 + $0x3e4] ss:$8 sps:$4 sm:$0xff]   ;;  %v3128_v48 = vld [vmem:[%s4582_s1 + $0x2e0] ss:$8 sps:$4 sm:$0xff]  }
  0x31   :  { %2041 = vmatprep.subr.bf16.mxu1 %v3046_v50  ;;  %v3136_v50 = vld [vmem:[%s4582_s1 + $0x2d4] ss:$8 sps:$4 sm:$0xff]  }
  0x33   :  { %1989 = vmatpush2.bf16.msra.mxu0 %v3048_v52  ;;  %v3134_v52 = vld [vmem:[%s4582_s1 + $0x2d0] ss:$8 sps:$4 sm:$0xff]  }
  0x34   :  { %2042 = vmatpush2.bf16.msra.mxu1 %v3049_v53  ;;  %1990 = vmatprep.subr.bf16.mxu0 %v3050_v54  ;;  %v3137_v53 = vld [vmem:[%s4582_s1 + $0x3d0] ss:$8 sps:$4 sm:$0xff]   ;;  %v3142_v54 = vld [vmem:[%s4582_s1 + $0x2c4] ss:$8 sps:$4 sm:$0xff]  }
  0x35   :  { %2043 = vmatprep.subr.bf16.mxu1 %v3052_v55  ;;  %v3145_v55 = vld [vmem:[%s4582_s1 + $0x3c4] ss:$8 sps:$4 sm:$0xff]  }
  0x37   :  { %1991 = vmatpush2.bf16.msra.mxu0 %v3054_v56  ;;  %v3140_v56 = vld [vmem:[%s4582_s1 + $0x2c0] ss:$8 sps:$4 sm:$0xff]  }
  0x38   :  { %2044 = vmatpush2.bf16.msra.mxu1 %v3055_v57  ;;  %1992 = vmatprep.subr.bf16.mxu0 %v3056_v58  ;;  %v3143_v57 = vld [vmem:[%s4582_s1 + $0x3c0] ss:$8 sps:$4 sm:$0xff]   ;;  %v3148_v58 = vld [vmem:[%s4582_s1 + $0x2b4] ss:$8 sps:$4 sm:$0xff]  }
  0x39   :  { %2045 = vmatprep.subr.bf16.mxu1 %v3058_v59  ;;  %v3151_v59 = vld [vmem:[%s4582_s1 + $0x3b4] ss:$8 sps:$4 sm:$0xff]  }
  0x3b   :  { %1993 = vmatpush2.bf16.msra.mxu0 %v3060_v60  ;;  %v3146_v60 = vld [vmem:[%s4582_s1 + $0x2b0] ss:$8 sps:$4 sm:$0xff]  }
  0x3c   :  { %2046 = vmatpush2.bf16.msra.mxu1 %v3061_v61  ;;  %1994 = vmatprep.subr.bf16.mxu0 %v3062_v62  ;;  %v3149_v61 = vld [vmem:[%s4582_s1 + $0x3b0] ss:$8 sps:$4 sm:$0xff]   ;;  %v3160_v62 = vld [vmem:[%s4582_s1 + $0x2a4] ss:$8 sps:$4 sm:$0xff]  }
  0x3d   :  { %2047 = vmatprep.subr.bf16.mxu1 %v3064_v63  ;;  %v3163_v63 = vld [vmem:[%s4582_s1 + $0x3a4] ss:$8 sps:$4 sm:$0xff]  }
  0x3f   :  { %1995 = vmatpush2.bf16.msra.mxu0 %v3066_v0  ;;  %v3158_v0 = vld [vmem:[%s4582_s1 + $0x2a0] ss:$8 sps:$4 sm:$0xff]  }
  0x40   :  { %2048 = vmatpush2.bf16.msra.mxu1 %v3067_v1  ;;  %2070 = vmatprep.subr.bf16.mxu0 %v3076_v2  ;;  %v3161_v1 = vld [vmem:[%s4582_s1 + $0x3a0] ss:$8 sps:$4 sm:$0xff]   ;;  %v3166_v2 = vld [vmem:[%s4582_s1 + $0x294] ss:$8 sps:$4 sm:$0xff]  }
  0x41   :  { %2123 = vmatprep.subr.bf16.mxu1 %v3079_v3  ;;  %v3169_v3 = vld [vmem:[%s4582_s1 + $0x394] ss:$8 sps:$4 sm:$0xff]  }
  0x42   :  { %1997 = vmatmul.mubr.bf16.vlgmr.msra.gmra.mxu0 %v3068_v4  ;;  %v3164_v4 = vld [vmem:[%s4582_s1 + $0x290] ss:$8 sps:$4 sm:$0xff]  }
  0x43   :  { %2050 = vmatmul.mubr.bf16.vlgmr.msra.gmra.mxu1 %v3071_v5  ;;  %2071 = vmatpush1.bf16.msra.mxu0 %v3074_v6  ;;  %v3167_v5 = vld [vmem:[%s4582_s1 + $0x390] ss:$8 sps:$4 sm:$0xff]   ;;  %v3172_v6 = vld [vmem:[%s4582_s1 + $0x284] ss:$8 sps:$4 sm:$0xff]  }
  0x44   :  { %2124 = vmatpush1.bf16.msra.mxu1 %v3077_v7  ;;  %2072 = vmatprep.subr.bf16.mxu0 %v3082_v8  ;;  %v3175_v7 = vld [vmem:[%s4582_s1 + $0x384] ss:$8 sps:$4 sm:$0xff]   ;;  %v3170_v8 = vld [vmem:[%s4582_s1 + $0x280] ss:$8 sps:$4 sm:$0xff]  }
  0x45   :  { %2125 = vmatprep.subr.bf16.mxu1 %v3085_v9  ;;  %2006 = vmatprep.mubr.bf16.mxu0 %v3152_v26  ;;  %v3173_v9 = vld [vmem:[%s4582_s1 + $0x380] ss:$8 sps:$4 sm:$0xff]   ;;  %v3200_v26 = vld [vmem:[%s4582_s1 + $0x550] ss:$8 sps:$4 sm:$0xff]  }
  0x46   :  { %2059 = vmatprep.mubr.bf16.mxu1 %v3154_v27  ;;  %v3205_v27 = vld [vmem:[%s4583_s0 + $0xa8] ss:$72 sps:$4 sm:$0xff]  }
  0x47   :  { %2073 = vmatpush1.bf16.msra.mxu0 %v3080_v10  ;;  %v3184_v10 = vld [vmem:[%s4582_s1 + $0x474] ss:$8 sps:$4 sm:$0xff]  }
  0x48   :  { %2126 = vmatpush1.bf16.msra.mxu1 %v3083_v11  ;;  %2074 = vmatprep.subr.bf16.mxu0 %v3088_v12  ;;  %v3187_v11 = vld [vmem:[%s4582_s1 + $0x574] ss:$8 sps:$4 sm:$0xff]   ;;  %v3176_v12 = vld [vmem:[%s4583_s0 + $0x10] ss:$72 sps:$4 sm:$0xff]  }
  0x49   :  { %2127 = vmatprep.subr.bf16.mxu1 %v3091_v13  ;;  %v3179_v13 = vld [vmem:[%s4583_s0 + $0x18] ss:$72 sps:$4 sm:$0xff]  }
  0x4a   :  { %2007 = vmatmul.mubr.bf16.gmra.mxu0 %v3156_v28  ;;  %v3208_v28 = vld [vmem:[%s4582_s1 + $0x444] ss:$8 sps:$4 sm:$0xff]  }
  0x4b   :  { %2075 = vmatpush1.bf16.msra.mxu0 %v3086_v14  ;;  %2060 = vmatmul.mubr.bf16.gmra.mxu1 %v3157_v29  ;;  %v3182_v14 = vld [vmem:[%s4582_s1 + $0x470] ss:$8 sps:$4 sm:$0xff]   ;;  %v3211_v29 = vld [vmem:[%s4582_s1 + $0x544] ss:$8 sps:$4 sm:$0xff]  }
  0x4c   :  { %2128 = vmatpush1.bf16.msra.mxu1 %v3089_v15  ;;  %2076 = vmatprep.subr.bf16.mxu0 %v3094_v16  ;;  %v3185_v15 = vld [vmem:[%s4582_s1 + $0x570] ss:$8 sps:$4 sm:$0xff]   ;;  %v3190_v16 = vld [vmem:[%s4582_s1 + $0x464] ss:$8 sps:$4 sm:$0xff]  }
  0x4d   :  { %2129 = vmatprep.subr.bf16.mxu1 %v3097_v17  ;;  %2102 = vmatprep.mubr.bf16.mxu0 %v3178_v41  ;;  %v3193_v17 = vld [vmem:[%s4582_s1 + $0x564] ss:$8 sps:$4 sm:$0xff]   ;;  %v3221_v41 = vld [vmem:[%s4582_s1 + $0x520] ss:$8 sps:$4 sm:$0xff]  }
  0x4e   :  { %2155 = vmatprep.mubr.bf16.mxu1 %v3181_v43  ;;  %v3229_v43 = vld [vmem:[%s4582_s1 + $0x514] ss:$8 sps:$4 sm:$0xff]  }
  0x4f   :  { %2077 = vmatpush1.bf16.msra.mxu0 %v3092_v18  ;;  %v3194_v18 = vld [vmem:[%s4583_s0 + $0xa4] ss:$72 sps:$4 sm:$0xff]  }
  0x50   :  { %2130 = vmatpush1.bf16.msra.mxu1 %v3095_v19  ;;  %2078 = vmatprep.subr.bf16.mxu0 %v3100_v20  ;;  %v3203_v19 = vld [vmem:[%s4583_s0 + $0xac] ss:$72 sps:$4 sm:$0xff]   ;;  %v3188_v20 = vld [vmem:[%s4582_s1 + $0x460] ss:$8 sps:$4 sm:$0xff]  }
  0x51   :  { %2131 = vmatprep.subr.bf16.mxu1 %v3103_v21  ;;  %v3191_v21 = vld [vmem:[%s4582_s1 + $0x560] ss:$8 sps:$4 sm:$0xff]  }
  0x53   :  { %2079 = vmatpush1.bf16.msra.mxu0 %v3098_v22  ;;  %v3199_v22 = vld [vmem:[%s4582_s1 + $0x454] ss:$8 sps:$4 sm:$0xff]  }
  0x54   :  { %2132 = vmatpush1.bf16.msra.mxu1 %v3101_v23  ;;  %2080 = vmatprep.subr.bf16.mxu0 %v3106_v24  ;;  %v3202_v23 = vld [vmem:[%s4582_s1 + $0x554] ss:$8 sps:$4 sm:$0xff]   ;;  %v3196_v24 = vld [vmem:[%s4583_s0 + $0xa0] ss:$72 sps:$4 sm:$0xff]  }
  0x55   :  { %2133 = vmatprep.subr.bf16.mxu1 %v3109_v25  ;;  %v3197_v25 = vld [vmem:[%s4582_s1 + $0x450] ss:$8 sps:$4 sm:$0xff]  }
  0x57   :  { %2081 = vmatpush1.bf16.msra.mxu0 %v3104_v30  ;;  %v3206_v30 = vld [vmem:[%s4582_s1 + $0x440] ss:$8 sps:$4 sm:$0xff]  }
  0x58   :  { %2134 = vmatpush1.bf16.msra.mxu1 %v3107_v31  ;;  %2082 = vmatprep.subr.bf16.mxu0 %v3112_v32  ;;  %v3209_v31 = vld [vmem:[%s4582_s1 + $0x540] ss:$8 sps:$4 sm:$0xff]   ;;  %v3214_v32 = vld [vmem:[%s4582_s1 + $0x434] ss:$8 sps:$4 sm:$0xff]  }
  0x59   :  { %2135 = vmatprep.subr.bf16.mxu1 %v3115_v33  ;;  %v3286_v33 = vld [vmem:[%s4583_s0 + $0x24] ss:$72 sps:$4 sm:$0xff]  }
  0x5b   :  { %2083 = vmatpush1.bf16.msra.mxu0 %v3110_v34  ;;  %v3217_v34 = vld [vmem:[%s4582_s1 + $0x534] ss:$8 sps:$4 sm:$0xff]  }
  0x5c   :  { %2136 = vmatpush1.bf16.msra.mxu1 %v3113_v35  ;;  %2084 = vmatprep.subr.bf16.mxu0 %v3118_v36  ;;  %v3289_v35 = vld [vmem:[%s4583_s0 + $0x2c] ss:$72 sps:$4 sm:$0xff]   ;;  %v3212_v36 = vld [vmem:[%s4582_s1 + $0x430] ss:$8 sps:$4 sm:$0xff]  }
  0x5d   :  { %2137 = vmatprep.subr.bf16.mxu1 %v3121_v37  ;;  %v3215_v37 = vld [vmem:[%s4582_s1 + $0x530] ss:$8 sps:$4 sm:$0xff]  }
  0x5f   :  { %2085 = vmatpush1.bf16.msra.mxu0 %v3116_v38  ;;  %v3220_v38 = vld [vmem:[%s4582_s1 + $0x424] ss:$8 sps:$4 sm:$0xff]  }
  0x60   :  { %2138 = vmatpush1.bf16.msra.mxu1 %v3119_v39  ;;  %2086 = vmatprep.subr.bf16.mxu0 %v3124_v40  ;;  %v3223_v39 = vld [vmem:[%s4582_s1 + $0x524] ss:$8 sps:$4 sm:$0xff]   ;;  %v3218_v40 = vld [vmem:[%s4582_s1 + $0x420] ss:$8 sps:$4 sm:$0xff]  }
  0x61   :  { %2139 = vmatprep.subr.bf16.mxu1 %v3127_v42  ;;  %v3226_v42 = vld [vmem:[%s4582_s1 + $0x414] ss:$8 sps:$4 sm:$0xff]  }
  0x63   :  { %2087 = vmatpush2.bf16.msra.mxu0 %v3122_v44  ;;  %v3224_v44 = vld [vmem:[%s4582_s1 + $0x410] ss:$8 sps:$4 sm:$0xff]  }
  0x64   :  { %2140 = vmatpush2.bf16.msra.mxu1 %v3125_v45  ;;  %2088 = vmatprep.subr.bf16.mxu0 %v3130_v46  ;;  %v3227_v45 = vld [vmem:[%s4582_s1 + $0x510] ss:$8 sps:$4 sm:$0xff]   ;;  %v3232_v46 = vld [vmem:[%s4582_s1 + $0x404] ss:$8 sps:$4 sm:$0xff]  }
  0x65   :  { %2141 = vmatprep.subr.bf16.mxu1 %v3133_v47  ;;  %v3235_v47 = vld [vmem:[%s4582_s1 + $0x504] ss:$8 sps:$4 sm:$0xff]  }
  0x67   :  { %2089 = vmatpush2.bf16.msra.mxu0 %v3128_v48  ;;  %v3230_v48 = vld [vmem:[%s4582_s1 + $0x400] ss:$8 sps:$4 sm:$0xff]  }
  0x68   :  { %2142 = vmatpush2.bf16.msra.mxu1 %v3131_v49  ;;  %2090 = vmatprep.subr.bf16.mxu0 %v3136_v50  ;;  %v3233_v49 = vld [vmem:[%s4582_s1 + $0x500] ss:$8 sps:$4 sm:$0xff]   ;;  %v3238_v50 = vld [vmem:[%s4582_s1 + $0x4f4] ss:$8 sps:$4 sm:$0xff]  }
  0x69   :  { %2143 = vmatprep.subr.bf16.mxu1 %v3139_v51  ;;  %v3241_v51 = vld [vmem:[%s4582_s1 + $0x5f4] ss:$8 sps:$4 sm:$0xff]  }
  0x6b   :  { %2091 = vmatpush2.bf16.msra.mxu0 %v3134_v52  ;;  %v3236_v52 = vld [vmem:[%s4582_s1 + $0x4f0] ss:$8 sps:$4 sm:$0xff]  }
  0x6c   :  { %2144 = vmatpush2.bf16.msra.mxu1 %v3137_v53  ;;  %2092 = vmatprep.subr.bf16.mxu0 %v3142_v54  ;;  %v3239_v53 = vld [vmem:[%s4582_s1 + $0x5f0] ss:$8 sps:$4 sm:$0xff]   ;;  %v3244_v54 = vld [vmem:[%s4582_s1 + $0x4e4] ss:$8 sps:$4 sm:$0xff]  }
  0x6d   :  { %2145 = vmatprep.subr.bf16.mxu1 %v3145_v55  ;;  %v3247_v55 = vld [vmem:[%s4582_s1 + $0x5e4] ss:$8 sps:$4 sm:$0xff]  }
  0x6f   :  { %2093 = vmatpush2.bf16.msra.mxu0 %v3140_v56  ;;  %v3242_v56 = vld [vmem:[%s4582_s1 + $0x4e0] ss:$8 sps:$4 sm:$0xff]  }
  0x70   :  { %2146 = vmatpush2.bf16.msra.mxu1 %v3143_v57  ;;  %2094 = vmatprep.subr.bf16.mxu0 %v3148_v58  ;;  %v3245_v57 = vld [vmem:[%s4582_s1 + $0x5e0] ss:$8 sps:$4 sm:$0xff]   ;;  %v3250_v58 = vld [vmem:[%s4582_s1 + $0x4d4] ss:$8 sps:$4 sm:$0xff]  }
  0x71   :  { %2147 = vmatprep.subr.bf16.mxu1 %v3151_v59  ;;  %v3253_v59 = vld [vmem:[%s4582_s1 + $0x5d4] ss:$8 sps:$4 sm:$0xff]  }
  0x73   :  { %2095 = vmatpush2.bf16.msra.mxu0 %v3146_v60  ;;  %v3248_v60 = vld [vmem:[%s4582_s1 + $0x4d0] ss:$8 sps:$4 sm:$0xff]  }
  0x74   :  { %2148 = vmatpush2.bf16.msra.mxu1 %v3149_v61  ;;  %2096 = vmatprep.subr.bf16.mxu0 %v3160_v62  ;;  %v3251_v61 = vld [vmem:[%s4582_s1 + $0x5d0] ss:$8 sps:$4 sm:$0xff]   ;;  %v3256_v62 = vld [vmem:[%s4582_s1 + $0x4c4] ss:$8 sps:$4 sm:$0xff]  }
  0x75   :  { %2149 = vmatprep.subr.bf16.mxu1 %v3163_v63  ;;  %v3259_v63 = vld [vmem:[%s4582_s1 + $0x5c4] ss:$8 sps:$4 sm:$0xff]  }
  0x77   :  { %2097 = vmatpush2.bf16.msra.mxu0 %v3158_v0  ;;  %v3254_v0 = vld [vmem:[%s4582_s1 + $0x4c0] ss:$8 sps:$4 sm:$0xff]  }
  0x78   :  { %2150 = vmatpush2.bf16.msra.mxu1 %v3161_v1  ;;  %2098 = vmatprep.subr.bf16.mxu0 %v3166_v2  ;;  %v3257_v1 = vld [vmem:[%s4582_s1 + $0x5c0] ss:$8 sps:$4 sm:$0xff]   ;;  %v3262_v2 = vld [vmem:[%s4582_s1 + $0x4b4] ss:$8 sps:$4 sm:$0xff]  }
  0x79   :  { %2151 = vmatprep.subr.bf16.mxu1 %v3169_v3  ;;  %v3265_v3 = vld [vmem:[%s4582_s1 + $0x5b4] ss:$8 sps:$4 sm:$0xff]  }
  0x7b   :  { %2099 = vmatpush2.bf16.msra.mxu0 %v3164_v4  ;;  %v3260_v4 = vld [vmem:[%s4582_s1 + $0x4b0] ss:$8 sps:$4 sm:$0xff]  }
  0x7c   :  { %2152 = vmatpush2.bf16.msra.mxu1 %v3167_v5  ;;  %2100 = vmatprep.subr.bf16.mxu0 %v3172_v6  ;;  %v3263_v5 = vld [vmem:[%s4582_s1 + $0x5b0] ss:$8 sps:$4 sm:$0xff]   ;;  %v3268_v6 = vld [vmem:[%s4582_s1 + $0x4a4] ss:$8 sps:$4 sm:$0xff]  }
  0x7d   :  { %2153 = vmatprep.subr.bf16.mxu1 %v3175_v7  ;;  %v3271_v7 = vld [vmem:[%s4582_s1 + $0x5a4] ss:$8 sps:$4 sm:$0xff]  }
  0x7f   :  { %2101 = vmatpush2.bf16.msra.mxu0 %v3170_v8  ;;  %v3266_v8 = vld [vmem:[%s4582_s1 + $0x4a0] ss:$8 sps:$4 sm:$0xff]  }
  0x80   :  { %2154 = vmatpush2.bf16.msra.mxu1 %v3173_v9  ;;  %2176 = vmatprep.subr.bf16.mxu0 %v3184_v10  ;;  %v3269_v9 = vld [vmem:[%s4582_s1 + $0x5a0] ss:$8 sps:$4 sm:$0xff]   ;;  %v3274_v10 = vld [vmem:[%s4582_s1 + $0x494] ss:$8 sps:$4 sm:$0xff]  }
  0x81   :  { %2229 = vmatprep.subr.bf16.mxu1 %v3187_v11  ;;  %v3277_v11 = vld [vmem:[%s4582_s1 + $0x594] ss:$8 sps:$4 sm:$0xff]  }
  0x82   :  { %2103 = vmatmul.mubr.bf16.vlgmr.msra.gmra.mxu0 %v3176_v12  ;;  %v3272_v12 = vld [vmem:[%s4582_s1 + $0x490] ss:$8 sps:$4 sm:$0xff]  }
  0x83   :  { %2156 = vmatmul.mubr.bf16.vlgmr.msra.gmra.mxu1 %v3179_v13  ;;  %2177 = vmatpush1.bf16.msra.mxu0 %v3182_v14  ;;  %v3275_v13 = vld [vmem:[%s4582_s1 + $0x590] ss:$8 sps:$4 sm:$0xff]   ;;  %v3280_v14 = vld [vmem:[%s4582_s1 + $0x484] ss:$8 sps:$4 sm:$0xff]  }
  0x84   :  { %2230 = vmatpush1.bf16.msra.mxu1 %v3185_v15  ;;  %2178 = vmatprep.subr.bf16.mxu0 %v3190_v16  ;;  %v3283_v15 = vld [vmem:[%s4582_s1 + $0x584] ss:$8 sps:$4 sm:$0xff]   ;;  %v3278_v16 = vld [vmem:[%s4582_s1 + $0x480] ss:$8 sps:$4 sm:$0xff]  }
  0x85   :  { %2231 = vmatprep.subr.bf16.mxu1 %v3193_v17  ;;  %2112 = vmatprep.mubr.bf16.mxu0 %v3194_v18  ;;  %v3281_v17 = vld [vmem:[%s4582_s1 + $0x580] ss:$8 sps:$4 sm:$0xff]   ;;  %v3292_v18 = vld [vmem:[%s4582_s1 + $0x674] ss:$8 sps:$4 sm:$0xff]  }
  0x86   :  { %2165 = vmatprep.mubr.bf16.mxu1 %v3203_v19  ;;  %v3295_v19 = vld [vmem:[%s4582_s1 + $0x774] ss:$8 sps:$4 sm:$0xff]  }
  0x87   :  { %2179 = vmatpush1.bf16.msra.mxu0 %v3188_v20  ;;  %v3284_v20 = vld [vmem:[%s4583_s0 + $0x20] ss:$72 sps:$4 sm:$0xff]  }
  0x88   :  { %2232 = vmatpush1.bf16.msra.mxu1 %v3191_v21  ;;  %2180 = vmatprep.subr.bf16.mxu0 %v3199_v22  ;;  %v3287_v21 = vld [vmem:[%s4583_s0 + $0x28] ss:$72 sps:$4 sm:$0xff]  }
  0x89   :  { %2233 = vmatprep.subr.bf16.mxu1 %v3202_v23  ;;  %v3290_v22 = vld [vmem:[%s4582_s1 + $0x670] ss:$8 sps:$4 sm:$0xff]  }
  0x8a   :  { %2113 = vmatmul.mubr.bf16.gmra.mxu0 %v3196_v24  ;;  %v3293_v23 = vld [vmem:[%s4582_s1 + $0x770] ss:$8 sps:$4 sm:$0xff]   ;;  %v3298_v24 = vld [vmem:[%s4582_s1 + $0x664] ss:$8 sps:$4 sm:$0xff]  }
  0x8b   :  { %2166 = vmatmul.mubr.bf16.gmra.mxu1 %v3205_v27  ;;  %2181 = vmatpush1.bf16.msra.mxu0 %v3197_v25  ;;  %v3301_v25 = vld [vmem:[%s4582_s1 + $0x764] ss:$8 sps:$4 sm:$0xff]  }
  0x8c   :  { %2234 = vmatpush1.bf16.msra.mxu1 %v3200_v26  ;;  %2182 = vmatprep.subr.bf16.mxu0 %v3208_v28  ;;  %v3302_v26 = vld [vmem:[%s4583_s0 + $0xb4] ss:$72 sps:$4 sm:$0xff]   ;;  %v3296_v28 = vld [vmem:[%s4582_s1 + $0x660] ss:$8 sps:$4 sm:$0xff]  }
  0x8d   :  { %2235 = vmatprep.subr.bf16.mxu1 %v3211_v29  ;;  %2208 = vmatprep.mubr.bf16.mxu0 %v3286_v33  ;;  %v3311_v27 = vld [vmem:[%s4583_s0 + $0xbc] ss:$72 sps:$4 sm:$0xff]   ;;  %v3299_v29 = vld [vmem:[%s4582_s1 + $0x760] ss:$8 sps:$4 sm:$0xff]   ;;  %v3305_v33 = vld [vmem:[%s4582_s1 + $0x650] ss:$8 sps:$4 sm:$0xff]  }
  0x8e   :  { %2261 = vmatprep.mubr.bf16.mxu1 %v3289_v35  ;;  %v3313_v35 = vld [vmem:[%s4583_s0 + $0xb8] ss:$72 sps:$4 sm:$0xff]  }
  0x8f   :  { %2183 = vmatpush1.bf16.msra.mxu0 %v3206_v30  ;;  %v3307_v30 = vld [vmem:[%s4582_s1 + $0x654] ss:$8 sps:$4 sm:$0xff]  }
  0x90   :  { %2236 = vmatpush1.bf16.msra.mxu1 %v3209_v31  ;;  %2184 = vmatprep.subr.bf16.mxu0 %v3214_v32  ;;  %v3310_v31 = vld [vmem:[%s4582_s1 + $0x754] ss:$8 sps:$4 sm:$0xff]   ;;  %v3304_v32 = vld [vmem:[%s4583_s0 + $0xb0] ss:$72 sps:$4 sm:$0xff]  }
  0x91   :  { %2237 = vmatprep.subr.bf16.mxu1 %v3217_v34  ;;  %v3308_v34 = vld [vmem:[%s4582_s1 + $0x750] ss:$8 sps:$4 sm:$0xff]  }
  0x93   :  { %2185 = vmatpush1.bf16.msra.mxu0 %v3212_v36  ;;  %v3316_v36 = vld [vmem:[%s4582_s1 + $0x644] ss:$8 sps:$4 sm:$0xff]  }
  0x94   :  { %2238 = vmatpush1.bf16.msra.mxu1 %v3215_v37  ;;  %2186 = vmatprep.subr.bf16.mxu0 %v3220_v38  ;;  %v3319_v37 = vld [vmem:[%s4582_s1 + $0x744] ss:$8 sps:$4 sm:$0xff]   ;;  %v3394_v38 = vld [vmem:[%s4583_s0 + $0x34] ss:$72 sps:$4 sm:$0xff]  }
  0x95   :  { %2239 = vmatprep.subr.bf16.mxu1 %v3223_v39  ;;  %v3397_v39 = vld [vmem:[%s4583_s0 + $0x3c] ss:$72 sps:$4 sm:$0xff]  }
  0x97   :  { %2187 = vmatpush1.bf16.msra.mxu0 %v3218_v40  ;;  %v3314_v40 = vld [vmem:[%s4582_s1 + $0x640] ss:$8 sps:$4 sm:$0xff]  }
  0x98   :  { %2240 = vmatpush1.bf16.msra.mxu1 %v3221_v41  ;;  %2188 = vmatprep.subr.bf16.mxu0 %v3226_v42  ;;  %v3317_v41 = vld [vmem:[%s4582_s1 + $0x740] ss:$8 sps:$4 sm:$0xff]   ;;  %v3322_v42 = vld [vmem:[%s4582_s1 + $0x634] ss:$8 sps:$4 sm:$0xff]  }
  0x99   :  { %2241 = vmatprep.subr.bf16.mxu1 %v3229_v43  ;;  %v3325_v43 = vld [vmem:[%s4582_s1 + $0x734] ss:$8 sps:$4 sm:$0xff]  }
  0x9b   :  { %2189 = vmatpush1.bf16.msra.mxu0 %v3224_v44  ;;  %v3320_v44 = vld [vmem:[%s4582_s1 + $0x630] ss:$8 sps:$4 sm:$0xff]  }
  0x9c   :  { %2242 = vmatpush1.bf16.msra.mxu1 %v3227_v45  ;;  %2190 = vmatprep.subr.bf16.mxu0 %v3232_v46  ;;  %v3323_v45 = vld [vmem:[%s4582_s1 + $0x730] ss:$8 sps:$4 sm:$0xff]   ;;  %v3328_v46 = vld [vmem:[%s4582_s1 + $0x624] ss:$8 sps:$4 sm:$0xff]  }
  0x9d   :  { %2243 = vmatprep.subr.bf16.mxu1 %v3235_v47  ;;  %v3331_v47 = vld [vmem:[%s4582_s1 + $0x724] ss:$8 sps:$4 sm:$0xff]  }
  0x9f   :  { %2191 = vmatpush1.bf16.msra.mxu0 %v3230_v48  ;;  %v3326_v48 = vld [vmem:[%s4582_s1 + $0x620] ss:$8 sps:$4 sm:$0xff]  }
  0xa0   :  { %2244 = vmatpush1.bf16.msra.mxu1 %v3233_v49  ;;  %2192 = vmatprep.subr.bf16.mxu0 %v3238_v50  ;;  %v3329_v49 = vld [vmem:[%s4582_s1 + $0x720] ss:$8 sps:$4 sm:$0xff]   ;;  %v3334_v50 = vld [vmem:[%s4582_s1 + $0x614] ss:$8 sps:$4 sm:$0xff]  }
  0xa1   :  { %2245 = vmatprep.subr.bf16.mxu1 %v3241_v51  ;;  %v3337_v51 = vld [vmem:[%s4582_s1 + $0x714] ss:$8 sps:$4 sm:$0xff]  }
  0xa3   :  { %2193 = vmatpush2.bf16.msra.mxu0 %v3236_v52  ;;  %v3332_v52 = vld [vmem:[%s4582_s1 + $0x610] ss:$8 sps:$4 sm:$0xff]  }
  0xa4   :  { %2246 = vmatpush2.bf16.msra.mxu1 %v3239_v53  ;;  %2194 = vmatprep.subr.bf16.mxu0 %v3244_v54  ;;  %v3335_v53 = vld [vmem:[%s4582_s1 + $0x710] ss:$8 sps:$4 sm:$0xff]   ;;  %v3340_v54 = vld [vmem:[%s4582_s1 + $0x604] ss:$8 sps:$4 sm:$0xff]  }
  0xa5   :  { %2247 = vmatprep.subr.bf16.mxu1 %v3247_v55  ;;  %v3343_v55 = vld [vmem:[%s4582_s1 + $0x704] ss:$8 sps:$4 sm:$0xff]  }
  0xa7   :  { %2195 = vmatpush2.bf16.msra.mxu0 %v3242_v56  ;;  %v3338_v56 = vld [vmem:[%s4582_s1 + $0x600] ss:$8 sps:$4 sm:$0xff]  }
  0xa8   :  { %2248 = vmatpush2.bf16.msra.mxu1 %v3245_v57  ;;  %2196 = vmatprep.subr.bf16.mxu0 %v3250_v58  ;;  %v3341_v57 = vld [vmem:[%s4582_s1 + $0x700] ss:$8 sps:$4 sm:$0xff]   ;;  %v3346_v58 = vld [vmem:[%s4582_s1 + $0x6f4] ss:$8 sps:$4 sm:$0xff]  }
  0xa9   :  { %2249 = vmatprep.subr.bf16.mxu1 %v3253_v59  ;;  %v3349_v59 = vld [vmem:[%s4582_s1 + $0x7f4] ss:$8 sps:$4 sm:$0xff]  }
  0xab   :  { %2197 = vmatpush2.bf16.msra.mxu0 %v3248_v60  ;;  %v3344_v60 = vld [vmem:[%s4582_s1 + $0x6f0] ss:$8 sps:$4 sm:$0xff]  }
  0xac   :  { %2250 = vmatpush2.bf16.msra.mxu1 %v3251_v61  ;;  %2198 = vmatprep.subr.bf16.mxu0 %v3256_v62  ;;  %v3347_v61 = vld [vmem:[%s4582_s1 + $0x7f0] ss:$8 sps:$4 sm:$0xff]   ;;  %v3352_v62 = vld [vmem:[%s4582_s1 + $0x6e4] ss:$8 sps:$4 sm:$0xff]  }
  0xad   :  { %2251 = vmatprep.subr.bf16.mxu1 %v3259_v63  ;;  %v3355_v63 = vld [vmem:[%s4582_s1 + $0x7e4] ss:$8 sps:$4 sm:$0xff]  }
  0xaf   :  { %2199 = vmatpush2.bf16.msra.mxu0 %v3254_v0  ;;  %v3350_v0 = vld [vmem:[%s4582_s1 + $0x6e0] ss:$8 sps:$4 sm:$0xff]  }
  0xb0   :  { %2252 = vmatpush2.bf16.msra.mxu1 %v3257_v1  ;;  %2200 = vmatprep.subr.bf16.mxu0 %v3262_v2  ;;  %v3353_v1 = vld [vmem:[%s4582_s1 + $0x7e0] ss:$8 sps:$4 sm:$0xff]   ;;  %v3358_v2 = vld [vmem:[%s4582_s1 + $0x6d4] ss:$8 sps:$4 sm:$0xff]  }
  0xb1   :  { %2253 = vmatprep.subr.bf16.mxu1 %v3265_v3  ;;  %v3361_v3 = vld [vmem:[%s4582_s1 + $0x7d4] ss:$8 sps:$4 sm:$0xff]  }
  0xb3   :  { %2201 = vmatpush2.bf16.msra.mxu0 %v3260_v4  ;;  %v3356_v4 = vld [vmem:[%s4582_s1 + $0x6d0] ss:$8 sps:$4 sm:$0xff]  }
  0xb4   :  { %2254 = vmatpush2.bf16.msra.mxu1 %v3263_v5  ;;  %2202 = vmatprep.subr.bf16.mxu0 %v3268_v6  ;;  %v3359_v5 = vld [vmem:[%s4582_s1 + $0x7d0] ss:$8 sps:$4 sm:$0xff]   ;;  %v3364_v6 = vld [vmem:[%s4582_s1 + $0x6c4] ss:$8 sps:$4 sm:$0xff]  }
  0xb5   :  { %2255 = vmatprep.subr.bf16.mxu1 %v3271_v7  ;;  %v3367_v7 = vld [vmem:[%s4582_s1 + $0x7c4] ss:$8 sps:$4 sm:$0xff]  }
  0xb7   :  { %2203 = vmatpush2.bf16.msra.mxu0 %v3266_v8  ;;  %v3362_v8 = vld [vmem:[%s4582_s1 + $0x6c0] ss:$8 sps:$4 sm:$0xff]  }
  0xb8   :  { %2256 = vmatpush2.bf16.msra.mxu1 %v3269_v9  ;;  %2204 = vmatprep.subr.bf16.mxu0 %v3274_v10  ;;  %v3365_v9 = vld [vmem:[%s4582_s1 + $0x7c0] ss:$8 sps:$4 sm:$0xff]   ;;  %v3370_v10 = vld [vmem:[%s4582_s1 + $0x6b4] ss:$8 sps:$4 sm:$0xff]  }
  0xb9   :  { %2257 = vmatprep.subr.bf16.mxu1 %v3277_v11  ;;  %v3373_v11 = vld [vmem:[%s4582_s1 + $0x7b4] ss:$8 sps:$4 sm:$0xff]  }
  0xbb   :  { %2205 = vmatpush2.bf16.msra.mxu0 %v3272_v12  ;;  %v3368_v12 = vld [vmem:[%s4582_s1 + $0x6b0] ss:$8 sps:$4 sm:$0xff]  }
  0xbc   :  { %2258 = vmatpush2.bf16.msra.mxu1 %v3275_v13  ;;  %2206 = vmatprep.subr.bf16.mxu0 %v3280_v14  ;;  %v3371_v13 = vld [vmem:[%s4582_s1 + $0x7b0] ss:$8 sps:$4 sm:$0xff]   ;;  %v3376_v14 = vld [vmem:[%s4582_s1 + $0x6a4] ss:$8 sps:$4 sm:$0xff]  }
  0xbd   :  { %2259 = vmatprep.subr.bf16.mxu1 %v3283_v15  ;;  %v3379_v15 = vld [vmem:[%s4582_s1 + $0x7a4] ss:$8 sps:$4 sm:$0xff]  }
  0xbf   :  { %2207 = vmatpush2.bf16.msra.mxu0 %v3278_v16  ;;  %v3374_v16 = vld [vmem:[%s4582_s1 + $0x6a0] ss:$8 sps:$4 sm:$0xff]  }
  0xc0   :  { %2260 = vmatpush2.bf16.msra.mxu1 %v3281_v17  ;;  %2282 = vmatprep.subr.bf16.mxu0 %v3292_v18  ;;  %v3377_v17 = vld [vmem:[%s4582_s1 + $0x7a0] ss:$8 sps:$4 sm:$0xff]   ;;  %v3382_v18 = vld [vmem:[%s4582_s1 + $0x694] ss:$8 sps:$4 sm:$0xff]  }
  0xc1   :  { %2335 = vmatprep.subr.bf16.mxu1 %v3295_v19  ;;  %v3385_v19 = vld [vmem:[%s4582_s1 + $0x794] ss:$8 sps:$4 sm:$0xff]  }
  0xc2   :  { %2209 = vmatmul.mubr.bf16.vlgmr.msra.gmra.mxu0 %v3284_v20  ;;  %v3380_v20 = vld [vmem:[%s4582_s1 + $0x690] ss:$8 sps:$4 sm:$0xff]  }
  0xc3   :  { %2262 = vmatmul.mubr.bf16.vlgmr.msra.gmra.mxu1 %v3287_v21  ;;  %2283 = vmatpush1.bf16.msra.mxu0 %v3290_v22  ;;  %v3383_v21 = vld [vmem:[%s4582_s1 + $0x790] ss:$8 sps:$4 sm:$0xff]   ;;  %v3388_v22 = vld [vmem:[%s4582_s1 + $0x684] ss:$8 sps:$4 sm:$0xff]  }
  0xc4   :  { %2336 = vmatpush1.bf16.msra.mxu1 %v3293_v23  ;;  %2284 = vmatprep.subr.bf16.mxu0 %v3298_v24  ;;  %v3391_v23 = vld [vmem:[%s4582_s1 + $0x784] ss:$8 sps:$4 sm:$0xff]   ;;  %v3386_v24 = vld [vmem:[%s4582_s1 + $0x680] ss:$8 sps:$4 sm:$0xff]  }
  0xc5   :  { %2337 = vmatprep.subr.bf16.mxu1 %v3301_v25  ;;  %2218 = vmatprep.mubr.bf16.mxu0 %v3302_v26  ;;  %v3389_v25 = vld [vmem:[%s4582_s1 + $0x780] ss:$8 sps:$4 sm:$0xff]   ;;  %v3400_v26 = vld [vmem:[%s4582_s1 + $0x874] ss:$8 sps:$4 sm:$0xff]  }
  0xc6   :  { %2271 = vmatprep.mubr.bf16.mxu1 %v3311_v27  ;;  %v3392_v27 = vld [vmem:[%s4583_s0 + $0x30] ss:$72 sps:$4 sm:$0xff]  }
  0xc7   :  { %2285 = vmatpush1.bf16.msra.mxu0 %v3296_v28  ;;  %v3395_v28 = vld [vmem:[%s4583_s0 + $0x38] ss:$72 sps:$4 sm:$0xff]  }
  0xc8   :  { %2338 = vmatpush1.bf16.msra.mxu1 %v3299_v29  ;;  %2286 = vmatprep.subr.bf16.mxu0 %v3307_v30  ;;  %v3398_v29 = vld [vmem:[%s4582_s1 + $0x870] ss:$8 sps:$4 sm:$0xff]   ;;  %v3403_v30 = vld [vmem:[%s4582_s1 + $0x864] ss:$8 sps:$4 sm:$0xff]  }
  0xc9   :  { %2339 = vmatprep.subr.bf16.mxu1 %v3310_v31  ;;  %v3404_v31 = vld [vmem:[%s4583_s0 + $0xc4] ss:$72 sps:$4 sm:$0xff]  }
  0xca   :  { %2219 = vmatmul.mubr.bf16.gmra.mxu0 %v3304_v32  ;;  %v3410_v32 = vld [vmem:[%s4583_s0 + $0xcc] ss:$72 sps:$4 sm:$0xff]  }
  0xcb   :  { %2272 = vmatmul.mubr.bf16.gmra.mxu1 %v3313_v35  ;;  %2287 = vmatpush1.bf16.msra.mxu0 %v3305_v33  ;;  %v3401_v33 = vld [vmem:[%s4582_s1 + $0x860] ss:$8 sps:$4 sm:$0xff]  }
  0xcc   :  { %2340 = vmatpush1.bf16.msra.mxu1 %v3308_v34  ;;  %2288 = vmatprep.subr.bf16.mxu0 %v3316_v36  ;;  %v3409_v34 = vld [vmem:[%s4582_s1 + $0x854] ss:$8 sps:$4 sm:$0xff]   ;;  %v3406_v35 = vld [vmem:[%s4583_s0 + $0xc0] ss:$72 sps:$4 sm:$0xff]  }
  0xcd   :  { %2341 = vmatprep.subr.bf16.mxu1 %v3319_v37  ;;  %2314 = vmatprep.mubr.bf16.mxu0 %v3394_v38  ;;  %v3412_v36 = vld [vmem:[%s4583_s0 + $0xc8] ss:$72 sps:$4 sm:$0xff]   ;;  %v3415_v38 = vld [vmem:[%s4582_s1 + $0x844] ss:$8 sps:$4 sm:$0xff]  }
  0xce   :  { %2367 = vmatprep.mubr.bf16.mxu1 %v3397_v39  ;;  %v3407_v37 = vld [vmem:[%s4582_s1 + $0x850] ss:$8 sps:$4 sm:$0xff]   ;;  %v3454_v39 = vld [vmem:[%s4583_s0 + $0x44] ss:$72 sps:$4 sm:$0xff]  }
  0xcf   :  { %2289 = vmatpush1.bf16.msra.mxu0 %v3314_v40  ;;  %v3457_v40 = vld [vmem:[%s4583_s0 + $0xd4] ss:$72 sps:$4 sm:$0xff]  }
  0xd0   :  { %2342 = vmatpush1.bf16.msra.mxu1 %v3317_v41  ;;  %2290 = vmatprep.subr.bf16.mxu0 %v3322_v42  ;;  %v3413_v41 = vld [vmem:[%s4582_s1 + $0x840] ss:$8 sps:$4 sm:$0xff]   ;;  %v3418_v42 = vld [vmem:[%s4582_s1 + $0x834] ss:$8 sps:$4 sm:$0xff]  }
  0xd1   :  { %2343 = vmatprep.subr.bf16.mxu1 %v3325_v43  ;;  %v3416_v43 = vld [vmem:[%s4582_s1 + $0x830] ss:$8 sps:$4 sm:$0xff]  }
  0xd3   :  { %2291 = vmatpush1.bf16.msra.mxu0 %v3320_v44  ;;  %v3421_v44 = vld [vmem:[%s4582_s1 + $0x824] ss:$8 sps:$4 sm:$0xff]  }
  0xd4   :  { %2344 = vmatpush1.bf16.msra.mxu1 %v3323_v45  ;;  %2292 = vmatprep.subr.bf16.mxu0 %v3328_v46  ;;  %v3419_v45 = vld [vmem:[%s4582_s1 + $0x820] ss:$8 sps:$4 sm:$0xff]   ;;  %v3424_v46 = vld [vmem:[%s4582_s1 + $0x814] ss:$8 sps:$4 sm:$0xff]  }
  0xd5   :  { %2345 = vmatprep.subr.bf16.mxu1 %v3331_v47  ;;  %v3422_v47 = vld [vmem:[%s4582_s1 + $0x810] ss:$8 sps:$4 sm:$0xff]  }
  0xd7   :  { %2293 = vmatpush1.bf16.msra.mxu0 %v3326_v48  ;;  %v3427_v48 = vld [vmem:[%s4582_s1 + $0x804] ss:$8 sps:$4 sm:$0xff]  }
  0xd8   :  { %2346 = vmatpush1.bf16.msra.mxu1 %v3329_v49  ;;  %2294 = vmatprep.subr.bf16.mxu0 %v3334_v50  ;;  %v3425_v49 = vld [vmem:[%s4582_s1 + $0x800] ss:$8 sps:$4 sm:$0xff]   ;;  %v3430_v50 = vld [vmem:[%s4582_s1 + $0x8f4] ss:$8 sps:$4 sm:$0xff]  }
  0xd9   :  { %2347 = vmatprep.subr.bf16.mxu1 %v3337_v51  ;;  %v3428_v51 = vld [vmem:[%s4582_s1 + $0x8f0] ss:$8 sps:$4 sm:$0xff]  }
  0xdb   :  { %2295 = vmatpush1.bf16.msra.mxu0 %v3332_v52  ;;  %v3433_v52 = vld [vmem:[%s4582_s1 + $0x8e4] ss:$8 sps:$4 sm:$0xff]  }
  0xdc   :  { %2348 = vmatpush1.bf16.msra.mxu1 %v3335_v53  ;;  %2296 = vmatprep.subr.bf16.mxu0 %v3340_v54  ;;  %v3431_v53 = vld [vmem:[%s4582_s1 + $0x8e0] ss:$8 sps:$4 sm:$0xff]   ;;  %v3436_v54 = vld [vmem:[%s4582_s1 + $0x8d4] ss:$8 sps:$4 sm:$0xff]  }
  0xdd   :  { %2349 = vmatprep.subr.bf16.mxu1 %v3343_v55  ;;  %v3434_v55 = vld [vmem:[%s4582_s1 + $0x8d0] ss:$8 sps:$4 sm:$0xff]  }
  0xdf   :  { %2297 = vmatpush1.bf16.msra.mxu0 %v3338_v56  ;;  %v3439_v56 = vld [vmem:[%s4582_s1 + $0x8c4] ss:$8 sps:$4 sm:$0xff]  }
  0xe0   :  { %2350 = vmatpush1.bf16.msra.mxu1 %v3341_v57  ;;  %2298 = vmatprep.subr.bf16.mxu0 %v3346_v58  ;;  %v3437_v57 = vld [vmem:[%s4582_s1 + $0x8c0] ss:$8 sps:$4 sm:$0xff]   ;;  %v3442_v58 = vld [vmem:[%s4582_s1 + $0x8b4] ss:$8 sps:$4 sm:$0xff]  }
  0xe1   :  { %2351 = vmatprep.subr.bf16.mxu1 %v3349_v59  ;;  %v3440_v59 = vld [vmem:[%s4582_s1 + $0x8b0] ss:$8 sps:$4 sm:$0xff]  }
  0xe3   :  { %2299 = vmatpush2.bf16.msra.mxu0 %v3344_v60  ;;  %v3445_v60 = vld [vmem:[%s4582_s1 + $0x8a4] ss:$8 sps:$4 sm:$0xff]  }
  0xe4   :  { %2352 = vmatpush2.bf16.msra.mxu1 %v3347_v61  ;;  %2300 = vmatprep.subr.bf16.mxu0 %v3352_v62  ;;  %v3443_v61 = vld [vmem:[%s4582_s1 + $0x8a0] ss:$8 sps:$4 sm:$0xff]   ;;  %v3448_v62 = vld [vmem:[%s4582_s1 + $0x894] ss:$8 sps:$4 sm:$0xff]  }
  0xe5   :  { %2353 = vmatprep.subr.bf16.mxu1 %v3355_v63  ;;  %v3446_v63 = vld [vmem:[%s4582_s1 + $0x890] ss:$8 sps:$4 sm:$0xff]  }
  0xe7   :  { %2301 = vmatpush2.bf16.msra.mxu0 %v3350_v0  ;;  %v3451_v0 = vld [vmem:[%s4582_s1 + $0x884] ss:$8 sps:$4 sm:$0xff]  }
  0xe8   :  { %2354 = vmatpush2.bf16.msra.mxu1 %v3353_v1  ;;  %2302 = vmatprep.subr.bf16.mxu0 %v3358_v2  ;;  %v3449_v1 = vld [vmem:[%s4582_s1 + $0x880] ss:$8 sps:$4 sm:$0xff]  }
  0xe9   :  { %2355 = vmatprep.subr.bf16.mxu1 %v3361_v3  ;;  %v3452_v2 = vld [vmem:[%s4583_s0 + $0x40] ss:$72 sps:$4 sm:$0xff]   ;;  %v3455_v3 = vld [vmem:[%s4583_s0 + $0xd0] ss:$72 sps:$4 sm:$0xff]  }
  0xeb   :  { %2303 = vmatpush2.bf16.msra.mxu0 %v3356_v4 }
  0xec   :  { %2356 = vmatpush2.bf16.msra.mxu1 %v3359_v5  ;;  %2304 = vmatprep.subr.bf16.mxu0 %v3364_v6 }
  0xed   :  { %2357 = vmatprep.subr.bf16.mxu1 %v3367_v7 }
  0xef   :  { %2305 = vmatpush2.bf16.msra.mxu0 %v3362_v8 }
  0xf0   :  { %2358 = vmatpush2.bf16.msra.mxu1 %v3365_v9  ;;  %2306 = vmatprep.subr.bf16.mxu0 %v3370_v10 }
  0xf1   :  { %2359 = vmatprep.subr.bf16.mxu1 %v3373_v11 }
  0xf3   :  { %2307 = vmatpush2.bf16.msra.mxu0 %v3368_v12 }
  0xf4   :  { %2360 = vmatpush2.bf16.msra.mxu1 %v3371_v13  ;;  %2308 = vmatprep.subr.bf16.mxu0 %v3376_v14 }
  0xf5   :  { %2361 = vmatprep.subr.bf16.mxu1 %v3379_v15 }
  0xf7   :  { %2309 = vmatpush2.bf16.msra.mxu0 %v3374_v16 }
  0xf8   :  { %2362 = vmatpush2.bf16.msra.mxu1 %v3377_v17  ;;  %2310 = vmatprep.subr.bf16.mxu0 %v3382_v18 }
  0xf9   :  { %2363 = vmatprep.subr.bf16.mxu1 %v3385_v19 }
  0xfb   :  { %2311 = vmatpush2.bf16.msra.mxu0 %v3380_v20 }
  0xfc   :  { %2364 = vmatpush2.bf16.msra.mxu1 %v3383_v21  ;;  %2312 = vmatprep.subr.bf16.mxu0 %v3388_v22 }
  0xfd   :  { %2365 = vmatprep.subr.bf16.mxu1 %v3391_v23 }
  0xff   :  { %2313 = vmatpush2.bf16.msra.mxu0 %v3386_v24 }
 0x100   :  { %2366 = vmatpush2.bf16.msra.mxu1 %v3389_v25  ;;  %2388 = vmatprep.subr.bf16.mxu0 %v3400_v26 }
 0x101   :  { %2939 = vmatprep.subr.bf16.mxu1 %v3400_v26 }
 0x102   :  { %2315 = vmatmul.mubr.bf16.vlgmr.msra.gmra.mxu0 %v3392_v27  ;;  %v1998_v4 = vpop.f32.mrf.mxu0 }
 0x103   :  { %2368 = vmatmul.mubr.bf16.vlgmr.msra.gmra.mxu1 %v3395_v28  ;;  %2389 = vmatpush1.bf16.msra.mxu0 %v3398_v29  ;;  %v2051_v6 = vpop.f32.mrf.mxu1 }
 0x104   :  { %2955 = vmatpush1.bf16.msra.mxu1 %v3398_v29  ;;  %2390 = vmatprep.subr.bf16.mxu0 %v3403_v30  ;;  %v2000_v5 = vpop.f32.mrf.mxu0 }
 0x105   :  { %2940 = vmatprep.subr.bf16.mxu1 %v3403_v30  ;;  %2324 = vmatprep.mubr.bf16.mxu0 %v3404_v31  ;;  %v2053_v8 = vpop.f32.mrf.mxu1 }
 0x106   :  { %2377 = vmatprep.mubr.bf16.mxu1 %v3410_v32  ;;  %v2002_v7 = vpop.f32.mrf.mxu0 }
 0x107   :  { %2391 = vmatpush1.bf16.msra.mxu0 %v3401_v33  ;;  %v2055_v10 = vpop.f32.mrf.mxu1 }
 0x108   :  { %2956 = vmatpush1.bf16.msra.mxu1 %v3401_v33  ;;  %2392 = vmatprep.subr.bf16.mxu0 %v3409_v34  ;;  %v2004_v9 = vpop.f32.mrf.mxu0 }
 0x109   :  { %2941 = vmatprep.subr.bf16.mxu1 %v3409_v34  ;;  %v2057_v12 = vpop.f32.mrf.mxu1 }
 0x10a   :  { %2325 = vmatmul.mubr.bf16.gmra.mxu0 %v3406_v35  ;;  %v2008_v11 = vpop.f32.mrf.mxu0 }
 0x10b   :  { %2378 = vmatmul.mubr.bf16.gmra.mxu1 %v3412_v36  ;;  %2393 = vmatpush1.bf16.msra.mxu0 %v3407_v37  ;;  %v2061_v14 = vpop.f32.mrf.mxu1 }
 0x10c   :  { %2957 = vmatpush1.bf16.msra.mxu1 %v3407_v37  ;;  %2394 = vmatprep.subr.bf16.mxu0 %v3415_v38  ;;  %v2010_v13 = vpop.f32.mrf.mxu0 }
 0x10d   :  { %2942 = vmatprep.subr.bf16.mxu1 %v3415_v38  ;;  %2420 = vmatprep.mubr.bf16.mxu0 %v3454_v39  ;;  %v2063_v16 = vpop.f32.mrf.mxu1 }
 0x10e   :  { %2430 = vmatprep.mubr.bf16.mxu1 %v3457_v40  ;;  %v2012_v15 = vpop.f32.mrf.mxu0 }
 0x10f   :  { %2395 = vmatpush1.bf16.msra.mxu0 %v3413_v41  ;;  %v2065_v18 = vpop.f32.mrf.mxu1 }
 0x110   :  { %2958 = vmatpush1.bf16.msra.mxu1 %v3413_v41  ;;  %2396 = vmatprep.subr.bf16.mxu0 %v3418_v42  ;;  %v2014_v17 = vpop.f32.mrf.mxu0 }
 0x111   :  { %2943 = vmatprep.subr.bf16.mxu1 %v3418_v42  ;;  %v2067_v20 = vpop.f32.mrf.mxu1 }
 0x113   :  { %2397 = vmatpush1.bf16.msra.mxu0 %v3416_v43 }
 0x114   :  { %2959 = vmatpush1.bf16.msra.mxu1 %v3416_v43  ;;  %2398 = vmatprep.subr.bf16.mxu0 %v3421_v44 }
 0x115   :  { %2944 = vmatprep.subr.bf16.mxu1 %v3421_v44 }
 0x117   :  { %2399 = vmatpush1.bf16.msra.mxu0 %v3419_v45 }
 0x118   :  { %2960 = vmatpush1.bf16.msra.mxu1 %v3419_v45  ;;  %2400 = vmatprep.subr.bf16.mxu0 %v3424_v46 }
 0x119   :  { %2945 = vmatprep.subr.bf16.mxu1 %v3424_v46 }
 0x11b   :  { %2401 = vmatpush1.bf16.msra.mxu0 %v3422_v47 }
 0x11c   :  { %2961 = vmatpush1.bf16.msra.mxu1 %v3422_v47  ;;  %2402 = vmatprep.subr.bf16.mxu0 %v3427_v48 }
 0x11d   :  { %2946 = vmatprep.subr.bf16.mxu1 %v3427_v48 }
 0x11f   :  { %2403 = vmatpush1.bf16.msra.mxu0 %v3425_v49 }
 0x120   :  { %2962 = vmatpush1.bf16.msra.mxu1 %v3425_v49  ;;  %2404 = vmatprep.subr.bf16.mxu0 %v3430_v50 }
 0x121   :  { %2947 = vmatprep.subr.bf16.mxu1 %v3430_v50 }
 0x123   :  { %2405 = vmatpush2.bf16.msra.mxu0 %v3428_v51 }
 0x124   :  { %2963 = vmatpush2.bf16.msra.mxu1 %v3428_v51  ;;  %2406 = vmatprep.subr.bf16.mxu0 %v3433_v52 }
 0x125   :  { %2948 = vmatprep.subr.bf16.mxu1 %v3433_v52 }
 0x127   :  { %2407 = vmatpush2.bf16.msra.mxu0 %v3431_v53 }
 0x128   :  { %2964 = vmatpush2.bf16.msra.mxu1 %v3431_v53  ;;  %2408 = vmatprep.subr.bf16.mxu0 %v3436_v54 }
 0x129   :  { %2949 = vmatprep.subr.bf16.mxu1 %v3436_v54 }
 0x12b   :  { %2409 = vmatpush2.bf16.msra.mxu0 %v3434_v55 }
 0x12c   :  { %2965 = vmatpush2.bf16.msra.mxu1 %v3434_v55  ;;  %2410 = vmatprep.subr.bf16.mxu0 %v3439_v56 }
 0x12d   :  { %2950 = vmatprep.subr.bf16.mxu1 %v3439_v56 }
 0x12f   :  { %2411 = vmatpush2.bf16.msra.mxu0 %v3437_v57 }
 0x130   :  { %2966 = vmatpush2.bf16.msra.mxu1 %v3437_v57  ;;  %2412 = vmatprep.subr.bf16.mxu0 %v3442_v58 }
 0x131   :  { %2951 = vmatprep.subr.bf16.mxu1 %v3442_v58 }
 0x133   :  { %2413 = vmatpush2.bf16.msra.mxu0 %v3440_v59 }
 0x134   :  { %2967 = vmatpush2.bf16.msra.mxu1 %v3440_v59  ;;  %2414 = vmatprep.subr.bf16.mxu0 %v3445_v60  ;;  %v2052_v59 = vadd.f32 %v2051_v6, %v1998_v4  ;;  %v2068_v6 = vadd.f32 %v2067_v20, %v2014_v17 }
 0x135   :  { %2952 = vmatprep.subr.bf16.mxu1 %v3445_v60  ;;  %v2054_v60 = vadd.f32 %v2053_v8, %v2000_v5 }
 0x137   :  { %2415 = vmatpush2.bf16.msra.mxu0 %v3443_v61 }
 0x138   :  { %2968 = vmatpush2.bf16.msra.mxu1 %v3443_v61  ;;  %2416 = vmatprep.subr.bf16.mxu0 %v3448_v62  ;;  %v2062_v61 = vadd.f32 %v2061_v14, %v2008_v11 }
 0x139   :  { %2953 = vmatprep.subr.bf16.mxu1 %v3448_v62 }
 0x13b   :  { %2417 = vmatpush2.bf16.msra.mxu0 %v3446_v63 }
 0x13c   :  { %2969 = vmatpush2.bf16.msra.mxu1 %v3446_v63  ;;  %2418 = vmatprep.subr.bf16.mxu0 %v3451_v0  ;;  %v2056_v63 = vadd.f32 %v2055_v10, %v2002_v7 }
 0x13d   :  { %2954 = vmatprep.subr.bf16.mxu1 %v3451_v0 }
 0x13f   :  { %2419 = vmatpush2.bf16.msra.mxu0 %v3449_v1 }
 0x140   :  { %2970 = vmatpush2.bf16.msra.mxu1 %v3449_v1  ;;  %v2064_v1 = vadd.f32 %v2063_v16, %v2010_v13 }
 0x142   :  { %2421 = vmatmul.mubr.bf16.vlgmr.msra.gmra.mxu0 %v3452_v2  ;;  %v2104_v19 = vpop.f32.mrf.mxu0  ;;  %v2066_v2 = vadd.f32 %v2065_v18, %v2012_v15 }
 0x143   :  { %2431 = vmatmul.mubr.bf16.vlgmr.msra.gmra.mxu1 %v3455_v3  ;;  %v2157_v22 = vpop.f32.mrf.mxu1  ;;  %v2105_v0 = vadd.f32 %v2104_v19, %v2052_v59 }
 0x144   :  { %v2106_v21 = vpop.f32.mrf.mxu0 }
 0x145   :  { %v2159_v24 = vpop.f32.mrf.mxu1  ;;  %v2107_v3 = vadd.f32 %v2106_v21, %v2054_v60  ;;  %v2158_v11 = vadd.f32 %v2157_v22, %v2105_v0 }
 0x146   :  { %v2108_v23 = vpop.f32.mrf.mxu0 }
 0x147   :  { %v2161_v26 = vpop.f32.mrf.mxu1  ;;  %v2109_v4 = vadd.f32 %v2108_v23, %v2056_v63 }
 0x148   :  { %v2110_v25 = vpop.f32.mrf.mxu0 }
 0x149   :  { %v2163_v28 = vpop.f32.mrf.mxu1  ;;  %v2162_v13 = vadd.f32 %v2161_v26, %v2109_v4 }
 0x14a   :  { %v2114_v27 = vpop.f32.mrf.mxu0 }
 0x14b   :  { %v2167_v30 = vpop.f32.mrf.mxu1 }
 0x14c   :  { %v2116_v29 = vpop.f32.mrf.mxu0 }
 0x14d   :  { %v2169_v32 = vpop.f32.mrf.mxu1  ;;  %v2117_v5 = vadd.f32 %v2116_v29, %v2064_v1 }
 0x14e   :  { %v2118_v31 = vpop.f32.mrf.mxu0 }
 0x14f   :  { %v2171_v34 = vpop.f32.mrf.mxu1  ;;  %v2119_v8 = vadd.f32 %v2118_v31, %v2066_v2  ;;  %v2170_v15 = vadd.f32 %v2169_v32, %v2117_v5 }
 0x150   :  { %v2120_v33 = vpop.f32.mrf.mxu0 }
 0x151   :  { %v2173_v36 = vpop.f32.mrf.mxu1  ;;  %v2121_v10 = vadd.f32 %v2120_v33, %v2068_v6  ;;  %v2172_v18 = vadd.f32 %v2171_v34, %v2119_v8 }
 0x182   :  { %v2210_v35 = vpop.f32.mrf.mxu0 }
 0x183   :  { %v2263_v37 = vpop.f32.mrf.mxu1  ;;  %v2211_v16 = vadd.f32 %v2210_v35, %v2158_v11 }
 0x184   :  { %v2212_v38 = vpop.f32.mrf.mxu0 }
 0x185   :  { %v2265_v39 = vpop.f32.mrf.mxu1  ;;  %v2264_v22 = vadd.f32 %v2263_v37, %v2211_v16 }
 0x186   :  { %v2214_v40 = vpop.f32.mrf.mxu0 }
 0x187   :  { %v2267_v41 = vpop.f32.mrf.mxu1 }
 0x188   :  { %v2216_v42 = vpop.f32.mrf.mxu0 }
 0x189   :  { %v4465_v43 = vpop.f32.mrf.mxu1 }
 0x18a   :  { %4588 = vst [vmem:[#allocation2_spill] sm:$0xff] %v4465_v43  ;;  %v2220_v44 = vpop.f32.mrf.mxu0  ;;  %v2115_v43 = vadd.f32 %v2114_v27, %v2062_v61  ;;  %v2215_v61 = vadd.f32 %v2214_v40, %v2162_v13 }
 0x18b   :  { %v2273_v45 = vpop.f32.mrf.mxu1 }
 0x18c   :  { %v2222_v46 = vpop.f32.mrf.mxu0  ;;  %v2168_v7 = vadd.f32 %v2167_v30, %v2115_v43  ;;  %v2268_v31 = vadd.f32 %v2267_v41, %v2215_v61 }
 0x18d   :  { %v2275_v47 = vpop.f32.mrf.mxu1 }
 0x18e   :  { %v2224_v48 = vpop.f32.mrf.mxu0  ;;  %v2221_v27 = vadd.f32 %v2220_v44, %v2168_v7 }
 0x18f   :  { %v2277_v49 = vpop.f32.mrf.mxu1  ;;  %v2225_v17 = vadd.f32 %v2224_v48, %v2172_v18 }
 0x190   :  { %v2226_v50 = vpop.f32.mrf.mxu0  ;;  %v2274_v29 = vadd.f32 %v2273_v45, %v2221_v27 }
 0x191   :  { %v2279_v51 = vpop.f32.mrf.mxu1  ;;  %v2278_v35 = vadd.f32 %v2277_v49, %v2225_v17 }
 0x1c2   :  { %v2316_v52 = vpop.f32.mrf.mxu0 }
 0x1c3   :  { %v4467_v53 = vpop.f32.mrf.mxu1  ;;  %v2317_v33 = vadd.f32 %v2316_v52, %v2264_v22 }
 0x1c4   :  { %4589 = vst [vmem:[#allocation3_spill] sm:$0xff] %v4467_v53  ;;  %v2318_v54 = vpop.f32.mrf.mxu0 }
 0x1c5   :  { %v4469_v55 = vpop.f32.mrf.mxu1 }
 0x1c6   :  { %4590 = vst [vmem:[#allocation4_spill] sm:$0xff] %v4469_v55  ;;  %v2320_v56 = vpop.f32.mrf.mxu0 }
 0x1c7   :  { %v4471_v57 = vpop.f32.mrf.mxu1 }
 0x1c8   :  { %4591 = vst [vmem:[#allocation5_spill] sm:$0xff] %v4471_v57  ;;  %v2322_v58 = vpop.f32.mrf.mxu0  ;;  %v2058_v57 = vadd.f32 %v2057_v12, %v2004_v9  ;;  %v2174_v9 = vadd.f32 %v2173_v36, %v2121_v10  ;;  %v2223_v12 = vadd.f32 %v2222_v46, %v2170_v15  ;;  %v2321_v36 = vadd.f32 %v2320_v56, %v2268_v31 }
 0x1c9   :  { %v4473_v62 = vpop.f32.mrf.mxu1 }
 0x1ca   :  { %4592 = vst [vmem:[#allocation6_spill] sm:$0xff] %v4473_v62  ;;  %v2326_v53 = vpop.f32.mrf.mxu0  ;;  %v2111_v14 = vadd.f32 %v2110_v25, %v2058_v57  ;;  %v2160_v62 = vadd.f32 %v2159_v24, %v2107_v3  ;;  %v2227_v30 = vadd.f32 %v2226_v50, %v2174_v9  ;;  %v2276_v26 = vadd.f32 %v2275_v47, %v2223_v12 }
 0x1cb   :  { %v2379_v55 = vpop.f32.mrf.mxu1  ;;  %v2327_v34 = vadd.f32 %v2326_v53, %v2274_v29 }
 0x1cc   :  { %v2328_v19 = vpop.f32.mrf.mxu0  ;;  %v2213_v21 = vadd.f32 %v2212_v38, %v2160_v62  ;;  %v2164_v60 = vadd.f32 %v2163_v28, %v2111_v14  ;;  %v4593_v28 = vld [vmem:[#allocation2_spill] sm:$0xff]  ;;  %v2280_v44 = vadd.f32 %v2279_v51, %v2227_v30 }
 0x1cd   :  { %v2381_v59 = vpop.f32.mrf.mxu1  ;;  %v2329_v46 = vadd.f32 %v2328_v19, %v2276_v26  ;;  %v4595_v50 = vld [vmem:[#allocation4_spill] sm:$0xff]  ;;  %v2380_v52 = vadd.f32 %v2379_v55, %v2327_v34 }
 0x1ce   :  { %v2330_v20 = vpop.f32.mrf.mxu0  ;;  %v2217_v25 = vadd.f32 %v2216_v42, %v2164_v60  ;;  %v2266_v24 = vadd.f32 %v2265_v39, %v2213_v21  ;;  %v4594_v42 = vld [vmem:[#allocation3_spill] sm:$0xff] }
 0x1cf   :  { %v2383_v23 = vpop.f32.mrf.mxu1  ;;  %v2331_v48 = vadd.f32 %v2330_v20, %v2278_v35  ;;  %v2370_v39 = vadd.f32 %v4594_v42, %v2317_v33  ;;  %v4596_v53 = vld [vmem:[#allocation5_spill] sm:$0xff]  ;;  %v2382_v0 = vadd.f32 %v2381_v59, %v2329_v46 }
 0x1d0   :  { %v2319_v32 = vadd.f32 %v2318_v54, %v2266_v24  ;;  %v2332_v38 = vpop.f32.mrf.mxu0  ;;  %v2270_v40 = vadd.f32 %v4593_v28, %v2217_v25  ;;  %v2374_v62 = vadd.f32 %v4596_v53, %v2321_v36 }
 0x1d1   :  { %v2385_v43 = vpop.f32.mrf.mxu1  ;;  %v2333_v47 = vadd.f32 %v2332_v38, %v2280_v44  ;;  %v2384_v56 = vadd.f32 %v2383_v23, %v2331_v48  ;;  %v4597_v4 = vld [vmem:[#allocation6_spill] sm:$0xff] }
 0x1d2   :  { %v2323_v45 = vadd.f32 %v2322_v58, %v2270_v40  ;;  %v2372_v41 = vadd.f32 %v4595_v50, %v2319_v32 }
 0x1d3   :  { %v2386_v55 = vadd.f32 %v2385_v43, %v2333_v47 }
 0x1d4   :  { %v2376_v58 = vadd.f32 %v4597_v4, %v2323_v45 }
 0x202   :  { %v2422_v57 = vpop.f32.mrf.mxu0 }
 0x203   :  { %v2432_v37 = vpop.f32.mrf.mxu1  ;;  %v4479_v63 = vadd.f32 %v2422_v57, %v2370_v39 }
 0x204   :  { %v2424_v49 = vpop.f32.mrf.mxu0  ;;  %v4481_v51 = vadd.f32 %v2432_v37, %v2380_v52 }
 0x205   :  { %v2434_v54 = vpop.f32.mrf.mxu1  ;;  %v4483_v1 = vadd.f32 %v2424_v49, %v2372_v41  ;;  %v2461_v7 = vmul.f32 %v4479_v63, %v4479_v63 }
 0x206   :  { %v2426_v2 = vpop.f32.mrf.mxu0  ;;  %v4488_v5 = vadd.f32 %v2434_v54, %v2382_v0  ;;  %v2465_v13 = vmul.f32 %v4481_v51, %v4481_v51 }
 0x207   :  { %v2436_v3 = vpop.f32.mrf.mxu1  ;;  %v4486_v6 = vadd.f32 %v2426_v2, %v2374_v62  ;;  %v2462_v16 = vmul.f32 %v4483_v1, %v4483_v1 }
 0x208   :  { %v4490_v8 = vadd.f32 %v2436_v3, %v2384_v56  ;;  %v2428_v11 = vpop.f32.mrf.mxu0  ;;  %v2466_v61 = vmul.f32 %v4488_v5, %v4488_v5 }
 0x209   :  { %v2438_v14 = vpop.f32.mrf.mxu1  ;;  %v2441_v10 = vadd.f32 %v4486_v6, %v4479_v63  ;;  %v2463_v19 = vmul.f32 %v4486_v6, %v4486_v6  ;;  %v4498_v59 = vadd.f32 %v2428_v11, %v2376_v58 }
 0x20a   :  { %v4504_v15 = vadd.f32 %v2438_v14, %v2386_v55  ;;  %v2467_v9 = vmul.f32 %v4490_v8, %v4490_v8 }
 0x20b   :  { %v2469_v18 = vadd.f32 %v2463_v19, %v2461_v7  ;;  %v2442_v21 = vadd.f32 %v2441_v10, %v4481_v51  ;;  %v2450_v27 = vadd.f32 %v4498_v59, %v4483_v1  ;;  %v2464_v60 = vmul.f32 %v4498_v59, %v4498_v59 }
 0x20c   :  { %v2468_v22 = vmul.f32 %v4504_v15, %v4504_v15  ;;  %v3462_v7 = vmov 1966171168   ;;  %v2506_v19 = vlaneseq }
 0x20d   :  { %v2443_v12 = vadd.f32 %v2442_v21, %v4490_v8  ;;  %v2470_v17 = vadd.f32 %v2469_v18, %v2465_v13  ;;  %v2478_v20 = vadd.f32 %v2464_v60, %v2462_v16  ;;  %v2451_v23 = vadd.f32 %v2450_v27, %v4488_v5 }
 0x20e   :  { %v2504_v10 = vunpack.c.l.s4 %v3462_v7  ;;  %v2507_v16 = vshrl.u32 %v2506_v19, 7 }
 0x20f   :  { %v2444_v25 = vrot.slane %v2443_v12, 4  ;;  %v2471_v24 = vadd.f32 %v2470_v17, %v2467_v9  ;;  %v2452_v29 = vadd.f32 %v2451_v23, %v4504_v15  ;;  %v2479_v30 = vadd.f32 %v2478_v20, %v2466_v61  ;;  %v2495_v9 = vld [vmem:[%s4584_s2] sm:$0x3] }
 0x210   :  { %v2505_v13 = vunpack.c.0.s8 %v2504_v10  ;;  %v2523_v17 = vsub.s32 0, %v2507_v16  ;;  %v2527_v20 = vsub.s32 1, %v2507_v16 }
 0x211   :  { %v2445_v31 = vadd.f32 %v2444_v25, %v2443_v12  ;;  %v2472_v33 = vrot.slane %v2471_v24, 4  ;;  %v2453_v26 = vrot.slane %v2452_v29, 4  ;;  %v2480_v35 = vadd.f32 %v2479_v30, %v2468_v22 }
 0x212   :  { %v2508_v21 = vsub.s32 %v2505_v13, %v2507_v16 }
 0x213   :  { %v2446_v32 = vrot.slane %v2445_v31, 2  ;;  %v2473_v34 = vadd.f32 %v2472_v33, %v2471_v24  ;;  %v2454_v38 = vadd.f32 %v2453_v26, %v2452_v29  ;;  %v2481_v43 = vrot.slane %v2480_v35, 4  ;;  %v2519_v33 = vld [vmem:[%s4585_s3] sm:$0x3] }
 0x215   :  { %v2447_v28 = vadd.f32 %v2446_v32, %v2445_v31  ;;  %v2474_v40 = vrot.slane %v2473_v34, 2  ;;  %v2455_v36 = vrot.slane %v2454_v38, 2  ;;  %v2482_v44 = vadd.f32 %v2481_v43, %v2480_v35 }
 0x217   :  { %v2448_v46 = vrot.slane %v2447_v28, 1  ;;  %v2475_v48 = vadd.f32 %v2474_v40, %v2473_v34  ;;  %v2456_v57 = vadd.f32 %v2455_v36, %v2454_v38  ;;  %v2483_v37 = vrot.slane %v2482_v44, 2  ;;  %v2579_v36 = vld [vmem:[%s4586_s4] sm:$0xff] }
 0x219   :  { %v2449_v42 = vadd.f32 %v2448_v46, %v2447_v28  ;;  %v2476_v39 = vrot.slane %v2475_v48, 1  ;;  %v2457_v45 = vrot.slane %v2456_v57, 1  ;;  %v2484_v50 = vadd.f32 %v2483_v37, %v2482_v44  ;;  %v2580_v44 = vld [vmem:[%s4586_s4 + $0x8] sm:$0xff] }
 0x21b   :  { %v2459_v41 = vmul.f32 0.055555556, %v2449_v42  ;;  %v2477_v52 = vadd.f32 %v2476_v39, %v2475_v48  ;;  %v2458_v47 = vadd.f32 %v2457_v45, %v2456_v57  ;;  %v2485_v49 = vrot.slane %v2484_v50, 1  ;;  %v2582_v48 = vld [vmem:[%s4586_s4 + $0x18] sm:$0xff]  ;;  %v2583_v57 = vld [vmem:[%s4586_s4 + $0x20] sm:$0xff] }
 0x21c   :  { %v2586_v39 = vld [vmem:[%s4586_s4 + $0x38] sm:$0xff] }
 0x21d   :  { %v2487_v54 = vmul.f32 0.055555556, %v2477_v52  ;;  %v2489_v53 = vmul.f32 %v2459_v41, %v2459_v41  ;;  %v2460_v62 = vmul.f32 0.055555556, %v2458_v47  ;;  %v2486_v0 = vadd.f32 %v2485_v49, %v2484_v50 }
 0x21f   :  { %v2491_v56 = vsub.f32 %v2487_v54, %v2489_v53  ;;  %v2488_v2 = vmul.f32 0.055555556, %v2486_v0  ;;  %v2490_v3 = vmul.f32 %v2460_v62, %v2460_v62 }
 0x221   :  { %v2493_v4 = vmax.f32 %v2491_v56, 0.0  ;;  %v2492_v58 = vsub.f32 %v2488_v2, %v2490_v3 }
 0x223   :  { %v2496_v55 = vadd.f32 1e-05, %v2493_v4  ;;  %v2494_v11 = vmax.f32 %v2492_v58, 0.0 }
 0x225   :  { %v2497_v14 = vadd.f32 1e-05, %v2494_v11  ;;  %3458 = vrsqrt.f32 %v2496_v55 }
 0x227   :  { %3460 = vrsqrt.f32 %v2497_v14 }
 0x232   :  { %v3459_v18 = vpop.eup %3458 }
 0x234   :  { %v3461_v27 = vpop.eup %3460 }
 0x235   :  { %v2502_v60 = vcombine.low %v3459_v18, %v3461_v27 }
 0x237   :  { %v2509_v61 = vrot.slane %v2502_v60, %v2508_v21 }
 0x239   :  { %v2516_v12 = vrot.slane %v2509_v61, %v2508_v21 }
 0x23b   :  { %v2518_v23 = vmul.f32 %v2516_v12, %v2495_v9 }
 0x23d   :  { %v2524_v22 = vrot.slane %v2518_v23, %v2523_v17  ;;  %v2528_v25 = vrot.slane %v2518_v23, %v2527_v20 }
 0x23f   :  { %v2531_v24 = vmul.f32 %v2524_v22, %v2459_v41  ;;  %v2532_v29 = vmul.f32 %v2528_v25, %v2460_v62  ;;  %v2552_v32 = vmul.f32 %v2524_v22, %v4479_v63  ;;  %v2553_v34 = vmul.f32 %v2528_v25, %v4483_v1 }
 0x240   :  { %v2554_v38 = vmul.f32 %v2524_v22, %v4486_v6  ;;  %v2555_v43 = vmul.f32 %v2528_v25, %v4498_v59  ;;  %v2556_v46 = vmul.f32 %v2524_v22, %v4481_v51  ;;  %v2557_v63 = vmul.f32 %v2528_v25, %v4488_v5  ;;  %v2581_v59 = vld [vmem:[%s4586_s4 + $0x10] sm:$0xff] }
 0x241   :  { %v2535_v30 = vcombine.low %v2531_v24, %v2532_v29  ;;  %v2558_v1 = vmul.f32 %v2524_v22, %v4490_v8  ;;  %v2559_v6 = vmul.f32 %v2528_v25, %v4504_v15  ;;  %v2584_v8 = vld [vmem:[%s4586_s4 + $0x28] sm:$0xff]  ;;  %v2585_v15 = vld [vmem:[%s4586_s4 + $0x30] sm:$0xff] }
 0x243   :  { %v2542_v31 = vrot.slane %v2535_v30, %v2508_v21 }
 0x245   :  { %v2549_v26 = vrot.slane %v2542_v31, %v2508_v21 }
 0x247   :  { %v2551_v35 = vsub.f32 %v2519_v33, %v2549_v26 }
 0x249   :  { %v2564_v28 = vrot.slane %v2551_v35, %v2523_v17  ;;  %v2568_v40 = vrot.slane %v2551_v35, %v2527_v20 }
 0x24b   :  { %v2571_v37 = vadd.f32 %v2564_v28, %v2552_v32  ;;  %v2572_v51 = vadd.f32 %v2568_v40, %v2553_v34  ;;  %v2573_v42 = vadd.f32 %v2564_v28, %v2554_v38  ;;  %v2574_v5 = vadd.f32 %v2568_v40, %v2555_v43 }
 0x24c   :  { %v2575_v45 = vadd.f32 %v2564_v28, %v2556_v46  ;;  %v2576_v50 = vadd.f32 %v2568_v40, %v2557_v63  ;;  %v2577_v41 = vadd.f32 %v2564_v28, %v2558_v1  ;;  %v2578_v52 = vadd.f32 %v2568_v40, %v2559_v6 }
 0x24d   :  { %v2587_v47 = vadd.f32 %v2579_v36, %v2571_v37  ;;  %v2588_v49 = vadd.f32 %v2580_v44, %v2572_v51  ;;  %v2589_v54 = vadd.f32 %v2581_v59, %v2573_v42  ;;  %v2590_v53 = vadd.f32 %v2582_v48, %v2574_v5 }
 0x24e   :  { %v2591_v62 = vadd.f32 %v2583_v57, %v2575_v45  ;;  %v2592_v0 = vadd.f32 %v2584_v8, %v2576_v50  ;;  %v2593_v56 = vadd.f32 %v2585_v15, %v2577_v41  ;;  %v2594_v2 = vadd.f32 %v2586_v39, %v2578_v52 }
 0x24f   :  { %v2595_v3 = vmax.f32 %v2587_v47, 0.0  ;;  %v2596_v4 = vmax.f32 %v2588_v49, 0.0  ;;  %v2597_v58 = vmax.f32 %v2589_v54, 0.0  ;;  %v2598_v55 = vmax.f32 %v2590_v53, 0.0 }
 0x250   :  { %v2599_v11 = vmax.f32 %v2591_v62, 0.0  ;;  %v2600_v14 = vmax.f32 %v2592_v0, 0.0  ;;  %v2601_v7 = vmax.f32 %v2593_v56, 0.0  ;;  %v2602_v10 = vmax.f32 %v2594_v2, 0.0 }
 0x251   :  { %2603 = vst [vmem:[%s4587_s5] sm:$0xff] %v2595_v3  ;;  %2604 = vst [vmem:[%s4587_s5 + $0x8] sm:$0xff] %v2596_v4 }
 0x252   :  { %2605 = vst [vmem:[%s4587_s5 + $0x10] sm:$0xff] %v2597_v58  ;;  %2606 = vst [vmem:[%s4587_s5 + $0x18] sm:$0xff] %v2598_v55 }
 0x253   :  { %2607 = vst [vmem:[%s4587_s5 + $0x20] sm:$0xff] %v2599_v11  ;;  %2608 = vst [vmem:[%s4587_s5 + $0x28] sm:$0xff] %v2600_v14 }
 0x254   :  { %2609 = vst [vmem:[%s4587_s5 + $0x30] sm:$0xff] %v2601_v7  ;;  %2610 = vst [vmem:[%s4587_s5 + $0x38] sm:$0xff] %v2602_v10 }

</bundles_post_ra>
